<compile_context>
chip_gen: v7x
topology: tpu7x:2x2x1
jax: 0.10.0
libtpu: 0.0.40
codegen_flags: <defaults>
</compile_context>

<pallas_src>
import functools
import math

import numpy as np
import jax
import jax.numpy as jnp
from jax import lax
from jax.experimental import pallas as pl
from jax.experimental.pallas import tpu as pltpu

EPS_BN = 1e-5
BN_EVAL_SCALE = 1.0 / math.sqrt(1.0 + EPS_BN)   # eval BatchNorm, default affine/stats
ALPHA_V = 0.05
LAYER_NUM = 8
STEP = 4


# ----------------------------------------------------------------------------
# In-kernel helper
# ----------------------------------------------------------------------------
def _flip_col_to_row(v_col, eye_f):
    # Exact [N, 1] -> [1, N] reorientation via a diagonal mask + sublane reduce.
    return jnp.sum(v_col * eye_f, axis=0, keepdims=True)


# ----------------------------------------------------------------------------
# One fused kernel: grid=(2*LAYER_NUM,), state carried in VMEM scratch
#   steps 0..7   : HGNN_layer1 iterations (+ conv1/bn1/relu tail at step 7)
#   steps 8..15  : HGNN_layer2 iterations (+ bn2/residual/relu tail at step 15)
# ----------------------------------------------------------------------------
def _block_kernel(B, C, N, MP,
                  x0_ref, hloc_ref, wv_ref, bv_ref, we_ref, be_ref,
                  w9_ref, skt_ref,
                  out_ref,
                  x_scr, e_scr, h_scr, dmat_scr, res_scr):
    f32 = jnp.float32
    step = pl.program_id(0)

    # Small hoisted constants (a handful of vregs per step).
    ii = lax.broadcasted_iota(jnp.int32, (N, N), 0)
    jj = lax.broadcasted_iota(jnp.int32, (N, N), 1)
    eye_b = ii == jj
    eye_f = jnp.where(eye_b, 1.0, 0.0)
    pi = lax.broadcasted_iota(jnp.int32, (N, MP), 0)
    pj = lax.broadcasted_iota(jnp.int32, (N, MP), 1)
    proj = jnp.where(pi == pj, 1.0, 0.0)        # [N, MP] "place into first N lanes"

    hloc = hloc_ref[...]                        # [N, MP]: cols [N, N+E_loc) = local edges

    # ---- step 0: load block input into the persistent X state ----
    @pl.when(step == 0)
    def _init():
        x_scr[...] = x0_ref[...]

    unroll = 8 if N % 8 == 0 else (4 if N % 4 == 0 else 1)

    # ======================= Phase A: build the hypergraph ===================
    # symmetric pairwise distances -> stable rank (comparison counting, in
    # registers) -> kNN incidence -> hyperedge features.  Uses PRE-theta X.
    for b in range(B):
        xt = x_scr[b]                                                   # [C, N]
        # exact transposed copy via 0/1 matmul (known-good lowering path)
        xn = lax.dot_general(eye_f, xt, (((1,), (1,)), ((), ())),
                             preferred_element_type=f32)                # [N, C]
        inner = jnp.dot(xn, xt, preferred_element_type=f32)             # [N, N] Gram (symmetric)
        sq_row = jnp.sum(xt * xt, axis=0, keepdims=True)                # [1, N]
        sq_col = jnp.sum(eye_f * sq_row, axis=1, keepdims=True)         # [N, 1] exact copy
        dmat = (sq_col + sq_row) - 2.0 * inner                          # exactly symmetric
        dmat_scr[pl.ds(b * N, N), :] = dmat

        # Stable rank by comparison counting, accumulated in the loop carry.
        # rankt[a, q] = stable rank of node a within node q's neighbour list
        #   (row k of the symmetric dmat doubles as column k).
        def rank_body(kk, acc, _b=b, _dmat=dmat):
            base = kk * unroll
            for u in range(unroll):                  # manual unroll (LLO visibility)
                k = base + u
                dk = dmat_scr[pl.ds(_b * N + k, 1), :]               # [1, N] = d[k, :]
                before = (dk < _dmat) | ((dk == _dmat) & (ii > k))   # stable tie-break k<a
                acc = acc + jnp.where(before, 1.0, 0.0)
            return acc

        rankt = lax.fori_loop(0, N // unroll, rank_body,
                              jnp.zeros((N, N), f32))                   # [N, N]

        # first kNN pass (top-2 vote counts), second pass builds incidence
        top2 = jnp.where(rankt < 2.0, 1.0, 0.0)
        dvk_row = _flip_col_to_row(jnp.sum(top2, axis=1, keepdims=True), eye_f)  # [1, N]
        new_h = jnp.where((rankt < dvk_row) | eye_b, 1.0, 0.0)          # [node, knn-edge]

        # lane-dense incidence + hyperedge features (full 128-wide stores)
        h_full = jnp.dot(new_h, proj, preferred_element_type=f32) + hloc     # [N, MP]
        de_full = jnp.maximum(jnp.sum(h_full, axis=0, keepdims=True), 1.0)   # [1, MP]
        e_full = jnp.dot(xt, h_full, preferred_element_type=f32) / de_full   # [C, MP]
        h_scr[b] = h_full
        e_scr[b] = e_full

    # =========== Phase B: theta_v / theta_e + fresh BatchNorm1d ==============
    # (every STEP-th iteration; true batch statistics over batch & channels)
    @pl.when(step % STEP == 0)
    def _theta_bn():
        use1 = step < LAYER_NUM                    # layer1 weights vs layer2 weights
        wv = jnp.where(use1, wv_ref[0], wv_ref[1])
        bv = jnp.where(use1, bv_ref[0], bv_ref[1])
        we = jnp.where(use1, we_ref[0], we_ref[1])
        be = jnp.where(use1, be_ref[0], be_ref[1])
        denom = float(B * C)

        xs = [x_scr[b] for b in range(B)]
        xs = [x + jnp.maximum(jnp.dot(wv, x, preferred_element_type=f32) + bv, 0.0)
              for x in xs]
        mean_x = sum(jnp.sum(x, axis=0, keepdims=True) for x in xs) / denom
        var_x = sum(jnp.sum((x - mean_x) ** 2, axis=0, keepdims=True) for x in xs) / denom
        inv_x = lax.rsqrt(var_x + EPS_BN)
        for b in range(B):
            x_scr[b] = (xs[b] - mean_x) * inv_x

        es = [e_scr[b] for b in range(B)]
        es = [e + jnp.maximum(jnp.dot(we, e, preferred_element_type=f32) + be, 0.0)
              for e in es]
        mean_e = sum(jnp.sum(e, axis=0, keepdims=True) for e in es) / denom
        var_e = sum(jnp.sum((e - mean_e) ** 2, axis=0, keepdims=True) for e in es) / denom
        inv_e = lax.rsqrt(var_e + EPS_BN)
        for b in range(B):
            e_scr[b] = (es[b] - mean_e) * inv_e

    # TODO(synk): nn.Dropout(0.15) is treated as eval-mode identity (deterministic).

    # ============ Phase C: newX = X - alpha_v * (X - W_ve @ E) ===============
    for b in range(B):
        hf = h_scr[b]                                                    # [N, MP]
        et = e_scr[b]                                                    # [C, MP]
        xt = x_scr[b]                                                    # [C, N]
        dv_row = _flip_col_to_row(jnp.sum(hf, axis=1, keepdims=True), eye_f)  # [1, N] >= 1
        agg = lax.dot_general(et, hf, (((1,), (1,)), ((), ())),
                              preferred_element_type=f32) / dv_row       # [C, N]
        x_scr[b] = xt - ALPHA_V * (xt - agg)

    # ===== tail 1 (end of HGNN_layer1): DS_HGNN tail + conv1 + bn1 + relu ====
    @pl.when(step == LAYER_NUM - 1)
    def _tail1():
        for b in range(B):
            y = jnp.maximum(x_scr[b] * BN_EVAL_SCALE, 0.0) + x0_ref[b]   # layer residual
            # 3x3 conv (pad 1, no bias) as 9 per-tap matmuls on the idle MXU
            acc = jnp.zeros((C, N), f32)
            for t in range(9):
                a = jnp.dot(w9_ref[t], y, preferred_element_type=f32)            # [C, N]
                acc = acc + jnp.dot(a, skt_ref[t], preferred_element_type=f32)   # [C, N]
            z = jnp.maximum(acc * BN_EVAL_SCALE, 0.0)                    # bn1(eval) + relu
            x_scr[b] = z                                                 # feeds layer2
            res_scr[b] = z                                               # layer2 residual

    # ===== tail 2 (end of HGNN_layer2): bn2(eval) + block residual + relu ====
    @pl.when(step == 2 * LAYER_NUM - 1)
    def _tail2():
        for b in range(B):
            y = jnp.maximum(x_scr[b] * BN_EVAL_SCALE, 0.0) + res_scr[b]
            out_ref[b] = jnp.maximum(y * BN_EVAL_SCALE + x0_ref[b], 0.0)


# ----------------------------------------------------------------------------
# pallas_call wrapper
# ----------------------------------------------------------------------------
def _resident_spec(shape):
    nd = len(shape)
    return pl.BlockSpec(tuple(shape), lambda i, _nd=nd: (0,) * _nd)


def fused_block_forward(x_cm, hloc_full, wv, bv, we, be, conv_w9, conv_skt):
    B, C, N = x_cm.shape
    MP = hloc_full.shape[1]
    operands = [x_cm, hloc_full, wv, bv, we, be, conv_w9, conv_skt]
    kernel = functools.partial(_block_kernel, B, C, N, MP)
    return pl.pallas_call(
        kernel,
        grid=(2 * LAYER_NUM,),
        in_specs=[_resident_spec(a.shape) for a in operands],
        out_specs=_resident_spec((B, C, N)),
        out_shape=jax.ShapeDtypeStruct((B, C, N), jnp.float32),
        scratch_shapes=[
            pltpu.VMEM((B, C, N), jnp.float32),    # X state (channel-major)
            pltpu.VMEM((B, C, MP), jnp.float32),   # E state (edge dim padded to 128)
            pltpu.VMEM((B, N, MP), jnp.float32),   # incidence H = [H_knn | H_local | 0]
            pltpu.VMEM((B * N, N), jnp.float32),   # per-batch distance matrices (row-major)
            pltpu.VMEM((B, C, N), jnp.float32),    # conv output (layer-2 residual)
        ],
        compiler_params=pltpu.CompilerParams(
            dimension_semantics=("arbitrary",)),   # state carried across grid steps
    )(*operands)


# ----------------------------------------------------------------------------
# Host-side constant construction
# ----------------------------------------------------------------------------
def make_local_H_full(size, mp, ksize=3, stride=1):
    # DS_HGNN local (unfold) incidence, placed at edge columns [N, N+E_loc),
    # zero-padded so the full edge axis is MP (multiple of 128).
    n = size * size
    h = np.zeros((n, mp), np.float32)
    e = 0
    for i in range(0, size - ksize + 1, stride):
        for j in range(0, size - ksize + 1, stride):
            for di in range(ksize):
                for dj in range(ksize):
                    h[(i + di) * size + (j + dj), n + e] = 1.0
            e += 1
    return jnp.asarray(h)


def make_conv_shift_t(hh, ww):
    # skt[k, m, n] = 1 iff input pixel m feeds output pixel n under 3x3 tap k
    # (stride 1, zero padding 1).
    n = hh * ww
    skt = np.zeros((9, n, n), np.float32)
    for k in range(9):
        kh, kw = k // 3, k % 3
        for y in range(hh):
            for x in range(ww):
                sy, sx = y + kh - 1, x + kw - 1
                if 0 <= sy < hh and 0 <= sx < ww:
                    skt[k, sy * ww + sx, y * ww + x] = 1.0
    return jnp.asarray(skt)


def init_params(key, channels, node):
    ks = jax.random.split(key, 9)
    c = channels
    n = node * node
    bnd = 1.0 / math.sqrt(c)

    def lin(kw_, kb_):
        w = jax.random.uniform(kw_, (c, c), jnp.float32, -bnd, bnd)
        b_ = jax.random.uniform(kb_, (c, 1), jnp.float32, -bnd, bnd)
        return w, b_

    t1v_w, t1v_b = lin(ks[0], ks[1])
    t1e_w, t1e_b = lin(ks[2], ks[3])
    t2v_w, t2v_b = lin(ks[4], ks[5])
    t2e_w, t2e_b = lin(ks[6], ks[7])

    bc = 1.0 / math.sqrt(9 * c)
    conv_w = jax.random.uniform(ks[8], (3, 3, c, c), jnp.float32, -bc, bc)  # [kh,kw,ci,co]
    conv_w9 = jnp.transpose(conv_w.reshape(9, c, c), (0, 2, 1))             # [tap, co, ci]

    e_loc = ((node - 3) // 1 + 1) ** 2
    mp = int(math.ceil((n + e_loc) / 128.0)) * 128
    local_H = make_local_H_full(node, mp)

    return dict(
        theta_v_w=jnp.stack([t1v_w, t2v_w]),   # [2, C, C] (layer1 / layer2)
        theta_v_b=jnp.stack([t1v_b, t2v_b]),   # [2, C, 1]
        theta_e_w=jnp.stack([t1e_w, t2e_w]),
        theta_e_b=jnp.stack([t1e_b, t2e_b]),
        conv1_w9=conv_w9,
        conv1_skt=make_conv_shift_t(node, node),
        local_H=local_H,
    )


# ----------------------------------------------------------------------------
# Block forward (NCHW in / NCHW out)
# ----------------------------------------------------------------------------
def basic_block_forward(x_nchw, params):
    b, c, h, w = x_nchw.shape
    n = h * w
    x_cm = x_nchw.reshape(b, c, n)                 # channel-major nodes [B, C, N]
    y = fused_block_forward(x_cm, params["local_H"],
                            params["theta_v_w"], params["theta_v_b"],
                            params["theta_e_w"], params["theta_e_b"],
                            params["conv1_w9"], params["conv1_skt"])
    return y.reshape(b, c, h, w)


if __name__ == "__main__":
    B, C, NODE = 2, 8, 8                 # inplanes = planes = 8, spatial 8x8, N = 64
    key = jax.random.PRNGKey(0)
    kx, kp = jax.random.split(key)
    x = jax.random.normal(kx, (B, C, NODE, NODE), dtype=jnp.float32)
    params = init_params(kp, C, NODE)

    fwd = jax.jit(basic_block_forward)
    y = fwd(x, params)
    jax.block_until_ready(y)

    assert y.shape == x.shape and y.dtype == jnp.float32
    assert bool(jnp.all(jnp.isfinite(y)))
    print("KERNEL_OK")
</pallas_src>

<mosaic_0001>
module attributes {stable_mosaic.version = 11 : i64} {
  func.func @_block_kernel(%arg0: i32, %arg1: memref<2x8x64xf32, #tpu.memory_space<vmem>>, %arg2: memref<64x128xf32, #tpu.memory_space<vmem>>, %arg3: memref<2x8x8xf32, #tpu.memory_space<vmem>>, %arg4: memref<2x8x1xf32, #tpu.memory_space<vmem>>, %arg5: memref<2x8x8xf32, #tpu.memory_space<vmem>>, %arg6: memref<2x8x1xf32, #tpu.memory_space<vmem>>, %arg7: memref<9x8x8xf32, #tpu.memory_space<vmem>>, %arg8: memref<9x64x64xf32, #tpu.memory_space<vmem>>, %arg9: memref<2x8x64xf32, #tpu.memory_space<vmem>>, %arg10: memref<2x8x64xf32, #tpu.memory_space<vmem>>, %arg11: memref<2x8x128xf32, #tpu.memory_space<vmem>>, %arg12: memref<2x64x128xf32, #tpu.memory_space<vmem>>, %arg13: memref<128x64xf32, #tpu.memory_space<vmem>>, %arg14: memref<2x8x64xf32, #tpu.memory_space<vmem>>) attributes {dimension_semantics = [#tpu.dimension_semantics<arbitrary>], iteration_bounds = array<i64: 16>, scalar_prefetch = 0 : i64, scratch_operands = 5 : i64, tpu.core_type = #tpu.core_type<tc>, window_params = [{pipeline_mode = #tpu.pipeline_mode<synchronous>, transform_indices = @transform_0, window_bounds = array<i64: 2, 8, 64>}, {pipeline_mode = #tpu.pipeline_mode<synchronous>, transform_indices = @transform_1, window_bounds = array<i64: 64, 128>}, {pipeline_mode = #tpu.pipeline_mode<synchronous>, transform_indices = @transform_2, window_bounds = array<i64: 2, 8, 8>}, {pipeline_mode = #tpu.pipeline_mode<synchronous>, transform_indices = @transform_3, window_bounds = array<i64: 2, 8, 1>}, {pipeline_mode = #tpu.pipeline_mode<synchronous>, transform_indices = @transform_4, window_bounds = array<i64: 2, 8, 8>}, {pipeline_mode = #tpu.pipeline_mode<synchronous>, transform_indices = @transform_5, window_bounds = array<i64: 2, 8, 1>}, {pipeline_mode = #tpu.pipeline_mode<synchronous>, transform_indices = @transform_6, window_bounds = array<i64: 9, 8, 8>}, {pipeline_mode = #tpu.pipeline_mode<synchronous>, transform_indices = @transform_7, window_bounds = array<i64: 9, 64, 64>}, {pipeline_mode = #tpu.pipeline_mode<synchronous>, transform_indices = @transform_8, window_bounds = array<i64: 2, 8, 64>}]} {
    %0 = tpu.iota {dimensions = array<i32: 0>} : vector<64x64xi32>
    %1 = tpu.iota {dimensions = array<i32: 1>} : vector<64x64xi32>
    %2 = arith.cmpi eq, %0, %1 : vector<64x64xi32>
    %cst = arith.constant 1.000000e+00 : f32
    %cst_0 = arith.constant 0.000000e+00 : f32
    %3 = vector.broadcast %cst : f32 to vector<64x64xf32>
    %4 = vector.broadcast %cst_0 : f32 to vector<64x64xf32>
    %5 = arith.select %2, %3, %4 : vector<64x64xi1>, vector<64x64xf32>
    %6 = tpu.iota {dimensions = array<i32: 0>} : vector<64x128xi32>
    %7 = tpu.iota {dimensions = array<i32: 1>} : vector<64x128xi32>
    %8 = arith.cmpi eq, %6, %7 : vector<64x128xi32>
    %cst_1 = arith.constant 1.000000e+00 : f32
    %cst_2 = arith.constant 0.000000e+00 : f32
    %9 = vector.broadcast %cst_1 : f32 to vector<64x128xf32>
    %10 = vector.broadcast %cst_2 : f32 to vector<64x128xf32>
    %11 = arith.select %8, %9, %10 : vector<64x128xi1>, vector<64x128xf32>
    %c0 = arith.constant 0 : index
    %c0_3 = arith.constant 0 : index
    %12 = vector.load %arg2[%c0, %c0_3] : memref<64x128xf32, #tpu.memory_space<vmem>>, vector<64x128xf32>
    %c0_i32 = arith.constant 0 : i32
    %13 = arith.cmpi eq, %arg0, %c0_i32 : i32
    %14 = arith.extui %13 : i1 to i32
    %c0_i32_4 = arith.constant 0 : i32
    %15 = arith.cmpi ne, %14, %c0_i32_4 : i32
    scf.if %15 {
      %c0_106 = arith.constant 0 : index
      %c0_107 = arith.constant 0 : index
      %c0_108 = arith.constant 0 : index
      %185 = vector.load %arg1[%c0_106, %c0_107, %c0_108] : memref<2x8x64xf32, #tpu.memory_space<vmem>>, vector<2x8x64xf32>
      %c0_109 = arith.constant 0 : index
      %c0_110 = arith.constant 0 : index
      %c0_111 = arith.constant 0 : index
      %186 = vector.load %arg10[%c0_109, %c0_110, %c0_111] : memref<2x8x64xf32, #tpu.memory_space<vmem>>, vector<2x8x64xf32>
      tpu.vector_store %arg10[%c0_109, %c0_110, %c0_111], %185 {strides = array<i32>} : memref<2x8x64xf32, #tpu.memory_space<vmem>>, vector<2x8x64xf32>,
    } else {
    }
    %c0_5 = arith.constant 0 : index
    %c0_6 = arith.constant 0 : index
    %c0_7 = arith.constant 0 : index
    %16 = vector.load %arg10[%c0_5, %c0_6, %c0_7] : memref<2x8x64xf32, #tpu.memory_space<vmem>>, vector<1x8x64xf32>
    %17 = vector.shape_cast %16 : vector<1x8x64xf32> to vector<8x64xf32>
    %cst_8 = arith.constant dense<0.000000e+00> : vector<64x8xf32>
    %18 = tpu.matmul %5, %17, %cst_8 {dimension_numbers = #tpu.dot_dimension_numbers<[1], [1], [0], [0], [0, 0, 1, 0], [], []>} : vector<64x64xf32>, vector<8x64xf32>, vector<64x8xf32> -> vector<64x8xf32>
    %cst_9 = arith.constant dense<0.000000e+00> : vector<64x64xf32>
    %19 = tpu.matmul %18, %17, %cst_9 {dimension_numbers = #tpu.dot_dimension_numbers<[1], [0], [0], [1], [0, 0, 1, 1], [], []>} : vector<64x8xf32>, vector<8x64xf32>, vector<64x64xf32> -> vector<64x64xf32>
    %20 = arith.mulf %17, %17 : vector<8x64xf32>
    %cst_10 = arith.constant dense<0.000000e+00> : vector<64xf32>
    %21 = vector.multi_reduction <add>, %20, %cst_10 [0] : vector<8x64xf32> to vector<64xf32>
    %22 = vector.shape_cast %21 : vector<64xf32> to vector<1x64xf32>
    %23 = vector.broadcast %22 : vector<1x64xf32> to vector<64x64xf32>
    %24 = arith.mulf %5, %23 : vector<64x64xf32>
    %cst_11 = arith.constant dense<0.000000e+00> : vector<64xf32>
    %25 = vector.multi_reduction <add>, %24, %cst_11 [1] : vector<64x64xf32> to vector<64xf32>
    %26 = vector.shape_cast %25 : vector<64xf32> to vector<64x1xf32>
    %27 = vector.broadcast %26 : vector<64x1xf32> to vector<64x64xf32>
    %28 = vector.broadcast %22 : vector<1x64xf32> to vector<64x64xf32>
    %29 = arith.addf %27, %28 : vector<64x64xf32>
    %cst_12 = arith.constant 2.000000e+00 : f32
    %30 = vector.broadcast %cst_12 : f32 to vector<64x64xf32>
    %31 = arith.mulf %30, %19 : vector<64x64xf32>
    %32 = arith.subf %29, %31 : vector<64x64xf32>
    %c0_13 = arith.constant 0 : index
    %c0_14 = arith.constant 0 : index
    %33 = vector.load %arg13[%c0_13, %c0_14] : memref<128x64xf32, #tpu.memory_space<vmem>>, vector<64x64xf32>
    tpu.vector_store %arg13[%c0_13, %c0_14], %32 {strides = array<i32>} : memref<128x64xf32, #tpu.memory_space<vmem>>, vector<64x64xf32>,
    %cst_15 = arith.constant 0.000000e+00 : f32
    %34 = vector.broadcast %cst_15 : f32 to vector<64x64xf32>
    %c0_i32_16 = arith.constant 0 : i32
    %c8_i32 = arith.constant 8 : i32
    %35 = arith.addi %c0_i32_16, %c8_i32 : i32
    %c1_i32 = arith.constant 1 : i32
    %36 = scf.for %arg15 = %c0_i32_16 to %35 step %c1_i32 iter_args(%arg16 = %34) -> (vector<64x64xf32>)  : i32 {
      %c8_i32_106 = arith.constant 8 : i32
      %185 = arith.muli %arg15, %c8_i32_106 : i32
      %c0_i32_107 = arith.constant 0 : i32
      %186 = arith.addi %185, %c0_i32_107 : i32
      %c0_i32_108 = arith.constant 0 : i32
      %187 = arith.addi %c0_i32_108, %186 : i32
      %188 = arith.index_cast %187 : i32 to index
      %c0_109 = arith.constant 0 : index
      %189 = vector.load %arg13[%188, %c0_109] : memref<128x64xf32, #tpu.memory_space<vmem>>, vector<1x64xf32>
      %190 = vector.broadcast %189 : vector<1x64xf32> to vector<64x64xf32>
      %191 = arith.cmpf olt, %190, %32 : vector<64x64xf32>
      %192 = vector.broadcast %189 : vector<1x64xf32> to vector<64x64xf32>
      %193 = arith.cmpf oeq, %192, %32 : vector<64x64xf32>
      %194 = vector.broadcast %186 : i32 to vector<64x64xi32>
      %195 = arith.cmpi sgt, %0, %194 : vector<64x64xi32>
      %196 = arith.andi %193, %195 : vector<64x64xi1>
      %197 = arith.ori %191, %196 : vector<64x64xi1>
      %cst_110 = arith.constant 1.000000e+00 : f32
      %cst_111 = arith.constant 0.000000e+00 : f32
      %198 = vector.broadcast %cst_110 : f32 to vector<64x64xf32>
      %199 = vector.broadcast %cst_111 : f32 to vector<64x64xf32>
      %200 = arith.select %197, %198, %199 : vector<64x64xi1>, vector<64x64xf32>
      %201 = arith.addf %arg16, %200 : vector<64x64xf32>
      %c1_i32_112 = arith.constant 1 : i32
      %202 = arith.addi %185, %c1_i32_112 : i32
      %c0_i32_113 = arith.constant 0 : i32
      %203 = arith.addi %c0_i32_113, %202 : i32
      %204 = arith.index_cast %203 : i32 to index
      %c0_114 = arith.constant 0 : index
      %205 = vector.load %arg13[%204, %c0_114] : memref<128x64xf32, #tpu.memory_space<vmem>>, vector<1x64xf32>
      %206 = vector.broadcast %205 : vector<1x64xf32> to vector<64x64xf32>
      %207 = arith.cmpf olt, %206, %32 : vector<64x64xf32>
      %208 = vector.broadcast %205 : vector<1x64xf32> to vector<64x64xf32>
      %209 = arith.cmpf oeq, %208, %32 : vector<64x64xf32>
      %210 = vector.broadcast %202 : i32 to vector<64x64xi32>
      %211 = arith.cmpi sgt, %0, %210 : vector<64x64xi32>
      %212 = arith.andi %209, %211 : vector<64x64xi1>
      %213 = arith.ori %207, %212 : vector<64x64xi1>
      %cst_115 = arith.constant 1.000000e+00 : f32
      %cst_116 = arith.constant 0.000000e+00 : f32
      %214 = vector.broadcast %cst_115 : f32 to vector<64x64xf32>
      %215 = vector.broadcast %cst_116 : f32 to vector<64x64xf32>
      %216 = arith.select %213, %214, %215 : vector<64x64xi1>, vector<64x64xf32>
      %217 = arith.addf %201, %216 : vector<64x64xf32>
      %c2_i32 = arith.constant 2 : i32
      %218 = arith.addi %185, %c2_i32 : i32
      %c0_i32_117 = arith.constant 0 : i32
      %219 = arith.addi %c0_i32_117, %218 : i32
      %220 = arith.index_cast %219 : i32 to index
      %c0_118 = arith.constant 0 : index
      %221 = vector.load %arg13[%220, %c0_118] : memref<128x64xf32, #tpu.memory_space<vmem>>, vector<1x64xf32>
      %222 = vector.broadcast %221 : vector<1x64xf32> to vector<64x64xf32>
      %223 = arith.cmpf olt, %222, %32 : vector<64x64xf32>
      %224 = vector.broadcast %221 : vector<1x64xf32> to vector<64x64xf32>
      %225 = arith.cmpf oeq, %224, %32 : vector<64x64xf32>
      %226 = vector.broadcast %218 : i32 to vector<64x64xi32>
      %227 = arith.cmpi sgt, %0, %226 : vector<64x64xi32>
      %228 = arith.andi %225, %227 : vector<64x64xi1>
      %229 = arith.ori %223, %228 : vector<64x64xi1>
      %cst_119 = arith.constant 1.000000e+00 : f32
      %cst_120 = arith.constant 0.000000e+00 : f32
      %230 = vector.broadcast %cst_119 : f32 to vector<64x64xf32>
      %231 = vector.broadcast %cst_120 : f32 to vector<64x64xf32>
      %232 = arith.select %229, %230, %231 : vector<64x64xi1>, vector<64x64xf32>
      %233 = arith.addf %217, %232 : vector<64x64xf32>
      %c3_i32 = arith.constant 3 : i32
      %234 = arith.addi %185, %c3_i32 : i32
      %c0_i32_121 = arith.constant 0 : i32
      %235 = arith.addi %c0_i32_121, %234 : i32
      %236 = arith.index_cast %235 : i32 to index
      %c0_122 = arith.constant 0 : index
      %237 = vector.load %arg13[%236, %c0_122] : memref<128x64xf32, #tpu.memory_space<vmem>>, vector<1x64xf32>
      %238 = vector.broadcast %237 : vector<1x64xf32> to vector<64x64xf32>
      %239 = arith.cmpf olt, %238, %32 : vector<64x64xf32>
      %240 = vector.broadcast %237 : vector<1x64xf32> to vector<64x64xf32>
      %241 = arith.cmpf oeq, %240, %32 : vector<64x64xf32>
      %242 = vector.broadcast %234 : i32 to vector<64x64xi32>
      %243 = arith.cmpi sgt, %0, %242 : vector<64x64xi32>
      %244 = arith.andi %241, %243 : vector<64x64xi1>
      %245 = arith.ori %239, %244 : vector<64x64xi1>
      %cst_123 = arith.constant 1.000000e+00 : f32
      %cst_124 = arith.constant 0.000000e+00 : f32
      %246 = vector.broadcast %cst_123 : f32 to vector<64x64xf32>
      %247 = vector.broadcast %cst_124 : f32 to vector<64x64xf32>
      %248 = arith.select %245, %246, %247 : vector<64x64xi1>, vector<64x64xf32>
      %249 = arith.addf %233, %248 : vector<64x64xf32>
      %c4_i32_125 = arith.constant 4 : i32
      %250 = arith.addi %185, %c4_i32_125 : i32
      %c0_i32_126 = arith.constant 0 : i32
      %251 = arith.addi %c0_i32_126, %250 : i32
      %252 = arith.index_cast %251 : i32 to index
      %c0_127 = arith.constant 0 : index
      %253 = vector.load %arg13[%252, %c0_127] : memref<128x64xf32, #tpu.memory_space<vmem>>, vector<1x64xf32>
      %254 = vector.broadcast %253 : vector<1x64xf32> to vector<64x64xf32>
      %255 = arith.cmpf olt, %254, %32 : vector<64x64xf32>
      %256 = vector.broadcast %253 : vector<1x64xf32> to vector<64x64xf32>
      %257 = arith.cmpf oeq, %256, %32 : vector<64x64xf32>
      %258 = vector.broadcast %250 : i32 to vector<64x64xi32>
      %259 = arith.cmpi sgt, %0, %258 : vector<64x64xi32>
      %260 = arith.andi %257, %259 : vector<64x64xi1>
      %261 = arith.ori %255, %260 : vector<64x64xi1>
      %cst_128 = arith.constant 1.000000e+00 : f32
      %cst_129 = arith.constant 0.000000e+00 : f32
      %262 = vector.broadcast %cst_128 : f32 to vector<64x64xf32>
      %263 = vector.broadcast %cst_129 : f32 to vector<64x64xf32>
      %264 = arith.select %261, %262, %263 : vector<64x64xi1>, vector<64x64xf32>
      %265 = arith.addf %249, %264 : vector<64x64xf32>
      %c5_i32 = arith.constant 5 : i32
      %266 = arith.addi %185, %c5_i32 : i32
      %c0_i32_130 = arith.constant 0 : i32
      %267 = arith.addi %c0_i32_130, %266 : i32
      %268 = arith.index_cast %267 : i32 to index
      %c0_131 = arith.constant 0 : index
      %269 = vector.load %arg13[%268, %c0_131] : memref<128x64xf32, #tpu.memory_space<vmem>>, vector<1x64xf32>
      %270 = vector.broadcast %269 : vector<1x64xf32> to vector<64x64xf32>
      %271 = arith.cmpf olt, %270, %32 : vector<64x64xf32>
      %272 = vector.broadcast %269 : vector<1x64xf32> to vector<64x64xf32>
      %273 = arith.cmpf oeq, %272, %32 : vector<64x64xf32>
      %274 = vector.broadcast %266 : i32 to vector<64x64xi32>
      %275 = arith.cmpi sgt, %0, %274 : vector<64x64xi32>
      %276 = arith.andi %273, %275 : vector<64x64xi1>
      %277 = arith.ori %271, %276 : vector<64x64xi1>
      %cst_132 = arith.constant 1.000000e+00 : f32
      %cst_133 = arith.constant 0.000000e+00 : f32
      %278 = vector.broadcast %cst_132 : f32 to vector<64x64xf32>
      %279 = vector.broadcast %cst_133 : f32 to vector<64x64xf32>
      %280 = arith.select %277, %278, %279 : vector<64x64xi1>, vector<64x64xf32>
      %281 = arith.addf %265, %280 : vector<64x64xf32>
      %c6_i32 = arith.constant 6 : i32
      %282 = arith.addi %185, %c6_i32 : i32
      %c0_i32_134 = arith.constant 0 : i32
      %283 = arith.addi %c0_i32_134, %282 : i32
      %284 = arith.index_cast %283 : i32 to index
      %c0_135 = arith.constant 0 : index
      %285 = vector.load %arg13[%284, %c0_135] : memref<128x64xf32, #tpu.memory_space<vmem>>, vector<1x64xf32>
      %286 = vector.broadcast %285 : vector<1x64xf32> to vector<64x64xf32>
      %287 = arith.cmpf olt, %286, %32 : vector<64x64xf32>
      %288 = vector.broadcast %285 : vector<1x64xf32> to vector<64x64xf32>
      %289 = arith.cmpf oeq, %288, %32 : vector<64x64xf32>
      %290 = vector.broadcast %282 : i32 to vector<64x64xi32>
      %291 = arith.cmpi sgt, %0, %290 : vector<64x64xi32>
      %292 = arith.andi %289, %291 : vector<64x64xi1>
      %293 = arith.ori %287, %292 : vector<64x64xi1>
      %cst_136 = arith.constant 1.000000e+00 : f32
      %cst_137 = arith.constant 0.000000e+00 : f32
      %294 = vector.broadcast %cst_136 : f32 to vector<64x64xf32>
      %295 = vector.broadcast %cst_137 : f32 to vector<64x64xf32>
      %296 = arith.select %293, %294, %295 : vector<64x64xi1>, vector<64x64xf32>
      %297 = arith.addf %281, %296 : vector<64x64xf32>
      %c7_i32_138 = arith.constant 7 : i32
      %298 = arith.addi %185, %c7_i32_138 : i32
      %c0_i32_139 = arith.constant 0 : i32
      %299 = arith.addi %c0_i32_139, %298 : i32
      %300 = arith.index_cast %299 : i32 to index
      %c0_140 = arith.constant 0 : index
      %301 = vector.load %arg13[%300, %c0_140] : memref<128x64xf32, #tpu.memory_space<vmem>>, vector<1x64xf32>
      %302 = vector.broadcast %301 : vector<1x64xf32> to vector<64x64xf32>
      %303 = arith.cmpf olt, %302, %32 : vector<64x64xf32>
      %304 = vector.broadcast %301 : vector<1x64xf32> to vector<64x64xf32>
      %305 = arith.cmpf oeq, %304, %32 : vector<64x64xf32>
      %306 = vector.broadcast %298 : i32 to vector<64x64xi32>
      %307 = arith.cmpi sgt, %0, %306 : vector<64x64xi32>
      %308 = arith.andi %305, %307 : vector<64x64xi1>
      %309 = arith.ori %303, %308 : vector<64x64xi1>
      %cst_141 = arith.constant 1.000000e+00 : f32
      %cst_142 = arith.constant 0.000000e+00 : f32
      %310 = vector.broadcast %cst_141 : f32 to vector<64x64xf32>
      %311 = vector.broadcast %cst_142 : f32 to vector<64x64xf32>
      %312 = arith.select %309, %310, %311 : vector<64x64xi1>, vector<64x64xf32>
      %313 = arith.addf %297, %312 : vector<64x64xf32>
      scf.yield %313 : vector<64x64xf32>
    }
    %c8_i32_17 = arith.constant 8 : i32
    %cst_18 = arith.constant 2.000000e+00 : f32
    %37 = vector.broadcast %cst_18 : f32 to vector<64x64xf32>
    %38 = arith.cmpf olt, %36, %37 : vector<64x64xf32>
    %cst_19 = arith.constant 1.000000e+00 : f32
    %cst_20 = arith.constant 0.000000e+00 : f32
    %39 = vector.broadcast %cst_19 : f32 to vector<64x64xf32>
    %40 = vector.broadcast %cst_20 : f32 to vector<64x64xf32>
    %41 = arith.select %38, %39, %40 : vector<64x64xi1>, vector<64x64xf32>
    %cst_21 = arith.constant dense<0.000000e+00> : vector<64xf32>
    %42 = vector.multi_reduction <add>, %41, %cst_21 [1] : vector<64x64xf32> to vector<64xf32>
    %43 = vector.shape_cast %42 : vector<64xf32> to vector<64x1xf32>
    %44 = vector.broadcast %43 : vector<64x1xf32> to vector<64x64xf32>
    %45 = arith.mulf %44, %5 : vector<64x64xf32>
    %cst_22 = arith.constant dense<0.000000e+00> : vector<64xf32>
    %46 = vector.multi_reduction <add>, %45, %cst_22 [0] : vector<64x64xf32> to vector<64xf32>
    %47 = vector.shape_cast %46 : vector<64xf32> to vector<1x64xf32>
    %48 = vector.broadcast %47 : vector<1x64xf32> to vector<64x64xf32>
    %49 = arith.cmpf olt, %36, %48 : vector<64x64xf32>
    %50 = arith.ori %49, %2 : vector<64x64xi1>
    %cst_23 = arith.constant 1.000000e+00 : f32
    %cst_24 = arith.constant 0.000000e+00 : f32
    %51 = vector.broadcast %cst_23 : f32 to vector<64x64xf32>
    %52 = vector.broadcast %cst_24 : f32 to vector<64x64xf32>
    %53 = arith.select %50, %51, %52 : vector<64x64xi1>, vector<64x64xf32>
    %cst_25 = arith.constant dense<0.000000e+00> : vector<64x128xf32>
    %54 = tpu.matmul %53, %11, %cst_25 {dimension_numbers = #tpu.dot_dimension_numbers<[1], [0], [0], [1], [0, 0, 1, 1], [], []>} : vector<64x64xf32>, vector<64x128xf32>, vector<64x128xf32> -> vector<64x128xf32>
    %55 = arith.addf %54, %12 : vector<64x128xf32>
    %cst_26 = arith.constant dense<0.000000e+00> : vector<128xf32>
    %56 = vector.multi_reduction <add>, %55, %cst_26 [0] : vector<64x128xf32> to vector<128xf32>
    %57 = vector.shape_cast %56 : vector<128xf32> to vector<1x128xf32>
    %cst_27 = arith.constant 1.000000e+00 : f32
    %58 = vector.broadcast %cst_27 : f32 to vector<1x128xf32>
    %59 = arith.maximumf %57, %58 : vector<1x128xf32>
    %cst_28 = arith.constant dense<0.000000e+00> : vector<8x128xf32>
    %60 = tpu.matmul %17, %55, %cst_28 {dimension_numbers = #tpu.dot_dimension_numbers<[1], [0], [0], [1], [0, 0, 1, 1], [], []>} : vector<8x64xf32>, vector<64x128xf32>, vector<8x128xf32> -> vector<8x128xf32>
    %61 = vector.broadcast %59 : vector<1x128xf32> to vector<8x128xf32>
    %62 = arith.divf %60, %61 : vector<8x128xf32>
    %c0_29 = arith.constant 0 : index
    %c0_30 = arith.constant 0 : index
    %c0_31 = arith.constant 0 : index
    %63 = vector.load %arg12[%c0_29, %c0_30, %c0_31] : memref<2x64x128xf32, #tpu.memory_space<vmem>>, vector<1x64x128xf32>
    %64 = vector.shape_cast %63 : vector<1x64x128xf32> to vector<64x128xf32>
    %65 = vector.shape_cast %55 : vector<64x128xf32> to vector<1x64x128xf32>
    tpu.vector_store %arg12[%c0_29, %c0_30, %c0_31], %65 {strides = array<i32>} : memref<2x64x128xf32, #tpu.memory_space<vmem>>, vector<1x64x128xf32>,
    %c0_32 = arith.constant 0 : index
    %c0_33 = arith.constant 0 : index
    %c0_34 = arith.constant 0 : index
    %66 = vector.load %arg11[%c0_32, %c0_33, %c0_34] : memref<2x8x128xf32, #tpu.memory_space<vmem>>, vector<1x8x128xf32>
    %67 = vector.shape_cast %66 : vector<1x8x128xf32> to vector<8x128xf32>
    %68 = vector.shape_cast %62 : vector<8x128xf32> to vector<1x8x128xf32>
    tpu.vector_store %arg11[%c0_32, %c0_33, %c0_34], %68 {strides = array<i32>} : memref<2x8x128xf32, #tpu.memory_space<vmem>>, vector<1x8x128xf32>,
    %c1 = arith.constant 1 : index
    %c0_35 = arith.constant 0 : index
    %c0_36 = arith.constant 0 : index
    %69 = vector.load %arg10[%c1, %c0_35, %c0_36] : memref<2x8x64xf32, #tpu.memory_space<vmem>>, vector<1x8x64xf32>
    %70 = vector.shape_cast %69 : vector<1x8x64xf32> to vector<8x64xf32>
    %cst_37 = arith.constant dense<0.000000e+00> : vector<64x8xf32>
    %71 = tpu.matmul %5, %70, %cst_37 {dimension_numbers = #tpu.dot_dimension_numbers<[1], [1], [0], [0], [0, 0, 1, 0], [], []>} : vector<64x64xf32>, vector<8x64xf32>, vector<64x8xf32> -> vector<64x8xf32>
    %cst_38 = arith.constant dense<0.000000e+00> : vector<64x64xf32>
    %72 = tpu.matmul %71, %70, %cst_38 {dimension_numbers = #tpu.dot_dimension_numbers<[1], [0], [0], [1], [0, 0, 1, 1], [], []>} : vector<64x8xf32>, vector<8x64xf32>, vector<64x64xf32> -> vector<64x64xf32>
    %73 = arith.mulf %70, %70 : vector<8x64xf32>
    %cst_39 = arith.constant dense<0.000000e+00> : vector<64xf32>
    %74 = vector.multi_reduction <add>, %73, %cst_39 [0] : vector<8x64xf32> to vector<64xf32>
    %75 = vector.shape_cast %74 : vector<64xf32> to vector<1x64xf32>
    %76 = vector.broadcast %75 : vector<1x64xf32> to vector<64x64xf32>
    %77 = arith.mulf %5, %76 : vector<64x64xf32>
    %cst_40 = arith.constant dense<0.000000e+00> : vector<64xf32>
    %78 = vector.multi_reduction <add>, %77, %cst_40 [1] : vector<64x64xf32> to vector<64xf32>
    %79 = vector.shape_cast %78 : vector<64xf32> to vector<64x1xf32>
    %80 = vector.broadcast %79 : vector<64x1xf32> to vector<64x64xf32>
    %81 = vector.broadcast %75 : vector<1x64xf32> to vector<64x64xf32>
    %82 = arith.addf %80, %81 : vector<64x64xf32>
    %cst_41 = arith.constant 2.000000e+00 : f32
    %83 = vector.broadcast %cst_41 : f32 to vector<64x64xf32>
    %84 = arith.mulf %83, %72 : vector<64x64xf32>
    %85 = arith.subf %82, %84 : vector<64x64xf32>
    %c64 = arith.constant 64 : index
    %c0_42 = arith.constant 0 : index
    %86 = vector.load %arg13[%c64, %c0_42] : memref<128x64xf32, #tpu.memory_space<vmem>>, vector<64x64xf32>
    tpu.vector_store %arg13[%c64, %c0_42], %85 {strides = array<i32>} : memref<128x64xf32, #tpu.memory_space<vmem>>, vector<64x64xf32>,
    %cst_43 = arith.constant 0.000000e+00 : f32
    %87 = vector.broadcast %cst_43 : f32 to vector<64x64xf32>
    %c0_i32_44 = arith.constant 0 : i32
    %c8_i32_45 = arith.constant 8 : i32
    %88 = arith.addi %c0_i32_44, %c8_i32_45 : i32
    %c1_i32_46 = arith.constant 1 : i32
    %89 = scf.for %arg15 = %c0_i32_44 to %88 step %c1_i32_46 iter_args(%arg16 = %87) -> (vector<64x64xf32>)  : i32 {
      %c8_i32_106 = arith.constant 8 : i32
      %185 = arith.muli %arg15, %c8_i32_106 : i32
      %c0_i32_107 = arith.constant 0 : i32
      %186 = arith.addi %185, %c0_i32_107 : i32
      %c64_i32 = arith.constant 64 : i32
      %187 = arith.addi %c64_i32, %186 : i32
      %188 = arith.index_cast %187 : i32 to index
      %c0_108 = arith.constant 0 : index
      %189 = vector.load %arg13[%188, %c0_108] : memref<128x64xf32, #tpu.memory_space<vmem>>, vector<1x64xf32>
      %190 = vector.broadcast %189 : vector<1x64xf32> to vector<64x64xf32>
      %191 = arith.cmpf olt, %190, %85 : vector<64x64xf32>
      %192 = vector.broadcast %189 : vector<1x64xf32> to vector<64x64xf32>
      %193 = arith.cmpf oeq, %192, %85 : vector<64x64xf32>
      %194 = vector.broadcast %186 : i32 to vector<64x64xi32>
      %195 = arith.cmpi sgt, %0, %194 : vector<64x64xi32>
      %196 = arith.andi %193, %195 : vector<64x64xi1>
      %197 = arith.ori %191, %196 : vector<64x64xi1>
      %cst_109 = arith.constant 1.000000e+00 : f32
      %cst_110 = arith.constant 0.000000e+00 : f32
      %198 = vector.broadcast %cst_109 : f32 to vector<64x64xf32>
      %199 = vector.broadcast %cst_110 : f32 to vector<64x64xf32>
      %200 = arith.select %197, %198, %199 : vector<64x64xi1>, vector<64x64xf32>
      %201 = arith.addf %arg16, %200 : vector<64x64xf32>
      %c1_i32_111 = arith.constant 1 : i32
      %202 = arith.addi %185, %c1_i32_111 : i32
      %c64_i32_112 = arith.constant 64 : i32
      %203 = arith.addi %c64_i32_112, %202 : i32
      %204 = arith.index_cast %203 : i32 to index
      %c0_113 = arith.constant 0 : index
      %205 = vector.load %arg13[%204, %c0_113] : memref<128x64xf32, #tpu.memory_space<vmem>>, vector<1x64xf32>
      %206 = vector.broadcast %205 : vector<1x64xf32> to vector<64x64xf32>
      %207 = arith.cmpf olt, %206, %85 : vector<64x64xf32>
      %208 = vector.broadcast %205 : vector<1x64xf32> to vector<64x64xf32>
      %209 = arith.cmpf oeq, %208, %85 : vector<64x64xf32>
      %210 = vector.broadcast %202 : i32 to vector<64x64xi32>
      %211 = arith.cmpi sgt, %0, %210 : vector<64x64xi32>
      %212 = arith.andi %209, %211 : vector<64x64xi1>
      %213 = arith.ori %207, %212 : vector<64x64xi1>
      %cst_114 = arith.constant 1.000000e+00 : f32
      %cst_115 = arith.constant 0.000000e+00 : f32
      %214 = vector.broadcast %cst_114 : f32 to vector<64x64xf32>
      %215 = vector.broadcast %cst_115 : f32 to vector<64x64xf32>
      %216 = arith.select %213, %214, %215 : vector<64x64xi1>, vector<64x64xf32>
      %217 = arith.addf %201, %216 : vector<64x64xf32>
      %c2_i32 = arith.constant 2 : i32
      %218 = arith.addi %185, %c2_i32 : i32
      %c64_i32_116 = arith.constant 64 : i32
      %219 = arith.addi %c64_i32_116, %218 : i32
      %220 = arith.index_cast %219 : i32 to index
      %c0_117 = arith.constant 0 : index
      %221 = vector.load %arg13[%220, %c0_117] : memref<128x64xf32, #tpu.memory_space<vmem>>, vector<1x64xf32>
      %222 = vector.broadcast %221 : vector<1x64xf32> to vector<64x64xf32>
      %223 = arith.cmpf olt, %222, %85 : vector<64x64xf32>
      %224 = vector.broadcast %221 : vector<1x64xf32> to vector<64x64xf32>
      %225 = arith.cmpf oeq, %224, %85 : vector<64x64xf32>
      %226 = vector.broadcast %218 : i32 to vector<64x64xi32>
      %227 = arith.cmpi sgt, %0, %226 : vector<64x64xi32>
      %228 = arith.andi %225, %227 : vector<64x64xi1>
      %229 = arith.ori %223, %228 : vector<64x64xi1>
      %cst_118 = arith.constant 1.000000e+00 : f32
      %cst_119 = arith.constant 0.000000e+00 : f32
      %230 = vector.broadcast %cst_118 : f32 to vector<64x64xf32>
      %231 = vector.broadcast %cst_119 : f32 to vector<64x64xf32>
      %232 = arith.select %229, %230, %231 : vector<64x64xi1>, vector<64x64xf32>
      %233 = arith.addf %217, %232 : vector<64x64xf32>
      %c3_i32 = arith.constant 3 : i32
      %234 = arith.addi %185, %c3_i32 : i32
      %c64_i32_120 = arith.constant 64 : i32
      %235 = arith.addi %c64_i32_120, %234 : i32
      %236 = arith.index_cast %235 : i32 to index
      %c0_121 = arith.constant 0 : index
      %237 = vector.load %arg13[%236, %c0_121] : memref<128x64xf32, #tpu.memory_space<vmem>>, vector<1x64xf32>
      %238 = vector.broadcast %237 : vector<1x64xf32> to vector<64x64xf32>
      %239 = arith.cmpf olt, %238, %85 : vector<64x64xf32>
      %240 = vector.broadcast %237 : vector<1x64xf32> to vector<64x64xf32>
      %241 = arith.cmpf oeq, %240, %85 : vector<64x64xf32>
      %242 = vector.broadcast %234 : i32 to vector<64x64xi32>
      %243 = arith.cmpi sgt, %0, %242 : vector<64x64xi32>
      %244 = arith.andi %241, %243 : vector<64x64xi1>
      %245 = arith.ori %239, %244 : vector<64x64xi1>
      %cst_122 = arith.constant 1.000000e+00 : f32
      %cst_123 = arith.constant 0.000000e+00 : f32
      %246 = vector.broadcast %cst_122 : f32 to vector<64x64xf32>
      %247 = vector.broadcast %cst_123 : f32 to vector<64x64xf32>
      %248 = arith.select %245, %246, %247 : vector<64x64xi1>, vector<64x64xf32>
      %249 = arith.addf %233, %248 : vector<64x64xf32>
      %c4_i32_124 = arith.constant 4 : i32
      %250 = arith.addi %185, %c4_i32_124 : i32
      %c64_i32_125 = arith.constant 64 : i32
      %251 = arith.addi %c64_i32_125, %250 : i32
      %252 = arith.index_cast %251 : i32 to index
      %c0_126 = arith.constant 0 : index
      %253 = vector.load %arg13[%252, %c0_126] : memref<128x64xf32, #tpu.memory_space<vmem>>, vector<1x64xf32>
      %254 = vector.broadcast %253 : vector<1x64xf32> to vector<64x64xf32>
      %255 = arith.cmpf olt, %254, %85 : vector<64x64xf32>
      %256 = vector.broadcast %253 : vector<1x64xf32> to vector<64x64xf32>
      %257 = arith.cmpf oeq, %256, %85 : vector<64x64xf32>
      %258 = vector.broadcast %250 : i32 to vector<64x64xi32>
      %259 = arith.cmpi sgt, %0, %258 : vector<64x64xi32>
      %260 = arith.andi %257, %259 : vector<64x64xi1>
      %261 = arith.ori %255, %260 : vector<64x64xi1>
      %cst_127 = arith.constant 1.000000e+00 : f32
      %cst_128 = arith.constant 0.000000e+00 : f32
      %262 = vector.broadcast %cst_127 : f32 to vector<64x64xf32>
      %263 = vector.broadcast %cst_128 : f32 to vector<64x64xf32>
      %264 = arith.select %261, %262, %263 : vector<64x64xi1>, vector<64x64xf32>
      %265 = arith.addf %249, %264 : vector<64x64xf32>
      %c5_i32 = arith.constant 5 : i32
      %266 = arith.addi %185, %c5_i32 : i32
      %c64_i32_129 = arith.constant 64 : i32
      %267 = arith.addi %c64_i32_129, %266 : i32
      %268 = arith.index_cast %267 : i32 to index
      %c0_130 = arith.constant 0 : index
      %269 = vector.load %arg13[%268, %c0_130] : memref<128x64xf32, #tpu.memory_space<vmem>>, vector<1x64xf32>
      %270 = vector.broadcast %269 : vector<1x64xf32> to vector<64x64xf32>
      %271 = arith.cmpf olt, %270, %85 : vector<64x64xf32>
      %272 = vector.broadcast %269 : vector<1x64xf32> to vector<64x64xf32>
      %273 = arith.cmpf oeq, %272, %85 : vector<64x64xf32>
      %274 = vector.broadcast %266 : i32 to vector<64x64xi32>
      %275 = arith.cmpi sgt, %0, %274 : vector<64x64xi32>
      %276 = arith.andi %273, %275 : vector<64x64xi1>
      %277 = arith.ori %271, %276 : vector<64x64xi1>
      %cst_131 = arith.constant 1.000000e+00 : f32
      %cst_132 = arith.constant 0.000000e+00 : f32
      %278 = vector.broadcast %cst_131 : f32 to vector<64x64xf32>
      %279 = vector.broadcast %cst_132 : f32 to vector<64x64xf32>
      %280 = arith.select %277, %278, %279 : vector<64x64xi1>, vector<64x64xf32>
      %281 = arith.addf %265, %280 : vector<64x64xf32>
      %c6_i32 = arith.constant 6 : i32
      %282 = arith.addi %185, %c6_i32 : i32
      %c64_i32_133 = arith.constant 64 : i32
      %283 = arith.addi %c64_i32_133, %282 : i32
      %284 = arith.index_cast %283 : i32 to index
      %c0_134 = arith.constant 0 : index
      %285 = vector.load %arg13[%284, %c0_134] : memref<128x64xf32, #tpu.memory_space<vmem>>, vector<1x64xf32>
      %286 = vector.broadcast %285 : vector<1x64xf32> to vector<64x64xf32>
      %287 = arith.cmpf olt, %286, %85 : vector<64x64xf32>
      %288 = vector.broadcast %285 : vector<1x64xf32> to vector<64x64xf32>
      %289 = arith.cmpf oeq, %288, %85 : vector<64x64xf32>
      %290 = vector.broadcast %282 : i32 to vector<64x64xi32>
      %291 = arith.cmpi sgt, %0, %290 : vector<64x64xi32>
      %292 = arith.andi %289, %291 : vector<64x64xi1>
      %293 = arith.ori %287, %292 : vector<64x64xi1>
      %cst_135 = arith.constant 1.000000e+00 : f32
      %cst_136 = arith.constant 0.000000e+00 : f32
      %294 = vector.broadcast %cst_135 : f32 to vector<64x64xf32>
      %295 = vector.broadcast %cst_136 : f32 to vector<64x64xf32>
      %296 = arith.select %293, %294, %295 : vector<64x64xi1>, vector<64x64xf32>
      %297 = arith.addf %281, %296 : vector<64x64xf32>
      %c7_i32_137 = arith.constant 7 : i32
      %298 = arith.addi %185, %c7_i32_137 : i32
      %c64_i32_138 = arith.constant 64 : i32
      %299 = arith.addi %c64_i32_138, %298 : i32
      %300 = arith.index_cast %299 : i32 to index
      %c0_139 = arith.constant 0 : index
      %301 = vector.load %arg13[%300, %c0_139] : memref<128x64xf32, #tpu.memory_space<vmem>>, vector<1x64xf32>
      %302 = vector.broadcast %301 : vector<1x64xf32> to vector<64x64xf32>
      %303 = arith.cmpf olt, %302, %85 : vector<64x64xf32>
      %304 = vector.broadcast %301 : vector<1x64xf32> to vector<64x64xf32>
      %305 = arith.cmpf oeq, %304, %85 : vector<64x64xf32>
      %306 = vector.broadcast %298 : i32 to vector<64x64xi32>
      %307 = arith.cmpi sgt, %0, %306 : vector<64x64xi32>
      %308 = arith.andi %305, %307 : vector<64x64xi1>
      %309 = arith.ori %303, %308 : vector<64x64xi1>
      %cst_140 = arith.constant 1.000000e+00 : f32
      %cst_141 = arith.constant 0.000000e+00 : f32
      %310 = vector.broadcast %cst_140 : f32 to vector<64x64xf32>
      %311 = vector.broadcast %cst_141 : f32 to vector<64x64xf32>
      %312 = arith.select %309, %310, %311 : vector<64x64xi1>, vector<64x64xf32>
      %313 = arith.addf %297, %312 : vector<64x64xf32>
      scf.yield %313 : vector<64x64xf32>
    }
    %c8_i32_47 = arith.constant 8 : i32
    %cst_48 = arith.constant 2.000000e+00 : f32
    %90 = vector.broadcast %cst_48 : f32 to vector<64x64xf32>
    %91 = arith.cmpf olt, %89, %90 : vector<64x64xf32>
    %cst_49 = arith.constant 1.000000e+00 : f32
    %cst_50 = arith.constant 0.000000e+00 : f32
    %92 = vector.broadcast %cst_49 : f32 to vector<64x64xf32>
    %93 = vector.broadcast %cst_50 : f32 to vector<64x64xf32>
    %94 = arith.select %91, %92, %93 : vector<64x64xi1>, vector<64x64xf32>
    %cst_51 = arith.constant dense<0.000000e+00> : vector<64xf32>
    %95 = vector.multi_reduction <add>, %94, %cst_51 [1] : vector<64x64xf32> to vector<64xf32>
    %96 = vector.shape_cast %95 : vector<64xf32> to vector<64x1xf32>
    %97 = vector.broadcast %96 : vector<64x1xf32> to vector<64x64xf32>
    %98 = arith.mulf %97, %5 : vector<64x64xf32>
    %cst_52 = arith.constant dense<0.000000e+00> : vector<64xf32>
    %99 = vector.multi_reduction <add>, %98, %cst_52 [0] : vector<64x64xf32> to vector<64xf32>
    %100 = vector.shape_cast %99 : vector<64xf32> to vector<1x64xf32>
    %101 = vector.broadcast %100 : vector<1x64xf32> to vector<64x64xf32>
    %102 = arith.cmpf olt, %89, %101 : vector<64x64xf32>
    %103 = arith.ori %102, %2 : vector<64x64xi1>
    %cst_53 = arith.constant 1.000000e+00 : f32
    %cst_54 = arith.constant 0.000000e+00 : f32
    %104 = vector.broadcast %cst_53 : f32 to vector<64x64xf32>
    %105 = vector.broadcast %cst_54 : f32 to vector<64x64xf32>
    %106 = arith.select %103, %104, %105 : vector<64x64xi1>, vector<64x64xf32>
    %cst_55 = arith.constant dense<0.000000e+00> : vector<64x128xf32>
    %107 = tpu.matmul %106, %11, %cst_55 {dimension_numbers = #tpu.dot_dimension_numbers<[1], [0], [0], [1], [0, 0, 1, 1], [], []>} : vector<64x64xf32>, vector<64x128xf32>, vector<64x128xf32> -> vector<64x128xf32>
    %108 = arith.addf %107, %12 : vector<64x128xf32>
    %cst_56 = arith.constant dense<0.000000e+00> : vector<128xf32>
    %109 = vector.multi_reduction <add>, %108, %cst_56 [0] : vector<64x128xf32> to vector<128xf32>
    %110 = vector.shape_cast %109 : vector<128xf32> to vector<1x128xf32>
    %cst_57 = arith.constant 1.000000e+00 : f32
    %111 = vector.broadcast %cst_57 : f32 to vector<1x128xf32>
    %112 = arith.maximumf %110, %111 : vector<1x128xf32>
    %cst_58 = arith.constant dense<0.000000e+00> : vector<8x128xf32>
    %113 = tpu.matmul %70, %108, %cst_58 {dimension_numbers = #tpu.dot_dimension_numbers<[1], [0], [0], [1], [0, 0, 1, 1], [], []>} : vector<8x64xf32>, vector<64x128xf32>, vector<8x128xf32> -> vector<8x128xf32>
    %114 = vector.broadcast %112 : vector<1x128xf32> to vector<8x128xf32>
    %115 = arith.divf %113, %114 : vector<8x128xf32>
    %c1_59 = arith.constant 1 : index
    %c0_60 = arith.constant 0 : index
    %c0_61 = arith.constant 0 : index
    %116 = vector.load %arg12[%c1_59, %c0_60, %c0_61] : memref<2x64x128xf32, #tpu.memory_space<vmem>>, vector<1x64x128xf32>
    %117 = vector.shape_cast %116 : vector<1x64x128xf32> to vector<64x128xf32>
    %118 = vector.shape_cast %108 : vector<64x128xf32> to vector<1x64x128xf32>
    tpu.vector_store %arg12[%c1_59, %c0_60, %c0_61], %118 {strides = array<i32>} : memref<2x64x128xf32, #tpu.memory_space<vmem>>, vector<1x64x128xf32>,
    %c1_62 = arith.constant 1 : index
    %c0_63 = arith.constant 0 : index
    %c0_64 = arith.constant 0 : index
    %119 = vector.load %arg11[%c1_62, %c0_63, %c0_64] : memref<2x8x128xf32, #tpu.memory_space<vmem>>, vector<1x8x128xf32>
    %120 = vector.shape_cast %119 : vector<1x8x128xf32> to vector<8x128xf32>
    %121 = vector.shape_cast %115 : vector<8x128xf32> to vector<1x8x128xf32>
    tpu.vector_store %arg11[%c1_62, %c0_63, %c0_64], %121 {strides = array<i32>} : memref<2x8x128xf32, #tpu.memory_space<vmem>>, vector<1x8x128xf32>,
    %c4_i32 = arith.constant 4 : i32
    %c0_i32_65 = arith.constant 0 : i32
    %122 = arith.cmpi eq, %c4_i32, %c0_i32_65 : i32
    %c1_i32_66 = arith.constant 1 : i32
    %123 = arith.select %122, %c1_i32_66, %c4_i32 : i32
    %124 = arith.remsi %arg0, %123 : i32
    %c0_i32_67 = arith.constant 0 : i32
    %125 = arith.cmpi ne, %124, %c0_i32_67 : i32
    %c0_i32_68 = arith.constant 0 : i32
    %126 = arith.cmpi slt, %124, %c0_i32_68 : i32
    %c0_i32_69 = arith.constant 0 : i32
    %127 = arith.cmpi slt, %123, %c0_i32_69 : i32
    %128 = arith.xori %126, %127 : i1
    %129 = arith.andi %128, %125 : i1
    %130 = arith.addi %124, %123 : i32
    %131 = arith.select %129, %130, %124 : i32
    %c0_i32_70 = arith.constant 0 : i32
    %132 = arith.cmpi eq, %131, %c0_i32_70 : i32
    %133 = arith.extui %132 : i1 to i32
    %c0_i32_71 = arith.constant 0 : i32
    %134 = arith.cmpi ne, %133, %c0_i32_71 : i32
    scf.if %134 {
      %c8_i32_106 = arith.constant 8 : i32
      %185 = arith.cmpi slt, %arg0, %c8_i32_106 : i32
      %c0_107 = arith.constant 0 : index
      %c0_108 = arith.constant 0 : index
      %c0_109 = arith.constant 0 : index
      %186 = vector.load %arg3[%c0_107, %c0_108, %c0_109] : memref<2x8x8xf32, #tpu.memory_space<vmem>>, vector<1x8x8xf32>
      %187 = vector.shape_cast %186 : vector<1x8x8xf32> to vector<8x8xf32>
      %c1_110 = arith.constant 1 : index
      %c0_111 = arith.constant 0 : index
      %c0_112 = arith.constant 0 : index
      %188 = vector.load %arg3[%c1_110, %c0_111, %c0_112] : memref<2x8x8xf32, #tpu.memory_space<vmem>>, vector<1x8x8xf32>
      %189 = vector.shape_cast %188 : vector<1x8x8xf32> to vector<8x8xf32>
      %190 = arith.select %185, %187, %189 : vector<8x8xf32>
      %c0_113 = arith.constant 0 : index
      %c0_114 = arith.constant 0 : index
      %c0_115 = arith.constant 0 : index
      %191 = vector.load %arg4[%c0_113, %c0_114, %c0_115] : memref<2x8x1xf32, #tpu.memory_space<vmem>>, vector<1x8x1xf32>
      %192 = vector.shape_cast %191 : vector<1x8x1xf32> to vector<8x1xf32>
      %c1_116 = arith.constant 1 : index
      %c0_117 = arith.constant 0 : index
      %c0_118 = arith.constant 0 : index
      %193 = vector.load %arg4[%c1_116, %c0_117, %c0_118] : memref<2x8x1xf32, #tpu.memory_space<vmem>>, vector<1x8x1xf32>
      %194 = vector.shape_cast %193 : vector<1x8x1xf32> to vector<8x1xf32>
      %195 = arith.select %185, %192, %194 : vector<8x1xf32>
      %c0_119 = arith.constant 0 : index
      %c0_120 = arith.constant 0 : index
      %c0_121 = arith.constant 0 : index
      %196 = vector.load %arg5[%c0_119, %c0_120, %c0_121] : memref<2x8x8xf32, #tpu.memory_space<vmem>>, vector<1x8x8xf32>
      %197 = vector.shape_cast %196 : vector<1x8x8xf32> to vector<8x8xf32>
      %c1_122 = arith.constant 1 : index
      %c0_123 = arith.constant 0 : index
      %c0_124 = arith.constant 0 : index
      %198 = vector.load %arg5[%c1_122, %c0_123, %c0_124] : memref<2x8x8xf32, #tpu.memory_space<vmem>>, vector<1x8x8xf32>
      %199 = vector.shape_cast %198 : vector<1x8x8xf32> to vector<8x8xf32>
      %200 = arith.select %185, %197, %199 : vector<8x8xf32>
      %c0_125 = arith.constant 0 : index
      %c0_126 = arith.constant 0 : index
      %c0_127 = arith.constant 0 : index
      %201 = vector.load %arg6[%c0_125, %c0_126, %c0_127] : memref<2x8x1xf32, #tpu.memory_space<vmem>>, vector<1x8x1xf32>
      %202 = vector.shape_cast %201 : vector<1x8x1xf32> to vector<8x1xf32>
      %c1_128 = arith.constant 1 : index
      %c0_129 = arith.constant 0 : index
      %c0_130 = arith.constant 0 : index
      %203 = vector.load %arg6[%c1_128, %c0_129, %c0_130] : memref<2x8x1xf32, #tpu.memory_space<vmem>>, vector<1x8x1xf32>
      %204 = vector.shape_cast %203 : vector<1x8x1xf32> to vector<8x1xf32>
      %205 = arith.select %185, %202, %204 : vector<8x1xf32>
      %c0_131 = arith.constant 0 : index
      %c0_132 = arith.constant 0 : index
      %c0_133 = arith.constant 0 : index
      %206 = vector.load %arg10[%c0_131, %c0_132, %c0_133] : memref<2x8x64xf32, #tpu.memory_space<vmem>>, vector<1x8x64xf32>
      %207 = vector.shape_cast %206 : vector<1x8x64xf32> to vector<8x64xf32>
      %c1_134 = arith.constant 1 : index
      %c0_135 = arith.constant 0 : index
      %c0_136 = arith.constant 0 : index
      %208 = vector.load %arg10[%c1_134, %c0_135, %c0_136] : memref<2x8x64xf32, #tpu.memory_space<vmem>>, vector<1x8x64xf32>
      %209 = vector.shape_cast %208 : vector<1x8x64xf32> to vector<8x64xf32>
      %cst_137 = arith.constant dense<0.000000e+00> : vector<8x64xf32>
      %210 = tpu.matmul %190, %207, %cst_137 {dimension_numbers = #tpu.dot_dimension_numbers<[1], [0], [0], [1], [0, 0, 1, 1], [], []>} : vector<8x8xf32>, vector<8x64xf32>, vector<8x64xf32> -> vector<8x64xf32>
      %211 = vector.broadcast %195 : vector<8x1xf32> to vector<8x64xf32>
      %212 = arith.addf %210, %211 : vector<8x64xf32>
      %cst_138 = arith.constant 0.000000e+00 : f32
      %213 = vector.broadcast %cst_138 : f32 to vector<8x64xf32>
      %214 = arith.maximumf %212, %213 : vector<8x64xf32>
      %215 = arith.addf %207, %214 : vector<8x64xf32>
      %cst_139 = arith.constant dense<0.000000e+00> : vector<8x64xf32>
      %216 = tpu.matmul %190, %209, %cst_139 {dimension_numbers = #tpu.dot_dimension_numbers<[1], [0], [0], [1], [0, 0, 1, 1], [], []>} : vector<8x8xf32>, vector<8x64xf32>, vector<8x64xf32> -> vector<8x64xf32>
      %217 = vector.broadcast %195 : vector<8x1xf32> to vector<8x64xf32>
      %218 = arith.addf %216, %217 : vector<8x64xf32>
      %cst_140 = arith.constant 0.000000e+00 : f32
      %219 = vector.broadcast %cst_140 : f32 to vector<8x64xf32>
      %220 = arith.maximumf %218, %219 : vector<8x64xf32>
      %221 = arith.addf %209, %220 : vector<8x64xf32>
      %cst_141 = arith.constant dense<0.000000e+00> : vector<64xf32>
      %222 = vector.multi_reduction <add>, %215, %cst_141 [0] : vector<8x64xf32> to vector<64xf32>
      %223 = vector.shape_cast %222 : vector<64xf32> to vector<1x64xf32>
      %cst_142 = arith.constant 0.000000e+00 : f32
      %224 = vector.broadcast %cst_142 : f32 to vector<1x64xf32>
      %225 = arith.addf %224, %223 : vector<1x64xf32>
      %cst_143 = arith.constant dense<0.000000e+00> : vector<64xf32>
      %226 = vector.multi_reduction <add>, %221, %cst_143 [0] : vector<8x64xf32> to vector<64xf32>
      %227 = vector.shape_cast %226 : vector<64xf32> to vector<1x64xf32>
      %228 = arith.addf %225, %227 : vector<1x64xf32>
      %cst_144 = arith.constant 1.600000e+01 : f32
      %229 = vector.broadcast %cst_144 : f32 to vector<1x64xf32>
      %230 = arith.divf %228, %229 : vector<1x64xf32>
      %231 = vector.broadcast %230 : vector<1x64xf32> to vector<8x64xf32>
      %232 = arith.subf %215, %231 : vector<8x64xf32>
      %233 = arith.mulf %232, %232 : vector<8x64xf32>
      %cst_145 = arith.constant dense<0.000000e+00> : vector<64xf32>
      %234 = vector.multi_reduction <add>, %233, %cst_145 [0] : vector<8x64xf32> to vector<64xf32>
      %235 = vector.shape_cast %234 : vector<64xf32> to vector<1x64xf32>
      %cst_146 = arith.constant 0.000000e+00 : f32
      %236 = vector.broadcast %cst_146 : f32 to vector<1x64xf32>
      %237 = arith.addf %236, %235 : vector<1x64xf32>
      %238 = vector.broadcast %230 : vector<1x64xf32> to vector<8x64xf32>
      %239 = arith.subf %221, %238 : vector<8x64xf32>
      %240 = arith.mulf %239, %239 : vector<8x64xf32>
      %cst_147 = arith.constant dense<0.000000e+00> : vector<64xf32>
      %241 = vector.multi_reduction <add>, %240, %cst_147 [0] : vector<8x64xf32> to vector<64xf32>
      %242 = vector.shape_cast %241 : vector<64xf32> to vector<1x64xf32>
      %243 = arith.addf %237, %242 : vector<1x64xf32>
      %cst_148 = arith.constant 1.600000e+01 : f32
      %244 = vector.broadcast %cst_148 : f32 to vector<1x64xf32>
      %245 = arith.divf %243, %244 : vector<1x64xf32>
      %cst_149 = arith.constant 9.99999974E-6 : f32
      %246 = vector.broadcast %cst_149 : f32 to vector<1x64xf32>
      %247 = arith.addf %245, %246 : vector<1x64xf32>
      %248 = math.rsqrt %247 : vector<1x64xf32>
      %249 = vector.broadcast %230 : vector<1x64xf32> to vector<8x64xf32>
      %250 = arith.subf %215, %249 : vector<8x64xf32>
      %251 = vector.broadcast %248 : vector<1x64xf32> to vector<8x64xf32>
      %252 = arith.mulf %250, %251 : vector<8x64xf32>
      %c0_150 = arith.constant 0 : index
      %c0_151 = arith.constant 0 : index
      %c0_152 = arith.constant 0 : index
      %253 = vector.load %arg10[%c0_150, %c0_151, %c0_152] : memref<2x8x64xf32, #tpu.memory_space<vmem>>, vector<1x8x64xf32>
      %254 = vector.shape_cast %253 : vector<1x8x64xf32> to vector<8x64xf32>
      %255 = vector.shape_cast %252 : vector<8x64xf32> to vector<1x8x64xf32>
      tpu.vector_store %arg10[%c0_150, %c0_151, %c0_152], %255 {strides = array<i32>} : memref<2x8x64xf32, #tpu.memory_space<vmem>>, vector<1x8x64xf32>,
      %256 = vector.broadcast %230 : vector<1x64xf32> to vector<8x64xf32>
      %257 = arith.subf %221, %256 : vector<8x64xf32>
      %258 = vector.broadcast %248 : vector<1x64xf32> to vector<8x64xf32>
      %259 = arith.mulf %257, %258 : vector<8x64xf32>
      %c1_153 = arith.constant 1 : index
      %c0_154 = arith.constant 0 : index
      %c0_155 = arith.constant 0 : index
      %260 = vector.load %arg10[%c1_153, %c0_154, %c0_155] : memref<2x8x64xf32, #tpu.memory_space<vmem>>, vector<1x8x64xf32>
      %261 = vector.shape_cast %260 : vector<1x8x64xf32> to vector<8x64xf32>
      %262 = vector.shape_cast %259 : vector<8x64xf32> to vector<1x8x64xf32>
      tpu.vector_store %arg10[%c1_153, %c0_154, %c0_155], %262 {strides = array<i32>} : memref<2x8x64xf32, #tpu.memory_space<vmem>>, vector<1x8x64xf32>,
      %c0_156 = arith.constant 0 : index
      %c0_157 = arith.constant 0 : index
      %c0_158 = arith.constant 0 : index
      %263 = vector.load %arg11[%c0_156, %c0_157, %c0_158] : memref<2x8x128xf32, #tpu.memory_space<vmem>>, vector<1x8x128xf32>
      %264 = vector.shape_cast %263 : vector<1x8x128xf32> to vector<8x128xf32>
      %c1_159 = arith.constant 1 : index
      %c0_160 = arith.constant 0 : index
      %c0_161 = arith.constant 0 : index
      %265 = vector.load %arg11[%c1_159, %c0_160, %c0_161] : memref<2x8x128xf32, #tpu.memory_space<vmem>>, vector<1x8x128xf32>
      %266 = vector.shape_cast %265 : vector<1x8x128xf32> to vector<8x128xf32>
      %cst_162 = arith.constant dense<0.000000e+00> : vector<8x128xf32>
      %267 = tpu.matmul %200, %264, %cst_162 {dimension_numbers = #tpu.dot_dimension_numbers<[1], [0], [0], [1], [0, 0, 1, 1], [], []>} : vector<8x8xf32>, vector<8x128xf32>, vector<8x128xf32> -> vector<8x128xf32>
      %268 = vector.broadcast %205 : vector<8x1xf32> to vector<8x128xf32>
      %269 = arith.addf %267, %268 : vector<8x128xf32>
      %cst_163 = arith.constant 0.000000e+00 : f32
      %270 = vector.broadcast %cst_163 : f32 to vector<8x128xf32>
      %271 = arith.maximumf %269, %270 : vector<8x128xf32>
      %272 = arith.addf %264, %271 : vector<8x128xf32>
      %cst_164 = arith.constant dense<0.000000e+00> : vector<8x128xf32>
      %273 = tpu.matmul %200, %266, %cst_164 {dimension_numbers = #tpu.dot_dimension_numbers<[1], [0], [0], [1], [0, 0, 1, 1], [], []>} : vector<8x8xf32>, vector<8x128xf32>, vector<8x128xf32> -> vector<8x128xf32>
      %274 = vector.broadcast %205 : vector<8x1xf32> to vector<8x128xf32>
      %275 = arith.addf %273, %274 : vector<8x128xf32>
      %cst_165 = arith.constant 0.000000e+00 : f32
      %276 = vector.broadcast %cst_165 : f32 to vector<8x128xf32>
      %277 = arith.maximumf %275, %276 : vector<8x128xf32>
      %278 = arith.addf %266, %277 : vector<8x128xf32>
      %cst_166 = arith.constant dense<0.000000e+00> : vector<128xf32>
      %279 = vector.multi_reduction <add>, %272, %cst_166 [0] : vector<8x128xf32> to vector<128xf32>
      %280 = vector.shape_cast %279 : vector<128xf32> to vector<1x128xf32>
      %cst_167 = arith.constant 0.000000e+00 : f32
      %281 = vector.broadcast %cst_167 : f32 to vector<1x128xf32>
      %282 = arith.addf %281, %280 : vector<1x128xf32>
      %cst_168 = arith.constant dense<0.000000e+00> : vector<128xf32>
      %283 = vector.multi_reduction <add>, %278, %cst_168 [0] : vector<8x128xf32> to vector<128xf32>
      %284 = vector.shape_cast %283 : vector<128xf32> to vector<1x128xf32>
      %285 = arith.addf %282, %284 : vector<1x128xf32>
      %cst_169 = arith.constant 1.600000e+01 : f32
      %286 = vector.broadcast %cst_169 : f32 to vector<1x128xf32>
      %287 = arith.divf %285, %286 : vector<1x128xf32>
      %288 = vector.broadcast %287 : vector<1x128xf32> to vector<8x128xf32>
      %289 = arith.subf %272, %288 : vector<8x128xf32>
      %290 = arith.mulf %289, %289 : vector<8x128xf32>
      %cst_170 = arith.constant dense<0.000000e+00> : vector<128xf32>
      %291 = vector.multi_reduction <add>, %290, %cst_170 [0] : vector<8x128xf32> to vector<128xf32>
      %292 = vector.shape_cast %291 : vector<128xf32> to vector<1x128xf32>
      %cst_171 = arith.constant 0.000000e+00 : f32
      %293 = vector.broadcast %cst_171 : f32 to vector<1x128xf32>
      %294 = arith.addf %293, %292 : vector<1x128xf32>
      %295 = vector.broadcast %287 : vector<1x128xf32> to vector<8x128xf32>
      %296 = arith.subf %278, %295 : vector<8x128xf32>
      %297 = arith.mulf %296, %296 : vector<8x128xf32>
      %cst_172 = arith.constant dense<0.000000e+00> : vector<128xf32>
      %298 = vector.multi_reduction <add>, %297, %cst_172 [0] : vector<8x128xf32> to vector<128xf32>
      %299 = vector.shape_cast %298 : vector<128xf32> to vector<1x128xf32>
      %300 = arith.addf %294, %299 : vector<1x128xf32>
      %cst_173 = arith.constant 1.600000e+01 : f32
      %301 = vector.broadcast %cst_173 : f32 to vector<1x128xf32>
      %302 = arith.divf %300, %301 : vector<1x128xf32>
      %cst_174 = arith.constant 9.99999974E-6 : f32
      %303 = vector.broadcast %cst_174 : f32 to vector<1x128xf32>
      %304 = arith.addf %302, %303 : vector<1x128xf32>
      %305 = math.rsqrt %304 : vector<1x128xf32>
      %306 = vector.broadcast %287 : vector<1x128xf32> to vector<8x128xf32>
      %307 = arith.subf %272, %306 : vector<8x128xf32>
      %308 = vector.broadcast %305 : vector<1x128xf32> to vector<8x128xf32>
      %309 = arith.mulf %307, %308 : vector<8x128xf32>
      %c0_175 = arith.constant 0 : index
      %c0_176 = arith.constant 0 : index
      %c0_177 = arith.constant 0 : index
      %310 = vector.load %arg11[%c0_175, %c0_176, %c0_177] : memref<2x8x128xf32, #tpu.memory_space<vmem>>, vector<1x8x128xf32>
      %311 = vector.shape_cast %310 : vector<1x8x128xf32> to vector<8x128xf32>
      %312 = vector.shape_cast %309 : vector<8x128xf32> to vector<1x8x128xf32>
      tpu.vector_store %arg11[%c0_175, %c0_176, %c0_177], %312 {strides = array<i32>} : memref<2x8x128xf32, #tpu.memory_space<vmem>>, vector<1x8x128xf32>,
      %313 = vector.broadcast %287 : vector<1x128xf32> to vector<8x128xf32>
      %314 = arith.subf %278, %313 : vector<8x128xf32>
      %315 = vector.broadcast %305 : vector<1x128xf32> to vector<8x128xf32>
      %316 = arith.mulf %314, %315 : vector<8x128xf32>
      %c1_178 = arith.constant 1 : index
      %c0_179 = arith.constant 0 : index
      %c0_180 = arith.constant 0 : index
      %317 = vector.load %arg11[%c1_178, %c0_179, %c0_180] : memref<2x8x128xf32, #tpu.memory_space<vmem>>, vector<1x8x128xf32>
      %318 = vector.shape_cast %317 : vector<1x8x128xf32> to vector<8x128xf32>
      %319 = vector.shape_cast %316 : vector<8x128xf32> to vector<1x8x128xf32>
      tpu.vector_store %arg11[%c1_178, %c0_179, %c0_180], %319 {strides = array<i32>} : memref<2x8x128xf32, #tpu.memory_space<vmem>>, vector<1x8x128xf32>,
    } else {
    }
    %c0_72 = arith.constant 0 : index
    %c0_73 = arith.constant 0 : index
    %c0_74 = arith.constant 0 : index
    %135 = vector.load %arg12[%c0_72, %c0_73, %c0_74] : memref<2x64x128xf32, #tpu.memory_space<vmem>>, vector<1x64x128xf32>
    %136 = vector.shape_cast %135 : vector<1x64x128xf32> to vector<64x128xf32>
    %c0_75 = arith.constant 0 : index
    %c0_76 = arith.constant 0 : index
    %c0_77 = arith.constant 0 : index
    %137 = vector.load %arg11[%c0_75, %c0_76, %c0_77] : memref<2x8x128xf32, #tpu.memory_space<vmem>>, vector<1x8x128xf32>
    %138 = vector.shape_cast %137 : vector<1x8x128xf32> to vector<8x128xf32>
    %c0_78 = arith.constant 0 : index
    %c0_79 = arith.constant 0 : index
    %c0_80 = arith.constant 0 : index
    %139 = vector.load %arg10[%c0_78, %c0_79, %c0_80] : memref<2x8x64xf32, #tpu.memory_space<vmem>>, vector<1x8x64xf32>
    %140 = vector.shape_cast %139 : vector<1x8x64xf32> to vector<8x64xf32>
    %cst_81 = arith.constant dense<0.000000e+00> : vector<64xf32>
    %141 = vector.multi_reduction <add>, %136, %cst_81 [1] : vector<64x128xf32> to vector<64xf32>
    %142 = vector.shape_cast %141 : vector<64xf32> to vector<64x1xf32>
    %143 = vector.broadcast %142 : vector<64x1xf32> to vector<64x64xf32>
    %144 = arith.mulf %143, %5 : vector<64x64xf32>
    %cst_82 = arith.constant dense<0.000000e+00> : vector<64xf32>
    %145 = vector.multi_reduction <add>, %144, %cst_82 [0] : vector<64x64xf32> to vector<64xf32>
    %146 = vector.shape_cast %145 : vector<64xf32> to vector<1x64xf32>
    %cst_83 = arith.constant dense<0.000000e+00> : vector<8x64xf32>
    %147 = tpu.matmul %138, %136, %cst_83 {dimension_numbers = #tpu.dot_dimension_numbers<[1], [1], [0], [0], [0, 0, 1, 0], [], []>} : vector<8x128xf32>, vector<64x128xf32>, vector<8x64xf32> -> vector<8x64xf32>
    %148 = vector.broadcast %146 : vector<1x64xf32> to vector<8x64xf32>
    %149 = arith.divf %147, %148 : vector<8x64xf32>
    %150 = arith.subf %140, %149 : vector<8x64xf32>
    %cst_84 = arith.constant 5.000000e-02 : f32
    %151 = vector.broadcast %cst_84 : f32 to vector<8x64xf32>
    %152 = arith.mulf %151, %150 : vector<8x64xf32>
    %153 = arith.subf %140, %152 : vector<8x64xf32>
    %c0_85 = arith.constant 0 : index
    %c0_86 = arith.constant 0 : index
    %c0_87 = arith.constant 0 : index
    %154 = vector.load %arg10[%c0_85, %c0_86, %c0_87] : memref<2x8x64xf32, #tpu.memory_space<vmem>>, vector<1x8x64xf32>
    %155 = vector.shape_cast %154 : vector<1x8x64xf32> to vector<8x64xf32>
    %156 = vector.shape_cast %153 : vector<8x64xf32> to vector<1x8x64xf32>
    tpu.vector_store %arg10[%c0_85, %c0_86, %c0_87], %156 {strides = array<i32>} : memref<2x8x64xf32, #tpu.memory_space<vmem>>, vector<1x8x64xf32>,
    %c1_88 = arith.constant 1 : index
    %c0_89 = arith.constant 0 : index
    %c0_90 = arith.constant 0 : index
    %157 = vector.load %arg12[%c1_88, %c0_89, %c0_90] : memref<2x64x128xf32, #tpu.memory_space<vmem>>, vector<1x64x128xf32>
    %158 = vector.shape_cast %157 : vector<1x64x128xf32> to vector<64x128xf32>
    %c1_91 = arith.constant 1 : index
    %c0_92 = arith.constant 0 : index
    %c0_93 = arith.constant 0 : index
    %159 = vector.load %arg11[%c1_91, %c0_92, %c0_93] : memref<2x8x128xf32, #tpu.memory_space<vmem>>, vector<1x8x128xf32>
    %160 = vector.shape_cast %159 : vector<1x8x128xf32> to vector<8x128xf32>
    %c1_94 = arith.constant 1 : index
    %c0_95 = arith.constant 0 : index
    %c0_96 = arith.constant 0 : index
    %161 = vector.load %arg10[%c1_94, %c0_95, %c0_96] : memref<2x8x64xf32, #tpu.memory_space<vmem>>, vector<1x8x64xf32>
    %162 = vector.shape_cast %161 : vector<1x8x64xf32> to vector<8x64xf32>
    %cst_97 = arith.constant dense<0.000000e+00> : vector<64xf32>
    %163 = vector.multi_reduction <add>, %158, %cst_97 [1] : vector<64x128xf32> to vector<64xf32>
    %164 = vector.shape_cast %163 : vector<64xf32> to vector<64x1xf32>
    %165 = vector.broadcast %164 : vector<64x1xf32> to vector<64x64xf32>
    %166 = arith.mulf %165, %5 : vector<64x64xf32>
    %cst_98 = arith.constant dense<0.000000e+00> : vector<64xf32>
    %167 = vector.multi_reduction <add>, %166, %cst_98 [0] : vector<64x64xf32> to vector<64xf32>
    %168 = vector.shape_cast %167 : vector<64xf32> to vector<1x64xf32>
    %cst_99 = arith.constant dense<0.000000e+00> : vector<8x64xf32>
    %169 = tpu.matmul %160, %158, %cst_99 {dimension_numbers = #tpu.dot_dimension_numbers<[1], [1], [0], [0], [0, 0, 1, 0], [], []>} : vector<8x128xf32>, vector<64x128xf32>, vector<8x64xf32> -> vector<8x64xf32>
    %170 = vector.broadcast %168 : vector<1x64xf32> to vector<8x64xf32>
    %171 = arith.divf %169, %170 : vector<8x64xf32>
    %172 = arith.subf %162, %171 : vector<8x64xf32>
    %cst_100 = arith.constant 5.000000e-02 : f32
    %173 = vector.broadcast %cst_100 : f32 to vector<8x64xf32>
    %174 = arith.mulf %173, %172 : vector<8x64xf32>
    %175 = arith.subf %162, %174 : vector<8x64xf32>
    %c1_101 = arith.constant 1 : index
    %c0_102 = arith.constant 0 : index
    %c0_103 = arith.constant 0 : index
    %176 = vector.load %arg10[%c1_101, %c0_102, %c0_103] : memref<2x8x64xf32, #tpu.memory_space<vmem>>, vector<1x8x64xf32>
    %177 = vector.shape_cast %176 : vector<1x8x64xf32> to vector<8x64xf32>
    %178 = vector.shape_cast %175 : vector<8x64xf32> to vector<1x8x64xf32>
    tpu.vector_store %arg10[%c1_101, %c0_102, %c0_103], %178 {strides = array<i32>} : memref<2x8x64xf32, #tpu.memory_space<vmem>>, vector<1x8x64xf32>,
    %c7_i32 = arith.constant 7 : i32
    %179 = arith.cmpi eq, %arg0, %c7_i32 : i32
    %180 = arith.extui %179 : i1 to i32
    %c0_i32_104 = arith.constant 0 : i32
    %181 = arith.cmpi ne, %180, %c0_i32_104 : i32
    scf.if %181 {
      %c0_106 = arith.constant 0 : index
      %c0_107 = arith.constant 0 : index
      %c0_108 = arith.constant 0 : index
      %185 = vector.load %arg10[%c0_106, %c0_107, %c0_108] : memref<2x8x64xf32, #tpu.memory_space<vmem>>, vector<1x8x64xf32>
      %186 = vector.shape_cast %185 : vector<1x8x64xf32> to vector<8x64xf32>
      %cst_109 = arith.constant 0.999994993 : f32
      %187 = vector.broadcast %cst_109 : f32 to vector<8x64xf32>
      %188 = arith.mulf %186, %187 : vector<8x64xf32>
      %cst_110 = arith.constant 0.000000e+00 : f32
      %189 = vector.broadcast %cst_110 : f32 to vector<8x64xf32>
      %190 = arith.maximumf %188, %189 : vector<8x64xf32>
      %c0_111 = arith.constant 0 : index
      %c0_112 = arith.constant 0 : index
      %c0_113 = arith.constant 0 : index
      %191 = vector.load %arg1[%c0_111, %c0_112, %c0_113] : memref<2x8x64xf32, #tpu.memory_space<vmem>>, vector<1x8x64xf32>
      %192 = vector.shape_cast %191 : vector<1x8x64xf32> to vector<8x64xf32>
      %193 = arith.addf %190, %192 : vector<8x64xf32>
      %cst_114 = arith.constant 0.000000e+00 : f32
      %194 = vector.broadcast %cst_114 : f32 to vector<8x64xf32>
      %c0_115 = arith.constant 0 : index
      %c0_116 = arith.constant 0 : index
      %c0_117 = arith.constant 0 : index
      %195 = vector.load %arg7[%c0_115, %c0_116, %c0_117] : memref<9x8x8xf32, #tpu.memory_space<vmem>>, vector<1x8x8xf32>
      %196 = vector.shape_cast %195 : vector<1x8x8xf32> to vector<8x8xf32>
      %cst_118 = arith.constant dense<0.000000e+00> : vector<8x64xf32>
      %197 = tpu.matmul %196, %193, %cst_118 {dimension_numbers = #tpu.dot_dimension_numbers<[1], [0], [0], [1], [0, 0, 1, 1], [], []>} : vector<8x8xf32>, vector<8x64xf32>, vector<8x64xf32> -> vector<8x64xf32>
      %c0_119 = arith.constant 0 : index
      %c0_120 = arith.constant 0 : index
      %c0_121 = arith.constant 0 : index
      %198 = vector.load %arg8[%c0_119, %c0_120, %c0_121] : memref<9x64x64xf32, #tpu.memory_space<vmem>>, vector<1x64x64xf32>
      %199 = vector.shape_cast %198 : vector<1x64x64xf32> to vector<64x64xf32>
      %cst_122 = arith.constant dense<0.000000e+00> : vector<8x64xf32>
      %200 = tpu.matmul %197, %199, %cst_122 {dimension_numbers = #tpu.dot_dimension_numbers<[1], [0], [0], [1], [0, 0, 1, 1], [], []>} : vector<8x64xf32>, vector<64x64xf32>, vector<8x64xf32> -> vector<8x64xf32>
      %201 = arith.addf %194, %200 : vector<8x64xf32>
      %c1_123 = arith.constant 1 : index
      %c0_124 = arith.constant 0 : index
      %c0_125 = arith.constant 0 : index
      %202 = vector.load %arg7[%c1_123, %c0_124, %c0_125] : memref<9x8x8xf32, #tpu.memory_space<vmem>>, vector<1x8x8xf32>
      %203 = vector.shape_cast %202 : vector<1x8x8xf32> to vector<8x8xf32>
      %cst_126 = arith.constant dense<0.000000e+00> : vector<8x64xf32>
      %204 = tpu.matmul %203, %193, %cst_126 {dimension_numbers = #tpu.dot_dimension_numbers<[1], [0], [0], [1], [0, 0, 1, 1], [], []>} : vector<8x8xf32>, vector<8x64xf32>, vector<8x64xf32> -> vector<8x64xf32>
      %c1_127 = arith.constant 1 : index
      %c0_128 = arith.constant 0 : index
      %c0_129 = arith.constant 0 : index
      %205 = vector.load %arg8[%c1_127, %c0_128, %c0_129] : memref<9x64x64xf32, #tpu.memory_space<vmem>>, vector<1x64x64xf32>
      %206 = vector.shape_cast %205 : vector<1x64x64xf32> to vector<64x64xf32>
      %cst_130 = arith.constant dense<0.000000e+00> : vector<8x64xf32>
      %207 = tpu.matmul %204, %206, %cst_130 {dimension_numbers = #tpu.dot_dimension_numbers<[1], [0], [0], [1], [0, 0, 1, 1], [], []>} : vector<8x64xf32>, vector<64x64xf32>, vector<8x64xf32> -> vector<8x64xf32>
      %208 = arith.addf %201, %207 : vector<8x64xf32>
      %c2 = arith.constant 2 : index
      %c0_131 = arith.constant 0 : index
      %c0_132 = arith.constant 0 : index
      %209 = vector.load %arg7[%c2, %c0_131, %c0_132] : memref<9x8x8xf32, #tpu.memory_space<vmem>>, vector<1x8x8xf32>
      %210 = vector.shape_cast %209 : vector<1x8x8xf32> to vector<8x8xf32>
      %cst_133 = arith.constant dense<0.000000e+00> : vector<8x64xf32>
      %211 = tpu.matmul %210, %193, %cst_133 {dimension_numbers = #tpu.dot_dimension_numbers<[1], [0], [0], [1], [0, 0, 1, 1], [], []>} : vector<8x8xf32>, vector<8x64xf32>, vector<8x64xf32> -> vector<8x64xf32>
      %c2_134 = arith.constant 2 : index
      %c0_135 = arith.constant 0 : index
      %c0_136 = arith.constant 0 : index
      %212 = vector.load %arg8[%c2_134, %c0_135, %c0_136] : memref<9x64x64xf32, #tpu.memory_space<vmem>>, vector<1x64x64xf32>
      %213 = vector.shape_cast %212 : vector<1x64x64xf32> to vector<64x64xf32>
      %cst_137 = arith.constant dense<0.000000e+00> : vector<8x64xf32>
      %214 = tpu.matmul %211, %213, %cst_137 {dimension_numbers = #tpu.dot_dimension_numbers<[1], [0], [0], [1], [0, 0, 1, 1], [], []>} : vector<8x64xf32>, vector<64x64xf32>, vector<8x64xf32> -> vector<8x64xf32>
      %215 = arith.addf %208, %214 : vector<8x64xf32>
      %c3 = arith.constant 3 : index
      %c0_138 = arith.constant 0 : index
      %c0_139 = arith.constant 0 : index
      %216 = vector.load %arg7[%c3, %c0_138, %c0_139] : memref<9x8x8xf32, #tpu.memory_space<vmem>>, vector<1x8x8xf32>
      %217 = vector.shape_cast %216 : vector<1x8x8xf32> to vector<8x8xf32>
      %cst_140 = arith.constant dense<0.000000e+00> : vector<8x64xf32>
      %218 = tpu.matmul %217, %193, %cst_140 {dimension_numbers = #tpu.dot_dimension_numbers<[1], [0], [0], [1], [0, 0, 1, 1], [], []>} : vector<8x8xf32>, vector<8x64xf32>, vector<8x64xf32> -> vector<8x64xf32>
      %c3_141 = arith.constant 3 : index
      %c0_142 = arith.constant 0 : index
      %c0_143 = arith.constant 0 : index
      %219 = vector.load %arg8[%c3_141, %c0_142, %c0_143] : memref<9x64x64xf32, #tpu.memory_space<vmem>>, vector<1x64x64xf32>
      %220 = vector.shape_cast %219 : vector<1x64x64xf32> to vector<64x64xf32>
      %cst_144 = arith.constant dense<0.000000e+00> : vector<8x64xf32>
      %221 = tpu.matmul %218, %220, %cst_144 {dimension_numbers = #tpu.dot_dimension_numbers<[1], [0], [0], [1], [0, 0, 1, 1], [], []>} : vector<8x64xf32>, vector<64x64xf32>, vector<8x64xf32> -> vector<8x64xf32>
      %222 = arith.addf %215, %221 : vector<8x64xf32>
      %c4 = arith.constant 4 : index
      %c0_145 = arith.constant 0 : index
      %c0_146 = arith.constant 0 : index
      %223 = vector.load %arg7[%c4, %c0_145, %c0_146] : memref<9x8x8xf32, #tpu.memory_space<vmem>>, vector<1x8x8xf32>
      %224 = vector.shape_cast %223 : vector<1x8x8xf32> to vector<8x8xf32>
      %cst_147 = arith.constant dense<0.000000e+00> : vector<8x64xf32>
      %225 = tpu.matmul %224, %193, %cst_147 {dimension_numbers = #tpu.dot_dimension_numbers<[1], [0], [0], [1], [0, 0, 1, 1], [], []>} : vector<8x8xf32>, vector<8x64xf32>, vector<8x64xf32> -> vector<8x64xf32>
      %c4_148 = arith.constant 4 : index
      %c0_149 = arith.constant 0 : index
      %c0_150 = arith.constant 0 : index
      %226 = vector.load %arg8[%c4_148, %c0_149, %c0_150] : memref<9x64x64xf32, #tpu.memory_space<vmem>>, vector<1x64x64xf32>
      %227 = vector.shape_cast %226 : vector<1x64x64xf32> to vector<64x64xf32>
      %cst_151 = arith.constant dense<0.000000e+00> : vector<8x64xf32>
      %228 = tpu.matmul %225, %227, %cst_151 {dimension_numbers = #tpu.dot_dimension_numbers<[1], [0], [0], [1], [0, 0, 1, 1], [], []>} : vector<8x64xf32>, vector<64x64xf32>, vector<8x64xf32> -> vector<8x64xf32>
      %229 = arith.addf %222, %228 : vector<8x64xf32>
      %c5 = arith.constant 5 : index
      %c0_152 = arith.constant 0 : index
      %c0_153 = arith.constant 0 : index
      %230 = vector.load %arg7[%c5, %c0_152, %c0_153] : memref<9x8x8xf32, #tpu.memory_space<vmem>>, vector<1x8x8xf32>
      %231 = vector.shape_cast %230 : vector<1x8x8xf32> to vector<8x8xf32>
      %cst_154 = arith.constant dense<0.000000e+00> : vector<8x64xf32>
      %232 = tpu.matmul %231, %193, %cst_154 {dimension_numbers = #tpu.dot_dimension_numbers<[1], [0], [0], [1], [0, 0, 1, 1], [], []>} : vector<8x8xf32>, vector<8x64xf32>, vector<8x64xf32> -> vector<8x64xf32>
      %c5_155 = arith.constant 5 : index
      %c0_156 = arith.constant 0 : index
      %c0_157 = arith.constant 0 : index
      %233 = vector.load %arg8[%c5_155, %c0_156, %c0_157] : memref<9x64x64xf32, #tpu.memory_space<vmem>>, vector<1x64x64xf32>
      %234 = vector.shape_cast %233 : vector<1x64x64xf32> to vector<64x64xf32>
      %cst_158 = arith.constant dense<0.000000e+00> : vector<8x64xf32>
      %235 = tpu.matmul %232, %234, %cst_158 {dimension_numbers = #tpu.dot_dimension_numbers<[1], [0], [0], [1], [0, 0, 1, 1], [], []>} : vector<8x64xf32>, vector<64x64xf32>, vector<8x64xf32> -> vector<8x64xf32>
      %236 = arith.addf %229, %235 : vector<8x64xf32>
      %c6 = arith.constant 6 : index
      %c0_159 = arith.constant 0 : index
      %c0_160 = arith.constant 0 : index
      %237 = vector.load %arg7[%c6, %c0_159, %c0_160] : memref<9x8x8xf32, #tpu.memory_space<vmem>>, vector<1x8x8xf32>
      %238 = vector.shape_cast %237 : vector<1x8x8xf32> to vector<8x8xf32>
      %cst_161 = arith.constant dense<0.000000e+00> : vector<8x64xf32>
      %239 = tpu.matmul %238, %193, %cst_161 {dimension_numbers = #tpu.dot_dimension_numbers<[1], [0], [0], [1], [0, 0, 1, 1], [], []>} : vector<8x8xf32>, vector<8x64xf32>, vector<8x64xf32> -> vector<8x64xf32>
      %c6_162 = arith.constant 6 : index
      %c0_163 = arith.constant 0 : index
      %c0_164 = arith.constant 0 : index
      %240 = vector.load %arg8[%c6_162, %c0_163, %c0_164] : memref<9x64x64xf32, #tpu.memory_space<vmem>>, vector<1x64x64xf32>
      %241 = vector.shape_cast %240 : vector<1x64x64xf32> to vector<64x64xf32>
      %cst_165 = arith.constant dense<0.000000e+00> : vector<8x64xf32>
      %242 = tpu.matmul %239, %241, %cst_165 {dimension_numbers = #tpu.dot_dimension_numbers<[1], [0], [0], [1], [0, 0, 1, 1], [], []>} : vector<8x64xf32>, vector<64x64xf32>, vector<8x64xf32> -> vector<8x64xf32>
      %243 = arith.addf %236, %242 : vector<8x64xf32>
      %c7 = arith.constant 7 : index
      %c0_166 = arith.constant 0 : index
      %c0_167 = arith.constant 0 : index
      %244 = vector.load %arg7[%c7, %c0_166, %c0_167] : memref<9x8x8xf32, #tpu.memory_space<vmem>>, vector<1x8x8xf32>
      %245 = vector.shape_cast %244 : vector<1x8x8xf32> to vector<8x8xf32>
      %cst_168 = arith.constant dense<0.000000e+00> : vector<8x64xf32>
      %246 = tpu.matmul %245, %193, %cst_168 {dimension_numbers = #tpu.dot_dimension_numbers<[1], [0], [0], [1], [0, 0, 1, 1], [], []>} : vector<8x8xf32>, vector<8x64xf32>, vector<8x64xf32> -> vector<8x64xf32>
      %c7_169 = arith.constant 7 : index
      %c0_170 = arith.constant 0 : index
      %c0_171 = arith.constant 0 : index
      %247 = vector.load %arg8[%c7_169, %c0_170, %c0_171] : memref<9x64x64xf32, #tpu.memory_space<vmem>>, vector<1x64x64xf32>
      %248 = vector.shape_cast %247 : vector<1x64x64xf32> to vector<64x64xf32>
      %cst_172 = arith.constant dense<0.000000e+00> : vector<8x64xf32>
      %249 = tpu.matmul %246, %248, %cst_172 {dimension_numbers = #tpu.dot_dimension_numbers<[1], [0], [0], [1], [0, 0, 1, 1], [], []>} : vector<8x64xf32>, vector<64x64xf32>, vector<8x64xf32> -> vector<8x64xf32>
      %250 = arith.addf %243, %249 : vector<8x64xf32>
      %c8 = arith.constant 8 : index
      %c0_173 = arith.constant 0 : index
      %c0_174 = arith.constant 0 : index
      %251 = vector.load %arg7[%c8, %c0_173, %c0_174] : memref<9x8x8xf32, #tpu.memory_space<vmem>>, vector<1x8x8xf32>
      %252 = vector.shape_cast %251 : vector<1x8x8xf32> to vector<8x8xf32>
      %cst_175 = arith.constant dense<0.000000e+00> : vector<8x64xf32>
      %253 = tpu.matmul %252, %193, %cst_175 {dimension_numbers = #tpu.dot_dimension_numbers<[1], [0], [0], [1], [0, 0, 1, 1], [], []>} : vector<8x8xf32>, vector<8x64xf32>, vector<8x64xf32> -> vector<8x64xf32>
      %c8_176 = arith.constant 8 : index
      %c0_177 = arith.constant 0 : index
      %c0_178 = arith.constant 0 : index
      %254 = vector.load %arg8[%c8_176, %c0_177, %c0_178] : memref<9x64x64xf32, #tpu.memory_space<vmem>>, vector<1x64x64xf32>
      %255 = vector.shape_cast %254 : vector<1x64x64xf32> to vector<64x64xf32>
      %cst_179 = arith.constant dense<0.000000e+00> : vector<8x64xf32>
      %256 = tpu.matmul %253, %255, %cst_179 {dimension_numbers = #tpu.dot_dimension_numbers<[1], [0], [0], [1], [0, 0, 1, 1], [], []>} : vector<8x64xf32>, vector<64x64xf32>, vector<8x64xf32> -> vector<8x64xf32>
      %257 = arith.addf %250, %256 : vector<8x64xf32>
      %cst_180 = arith.constant 0.999994993 : f32
      %258 = vector.broadcast %cst_180 : f32 to vector<8x64xf32>
      %259 = arith.mulf %257, %258 : vector<8x64xf32>
      %cst_181 = arith.constant 0.000000e+00 : f32
      %260 = vector.broadcast %cst_181 : f32 to vector<8x64xf32>
      %261 = arith.maximumf %259, %260 : vector<8x64xf32>
      %c0_182 = arith.constant 0 : index
      %c0_183 = arith.constant 0 : index
      %c0_184 = arith.constant 0 : index
      %262 = vector.load %arg10[%c0_182, %c0_183, %c0_184] : memref<2x8x64xf32, #tpu.memory_space<vmem>>, vector<1x8x64xf32>
      %263 = vector.shape_cast %262 : vector<1x8x64xf32> to vector<8x64xf32>
      %264 = vector.shape_cast %261 : vector<8x64xf32> to vector<1x8x64xf32>
      tpu.vector_store %arg10[%c0_182, %c0_183, %c0_184], %264 {strides = array<i32>} : memref<2x8x64xf32, #tpu.memory_space<vmem>>, vector<1x8x64xf32>,
      %c0_185 = arith.constant 0 : index
      %c0_186 = arith.constant 0 : index
      %c0_187 = arith.constant 0 : index
      %265 = vector.load %arg14[%c0_185, %c0_186, %c0_187] : memref<2x8x64xf32, #tpu.memory_space<vmem>>, vector<1x8x64xf32>
      %266 = vector.shape_cast %265 : vector<1x8x64xf32> to vector<8x64xf32>
      %267 = vector.shape_cast %261 : vector<8x64xf32> to vector<1x8x64xf32>
      tpu.vector_store %arg14[%c0_185, %c0_186, %c0_187], %267 {strides = array<i32>} : memref<2x8x64xf32, #tpu.memory_space<vmem>>, vector<1x8x64xf32>,
      %c1_188 = arith.constant 1 : index
      %c0_189 = arith.constant 0 : index
      %c0_190 = arith.constant 0 : index
      %268 = vector.load %arg10[%c1_188, %c0_189, %c0_190] : memref<2x8x64xf32, #tpu.memory_space<vmem>>, vector<1x8x64xf32>
      %269 = vector.shape_cast %268 : vector<1x8x64xf32> to vector<8x64xf32>
      %cst_191 = arith.constant 0.999994993 : f32
      %270 = vector.broadcast %cst_191 : f32 to vector<8x64xf32>
      %271 = arith.mulf %269, %270 : vector<8x64xf32>
      %cst_192 = arith.constant 0.000000e+00 : f32
      %272 = vector.broadcast %cst_192 : f32 to vector<8x64xf32>
      %273 = arith.maximumf %271, %272 : vector<8x64xf32>
      %c1_193 = arith.constant 1 : index
      %c0_194 = arith.constant 0 : index
      %c0_195 = arith.constant 0 : index
      %274 = vector.load %arg1[%c1_193, %c0_194, %c0_195] : memref<2x8x64xf32, #tpu.memory_space<vmem>>, vector<1x8x64xf32>
      %275 = vector.shape_cast %274 : vector<1x8x64xf32> to vector<8x64xf32>
      %276 = arith.addf %273, %275 : vector<8x64xf32>
      %cst_196 = arith.constant 0.000000e+00 : f32
      %277 = vector.broadcast %cst_196 : f32 to vector<8x64xf32>
      %c0_197 = arith.constant 0 : index
      %c0_198 = arith.constant 0 : index
      %c0_199 = arith.constant 0 : index
      %278 = vector.load %arg7[%c0_197, %c0_198, %c0_199] : memref<9x8x8xf32, #tpu.memory_space<vmem>>, vector<1x8x8xf32>
      %279 = vector.shape_cast %278 : vector<1x8x8xf32> to vector<8x8xf32>
      %cst_200 = arith.constant dense<0.000000e+00> : vector<8x64xf32>
      %280 = tpu.matmul %279, %276, %cst_200 {dimension_numbers = #tpu.dot_dimension_numbers<[1], [0], [0], [1], [0, 0, 1, 1], [], []>} : vector<8x8xf32>, vector<8x64xf32>, vector<8x64xf32> -> vector<8x64xf32>
      %c0_201 = arith.constant 0 : index
      %c0_202 = arith.constant 0 : index
      %c0_203 = arith.constant 0 : index
      %281 = vector.load %arg8[%c0_201, %c0_202, %c0_203] : memref<9x64x64xf32, #tpu.memory_space<vmem>>, vector<1x64x64xf32>
      %282 = vector.shape_cast %281 : vector<1x64x64xf32> to vector<64x64xf32>
      %cst_204 = arith.constant dense<0.000000e+00> : vector<8x64xf32>
      %283 = tpu.matmul %280, %282, %cst_204 {dimension_numbers = #tpu.dot_dimension_numbers<[1], [0], [0], [1], [0, 0, 1, 1], [], []>} : vector<8x64xf32>, vector<64x64xf32>, vector<8x64xf32> -> vector<8x64xf32>
      %284 = arith.addf %277, %283 : vector<8x64xf32>
      %c1_205 = arith.constant 1 : index
      %c0_206 = arith.constant 0 : index
      %c0_207 = arith.constant 0 : index
      %285 = vector.load %arg7[%c1_205, %c0_206, %c0_207] : memref<9x8x8xf32, #tpu.memory_space<vmem>>, vector<1x8x8xf32>
      %286 = vector.shape_cast %285 : vector<1x8x8xf32> to vector<8x8xf32>
      %cst_208 = arith.constant dense<0.000000e+00> : vector<8x64xf32>
      %287 = tpu.matmul %286, %276, %cst_208 {dimension_numbers = #tpu.dot_dimension_numbers<[1], [0], [0], [1], [0, 0, 1, 1], [], []>} : vector<8x8xf32>, vector<8x64xf32>, vector<8x64xf32> -> vector<8x64xf32>
      %c1_209 = arith.constant 1 : index
      %c0_210 = arith.constant 0 : index
      %c0_211 = arith.constant 0 : index
      %288 = vector.load %arg8[%c1_209, %c0_210, %c0_211] : memref<9x64x64xf32, #tpu.memory_space<vmem>>, vector<1x64x64xf32>
      %289 = vector.shape_cast %288 : vector<1x64x64xf32> to vector<64x64xf32>
      %cst_212 = arith.constant dense<0.000000e+00> : vector<8x64xf32>
      %290 = tpu.matmul %287, %289, %cst_212 {dimension_numbers = #tpu.dot_dimension_numbers<[1], [0], [0], [1], [0, 0, 1, 1], [], []>} : vector<8x64xf32>, vector<64x64xf32>, vector<8x64xf32> -> vector<8x64xf32>
      %291 = arith.addf %284, %290 : vector<8x64xf32>
      %c2_213 = arith.constant 2 : index
      %c0_214 = arith.constant 0 : index
      %c0_215 = arith.constant 0 : index
      %292 = vector.load %arg7[%c2_213, %c0_214, %c0_215] : memref<9x8x8xf32, #tpu.memory_space<vmem>>, vector<1x8x8xf32>
      %293 = vector.shape_cast %292 : vector<1x8x8xf32> to vector<8x8xf32>
      %cst_216 = arith.constant dense<0.000000e+00> : vector<8x64xf32>
      %294 = tpu.matmul %293, %276, %cst_216 {dimension_numbers = #tpu.dot_dimension_numbers<[1], [0], [0], [1], [0, 0, 1, 1], [], []>} : vector<8x8xf32>, vector<8x64xf32>, vector<8x64xf32> -> vector<8x64xf32>
      %c2_217 = arith.constant 2 : index
      %c0_218 = arith.constant 0 : index
      %c0_219 = arith.constant 0 : index
      %295 = vector.load %arg8[%c2_217, %c0_218, %c0_219] : memref<9x64x64xf32, #tpu.memory_space<vmem>>, vector<1x64x64xf32>
      %296 = vector.shape_cast %295 : vector<1x64x64xf32> to vector<64x64xf32>
      %cst_220 = arith.constant dense<0.000000e+00> : vector<8x64xf32>
      %297 = tpu.matmul %294, %296, %cst_220 {dimension_numbers = #tpu.dot_dimension_numbers<[1], [0], [0], [1], [0, 0, 1, 1], [], []>} : vector<8x64xf32>, vector<64x64xf32>, vector<8x64xf32> -> vector<8x64xf32>
      %298 = arith.addf %291, %297 : vector<8x64xf32>
      %c3_221 = arith.constant 3 : index
      %c0_222 = arith.constant 0 : index
      %c0_223 = arith.constant 0 : index
      %299 = vector.load %arg7[%c3_221, %c0_222, %c0_223] : memref<9x8x8xf32, #tpu.memory_space<vmem>>, vector<1x8x8xf32>
      %300 = vector.shape_cast %299 : vector<1x8x8xf32> to vector<8x8xf32>
      %cst_224 = arith.constant dense<0.000000e+00> : vector<8x64xf32>
      %301 = tpu.matmul %300, %276, %cst_224 {dimension_numbers = #tpu.dot_dimension_numbers<[1], [0], [0], [1], [0, 0, 1, 1], [], []>} : vector<8x8xf32>, vector<8x64xf32>, vector<8x64xf32> -> vector<8x64xf32>
      %c3_225 = arith.constant 3 : index
      %c0_226 = arith.constant 0 : index
      %c0_227 = arith.constant 0 : index
      %302 = vector.load %arg8[%c3_225, %c0_226, %c0_227] : memref<9x64x64xf32, #tpu.memory_space<vmem>>, vector<1x64x64xf32>
      %303 = vector.shape_cast %302 : vector<1x64x64xf32> to vector<64x64xf32>
      %cst_228 = arith.constant dense<0.000000e+00> : vector<8x64xf32>
      %304 = tpu.matmul %301, %303, %cst_228 {dimension_numbers = #tpu.dot_dimension_numbers<[1], [0], [0], [1], [0, 0, 1, 1], [], []>} : vector<8x64xf32>, vector<64x64xf32>, vector<8x64xf32> -> vector<8x64xf32>
      %305 = arith.addf %298, %304 : vector<8x64xf32>
      %c4_229 = arith.constant 4 : index
      %c0_230 = arith.constant 0 : index
      %c0_231 = arith.constant 0 : index
      %306 = vector.load %arg7[%c4_229, %c0_230, %c0_231] : memref<9x8x8xf32, #tpu.memory_space<vmem>>, vector<1x8x8xf32>
      %307 = vector.shape_cast %306 : vector<1x8x8xf32> to vector<8x8xf32>
      %cst_232 = arith.constant dense<0.000000e+00> : vector<8x64xf32>
      %308 = tpu.matmul %307, %276, %cst_232 {dimension_numbers = #tpu.dot_dimension_numbers<[1], [0], [0], [1], [0, 0, 1, 1], [], []>} : vector<8x8xf32>, vector<8x64xf32>, vector<8x64xf32> -> vector<8x64xf32>
      %c4_233 = arith.constant 4 : index
      %c0_234 = arith.constant 0 : index
      %c0_235 = arith.constant 0 : index
      %309 = vector.load %arg8[%c4_233, %c0_234, %c0_235] : memref<9x64x64xf32, #tpu.memory_space<vmem>>, vector<1x64x64xf32>
      %310 = vector.shape_cast %309 : vector<1x64x64xf32> to vector<64x64xf32>
      %cst_236 = arith.constant dense<0.000000e+00> : vector<8x64xf32>
      %311 = tpu.matmul %308, %310, %cst_236 {dimension_numbers = #tpu.dot_dimension_numbers<[1], [0], [0], [1], [0, 0, 1, 1], [], []>} : vector<8x64xf32>, vector<64x64xf32>, vector<8x64xf32> -> vector<8x64xf32>
      %312 = arith.addf %305, %311 : vector<8x64xf32>
      %c5_237 = arith.constant 5 : index
      %c0_238 = arith.constant 0 : index
      %c0_239 = arith.constant 0 : index
      %313 = vector.load %arg7[%c5_237, %c0_238, %c0_239] : memref<9x8x8xf32, #tpu.memory_space<vmem>>, vector<1x8x8xf32>
      %314 = vector.shape_cast %313 : vector<1x8x8xf32> to vector<8x8xf32>
      %cst_240 = arith.constant dense<0.000000e+00> : vector<8x64xf32>
      %315 = tpu.matmul %314, %276, %cst_240 {dimension_numbers = #tpu.dot_dimension_numbers<[1], [0], [0], [1], [0, 0, 1, 1], [], []>} : vector<8x8xf32>, vector<8x64xf32>, vector<8x64xf32> -> vector<8x64xf32>
      %c5_241 = arith.constant 5 : index
      %c0_242 = arith.constant 0 : index
      %c0_243 = arith.constant 0 : index
      %316 = vector.load %arg8[%c5_241, %c0_242, %c0_243] : memref<9x64x64xf32, #tpu.memory_space<vmem>>, vector<1x64x64xf32>
      %317 = vector.shape_cast %316 : vector<1x64x64xf32> to vector<64x64xf32>
      %cst_244 = arith.constant dense<0.000000e+00> : vector<8x64xf32>
      %318 = tpu.matmul %315, %317, %cst_244 {dimension_numbers = #tpu.dot_dimension_numbers<[1], [0], [0], [1], [0, 0, 1, 1], [], []>} : vector<8x64xf32>, vector<64x64xf32>, vector<8x64xf32> -> vector<8x64xf32>
      %319 = arith.addf %312, %318 : vector<8x64xf32>
      %c6_245 = arith.constant 6 : index
      %c0_246 = arith.constant 0 : index
      %c0_247 = arith.constant 0 : index
      %320 = vector.load %arg7[%c6_245, %c0_246, %c0_247] : memref<9x8x8xf32, #tpu.memory_space<vmem>>, vector<1x8x8xf32>
      %321 = vector.shape_cast %320 : vector<1x8x8xf32> to vector<8x8xf32>
      %cst_248 = arith.constant dense<0.000000e+00> : vector<8x64xf32>
      %322 = tpu.matmul %321, %276, %cst_248 {dimension_numbers = #tpu.dot_dimension_numbers<[1], [0], [0], [1], [0, 0, 1, 1], [], []>} : vector<8x8xf32>, vector<8x64xf32>, vector<8x64xf32> -> vector<8x64xf32>
      %c6_249 = arith.constant 6 : index
      %c0_250 = arith.constant 0 : index
      %c0_251 = arith.constant 0 : index
      %323 = vector.load %arg8[%c6_249, %c0_250, %c0_251] : memref<9x64x64xf32, #tpu.memory_space<vmem>>, vector<1x64x64xf32>
      %324 = vector.shape_cast %323 : vector<1x64x64xf32> to vector<64x64xf32>
      %cst_252 = arith.constant dense<0.000000e+00> : vector<8x64xf32>
      %325 = tpu.matmul %322, %324, %cst_252 {dimension_numbers = #tpu.dot_dimension_numbers<[1], [0], [0], [1], [0, 0, 1, 1], [], []>} : vector<8x64xf32>, vector<64x64xf32>, vector<8x64xf32> -> vector<8x64xf32>
      %326 = arith.addf %319, %325 : vector<8x64xf32>
      %c7_253 = arith.constant 7 : index
      %c0_254 = arith.constant 0 : index
      %c0_255 = arith.constant 0 : index
      %327 = vector.load %arg7[%c7_253, %c0_254, %c0_255] : memref<9x8x8xf32, #tpu.memory_space<vmem>>, vector<1x8x8xf32>
      %328 = vector.shape_cast %327 : vector<1x8x8xf32> to vector<8x8xf32>
      %cst_256 = arith.constant dense<0.000000e+00> : vector<8x64xf32>
      %329 = tpu.matmul %328, %276, %cst_256 {dimension_numbers = #tpu.dot_dimension_numbers<[1], [0], [0], [1], [0, 0, 1, 1], [], []>} : vector<8x8xf32>, vector<8x64xf32>, vector<8x64xf32> -> vector<8x64xf32>
      %c7_257 = arith.constant 7 : index
      %c0_258 = arith.constant 0 : index
      %c0_259 = arith.constant 0 : index
      %330 = vector.load %arg8[%c7_257, %c0_258, %c0_259] : memref<9x64x64xf32, #tpu.memory_space<vmem>>, vector<1x64x64xf32>
      %331 = vector.shape_cast %330 : vector<1x64x64xf32> to vector<64x64xf32>
      %cst_260 = arith.constant dense<0.000000e+00> : vector<8x64xf32>
      %332 = tpu.matmul %329, %331, %cst_260 {dimension_numbers = #tpu.dot_dimension_numbers<[1], [0], [0], [1], [0, 0, 1, 1], [], []>} : vector<8x64xf32>, vector<64x64xf32>, vector<8x64xf32> -> vector<8x64xf32>
      %333 = arith.addf %326, %332 : vector<8x64xf32>
      %c8_261 = arith.constant 8 : index
      %c0_262 = arith.constant 0 : index
      %c0_263 = arith.constant 0 : index
      %334 = vector.load %arg7[%c8_261, %c0_262, %c0_263] : memref<9x8x8xf32, #tpu.memory_space<vmem>>, vector<1x8x8xf32>
      %335 = vector.shape_cast %334 : vector<1x8x8xf32> to vector<8x8xf32>
      %cst_264 = arith.constant dense<0.000000e+00> : vector<8x64xf32>
      %336 = tpu.matmul %335, %276, %cst_264 {dimension_numbers = #tpu.dot_dimension_numbers<[1], [0], [0], [1], [0, 0, 1, 1], [], []>} : vector<8x8xf32>, vector<8x64xf32>, vector<8x64xf32> -> vector<8x64xf32>
      %c8_265 = arith.constant 8 : index
      %c0_266 = arith.constant 0 : index
      %c0_267 = arith.constant 0 : index
      %337 = vector.load %arg8[%c8_265, %c0_266, %c0_267] : memref<9x64x64xf32, #tpu.memory_space<vmem>>, vector<1x64x64xf32>
      %338 = vector.shape_cast %337 : vector<1x64x64xf32> to vector<64x64xf32>
      %cst_268 = arith.constant dense<0.000000e+00> : vector<8x64xf32>
      %339 = tpu.matmul %336, %338, %cst_268 {dimension_numbers = #tpu.dot_dimension_numbers<[1], [0], [0], [1], [0, 0, 1, 1], [], []>} : vector<8x64xf32>, vector<64x64xf32>, vector<8x64xf32> -> vector<8x64xf32>
      %340 = arith.addf %333, %339 : vector<8x64xf32>
      %cst_269 = arith.constant 0.999994993 : f32
      %341 = vector.broadcast %cst_269 : f32 to vector<8x64xf32>
      %342 = arith.mulf %340, %341 : vector<8x64xf32>
      %cst_270 = arith.constant 0.000000e+00 : f32
      %343 = vector.broadcast %cst_270 : f32 to vector<8x64xf32>
      %344 = arith.maximumf %342, %343 : vector<8x64xf32>
      %c1_271 = arith.constant 1 : index
      %c0_272 = arith.constant 0 : index
      %c0_273 = arith.constant 0 : index
      %345 = vector.load %arg10[%c1_271, %c0_272, %c0_273] : memref<2x8x64xf32, #tpu.memory_space<vmem>>, vector<1x8x64xf32>
      %346 = vector.shape_cast %345 : vector<1x8x64xf32> to vector<8x64xf32>
      %347 = vector.shape_cast %344 : vector<8x64xf32> to vector<1x8x64xf32>
      tpu.vector_store %arg10[%c1_271, %c0_272, %c0_273], %347 {strides = array<i32>} : memref<2x8x64xf32, #tpu.memory_space<vmem>>, vector<1x8x64xf32>,
      %c1_274 = arith.constant 1 : index
      %c0_275 = arith.constant 0 : index
      %c0_276 = arith.constant 0 : index
      %348 = vector.load %arg14[%c1_274, %c0_275, %c0_276] : memref<2x8x64xf32, #tpu.memory_space<vmem>>, vector<1x8x64xf32>
      %349 = vector.shape_cast %348 : vector<1x8x64xf32> to vector<8x64xf32>
      %350 = vector.shape_cast %344 : vector<8x64xf32> to vector<1x8x64xf32>
      tpu.vector_store %arg14[%c1_274, %c0_275, %c0_276], %350 {strides = array<i32>} : memref<2x8x64xf32, #tpu.memory_space<vmem>>, vector<1x8x64xf32>,
    } else {
    }
    %c15_i32 = arith.constant 15 : i32
    %182 = arith.cmpi eq, %arg0, %c15_i32 : i32
    %183 = arith.extui %182 : i1 to i32
    %c0_i32_105 = arith.constant 0 : i32
    %184 = arith.cmpi ne, %183, %c0_i32_105 : i32
    scf.if %184 {
      %c0_106 = arith.constant 0 : index
      %c0_107 = arith.constant 0 : index
      %c0_108 = arith.constant 0 : index
      %185 = vector.load %arg10[%c0_106, %c0_107, %c0_108] : memref<2x8x64xf32, #tpu.memory_space<vmem>>, vector<1x8x64xf32>
      %186 = vector.shape_cast %185 : vector<1x8x64xf32> to vector<8x64xf32>
      %cst_109 = arith.constant 0.999994993 : f32
      %187 = vector.broadcast %cst_109 : f32 to vector<8x64xf32>
      %188 = arith.mulf %186, %187 : vector<8x64xf32>
      %cst_110 = arith.constant 0.000000e+00 : f32
      %189 = vector.broadcast %cst_110 : f32 to vector<8x64xf32>
      %190 = arith.maximumf %188, %189 : vector<8x64xf32>
      %c0_111 = arith.constant 0 : index
      %c0_112 = arith.constant 0 : index
      %c0_113 = arith.constant 0 : index
      %191 = vector.load %arg14[%c0_111, %c0_112, %c0_113] : memref<2x8x64xf32, #tpu.memory_space<vmem>>, vector<1x8x64xf32>
      %192 = vector.shape_cast %191 : vector<1x8x64xf32> to vector<8x64xf32>
      %193 = arith.addf %190, %192 : vector<8x64xf32>
      %cst_114 = arith.constant 0.999994993 : f32
      %194 = vector.broadcast %cst_114 : f32 to vector<8x64xf32>
      %195 = arith.mulf %193, %194 : vector<8x64xf32>
      %c0_115 = arith.constant 0 : index
      %c0_116 = arith.constant 0 : index
      %c0_117 = arith.constant 0 : index
      %196 = vector.load %arg1[%c0_115, %c0_116, %c0_117] : memref<2x8x64xf32, #tpu.memory_space<vmem>>, vector<1x8x64xf32>
      %197 = vector.shape_cast %196 : vector<1x8x64xf32> to vector<8x64xf32>
      %198 = arith.addf %195, %197 : vector<8x64xf32>
      %cst_118 = arith.constant 0.000000e+00 : f32
      %199 = vector.broadcast %cst_118 : f32 to vector<8x64xf32>
      %200 = arith.maximumf %198, %199 : vector<8x64xf32>
      %c0_119 = arith.constant 0 : index
      %c0_120 = arith.constant 0 : index
      %c0_121 = arith.constant 0 : index
      %201 = vector.load %arg9[%c0_119, %c0_120, %c0_121] : memref<2x8x64xf32, #tpu.memory_space<vmem>>, vector<1x8x64xf32>
      %202 = vector.shape_cast %201 : vector<1x8x64xf32> to vector<8x64xf32>
      %203 = vector.shape_cast %200 : vector<8x64xf32> to vector<1x8x64xf32>
      tpu.vector_store %arg9[%c0_119, %c0_120, %c0_121], %203 {strides = array<i32>} : memref<2x8x64xf32, #tpu.memory_space<vmem>>, vector<1x8x64xf32>,
      %c1_122 = arith.constant 1 : index
      %c0_123 = arith.constant 0 : index
      %c0_124 = arith.constant 0 : index
      %204 = vector.load %arg10[%c1_122, %c0_123, %c0_124] : memref<2x8x64xf32, #tpu.memory_space<vmem>>, vector<1x8x64xf32>
      %205 = vector.shape_cast %204 : vector<1x8x64xf32> to vector<8x64xf32>
      %cst_125 = arith.constant 0.999994993 : f32
      %206 = vector.broadcast %cst_125 : f32 to vector<8x64xf32>
      %207 = arith.mulf %205, %206 : vector<8x64xf32>
      %cst_126 = arith.constant 0.000000e+00 : f32
      %208 = vector.broadcast %cst_126 : f32 to vector<8x64xf32>
      %209 = arith.maximumf %207, %208 : vector<8x64xf32>
      %c1_127 = arith.constant 1 : index
      %c0_128 = arith.constant 0 : index
      %c0_129 = arith.constant 0 : index
      %210 = vector.load %arg14[%c1_127, %c0_128, %c0_129] : memref<2x8x64xf32, #tpu.memory_space<vmem>>, vector<1x8x64xf32>
      %211 = vector.shape_cast %210 : vector<1x8x64xf32> to vector<8x64xf32>
      %212 = arith.addf %209, %211 : vector<8x64xf32>
      %cst_130 = arith.constant 0.999994993 : f32
      %213 = vector.broadcast %cst_130 : f32 to vector<8x64xf32>
      %214 = arith.mulf %212, %213 : vector<8x64xf32>
      %c1_131 = arith.constant 1 : index
      %c0_132 = arith.constant 0 : index
      %c0_133 = arith.constant 0 : index
      %215 = vector.load %arg1[%c1_131, %c0_132, %c0_133] : memref<2x8x64xf32, #tpu.memory_space<vmem>>, vector<1x8x64xf32>
      %216 = vector.shape_cast %215 : vector<1x8x64xf32> to vector<8x64xf32>
      %217 = arith.addf %214, %216 : vector<8x64xf32>
      %cst_134 = arith.constant 0.000000e+00 : f32
      %218 = vector.broadcast %cst_134 : f32 to vector<8x64xf32>
      %219 = arith.maximumf %217, %218 : vector<8x64xf32>
      %c1_135 = arith.constant 1 : index
      %c0_136 = arith.constant 0 : index
      %c0_137 = arith.constant 0 : index
      %220 = vector.load %arg9[%c1_135, %c0_136, %c0_137] : memref<2x8x64xf32, #tpu.memory_space<vmem>>, vector<1x8x64xf32>
      %221 = vector.shape_cast %220 : vector<1x8x64xf32> to vector<8x64xf32>
      %222 = vector.shape_cast %219 : vector<8x64xf32> to vector<1x8x64xf32>
      tpu.vector_store %arg9[%c1_135, %c0_136, %c0_137], %222 {strides = array<i32>} : memref<2x8x64xf32, #tpu.memory_space<vmem>>, vector<1x8x64xf32>,
    } else {
    }
    return
  }
  func.func @transform_0(%arg0: i32) -> (i32, i32, i32) {
    %c0_i32 = arith.constant 0 : i32
    %c0_i32_0 = arith.constant 0 : i32
    %c0_i32_1 = arith.constant 0 : i32
    %c0_i32_2 = arith.constant 0 : i32
    return %c0_i32, %c0_i32_0, %c0_i32_1 : i32, i32, i32
  }
  func.func @transform_1(%arg0: i32) -> (i32, i32) {
    %c0_i32 = arith.constant 0 : i32
    %c0_i32_0 = arith.constant 0 : i32
    %c0_i32_1 = arith.constant 0 : i32
    return %c0_i32, %c0_i32_0 : i32, i32
  }
  func.func @transform_2(%arg0: i32) -> (i32, i32, i32) {
    %c0_i32 = arith.constant 0 : i32
    %c0_i32_0 = arith.constant 0 : i32
    %c0_i32_1 = arith.constant 0 : i32
    %c0_i32_2 = arith.constant 0 : i32
    return %c0_i32, %c0_i32_0, %c0_i32_1 : i32, i32, i32
  }
  func.func @transform_3(%arg0: i32) -> (i32, i32, i32) {
    %c0_i32 = arith.constant 0 : i32
    %c0_i32_0 = arith.constant 0 : i32
    %c0_i32_1 = arith.constant 0 : i32
    %c0_i32_2 = arith.constant 0 : i32
    return %c0_i32, %c0_i32_0, %c0_i32_1 : i32, i32, i32
  }
  func.func @transform_4(%arg0: i32) -> (i32, i32, i32) {
    %c0_i32 = arith.constant 0 : i32
    %c0_i32_0 = arith.constant 0 : i32
    %c0_i32_1 = arith.constant 0 : i32
    %c0_i32_2 = arith.constant 0 : i32
    return %c0_i32, %c0_i32_0, %c0_i32_1 : i32, i32, i32
  }
  func.func @transform_5(%arg0: i32) -> (i32, i32, i32) {
    %c0_i32 = arith.constant 0 : i32
    %c0_i32_0 = arith.constant 0 : i32
    %c0_i32_1 = arith.constant 0 : i32
    %c0_i32_2 = arith.constant 0 : i32
    return %c0_i32, %c0_i32_0, %c0_i32_1 : i32, i32, i32
  }
  func.func @transform_6(%arg0: i32) -> (i32, i32, i32) {
    %c0_i32 = arith.constant 0 : i32
    %c0_i32_0 = arith.constant 0 : i32
    %c0_i32_1 = arith.constant 0 : i32
    %c0_i32_2 = arith.constant 0 : i32
    return %c0_i32, %c0_i32_0, %c0_i32_1 : i32, i32, i32
  }
  func.func @transform_7(%arg0: i32) -> (i32, i32, i32) {
    %c0_i32 = arith.constant 0 : i32
    %c0_i32_0 = arith.constant 0 : i32
    %c0_i32_1 = arith.constant 0 : i32
    %c0_i32_2 = arith.constant 0 : i32
    return %c0_i32, %c0_i32_0, %c0_i32_1 : i32, i32, i32
  }
  func.func @transform_8(%arg0: i32) -> (i32, i32, i32) {
    %c0_i32 = arith.constant 0 : i32
    %c0_i32_0 = arith.constant 0 : i32
    %c0_i32_1 = arith.constant 0 : i32
    %c0_i32_2 = arith.constant 0 : i32
    return %c0_i32, %c0_i32_0, %c0_i32_1 : i32, i32, i32
  }
}

</mosaic_0001>

<bundles_post_ra>
// kernel: basic_block_forward.1
= control target key start
LH: loop header
LB: loop body
LE: loop exit
PB: predicated region body
PF: predicated region fallthrough
CT: control target
= control target key end

     0   :  { %13 = vsyncpa [#allocation8], 0  ;;  %s8272_s27 = smov 0   ;;  %s13087_s0 = inlined_call_operand.vmem [shape: f32[2,8,64], index: 0, kind: input, shape index: {}]   ;;  %s13088_s1 = inlined_call_operand.vmem [shape: f32[64,128], index: 1, kind: input, shape index: {}]   ;;  %s13089_s2 = inlined_call_operand.vmem [shape: f32[2,8,8], index: 2, kind: input, shape index: {}]   ;;  %s13090_s3 = inlined_call_operand.vmem [shape: f32[2,8,1], index: 3, kind: input, shape index: {}]   ;;  %s13091_s4 = inlined_call_operand.vmem [shape: f32[2,8,8], index: 4, kind: input, shape index: {}]   ;;  %s13092_s5 = inlined_call_operand.vmem [shape: f32[2,8,1], index: 5, kind: input, shape index: {}]   ;;  %s13093_s6 = inlined_call_operand.vmem [shape: f32[9,8,8], index: 6, kind: input, shape index: {}]   ;;  %s13094_s7 = inlined_call_operand.hbm [shape: f32[9,64,64], index: 7, kind: input, shape index: {}]   ;;  %s13095_s8 = inlined_call_operand.vmem [shape: f32[2,8,64], index: 8, kind: output, shape index: {}]  }
   0x1 LB: > { %s8278_s28 = sadd.s32 4294967295, %s8138_s27   ;;  %p6369_p0 = scmp.ge.s32.totalorder %s8138_s27, 1  ;;  %s8138_s27 = sphi %s8272_s27, %s19_s27  }
   0x2   : > { %p213_p1 = scmp.lt.s32.totalorder %s8138_s27, 17  ;;  %s8212_s29 = smov [#allocation7]  }
   0x3   : > { %s246_s30 = sshll.u32 %s8212_s29, 4  ;;  %p13096_p4 = scmp.eq.s32.totalorder %s8278_s28, 0  ;;  %s247_s30 = int_to_ptr.vmem [resolvable:$true] %s246_s30 }
   0x4   : > { %p8283_p3 = pnand %p6369_p0, %p213_p1  ;;  %s8028_s13 = scalar_lea.hbm %s13094_s7, 9216 }
   0x5   : > { %p8029_p7 = scmp.ne.s32.totalorder %s13094_s7, %s8028_s13  ;;  %p8035_p11 = scmp.lt.u32.totalorder %s8028_s13, %s13094_s7 }
   0x6   : > { %s13186_s9 = scalar_select %p8283_p3, 1, 0 }
   0x7   : > { %p7842_p5 = pneg %p8283_p3 }
   0x9   : > { %p8292_p6 = pnand %p13096_p4, %p7842_p5 }
   0xb   : > { %p8030_p8 = pneg %p8292_p6 }
   0xd   : > { %p8031_p9 = pnand %p8030_p8, %p8029_p7 }
   0xf   : > { %p8032_p10 = pneg %p8031_p9 }
  0x11   : > { %p8037_p12 = pnand %p8035_p11, %p8032_p10 }
  0x13   : > { %8040 = shalt.err (!%p8037_p12)
}
  0x14   : > { %s8041_s18 = scalar_lea.vmem %s247_s30, 9216  ;;  %p8049_p5 = scmp.lt.s32.totalorder %s247_s30, %s247_s30 }
  0x15   : > { %p8042_p13 = scmp.ne.s32.totalorder %s247_s30, %s8041_s18  ;;  %p8050_p2 = scmp.lt.s32.totalorder %s8041_s18, %s8041_s18 }
  0x17   : > { %p8044_p0 = pnand %p8042_p13, %p8030_p8  ;;  %p8051_p4 = por %p8050_p2, %p8049_p5 }
  0x19   : > { %p8045_p1 = pneg %p8044_p0 }
  0x1b   : > { %p8052_p3 = pnand %p8051_p4, %p8045_p1 }
  0x1d   : > { %8055 = shalt.err (!%p8052_p3)
}
  0x1e   : > { %s8213_s19 = smov 128   ;;  %s8214_s20 = smov 8  }
  0x1f   : > { %7845 = dma.hbm_to_vmem [thread:$0]  (!%p8292_p6), %s13094_s7, 9216, %s247_s30, [#allocation8], %s8213_s19, %s8213_s19, %s8214_s20  }
  0x20   : > { %p13188_p7 = scmp.ne.s32.totalorder %s13186_s9, 0 }
  0x22   : > { %262 = sbr.rel (%p13188_p7) target bundleno = 4246 (0x1096), region = 52 }
  0x29   : > { %p13189_p9 = scmp.eq.s32.totalorder %s8278_s28, 0 }
  0x2b   : > { %8133 = dma.done.wait (%p13189_p9), [#allocation8], 9216   ;;  %p13190_p8 = pmov %p13189_p9 }
  0x2c   : > { %v286_v0 = vlaneseq  ;;  %v8356_v10 = vld [vmem:[%s13088_s1 + $0x8] sm:$0xff]  ;;  %v8361_v11 = vld [vmem:[%s13088_s1 + $0x18] sm:$0xff]  ;;  %v13108_v13 = vmov 0.0   ;;  %p13204_p2 = scmp.ne.s32.totalorder %s8278_s28, 0 }
  0x2d   : > { %8135 = vsyncadd (%p13190_p8), [#allocation8], 4294958080  ;;  %13192 = vst [vmem:[#allocation11_spill] sm:$0xff] %v8356_v10  ;;  %v8366_v12 = vld [vmem:[%s13088_s1 + $0x28] sm:$0xff]  ;;  %v8383_v15 = vld [vmem:[%s13088_s1 + $0x38] sm:$0xff]  ;;  %vm327_vm8 = vcmask (!%p13204_p2), 523264  }
  0x2e   : > { %v8318_v1 = vshrl.u32 %v286_v0, 7  ;;  %v8320_v2 = vand.u32 127, %v286_v0  ;;  %13193 = vst [vmem:[#allocation12_spill] sm:$0xff] %v8361_v11  ;;  %13194 = vst [vmem:[#allocation13_spill] sm:$0xff] %v8366_v12  ;;  %v325_v23 = vld [vmem:[%s13087_s0] sm:$0xff] (!%p13204_p2)  ;;  %v326_v24 = vld [vmem:[%s13087_s0 + $0x8] sm:$0xff] (!%p13204_p2) }
  0x2f   : > { %13196 = vst [vmem:[#allocation15_spill] sm:$0xff] %v8383_v15  ;;  %328 = vst.msk [vmem:[#allocation2] sm:$0xff] (!%p13204_p2), %vm327_vm8, %v325_v23 }
  0x30   : > { %13191 = vst [vmem:[#allocation10_spill] sm:$0xff] %v8320_v2  ;;  %v8323_v3 = vadd.s32 8, %v8318_v1  ;;  %v8326_v4 = vadd.s32 16, %v8318_v1  ;;  %v8329_v5 = vadd.s32 24, %v8318_v1  ;;  %v8332_v6 = vadd.s32 32, %v8318_v1  ;;  %329 = vst.msk [vmem:[#allocation2 + $0x8] sm:$0xff] (!%p13204_p2), %vm327_vm8, %v326_v24 }
  0x31   : > { %v8335_v7 = vadd.s32 40, %v8318_v1  ;;  %v8338_v8 = vadd.s32 48, %v8318_v1  ;;  %v8341_v9 = vadd.s32 56, %v8318_v1  ;;  %vm13106_vm0 = vcmp.eq.s32.totalorder %v8318_v1, %v8320_v2 }
  0x32   : > { %vm13105_vm1 = vcmp.eq.s32.totalorder %v8323_v3, %v8320_v2  ;;  %vm13104_vm2 = vcmp.eq.s32.totalorder %v8326_v4, %v8320_v2  ;;  %vm13103_vm3 = vcmp.eq.s32.totalorder %v8329_v5, %v8320_v2  ;;  %vm13102_vm4 = vcmp.eq.s32.totalorder %v8332_v6, %v8320_v2  ;;  %324 = sbr.rel (%p13204_p2) target bundleno = 57 (0x39), region = 60 }
  0x33   : > { %vm13101_vm5 = vcmp.eq.s32.totalorder %v8335_v7, %v8320_v2  ;;  %vm13100_vm6 = vcmp.eq.s32.totalorder %v8338_v8, %v8320_v2  ;;  %vm13099_vm7 = vcmp.eq.s32.totalorder %v8341_v9, %v8320_v2  ;;  %v8378_v14 = vsel %vm13106_vm0, 1.0, %v13108_v13 }
  0x34   : > { %13195 = vst [vmem:[#allocation14_spill] sm:$0xff] %v8378_v14  ;;  %v8389_v16 = vsel %vm13105_vm1, 1.0, %v13108_v13  ;;  %v8395_v17 = vsel %vm13104_vm2, 1.0, %v13108_v13  ;;  %v8401_v18 = vsel %vm13103_vm3, 1.0, %v13108_v13  ;;  %v8407_v19 = vsel %vm13102_vm4, 1.0, %v13108_v13 }
  0x35   : > { %13197 = vst [vmem:[#allocation16_spill] sm:$0xff] %v8389_v16  ;;  %13198 = vst [vmem:[#allocation17_spill] sm:$0xff] %v8395_v17  ;;  %v8413_v20 = vsel %vm13101_vm5, 1.0, %v13108_v13  ;;  %v8419_v21 = vsel %vm13100_vm6, 1.0, %v13108_v13  ;;  %v8425_v22 = vsel %vm13099_vm7, 1.0, %v13108_v13 }
  0x36   : > { %13199 = vst [vmem:[#allocation18_spill] sm:$0xff] %v8401_v18  ;;  %13200 = vst [vmem:[#allocation19_spill] sm:$0xff] %v8407_v19 }
  0x37   : > { %13201 = vst [vmem:[#allocation20_spill] sm:$0xff] %v8413_v20  ;;  %13202 = vst [vmem:[#allocation21_spill] sm:$0xff] %v8419_v21 }
  0x38   : > { %13203 = vst [vmem:[#allocation22_spill] sm:$0xff] %v8425_v22 }
  0x39 PF: > { %v8435_v25 = vld [vmem:[#allocation2] sm:$0xff]  ;;  %vm13107_vm9 = vcmask 523264   ;;  %vm13098_vm10 = vcmask 64512   ;;  %s8552_s15 = smov 0  }
  0x3a   : > { %13205 = vst [vmem:[#allocation23_spill] sm:$0xff] %v8435_v25  ;;  %6871 = vmatprep.subr.msk.mxu0 %vm13107_vm9, %v8435_v25  ;;  %6873 = vmatprep.mubr.msk.f32.mxu0 %vm13107_vm9, %v8378_v14  ;;  %v594_v26 = vmul.f32 %v8435_v25, %v8435_v25 }
  0x3b   : > { %6872 = vmatpush3.xpose.msk.msra.mxu0 %vm13107_vm9, %v8435_v25  ;;  %6885 = vmatprep.subr.mxu1 %v8435_v25 }
  0x3c   : > { %6886 = vmatpush3.msra.mxu1 %v8435_v25  ;;  %v595_v27 = vsel %vm13107_vm9, %v594_v26, 0.0 }
  0x3d   : > { %v596_v28 = vrot.slane %v595_v27, 4 }
  0x3e   : > { %6874 = vmatmul.mubr.msk.f32.vlgmr.msra.gmra.mrb[0].mxu0 %vm13107_vm9, %v8389_v16 }
  0x3f   : > { %6876 = vmatprep.mubr.msk.f32.mxu0 %vm13107_vm9, %v8395_v17  ;;  %v597_v29 = vadd.f32 %v596_v28, %v595_v27 }
  0x41   : > { %v598_v30 = vrot.slane %v597_v29, 2 }
  0x42   : > { %6877 = vmatmul.mubr.msk.f32.gmra.mrb[2].mxu0 %vm13107_vm9, %v8401_v18 }
  0x43   : > { %6879 = vmatprep.mubr.msk.f32.mxu0 %vm13107_vm9, %v8407_v19  ;;  %v599_v31 = vadd.f32 %v598_v30, %v597_v29 }
  0x45   : > { %v600_v32 = vrot.slane %v599_v31, 1 }
  0x46   : > { %6880 = vmatmul.mubr.msk.f32.gmra.mrb[4].mxu0 %vm13107_vm9, %v8413_v20 }
  0x47   : > { %6882 = vmatprep.mubr.msk.f32.mxu0 %vm13107_vm9, %v8419_v21  ;;  %v8462_v33 = vadd.f32 %v600_v32, %v599_v31 }
  0x49   : > { %v602_v34 = vmul.f32 %v8462_v33, %v8378_v14  ;;  %v604_v35 = vmul.f32 %v8462_v33, %v8395_v17  ;;  %v603_v36 = vmul.f32 %v8462_v33, %v8389_v16  ;;  %v605_v37 = vmul.f32 %v8462_v33, %v8401_v18 }
  0x4a   : > { %6883 = vmatmul.mubr.msk.f32.gmra.mrb[6].mxu0 %vm13107_vm9, %v8425_v22  ;;  %v607_v42 = vmul.f32 %v8462_v33, %v8413_v20  ;;  %v606_v43 = vmul.f32 %v8462_v33, %v8407_v19  ;;  %v609_v46 = vmul.f32 %v8462_v33, %v8425_v22  ;;  %v608_v47 = vmul.f32 %v8462_v33, %v8419_v21 }
  0x4b   : > { %v610_v38 = vsel %vm13107_vm9, %v602_v34, 0.0  ;;  %v616_v39 = vsel %vm13107_vm9, %v604_v35, 0.0  ;;  %v613_v40 = vsel %vm13107_vm9, %v603_v36, 0.0  ;;  %v619_v41 = vsel %vm13107_vm9, %v605_v37, 0.0 }
  0x4c   : > { %611 = vadd.xlane.f32.xlu0 %v610_v38  ;;  %617 = vadd.xlane.f32.xlu1 %v616_v39  ;;  %v625_v44 = vsel %vm13107_vm9, %v607_v42, 0.0  ;;  %v622_v45 = vsel %vm13107_vm9, %v606_v43, 0.0  ;;  %v631_v48 = vsel %vm13107_vm9, %v609_v46, 0.0  ;;  %v628_v49 = vsel %vm13107_vm9, %v608_v47, 0.0 }
  0x50   : > { %614 = vadd.xlane.f32.xlu0 %v613_v40  ;;  %620 = vadd.xlane.f32.xlu1 %v619_v41 }
  0x54   : > { %626 = vadd.xlane.f32.xlu1 %v625_v44  ;;  %623 = vadd.xlane.f32.xlu0 %v622_v45 }
  0x58   : > { %632 = vadd.xlane.f32.xlu1 %v631_v48  ;;  %629 = vadd.xlane.f32.xlu0 %v628_v49 }
  0xd9   : > { %v612_v58 = vpop.xlane.xlu0 %611  ;;  %v618_v59 = vpop.xlane.xlu1 %617 }
  0xda   : > { %v634_v63 = vadd.f32 %v612_v58, %v8462_v33  ;;  %v636_v36 = vadd.f32 %v618_v59, %v8462_v33  ;;  %v8538_v58 = vmov 0.0   ;;  %v8540_v59 = vmov 0.0  }
  0xdd   : > { %v615_v60 = vpop.xlane.xlu0 %614  ;;  %v621_v61 = vpop.xlane.xlu1 %620 }
  0xde   : > { %v635_v62 = vadd.f32 %v615_v60, %v8462_v33  ;;  %v637_v29 = vadd.f32 %v621_v61, %v8462_v33  ;;  %v8542_v60 = vmov 0.0   ;;  %v8544_v61 = vmov 0.0  }
  0xe1   : > { %v627_v27 = vpop.xlane.xlu1 %626  ;;  %v624_v30 = vpop.xlane.xlu0 %623 }
  0xe2   : > { %v639_v39 = vadd.f32 %v627_v27, %v8462_v33  ;;  %v638_v42 = vadd.f32 %v624_v30, %v8462_v33 }
  0xe5   : > { %v633_v43 = vpop.xlane.xlu1 %632  ;;  %v630_v46 = vpop.xlane.xlu0 %629 }
  0xe6   : > { %v641_v49 = vadd.f32 %v633_v43, %v8462_v33 }
 0x111   : > { %v6875_v50 = vpop.f32.mrb[0].mxu0 }
 0x112   : > { %v425_v51 = vpop.f32.mrb[1].mxu0 }
 0x113   : > { %6887 = vmatprep.mubr.msk.f32.mxu1 %vm13098_vm10, %v425_v51 }
 0x114   : > { %6888 = vmatmul.mubr.msk.f32.vlgmr.msra.gmra.mrb[0].mxu1 %vm13098_vm10, %v6875_v50 }
 0x115   : > { %v6878_v52 = vpop.f32.mrb[2].mxu0 }
 0x116   : > { %v435_v53 = vpop.f32.mrb[3].mxu0 }
 0x117   : > { %6890 = vmatprep.mubr.msk.f32.mxu1 %vm13098_vm10, %v435_v53 }
 0x118   : > { %6891 = vmatmul.mubr.msk.f32.gmra.mrb[2].mxu1 %vm13098_vm10, %v6878_v52  ;;  %v640_v52 = vadd.f32 %v630_v46, %v8462_v33  ;;  %v8536_v33 = vmov 0.0  }
 0x119   : > { %v6881_v54 = vpop.f32.mrb[4].mxu0 }
 0x11a   : > { %v445_v55 = vpop.f32.mrb[5].mxu0 }
 0x11b   : > { %6893 = vmatprep.mubr.msk.f32.mxu1 %vm13098_vm10, %v445_v55 }
 0x11c   : > { %6894 = vmatmul.mubr.msk.f32.gmra.mrb[4].mxu1 %vm13098_vm10, %v6881_v54 }
 0x11d   : > { %v6884_v56 = vpop.f32.mrb[6].mxu0 }
 0x11e   : > { %v455_v57 = vpop.f32.mrb[7].mxu0 }
 0x11f   : > { %6896 = vmatprep.mubr.msk.f32.mxu1 %vm13098_vm10, %v455_v57 }
 0x120   : > { %6897 = vmatmul.mubr.msk.f32.gmra.mrb[6].mxu1 %vm13098_vm10, %v6884_v56 }
 0x1e7   : > { %v6889_v0 = vpop.f32.mrb[0].mxu1 }
 0x1e8   : > { %v643_v23 = vmul.f32 2.0, %v6889_v0  ;;  %v555_v24 = vpop.f32.mrb[1].mxu1  ;;  %v8550_v0 = vmov 0.0  }
 0x1e9   : > { %v642_v26 = vmul.f32 2.0, %v555_v24 }
 0x1ea   : > { %v8498_v28 = vsub.f32 %v635_v62, %v643_v23  ;;  %v8546_v62 = vmov 0.0  }
 0x1eb   : > { %v8501_v31 = vsub.f32 %v634_v63, %v642_v26  ;;  %v6892_v32 = vpop.f32.mrb[2].mxu1  ;;  %v8548_v63 = vmov 0.0  }
 0x1ec   : > { %659 = vst.msk [vmem:[#allocation5 + $0x8] sm:$0xff] %vm13107_vm9, %v8498_v28  ;;  %v645_v34 = vmul.f32 2.0, %v6892_v32  ;;  %v565_v35 = vpop.f32.mrb[3].mxu1 }
 0x1ed   : > { %658 = vst.msk [vmem:[#allocation5] sm:$0xff] %vm13107_vm9, %v8501_v31  ;;  %v644_v37 = vmul.f32 2.0, %v565_v35 }
 0x1ee   : > { %v8508_v38 = vsub.f32 %v637_v29, %v645_v34 }
 0x1ef   : > { %v8511_v40 = vsub.f32 %v636_v36, %v644_v37  ;;  %v6895_v41 = vpop.f32.mrb[4].mxu1 }
 0x1f0   : > { %661 = vst.msk [vmem:[#allocation5 + $0x18] sm:$0xff] %vm13107_vm9, %v8508_v38  ;;  %v647_v44 = vmul.f32 2.0, %v6895_v41  ;;  %v575_v45 = vpop.f32.mrb[5].mxu1 }
 0x1f1   : > { %660 = vst.msk [vmem:[#allocation5 + $0x10] sm:$0xff] %vm13107_vm9, %v8511_v40  ;;  %v646_v47 = vmul.f32 2.0, %v575_v45 }
 0x1f2   : > { %v8518_v48 = vsub.f32 %v639_v39, %v647_v44 }
 0x1f3   : > { %v8521_v50 = vsub.f32 %v638_v42, %v646_v47  ;;  %v6898_v51 = vpop.f32.mrb[6].mxu1 }
 0x1f4   : > { %663 = vst.msk [vmem:[#allocation5 + $0x28] sm:$0xff] %vm13107_vm9, %v8518_v48  ;;  %v649_v53 = vmul.f32 2.0, %v6898_v51  ;;  %v585_v54 = vpop.f32.mrb[7].mxu1 }
 0x1f5   : > { %662 = vst.msk [vmem:[#allocation5 + $0x20] sm:$0xff] %vm13107_vm9, %v8521_v50  ;;  %v648_v55 = vmul.f32 2.0, %v585_v54 }
 0x1f6   : > { %v8528_v56 = vsub.f32 %v641_v49, %v649_v53 }
 0x1f7   : > { %v8530_v57 = vsub.f32 %v640_v52, %v648_v55 }
 0x1f8   : > { %665 = vst.msk [vmem:[#allocation5 + $0x38] sm:$0xff] %vm13107_vm9, %v8528_v56 }
 0x1f9   : > { %664 = vst.msk [vmem:[#allocation5 + $0x30] sm:$0xff] %vm13107_vm9, %v8530_v57 }
 0x1fa LB: >> { %s8582_s16 = sshll.u32 %s8174_s15, 3  ;;  %v13208_v27 = vmov 0  ;;  %v13210_v29 = vmov 0  ;;  %v13212_v30 = vmov 0  ;;  %v13220_v36 = vmov 0  ;;  %s671_s15 = sadd.s32 1, %s8174_s15   ;;  %s8174_s15 = sphi %s8552_s15, %s671_s15   ;;  %v8170_v0 = vphi %v8550_v0, %v13686_v0   ;;  %v8166_v63 = vphi %v8548_v63, %v13685_v63   ;;  %v8162_v62 = vphi %v8546_v62, %v13684_v62   ;;  %v8158_v61 = vphi %v8544_v61, %v13683_v61   ;;  %v8154_v60 = vphi %v8542_v60, %v13682_v60   ;;  %v8150_v59 = vphi %v8540_v59, %v13681_v59   ;;  %v8146_v58 = vphi %v8538_v58, %v13680_v58   ;;  %v8142_v33 = vphi %v8536_v33, %v13679_v33  }
 0x1fb   : >> { %s8585_s17 = scalar_lea.vmem [#allocation5], %s8582_s16  ;;  %v703_v24 = vstv %s8582_s16  ;;  %s744_s18 = sadd.s32 1, %s8582_s16  ;;  %v13222_v37 = vmov 0  ;;  %v13225_v42 = vmov 0  ;;  %v13231_v44 = vmov 0 }
 0x1fc   : >> { %vm704_vm12 = vcmp.gt.s32.totalorder %v8318_v1, %v703_v24  ;;  %vm705_vm14 = vcmp.gt.s32.totalorder %v8323_v3, %v703_v24  ;;  %vm706_vm8 = vcmp.gt.s32.totalorder %v8326_v4, %v703_v24  ;;  %vm707_vm7 = vcmp.gt.s32.totalorder %v8329_v5, %v703_v24  ;;  %s808_s19 = sadd.s32 2, %s8582_s16  ;;  %s872_s20 = sadd.s32 3, %s8582_s16 }
 0x1fd   : >> { %vm708_vm4 = vcmp.gt.s32.totalorder %v8332_v6, %v703_v24  ;;  %vm709_vm1 = vcmp.gt.s32.totalorder %v8335_v7, %v703_v24  ;;  %v767_v41 = vstv %s744_s18  ;;  %v13233_v45 = vmov 0  ;;  %s936_s21 = sadd.s32 4, %s8582_s16  ;;  %s1000_s22 = sadd.s32 5, %s8582_s16 }
 0x1fe   : >> { %v13235_v46 = vmov 0  ;;  %v13237_v47 = vmov 0  ;;  %v13240_v49 = vmov 0  ;;  %v8806_v35 = vstv %s808_s19  ;;  %s1064_s23 = sadd.s32 6, %s8582_s16  ;;  %s1128_s24 = sadd.s32 7, %s8582_s16 }
 0x1ff   : >> { %v8936_v54 = vstv %s872_s20  ;;  %v13331_v53 = vmov 0  ;;  %v13335_v13 = vmov 0  ;;  %v13339_v25 = vmov 0  ;;  %p668_p3 = scmp.ge.s32.totalorder %s671_s15, 8  }
 0x200   : >> { %v6392_v23 = vld [vmem:[%s8585_s17] ss:$0 sm:$0xff]  ;;  %v8649_v39 = vld [vmem:[%s8585_s17 + $0x1] ss:$0 sm:$0xff]  ;;  %v8737_v55 = vld [vmem:[%s8585_s17 + $0x2] ss:$0 sm:$0xff] }
 0x201   : >> { %vm695_vm11 = vcmp.eq.f32.partialorder %v6392_v23, %v8501_v31  ;;  %vm696_vm13 = vcmp.eq.f32.partialorder %v6392_v23, %v8498_v28  ;;  %vm697_vm15 = vcmp.eq.f32.partialorder %v6392_v23, %v8511_v40  ;;  %vm698_vm10 = vcmp.eq.f32.partialorder %v6392_v23, %v8508_v38  ;;  %s10640_s13 = smov (%p668_p3), 0  }
 0x202   : >> { %vm8597_vm6 = vmand %vm695_vm11, %vm704_vm12  ;;  %vm699_vm5 = vcmp.eq.f32.partialorder %v6392_v23, %v8521_v50  ;;  %vm700_vm2 = vcmp.eq.f32.partialorder %v6392_v23, %v8518_v48  ;;  %vm701_vm11 = vcmp.eq.f32.partialorder %v6392_v23, %v8530_v57  ;;  %vm710_vm12 = vcmp.gt.s32.totalorder %v8338_v8, %v703_v24 }
 0x203   : >> { %vm8603_vm3 = vmand %vm696_vm13, %vm705_vm14  ;;  %vm702_vm13 = vcmp.eq.f32.partialorder %v6392_v23, %v8528_v56  ;;  %vm711_vm14 = vcmp.gt.s32.totalorder %v8341_v9, %v703_v24  ;;  %v13113_v24 = vmov 0.0   ;;  %v13366_v11 = vmov 0 }
 0x204   : >> { %v13209_v27 = vsel %vm8603_vm3, 4294967295, %v13208_v27  ;;  %vm8609_vm0 = vmand %vm697_vm15, %vm706_vm8  ;;  %vm687_vm15 = vcmp.lt.f32.partialorder %v6392_v23, %v8501_v31  ;;  %v13380_v10 = vmov 0  ;;  %v13414_v22 = vmov 0 }
 0x205   : >> { %v13211_v29 = vsel %vm8609_vm0, 4294967295, %v13210_v29  ;;  %vm8615_vm9 = vmand %vm698_vm10, %vm707_vm7  ;;  %vm688_vm7 = vcmp.lt.f32.partialorder %v6392_v23, %v8498_v28  ;;  %v13418_v21 = vmov 0  ;;  %v13422_v20 = vmov 0 }
 0x206   : >> { %v13213_v30 = vsel %vm8615_vm9, 4294967295, %v13212_v30  ;;  %vm8621_vm3 = vmand %vm699_vm5, %vm708_vm4  ;;  %vm689_vm9 = vcmp.lt.f32.partialorder %v6392_v23, %v8511_v40  ;;  %vm690_vm4 = vcmp.lt.f32.partialorder %v6392_v23, %v8508_v38  ;;  %vm692_vm5 = vcmp.lt.f32.partialorder %v6392_v23, %v8518_v48 }
 0x207   : >> { %vm8626_vm8 = vmand %vm700_vm2, %vm709_vm1  ;;  %vm691_vm2 = vcmp.lt.f32.partialorder %v6392_v23, %v8521_v50  ;;  %v13426_v19 = vmov 0  ;;  %v13442_v18 = vmov 0  ;;  %v13454_v17 = vmov 0 }
 0x208   : >> { %vm8632_vm10 = vmand %vm701_vm11, %vm710_vm12  ;;  %vm13224_vm11 = vnez %v13209_v27  ;;  %v13295_v27 = vmov 0  ;;  %v13460_v2 = vmov 0  ;;  %v13492_v12 = vmov 0 }
 0x209   : >> { %vm8637_vm0 = vmand %vm702_vm13, %vm711_vm14  ;;  %vm693_vm13 = vcmp.lt.f32.partialorder %v6392_v23, %v8530_v57 }
 0x20a   : >> { %v13221_v36 = vsel %vm8637_vm0, 4294967295, %v13220_v36  ;;  %vm8644_vm1 = vmor %vm687_vm15, %vm8597_vm6  ;;  %vm13227_vm6 = vnez %v13211_v29  ;;  %vm694_vm15 = vcmp.lt.f32.partialorder %v6392_v23, %v8528_v56 }
 0x20b   : >> { %v13223_v37 = vsel %vm8644_vm1, 4294967295, %v13222_v37  ;;  %vm8655_vm12 = vmor %vm688_vm7, %vm13224_vm11  ;;  %vm13230_vm1 = vnez %v13213_v30  ;;  %vm759_vm7 = vcmp.eq.f32.partialorder %v8649_v39, %v8501_v31  ;;  %vm768_vm11 = vcmp.gt.s32.totalorder %v8318_v1, %v767_v41 }
 0x20c   : >> { %v13226_v42 = vsel %vm8655_vm12, 4294967295, %v13225_v42  ;;  %vm8662_vm14 = vmor %vm689_vm9, %vm13227_vm6 }
 0x20d   : >> { %vm8669_vm0 = vmor %vm690_vm4, %vm13230_vm1  ;;  %vm760_vm4 = vcmp.eq.f32.partialorder %v8649_v39, %v8498_v28  ;;  %vm769_vm1 = vcmp.gt.s32.totalorder %v8323_v3, %v767_v41  ;;  %v730_v32 = vsel %vm8662_vm14, 1.0, %v13113_v24 }
 0x20e   : >> { %v13232_v44 = vsel %vm8669_vm0, 4294967295, %v13231_v44  ;;  %vm8678_vm12 = vmor %vm691_vm2, %vm8621_vm3  ;;  %vm761_vm3 = vcmp.eq.f32.partialorder %v8649_v39, %v8511_v40  ;;  %vm13239_vm2 = vnez %v13221_v36 }
 0x20f   : >> { %v13234_v45 = vsel %vm8678_vm12, 4294967295, %v13233_v45  ;;  %vm8684_vm9 = vmor %vm692_vm5, %vm8626_vm8  ;;  %vm770_vm8 = vcmp.gt.s32.totalorder %v8326_v4, %v767_v41  ;;  %vm772_vm12 = vcmp.gt.s32.totalorder %v8332_v6, %v767_v41  ;;  %vm13262_vm14 = vnez %v13232_v44 }
 0x210   : >> { %v13236_v46 = vsel %vm8684_vm9, 4294967295, %v13235_v46  ;;  %vm8693_vm6 = vmor %vm693_vm13, %vm8632_vm10  ;;  %vm762_vm9 = vcmp.eq.f32.partialorder %v8649_v39, %v8508_v38  ;;  %vm771_vm10 = vcmp.gt.s32.totalorder %v8329_v5, %v767_v41  ;;  %v731_v36 = vsel %vm13262_vm14, 1.0, %v13113_v24 }
 0x211   : >> { %v13238_v47 = vsel %vm8693_vm6, 4294967295, %v13237_v47  ;;  %vm8702_vm5 = vmor %vm694_vm15, %vm13239_vm2  ;;  %vm763_vm6 = vcmp.eq.f32.partialorder %v8649_v39, %v8521_v50  ;;  %vm773_vm2 = vcmp.gt.s32.totalorder %v8335_v7, %v767_v41  ;;  %vm775_vm15 = vcmp.gt.s32.totalorder %v8341_v9, %v767_v41 }
 0x212   : >> { %v13241_v49 = vsel %vm8702_vm5, 4294967295, %v13240_v49  ;;  %vm8709_vm13 = vmand %vm759_vm7, %vm768_vm11  ;;  %vm765_vm11 = vcmp.eq.f32.partialorder %v8649_v39, %v8530_v57  ;;  %vm13266_vm14 = vnez %v13234_v45 }
 0x213   : >> { %vm8716_vm0 = vmand %vm760_vm4, %vm769_vm1  ;;  %vm774_vm4 = vcmp.gt.s32.totalorder %v8338_v8, %v767_v41 }
 0x214   : >> { %vm8723_vm5 = vmand %vm761_vm3, %vm770_vm8  ;;  %vm13271_vm3 = vnez %v13238_v47  ;;  %v8871_v47 = vadd.f32 %v8158_v61, %v731_v36  ;;  %v13391_v36 = vmov 0 }
 0x215   : >> { %vm8732_vm1 = vmand %vm762_vm9, %vm771_vm10  ;;  %vm13252_vm10 = vnez %v13223_v37  ;;  %v734_v45 = vsel %vm13271_vm3, 1.0, %v13113_v24  ;;  %vm13275_vm3 = vnez %v13241_v49  ;;  %v8887_v49 = vld [vmem:[%s8585_s17 + $0x3] ss:$0 sm:$0xff] }
 0x216   : >> { %vm8749_vm9 = vmand %vm763_vm6, %vm772_vm12  ;;  %v728_v26 = vsel %vm13252_vm10, 1.0, %v13113_v24  ;;  %vm13253_vm12 = vcmp.eq.f32.partialorder %v8649_v39, %v8518_v48  ;;  %vm13256_vm10 = vnez %v13226_v42 }
 0x217   : >> { %vm8768_vm6 = vmand %vm13253_vm12, %vm773_vm2  ;;  %v729_v29 = vsel %vm13256_vm10, 1.0, %v13113_v24  ;;  %vm823_vm2 = vcmp.eq.f32.partialorder %v8737_v55, %v8501_v31  ;;  %vm13259_vm12 = vcmp.eq.f32.partialorder %v8649_v39, %v8528_v56  ;;  %v8812_v37 = vadd.f32 %v8170_v0, %v728_v26 }
 0x218   : >> { %vm8784_vm7 = vmand %vm765_vm11, %vm774_vm4  ;;  %v732_v0 = vsel %vm13266_vm14, 1.0, %v13113_v24  ;;  %vm13267_vm11 = vnez %v13236_v46  ;;  %v8834_v43 = vadd.f32 %v8166_v63, %v729_v29  ;;  %v8851_v46 = vadd.f32 %v8162_v62, %v730_v32  ;;  %v9033_v32 = vld [vmem:[%s8585_s17 + $0x4] ss:$0 sm:$0xff] }
 0x219   : >> { %vm8798_vm10 = vmand %vm13259_vm12, %vm775_vm15  ;;  %vm13263_vm15 = vcmp.lt.f32.partialorder %v8649_v39, %v8501_v31  ;;  %v733_v42 = vsel %vm13267_vm11, 1.0, %v13113_v24  ;;  %vm13272_vm11 = vcmp.lt.f32.partialorder %v8649_v39, %v8511_v40  ;;  %v735_v62 = vsel %vm13275_vm3, 1.0, %v13113_v24 }
 0x21a   : >> { %vm8819_vm12 = vmor %vm13263_vm15, %vm8709_vm13  ;;  %vm13268_vm13 = vcmp.lt.f32.partialorder %v8649_v39, %v8498_v28  ;;  %v8890_v61 = vadd.f32 %v8154_v60, %v732_v0  ;;  %v8893_v52 = vadd.f32 %v8150_v59, %v733_v42  ;;  %v8909_v60 = vadd.f32 %v8146_v58, %v734_v45 }
 0x21b   : >> { %vm8841_vm15 = vmor %vm13268_vm13, %vm8716_vm0  ;;  %vm832_vm13 = vcmp.gt.s32.totalorder %v8318_v1, %v8806_v35  ;;  %vm13282_vm14 = vcmp.lt.f32.partialorder %v8649_v39, %v8518_v48  ;;  %v13285_v58 = vmov 0  ;;  %v8939_v23 = vadd.f32 %v8142_v33, %v735_v62 }
 0x21c   : >> { %vm8858_vm4 = vmor %vm13272_vm11, %vm8723_vm5  ;;  %vm13276_vm5 = vcmp.lt.f32.partialorder %v8649_v39, %v8508_v38  ;;  %vm13290_vm0 = vcmp.gt.s32.totalorder %v8323_v3, %v8806_v35  ;;  %v13299_v29 = vmov 0  ;;  %v792_v34 = vsel %vm8819_vm12, 1.0, %v13113_v24 }
 0x21d   : >> { %vm8878_vm11 = vmor %vm13276_vm5, %vm8732_vm1  ;;  %vm13279_vm1 = vcmp.lt.f32.partialorder %v8649_v39, %v8521_v50  ;;  %v793_v41 = vsel %vm8841_vm15, 1.0, %v13113_v24  ;;  %v9075_v42 = vstv %s936_s21  ;;  %v794_v44 = vsel %vm8858_vm4, 1.0, %v13113_v24 }
 0x21e   : >> { %vm8900_vm3 = vmor %vm13279_vm1, %vm8749_vm9  ;;  %vm13291_vm1 = vcmp.eq.f32.partialorder %v8737_v55, %v8498_v28  ;;  %vm13317_vm15 = vcmp.gt.s32.totalorder %v8341_v9, %v8806_v35  ;;  %v9101_v63 = vadd.f32 %v792_v34, %v8812_v37  ;;  %v13323_v62 = vmov 0 }
 0x21f   : >> { %vm8916_vm8 = vmor %vm13282_vm14, %vm8768_vm6  ;;  %vm13287_vm6 = vcmp.lt.f32.partialorder %v8649_v39, %v8530_v57  ;;  %v796_v37 = vsel %vm8900_vm3, 1.0, %v13113_v24  ;;  %v9123_v51 = vadd.f32 %v793_v41, %v8834_v43  ;;  %v13327_v34 = vmov 0 }
 0x220   : >> { %vm8932_vm5 = vmand %vm823_vm2, %vm832_vm13  ;;  %v9142_v43 = vadd.f32 %v794_v44, %v8851_v46  ;;  %vm13329_vm12 = vcmp.gt.s32.totalorder %v8326_v4, %v8936_v54  ;;  %v9161_v46 = vld [vmem:[%s8585_s17 + $0x5] ss:$0 sm:$0xff]  ;;  %v9163_v41 = vstv %s1000_s22  ;;  %vm13341_vm3 = vcmp.gt.s32.totalorder %v8332_v6, %v8936_v54 }
 0x221   : >> { %v13286_v58 = vsel %vm8932_vm5, 4294967295, %v13285_v58  ;;  %vm8946_vm14 = vmor %vm13287_vm6, %vm8784_vm7  ;;  %vm13294_vm6 = vcmp.lt.f32.partialorder %v8649_v39, %v8528_v56  ;;  %vm13298_vm7 = vcmp.eq.f32.partialorder %v8737_v55, %v8511_v40  ;;  %v13354_v26 = vmov 0 }
 0x222   : >> { %vm8962_vm5 = vmand %vm13291_vm1, %vm13290_vm0  ;;  %vm13297_vm1 = vcmp.gt.s32.totalorder %v8326_v4, %v8806_v35  ;;  %vm13306_vm0 = vcmp.eq.f32.partialorder %v8737_v55, %v8521_v50  ;;  %v13406_v45 = vmov 0  ;;  %v13477_v59 = vmov 0 }
 0x223   : >> { %vm8973_vm2 = vmor %vm13294_vm6, %vm8798_vm10  ;;  %vm13301_vm10 = vcmp.gt.s32.totalorder %v8329_v5, %v8806_v35  ;;  %vm13302_vm6 = vcmp.eq.f32.partialorder %v8737_v55, %v8508_v38 }
 0x224   : >> { %v13296_v27 = vsel %vm8973_vm2, 4294967295, %v13295_v27  ;;  %vm8987_vm13 = vmand %vm13298_vm7, %vm13297_vm1  ;;  %vm13309_vm7 = vcmp.gt.s32.totalorder %v8335_v7, %v8806_v35 }
 0x225   : >> { %v13300_v29 = vsel %vm8987_vm13, 4294967295, %v13299_v29  ;;  %vm8997_vm9 = vmand %vm13302_vm6, %vm13301_vm10  ;;  %vm13305_vm6 = vcmp.gt.s32.totalorder %v8332_v6, %v8806_v35  ;;  %vm13310_vm13 = vcmp.eq.f32.partialorder %v8737_v55, %v8518_v48 }
 0x226   : >> { %vm9020_vm2 = vmand %vm13306_vm0, %vm13305_vm6  ;;  %vm13313_vm6 = vcmp.gt.s32.totalorder %v8338_v8, %v8806_v35  ;;  %v795_v35 = vsel %vm8878_vm11, 1.0, %v13113_v24 }
 0x227   : >> { %vm9048_vm1 = vmand %vm13310_vm13, %vm13309_vm7  ;;  %vm13314_vm13 = vcmp.eq.f32.partialorder %v8737_v55, %v8530_v57  ;;  %v9166_v44 = vadd.f32 %v795_v35, %v8871_v47  ;;  %v797_v47 = vsel %vm8916_vm8, 1.0, %v13113_v24  ;;  %v9190_v35 = vadd.f32 %v796_v37, %v8890_v61 }
 0x228   : >> { %vm9067_vm7 = vmand %vm13314_vm13, %vm13313_vm6  ;;  %vm13318_vm6 = vcmp.eq.f32.partialorder %v8737_v55, %v8528_v56  ;;  %vm13342_vm8 = vcmp.eq.f32.partialorder %v8887_v49, %v8521_v50  ;;  %v13350_v37 = vmov 0  ;;  %v9324_v39 = vadd.f32 %v797_v47, %v8893_v52 }
 0x229   : >> { %vm9086_vm13 = vmand %vm13318_vm6, %vm13317_vm15  ;;  %vm13321_vm15 = vcmp.gt.s32.totalorder %v8318_v1, %v8936_v54  ;;  %vm13322_vm6 = vcmp.eq.f32.partialorder %v8887_v49, %v8501_v31  ;;  %v13394_v47 = vmov 0 }
 0x22a   : >> { %vm9111_vm10 = vmand %vm13322_vm6, %vm13321_vm15  ;;  %vm13325_vm15 = vcmp.gt.s32.totalorder %v8323_v3, %v8936_v54  ;;  %vm13326_vm6 = vcmp.eq.f32.partialorder %v8887_v49, %v8498_v28 }
 0x22b   : >> { %v13324_v62 = vsel %vm9111_vm10, 4294967295, %v13323_v62  ;;  %vm9133_vm11 = vmand %vm13326_vm6, %vm13325_vm15  ;;  %vm13330_vm15 = vcmp.eq.f32.partialorder %v8887_v49, %v8511_v40 }
 0x22c   : >> { %v13328_v34 = vsel %vm9133_vm11, 4294967295, %v13327_v34  ;;  %vm9152_vm6 = vmand %vm13330_vm15, %vm13329_vm12  ;;  %vm13333_vm12 = vcmp.gt.s32.totalorder %v8329_v5, %v8936_v54  ;;  %vm13334_vm15 = vcmp.eq.f32.partialorder %v8887_v49, %v8508_v38 }
 0x22d   : >> { %v13332_v53 = vsel %vm9152_vm6, 4294967295, %v13331_v53  ;;  %vm9176_vm0 = vmand %vm13334_vm15, %vm13333_vm12  ;;  %vm13337_vm12 = vnez %v13286_v58  ;;  %vm13338_vm15 = vcmp.lt.f32.partialorder %v8737_v55, %v8501_v31  ;;  %vm13345_vm6 = vcmp.gt.s32.totalorder %v8318_v1, %v9075_v42 }
 0x22e   : >> { %v13336_v13 = vsel %vm9176_vm0, 4294967295, %v13335_v13  ;;  %vm9197_vm4 = vmor %vm13338_vm15, %vm13337_vm12  ;;  %v798_v58 = vsel %vm8946_vm14, 1.0, %v13113_v24  ;;  %vm13357_vm0 = vcmp.eq.f32.partialorder %v9033_v32, %v8498_v28  ;;  %vm13361_vm14 = vnez %v13300_v29 }
 0x22f   : >> { %v13340_v25 = vsel %vm9197_vm4, 4294967295, %v13339_v25  ;;  %vm9209_vm11 = vmand %vm13342_vm8, %vm13341_vm3  ;;  %vm13346_vm4 = vcmp.eq.f32.partialorder %v9033_v32, %v8501_v31  ;;  %vm13349_vm3 = vcmp.lt.f32.partialorder %v8737_v55, %v8498_v28  ;;  %v9375_v30 = vadd.f32 %v798_v58, %v8909_v60 }
 0x230   : >> { %vm9225_vm10 = vmand %vm13346_vm4, %vm13345_vm6  ;;  %vm13352_vm4 = vcmp.gt.s32.totalorder %v8335_v7, %v8936_v54  ;;  %vm13353_vm6 = vcmp.eq.f32.partialorder %v8887_v49, %v8518_v48  ;;  %v13398_v60 = vmov 0  ;;  %v9455_v58 = vstv %s1064_s23 }
 0x231   : >> { %vm9237_vm8 = vmor %vm13349_vm3, %vm8962_vm5  ;;  %vm13356_vm3 = vcmp.gt.s32.totalorder %v8323_v3, %v9075_v42  ;;  %vm13360_vm5 = vnez %v13296_v27 }
 0x232   : >> { %v13351_v37 = vsel %vm9237_vm8, 4294967295, %v13350_v37  ;;  %vm9249_vm12 = vmand %vm13353_vm6, %vm13352_vm4  ;;  %v799_v15 = vsel %vm13360_vm5, 1.0, %v13113_v24  ;;  %vm13368_vm4 = vcmp.gt.s32.totalorder %v8338_v8, %v8936_v54  ;;  %vm13373_vm5 = vcmp.eq.f32.partialorder %v9033_v32, %v8511_v40 }
 0x233   : >> { %v13355_v26 = vsel %vm9249_vm12, 4294967295, %v13354_v26  ;;  %vm9263_vm15 = vmand %vm13357_vm0, %vm13356_vm3  ;;  %vm13362_vm12 = vcmp.lt.f32.partialorder %v8737_v55, %v8511_v40  ;;  %vm13365_vm0 = vcmp.lt.f32.partialorder %v8737_v55, %v8508_v38  ;;  %vm13376_vm6 = vcmp.lt.f32.partialorder %v8737_v55, %v8521_v50 }
 0x234   : >> { %vm9279_vm8 = vmor %vm13362_vm12, %vm13361_vm14  ;;  %vm13369_vm12 = vcmp.eq.f32.partialorder %v8887_v49, %v8530_v57  ;;  %v13377_v24 = vmov 0  ;;  %v9424_v0 = vadd.f32 %v799_v15, %v8939_v23  ;;  %v13410_v15 = vmov 0  ;;  %v9453_v23 = vld [vmem:[%s8585_s17 + $0x6] ss:$0 sm:$0xff] }
 0x235   : >> { %vm9288_vm3 = vmor %vm13365_vm0, %vm8997_vm9  ;;  %vm13372_vm0 = vcmp.gt.s32.totalorder %v8326_v4, %v9075_v42 }
 0x236   : >> { %v13367_v11 = vsel %vm9288_vm3, 4294967295, %v13366_v11  ;;  %vm9300_vm14 = vmand %vm13369_vm12, %vm13368_vm4  ;;  %vm13382_vm12 = vcmp.gt.s32.totalorder %v8341_v9, %v8936_v54  ;;  %vm13387_vm4 = vcmp.eq.f32.partialorder %v9033_v32, %v8508_v38  ;;  %v13388_v54 = vmov 0 }
 0x237   : >> { %vm9314_vm3 = vmand %vm13373_vm5, %vm13372_vm0  ;;  %vm13379_vm5 = vcmp.lt.f32.partialorder %v8737_v55, %v8518_v48 }
 0x238   : >> { %vm9331_vm9 = vmor %vm13376_vm6, %vm9020_vm2  ;;  %vm13383_vm2 = vcmp.eq.f32.partialorder %v8887_v49, %v8528_v56 }
 0x239   : >> { %v13378_v24 = vsel %vm9331_vm9, 4294967295, %v13377_v24  ;;  %vm9340_vm0 = vmor %vm13379_vm5, %vm9048_vm1  ;;  %vm13386_vm5 = vcmp.gt.s32.totalorder %v8329_v5, %v9075_v42  ;;  %vm13390_vm9 = vcmp.lt.f32.partialorder %v8737_v55, %v8530_v57 }
 0x23a   : >> { %v13381_v10 = vsel %vm9340_vm0, 4294967295, %v13380_v10  ;;  %vm9352_vm6 = vmand %vm13383_vm2, %vm13382_vm12  ;;  %vm13400_vm12 = vcmp.gt.s32.totalorder %v8318_v1, %v9163_v41  ;;  %vm13401_vm2 = vcmp.eq.f32.partialorder %v9161_v46, %v8501_v31 }
 0x23b   : >> { %vm9366_vm0 = vmand %vm13387_vm4, %vm13386_vm5  ;;  %vm13393_vm4 = vcmp.lt.f32.partialorder %v8737_v55, %v8528_v56  ;;  %v13402_v55 = vmov 0 }
 0x23c   : >> { %v13389_v54 = vsel %vm9366_vm0, 4294967295, %v13388_v54  ;;  %vm9382_vm1 = vmor %vm13390_vm9, %vm9067_vm7  ;;  %vm13396_vm7 = vcmp.gt.s32.totalorder %v8332_v6, %v9075_v42  ;;  %vm13397_vm9 = vcmp.eq.f32.partialorder %v9033_v32, %v8521_v50 }
 0x23d   : >> { %v13392_v36 = vsel %vm9382_vm1, 4294967295, %v13391_v36  ;;  %vm9391_vm5 = vmor %vm13393_vm4, %vm9086_vm13  ;;  %vm13405_vm13 = vcmp.eq.f32.partialorder %v9033_v32, %v8518_v48 }
 0x23e   : >> { %v13395_v47 = vsel %vm9391_vm5, 4294967295, %v13394_v47  ;;  %vm9405_vm1 = vmand %vm13397_vm9, %vm13396_vm7  ;;  %vm13404_vm9 = vcmp.gt.s32.totalorder %v8335_v7, %v9075_v42  ;;  %vm13409_vm7 = vcmp.eq.f32.partialorder %v9161_v46, %v8498_v28 }
 0x23f   : >> { %v13399_v60 = vsel %vm9405_vm1, 4294967295, %v13398_v60  ;;  %vm9419_vm5 = vmand %vm13401_vm2, %vm13400_vm12  ;;  %vm13413_vm12 = vcmp.eq.f32.partialorder %v9033_v32, %v8530_v57 }
 0x240   : >> { %v13403_v55 = vsel %vm9419_vm5, 4294967295, %v13402_v55  ;;  %vm9434_vm4 = vmand %vm13405_vm13, %vm13404_vm9  ;;  %vm13408_vm5 = vcmp.gt.s32.totalorder %v8323_v3, %v9163_v41  ;;  %vm13412_vm9 = vcmp.gt.s32.totalorder %v8338_v8, %v9075_v42  ;;  %vm13424_vm13 = vcmp.gt.s32.totalorder %v8341_v9, %v9075_v42 }
 0x241   : >> { %v13407_v45 = vsel %vm9434_vm4, 4294967295, %v13406_v45  ;;  %vm9448_vm1 = vmand %vm13409_vm7, %vm13408_vm5  ;;  %vm13416_vm4 = vcmp.gt.s32.totalorder %v8326_v4, %v9163_v41  ;;  %vm13420_vm5 = vnez %v13324_v62  ;;  %vm13421_vm7 = vcmp.lt.f32.partialorder %v8887_v49, %v8501_v31 }
 0x242   : >> { %v13411_v15 = vsel %vm9448_vm1, 4294967295, %v13410_v15  ;;  %vm9465_vm2 = vmand %vm13413_vm12, %vm13412_vm9  ;;  %vm13417_vm12 = vcmp.eq.f32.partialorder %v9161_v46, %v8511_v40  ;;  %v13430_v42 = vmov 0  ;;  %v13434_v62 = vmov 0 }
 0x243   : >> { %v13415_v22 = vsel %vm9465_vm2, 4294967295, %v13414_v22  ;;  %vm9483_vm9 = vmand %vm13417_vm12, %vm13416_vm4  ;;  %vm13425_vm4 = vcmp.eq.f32.partialorder %v9033_v32, %v8528_v56  ;;  %vm13441_vm1 = vcmp.lt.f32.partialorder %v8887_v49, %v8511_v40 }
 0x244   : >> { %v13419_v21 = vsel %vm9483_vm9, 4294967295, %v13418_v21  ;;  %vm9492_vm2 = vmor %vm13421_vm7, %vm13420_vm5  ;;  %vm13432_vm9 = vnez %v13328_v34  ;;  %vm13433_vm5 = vcmp.lt.f32.partialorder %v8887_v49, %v8498_v28  ;;  %v13438_v34 = vmov 0 }
 0x245   : >> { %v13423_v20 = vsel %vm9492_vm2, 4294967295, %v13422_v20  ;;  %vm9504_vm12 = vmand %vm13425_vm4, %vm13424_vm13  ;;  %vm13428_vm2 = vcmp.gt.s32.totalorder %v8329_v5, %v9163_v41  ;;  %vm13429_vm13 = vcmp.eq.f32.partialorder %v9161_v46, %v8508_v38  ;;  %vm13440_vm7 = vnez %v13332_v53 }
 0x246   : >> { %v13427_v19 = vsel %vm9504_vm12, 4294967295, %v13426_v19  ;;  %vm9522_vm4 = vmand %vm13429_vm13, %vm13428_vm2  ;;  %vm13436_vm13 = vcmp.gt.s32.totalorder %v8332_v6, %v9163_v41  ;;  %v13450_v53 = vmov 0 }
 0x247   : >> { %v13431_v42 = vsel %vm9522_vm4, 4294967295, %v13430_v42  ;;  %vm9531_vm12 = vmor %vm13433_vm5, %vm13432_vm9  ;;  %vm13437_vm4 = vcmp.eq.f32.partialorder %v9161_v46, %v8521_v50  ;;  %vm13445_vm9 = vcmp.eq.f32.partialorder %v9161_v46, %v8518_v48  ;;  %vm13453_vm5 = vcmp.eq.f32.partialorder %v9161_v46, %v8530_v57 }
 0x248   : >> { %v13435_v62 = vsel %vm9531_vm12, 4294967295, %v13434_v62  ;;  %vm9547_vm0 = vmand %vm13437_vm4, %vm13436_vm13  ;;  %vm13444_vm13 = vcmp.gt.s32.totalorder %v8335_v7, %v9163_v41  ;;  %vm13448_vm4 = vnez %v13336_v13  ;;  %v13457_v13 = vmov 0.0  }
 0x249   : >> { %v13439_v34 = vsel %vm9547_vm0, 4294967295, %v13438_v34  ;;  %vm9560_vm2 = vmor %vm13441_vm1, %vm13440_vm7 }
 0x24a   : >> { %v13443_v18 = vsel %vm9560_vm2, 4294967295, %v13442_v18  ;;  %vm9572_vm0 = vmand %vm13445_vm9, %vm13444_vm13  ;;  %vm13449_vm2 = vcmp.lt.f32.partialorder %v8887_v49, %v8508_v38  ;;  %vm13452_vm13 = vcmp.gt.s32.totalorder %v8338_v8, %v9163_v41  ;;  %vm13476_vm9 = vcmp.lt.f32.partialorder %v8887_v49, %v8518_v48 }
 0x24b   : >> { %vm9587_vm12 = vmor %vm13449_vm2, %vm13448_vm4  ;;  %vm13462_vm2 = vcmp.lt.f32.partialorder %v9033_v32, %v8501_v31  ;;  %vm13465_vm4 = vcmp.gt.s32.totalorder %v8341_v9, %v9163_v41 }
 0x24c   : >> { %v13451_v53 = vsel %vm9587_vm12, 4294967295, %v13450_v53  ;;  %vm9599_vm1 = vmand %vm13453_vm5, %vm13452_vm13  ;;  %vm13458_vm12 = vnez %v13340_v25  ;;  %vm13459_vm5 = vcmp.lt.f32.partialorder %v8887_v49, %v8521_v50  ;;  %v13467_v25 = vmov 0 }
 0x24d   : >> { %v13455_v17 = vsel %vm9599_vm1, 4294967295, %v13454_v17  ;;  %v856_v14 = vsel %vm13458_vm12, 1.0, %v13457_v13  ;;  %vm9619_vm13 = vmor %vm13459_vm5, %vm9209_vm11  ;;  %vm13466_vm11 = vcmp.eq.f32.partialorder %v9161_v46, %v8528_v56  ;;  %vm13470_vm12 = vcmp.gt.s32.totalorder %v8318_v1, %v9455_v58 }
 0x24e   : >> { %13456 = vst [vmem:[#allocation24_spill] sm:$0xff] %v13455_v17  ;;  %v13461_v2 = vsel %vm9619_vm13, 4294967295, %v13460_v2  ;;  %vm9628_vm7 = vmor %vm13462_vm2, %vm9225_vm10  ;;  %v13463_v17 = vmov 0  ;;  %vm13496_vm2 = vcmp.eq.f32.partialorder %v9453_v23, %v8511_v40 }
 0x24f   : >> { %v13464_v17 = vsel %vm9628_vm7, 4294967295, %v13463_v17  ;;  %vm9640_vm5 = vmand %vm13466_vm11, %vm13465_vm4  ;;  %vm13471_vm7 = vcmp.eq.f32.partialorder %v9453_v23, %v8501_v31  ;;  %vm13474_vm4 = vnez %v13351_v37  ;;  %vm13475_vm11 = vnez %v13355_v26 }
 0x250   : >> { %v13468_v25 = vsel %vm9640_vm5, 4294967295, %v13467_v25  ;;  %vm9656_vm13 = vmand %vm13471_vm7, %vm13470_vm12  ;;  %v857_v61 = vsel %vm13474_vm4, 1.0, %v13457_v13  ;;  %vm13479_vm7 = vcmp.lt.f32.partialorder %v9033_v32, %v8498_v28  ;;  %v858_v26 = vsel %vm9279_vm8, 1.0, %v13457_v13 }
 0x251   : >> { %13469 = vst [vmem:[#allocation25_spill] sm:$0xff] %v13468_v25  ;;  %vm9668_vm10 = vmor %vm13476_vm9, %vm13475_vm11  ;;  %v13480_v25 = vmov 0  ;;  %vm13483_vm11 = vcmp.gt.s32.totalorder %v8323_v3, %v9455_v58 }
 0x252   : >> { %v13478_v59 = vsel %vm9668_vm10, 4294967295, %v13477_v59  ;;  %vm9677_vm12 = vmor %vm13479_vm7, %vm9263_vm15  ;;  %vm13484_vm10 = vcmp.eq.f32.partialorder %v9453_v23, %v8498_v28  ;;  %vm13487_vm15 = vnez %v13367_v11  ;;  %vm13488_vm7 = vcmp.lt.f32.partialorder %v8887_v49, %v8530_v57 }
 0x253   : >> { %v13481_v25 = vsel %vm9677_vm12, 4294967295, %v13480_v25  ;;  %vm9693_vm5 = vmand %vm13484_vm10, %vm13483_vm11  ;;  %v859_v33 = vsel %vm13487_vm15, 1.0, %v13457_v13  ;;  %vm13491_vm10 = vcmp.lt.f32.partialorder %v9033_v32, %v8511_v40  ;;  %vm13501_vm11 = vcmp.lt.f32.partialorder %v8887_v49, %v8528_v56 }
 0x254   : >> { %13482 = vst [vmem:[#allocation26_spill] sm:$0xff] %v13481_v25  ;;  %vm9708_vm4 = vmor %vm13488_vm7, %vm9300_vm14  ;;  %v13489_v25 = vmov 0  ;;  %vm13495_vm7 = vcmp.gt.s32.totalorder %v8326_v4, %v9455_v58  ;;  %vm13516_vm14 = vcmp.lt.f32.partialorder %v9033_v32, %v8521_v50 }
 0x255   : >> { %v13490_v25 = vsel %vm9708_vm4, 4294967295, %v13489_v25  ;;  %vm9717_vm8 = vmor %vm13491_vm10, %vm9314_vm3  ;;  %vm13499_vm3 = vnez %v13378_v24  ;;  %vm13500_vm10 = vnez %v13381_v10  ;;  %v13506_v24 = vmov 0 }
 0x256   : >> { %v13493_v12 = vsel %vm9717_vm8, 4294967295, %v13492_v12  ;;  %vm9733_vm9 = vmand %vm13496_vm2, %vm13495_vm7  ;;  %v860_v27 = vsel %vm13499_vm3, 1.0, %v13457_v13  ;;  %v861_v29 = vsel %vm13500_vm10, 1.0, %v13457_v13  ;;  %vm13504_vm2 = vnez %v13389_v54 }
 0x257   : >> { %13494 = vst [vmem:[#allocation27_spill] sm:$0xff] %v13493_v12  ;;  %vm9748_vm15 = vmor %vm13501_vm11, %vm9352_vm6  ;;  %v13502_v12 = vmov 0  ;;  %vm13505_vm7 = vcmp.lt.f32.partialorder %v9033_v32, %v8508_v38  ;;  %vm13509_vm11 = vcmp.gt.s32.totalorder %v8329_v5, %v9455_v58  ;;  %vm13515_vm10 = vnez %v13399_v60  ;;  %v9817_v60 = vld [vmem:[%s8585_s17 + $0x7] ss:$0 sm:$0xff] }
 0x258   : >> { %v13503_v12 = vsel %vm9748_vm15, 4294967295, %v13502_v12  ;;  %vm9757_vm3 = vmor %vm13505_vm7, %vm13504_vm2  ;;  %vm13510_vm15 = vcmp.eq.f32.partialorder %v9453_v23, %v8508_v38  ;;  %vm13513_vm2 = vnez %v13392_v36  ;;  %vm13514_vm7 = vnez %v13395_v47 }
 0x259   : >> { %v13507_v24 = vsel %vm9757_vm3, 4294967295, %v13506_v24  ;;  %vm9773_vm8 = vmand %vm13510_vm15, %vm13509_vm11  ;;  %v862_v49 = vsel %vm13513_vm2, 1.0, %v13457_v13  ;;  %v863_v52 = vsel %vm13514_vm7, 1.0, %v13457_v13  ;;  %v13517_v54 = vmov 0 }
 0x25a   : >> { %13508 = vst [vmem:[#allocation28_spill] sm:$0xff] %v13507_v24  ;;  %vm9789_vm6 = vmor %vm13516_vm14, %vm13515_vm10  ;;  %vm13520_vm15 = vnez %v13403_v55  ;;  %vm13521_vm11 = vcmp.lt.f32.partialorder %v9161_v46, %v8501_v31  ;;  %v13522_v36 = vmov 0  ;;  %vm13525_vm14 = vcmp.gt.s32.totalorder %v8332_v6, %v9455_v58 }
 0x25b   : >> { %v13518_v54 = vsel %vm9789_vm6, 4294967295, %v13517_v54  ;;  %vm9798_vm3 = vmor %vm13521_vm11, %vm13520_vm15  ;;  %vm13526_vm10 = vcmp.eq.f32.partialorder %v9453_v23, %v8521_v50  ;;  %v13527_v47 = vmov 0  ;;  %v864_v55 = vadd.f32 %v856_v14, %v9101_v63 }
 0x25c   : >> { %13519 = vst [vmem:[#allocation29_spill] sm:$0xff] %v13518_v54  ;;  %v13523_v36 = vsel %vm9798_vm3, 4294967295, %v13522_v36  ;;  %vm9812_vm6 = vmand %vm13526_vm10, %vm13525_vm14  ;;  %v866_v54 = vadd.f32 %v858_v26, %v9142_v43  ;;  %vm13529_vm15 = vnez %v13407_v45  ;;  %vm13530_vm11 = vcmp.lt.f32.partialorder %v9033_v32, %v8518_v48 }
 0x25d   : >> { %13524 = vst [vmem:[#allocation30_spill] sm:$0xff] %v13523_v36  ;;  %v13528_v47 = vsel %vm9812_vm6, 4294967295, %v13527_v47  ;;  %v865_v36 = vadd.f32 %v857_v61, %v9123_v51  ;;  %vm9827_vm2 = vmor %vm13530_vm11, %vm13529_vm15  ;;  %v13531_v24 = vmov 0  ;;  %vm13533_vm14 = vnez %v13411_v15 }
 0x25e   : >> { %v13532_v24 = vsel %vm9827_vm2, 4294967295, %v13531_v24  ;;  %vm13534_vm10 = vcmp.lt.f32.partialorder %v9161_v46, %v8498_v28  ;;  %v13535_v14 = vmov 0  ;;  %vm13537_vm4 = vcmp.gt.s32.totalorder %v8335_v7, %v9455_v58 }
 0x25f   : >> { %vm9836_vm7 = vmor %vm13534_vm10, %vm13533_vm14  ;;  %vm13538_vm15 = vcmp.eq.f32.partialorder %v9453_v23, %v8518_v48  ;;  %v13539_v63 = vmov 0  ;;  %v867_v51 = vadd.f32 %v859_v33, %v9166_v44  ;;  %v868_v43 = vadd.f32 %v860_v27, %v9190_v35  ;;  %v13591_v27 = vld [vmem:[#allocation25_spill] sm:$0xff] }
 0x260   : >> { %v13536_v14 = vsel %vm9836_vm7, 4294967295, %v13535_v14  ;;  %vm9848_vm11 = vmand %vm13538_vm15, %vm13537_vm4  ;;  %v869_v45 = vadd.f32 %v861_v29, %v9324_v39  ;;  %vm13541_vm14 = vnez %v13415_v22  ;;  %vm13542_vm10 = vcmp.lt.f32.partialorder %v9033_v32, %v8530_v57 }
 0x261   : >> { %v13540_v63 = vsel %vm9848_vm11, 4294967295, %v13539_v63  ;;  %vm9860_vm3 = vmor %vm13542_vm10, %vm13541_vm14  ;;  %v13543_v15 = vmov 0  ;;  %vm13545_vm4 = vnez %v13419_v21  ;;  %vm13546_vm15 = vcmp.lt.f32.partialorder %v9161_v46, %v8511_v40 }
 0x262   : >> { %v13544_v15 = vsel %vm9860_vm3, 4294967295, %v13543_v15  ;;  %vm9869_vm7 = vmor %vm13546_vm15, %vm13545_vm4  ;;  %v13547_v44 = vmov 0  ;;  %vm13549_vm2 = vcmp.gt.s32.totalorder %v8338_v8, %v9455_v58  ;;  %vm13550_vm11 = vcmp.eq.f32.partialorder %v9453_v23, %v8530_v57 }
 0x263   : >> { %v13548_v44 = vsel %vm9869_vm7, 4294967295, %v13547_v44  ;;  %vm9879_vm6 = vmand %vm13550_vm11, %vm13549_vm2  ;;  %v13551_v22 = vmov 0  ;;  %v9883_v35 = vstv %s1128_s24  ;;  %v870_v21 = vadd.f32 %v862_v49, %v9375_v30 }
 0x264   : >> { %v13552_v22 = vsel %vm9879_vm6, 4294967295, %v13551_v22  ;;  %v9887_v39 = vadd.f32 %v863_v52, %v9424_v0  ;;  %vm13553_vm14 = vnez %v13423_v20  ;;  %vm13554_vm10 = vnez %v13427_v19 }
 0x265   : >> { %v920_v61 = vsel %vm13553_vm14, 1.0, %v13457_v13  ;;  %vm13555_vm4 = vcmp.lt.f32.partialorder %v9033_v32, %v8528_v56  ;;  %vm13558_vm11 = vnez %v13431_v42  ;;  %vm13559_vm15 = vcmp.lt.f32.partialorder %v9161_v46, %v8508_v38 }
 0x266   : >> { %vm9897_vm2 = vmor %vm13555_vm4, %vm13554_vm10  ;;  %v13560_v30 = vmov 0  ;;  %vm13562_vm14 = vcmp.gt.s32.totalorder %v8341_v9, %v9455_v58  ;;  %vm13563_vm3 = vcmp.eq.f32.partialorder %v9453_v23, %v8528_v56  ;;  %vm13566_vm4 = vnez %v13435_v62 }
 0x267   : >> { %vm9906_vm7 = vmor %vm13559_vm15, %vm13558_vm11  ;;  %v921_v20 = vsel %vm13566_vm4, 1.0, %v13457_v13  ;;  %vm13567_vm11 = vnez %v13439_v34  ;;  %vm13568_vm15 = vcmp.lt.f32.partialorder %v9161_v46, %v8521_v50  ;;  %v13576_v42 = vmov 0 }
 0x268   : >> { %v13561_v30 = vsel %vm9906_vm7, 4294967295, %v13560_v30  ;;  %vm9916_vm6 = vmand %vm13563_vm3, %vm13562_vm14  ;;  %vm13571_vm3 = vcmp.lt.f32.partialorder %v9453_v23, %v8501_v31  ;;  %vm13578_vm10 = vcmp.lt.f32.partialorder %v9453_v23, %v8498_v28  ;;  %v929_v33 = vadd.f32 %v921_v20, %v865_v36  ;;  %v13606_v36 = vld [vmem:[#allocation27_spill] sm:$0xff] }
 0x269   : >> { %vm9930_vm7 = vmor %vm13568_vm15, %vm13567_vm11  ;;  %vm13574_vm15 = vnez %v13443_v18  ;;  %v928_v18 = vadd.f32 %v920_v61, %v864_v55  ;;  %v985_v49 = vsel %vm9677_vm12, 1.0, %v13457_v13  ;;  %v13603_v52 = vmov 0 }
 0x26a   : >> { %vm9939_vm14 = vmor %vm13571_vm3, %vm9656_vm13  ;;  %v922_v58 = vsel %vm13574_vm15, 1.0, %v13457_v13  ;;  %vm13575_vm13 = vcmp.lt.f32.partialorder %v9161_v46, %v8518_v48  ;;  %vm13586_vm15 = vcmp.lt.f32.partialorder %v9453_v23, %v8511_v40  ;;  %vm13607_vm12 = vnez %v13606_v36 }
 0x26b   : >> { %vm9957_vm3 = vmor %vm13575_vm13, %vm9572_vm0  ;;  %vm13605_vm0 = vnez %v13490_v25  ;;  %v13610_v55 = vmov 0  ;;  %v993_v34 = vadd.f32 %v985_v49, %v929_v33  ;;  %v1052_v26 = vsel %vm9930_vm7, 1.0, %v13457_v13 }
 0x26c   : >> { %v13577_v42 = vsel %vm9957_vm3, 4294967295, %v13576_v42  ;;  %vm9966_vm4 = vmor %vm13578_vm10, %vm9693_vm5  ;;  %vm13581_vm3 = vnez %v13451_v53  ;;  %vm13583_vm5 = vcmp.lt.f32.partialorder %v9161_v46, %v8530_v57  ;;  %vm13648_vm7 = vcmp.gt.s32.totalorder %v8332_v6, %v9883_v35 }
 0x26d   : >> { %v923_v16 = vsel %vm13581_vm3, 1.0, %v13457_v13  ;;  %vm9986_vm10 = vmor %vm13583_vm5, %vm9599_vm1  ;;  %vm13589_vm5 = vnez %v13461_v2  ;;  %vm13593_vm3 = vcmp.lt.f32.partialorder %v9161_v46, %v8528_v56  ;;  %vm13596_vm1 = vcmp.lt.f32.partialorder %v9453_v23, %v8508_v38 }
 0x26e   : >> { %vm9995_vm13 = vmor %vm13586_vm15, %vm9733_vm9  ;;  %v924_v53 = vsel %vm13589_vm5, 1.0, %v13457_v13  ;;  %vm13590_vm9 = vnez %v13464_v17  ;;  %vm13592_vm15 = vnez %v13591_v27  ;;  %v930_v46 = vadd.f32 %v922_v58, %v866_v54 }
 0x26f   : >> { %v984_v11 = vsel %vm13590_vm9, 1.0, %v13457_v13  ;;  %vm10016_vm11 = vmor %vm13593_vm3, %vm13592_vm15  ;;  %vm13599_vm3 = vnez %v13478_v59  ;;  %v926_v59 = vsel %vm13605_vm0, 1.0, %v13457_v13  ;;  %v931_v54 = vadd.f32 %v923_v16, %v867_v51 }
 0x270   : >> { %vm10025_vm5 = vmor %vm13596_vm1, %vm9773_vm8  ;;  %v925_v17 = vsel %vm13599_vm3, 1.0, %v13457_v13  ;;  %vm13601_vm8 = vnez %v13528_v47  ;;  %vm13602_vm1 = vcmp.lt.f32.partialorder %v9453_v23, %v8521_v50  ;;  %v986_v47 = vsel %vm13607_vm12, 1.0, %v13457_v13 }
 0x271   : >> { %vm10044_vm15 = vmor %vm13602_vm1, %vm13601_vm8  ;;  %vm13608_vm8 = vnez %v13540_v63  ;;  %vm13609_vm1 = vcmp.lt.f32.partialorder %v9453_v23, %v8518_v48  ;;  %vm13612_vm3 = vnez %v13503_v12  ;;  %v932_v51 = vadd.f32 %v924_v53, %v868_v43  ;;  %v13613_v63 = vld [vmem:[#allocation28_spill] sm:$0xff]  ;;  %v13619_v43 = vld [vmem:[#allocation29_spill] sm:$0xff] }
 0x272   : >> { %v13604_v52 = vsel %vm10044_vm15, 4294967295, %v13603_v52  ;;  %vm10063_vm15 = vmor %vm13609_vm1, %vm13608_vm8  ;;  %v927_v25 = vsel %vm13612_vm3, 1.0, %v13457_v13  ;;  %vm13614_vm12 = vnez %v13613_v63  ;;  %v992_v20 = vadd.f32 %v984_v11, %v928_v18  ;;  %v13621_v18 = vld [vmem:[#allocation30_spill] sm:$0xff] }
 0x273   : >> { %v13611_v55 = vsel %vm10063_vm15, 4294967295, %v13610_v55  ;;  %v987_v61 = vsel %vm13614_vm12, 1.0, %v13457_v13  ;;  %vm13615_vm8 = vnez %v13552_v22  ;;  %vm13616_vm1 = vcmp.lt.f32.partialorder %v9453_v23, %v8530_v57 }
 0x274   : >> { %vm10082_vm15 = vmor %vm13616_vm1, %vm13615_vm8  ;;  %v933_v12 = vadd.f32 %v925_v17, %v869_v45  ;;  %vm13620_vm3 = vnez %v13619_v43  ;;  %vm13622_vm12 = vnez %v13621_v18  ;;  %vm13623_vm8 = vcmp.lt.f32.partialorder %v9453_v23, %v8528_v56 }
 0x275   : >> { %v988_v16 = vsel %vm13620_vm3, 1.0, %v13457_v13  ;;  %v1048_v22 = vsel %vm13622_vm12, 1.0, %v13457_v13  ;;  %vm10099_vm1 = vmor %vm13623_vm8, %vm9916_vm6  ;;  %v13624_v53 = vmov 0  ;;  %v934_v45 = vadd.f32 %v926_v59, %v870_v21 }
 0x276   : >> { %v13625_v53 = vsel %vm10099_vm1, 4294967295, %v13624_v53  ;;  %vm13626_vm3 = vnez %v13532_v24  ;;  %v994_v11 = vadd.f32 %v986_v47, %v930_v46  ;;  %vm13627_vm12 = vnez %v13536_v14 }
 0x277   : >> { %v989_v33 = vsel %vm13626_vm3, 1.0, %v13457_v13  ;;  %v1049_v19 = vsel %vm13627_vm12, 1.0, %v13457_v13  ;;  %vm13628_vm6 = vcmp.gt.s32.totalorder %v8318_v1, %v9883_v35  ;;  %vm13629_vm8 = vcmp.eq.f32.partialorder %v9817_v60, %v8501_v31 }
 0x278   : >> { %vm10119_vm9 = vmand %vm13629_vm8, %vm13628_vm6  ;;  %v935_v24 = vadd.f32 %v927_v25, %v9887_v39  ;;  %vm13632_vm3 = vnez %v13544_v15  ;;  %v995_v21 = vadd.f32 %v987_v61, %v931_v54  ;;  %vm13633_vm12 = vnez %v13548_v44 }
 0x279   : >> { %v990_v14 = vsel %vm13632_vm3, 1.0, %v13457_v13  ;;  %v1050_v27 = vsel %vm13633_vm12, 1.0, %v13457_v13  ;;  %vm13634_vm0 = vcmp.gt.s32.totalorder %v8323_v3, %v9883_v35  ;;  %vm13635_vm6 = vcmp.eq.f32.partialorder %v9817_v60, %v8498_v28 }
 0x27a   : >> { %vm10136_vm8 = vmand %vm13635_vm6, %vm13634_vm0  ;;  %v991_v15 = vsel %vm9897_vm2, 1.0, %v13457_v13  ;;  %v996_v39 = vadd.f32 %v988_v16, %v932_v51  ;;  %vm13638_vm3 = vnez %v13561_v30  ;;  %v1056_v46 = vadd.f32 %v1048_v22, %v992_v20 }
 0x27b   : >> { %v1051_v44 = vsel %vm13638_vm3, 1.0, %v13457_v13  ;;  %vm13639_vm12 = vcmp.gt.s32.totalorder %v8326_v4, %v9883_v35  ;;  %vm13640_vm1 = vcmp.eq.f32.partialorder %v9817_v60, %v8511_v40  ;;  %v997_v49 = vadd.f32 %v989_v33, %v933_v12 }
 0x27c   : >> { %vm10152_vm0 = vmand %vm13640_vm1, %vm13639_vm12  ;;  %v1057_v59 = vadd.f32 %v1049_v19, %v993_v34  ;;  %v1112_v30 = vsel %vm9939_vm14, 1.0, %v13457_v13  ;;  %vm13643_vm2 = vcmp.gt.s32.totalorder %v8329_v5, %v9883_v35  ;;  %vm13644_vm6 = vcmp.eq.f32.partialorder %v9817_v60, %v8508_v38 }
 0x27d   : >> { %vm10168_vm1 = vmand %vm13644_vm6, %vm13643_vm2  ;;  %v998_v36 = vadd.f32 %v990_v14, %v934_v45  ;;  %vm13647_vm3 = vnez %v13577_v42  ;;  %v1058_v47 = vadd.f32 %v1050_v27, %v994_v11  ;;  %v1113_v0 = vsel %vm9966_vm4, 1.0, %v13457_v13 }
 0x27e   : >> { %v1053_v32 = vsel %vm13647_vm3, 1.0, %v13457_v13  ;;  %vm13649_vm14 = vcmp.eq.f32.partialorder %v9817_v60, %v8521_v50  ;;  %v999_v51 = vadd.f32 %v991_v15, %v935_v24  ;;  %v1054_v42 = vsel %vm9986_vm10, 1.0, %v13457_v13 }
 0x27f   : >> { %vm10184_vm12 = vmand %vm13649_vm14, %vm13648_vm7  ;;  %v1059_v63 = vadd.f32 %v1051_v44, %v995_v21  ;;  %v1114_v62 = vsel %vm9995_vm13, 1.0, %v13457_v13  ;;  %vm13652_vm4 = vcmp.gt.s32.totalorder %v8335_v7, %v9883_v35  ;;  %vm13653_vm2 = vcmp.eq.f32.partialorder %v9817_v60, %v8518_v48 }
 0x280   : >> { %vm10200_vm6 = vmand %vm13653_vm2, %vm13652_vm4  ;;  %v1055_v41 = vsel %vm10016_vm11, 1.0, %v13457_v13  ;;  %v1060_v20 = vadd.f32 %v1052_v26, %v996_v39  ;;  %v1115_v37 = vsel %vm10025_vm5, 1.0, %v13457_v13  ;;  %v1120_v12 = vadd.f32 %v1112_v30, %v1056_v46 }
 0x281   : >> { %vm13656_vm13 = vcmp.gt.s32.totalorder %v8338_v8, %v9883_v35  ;;  %vm13657_vm10 = vcmp.eq.f32.partialorder %v9817_v60, %v8530_v57  ;;  %v1061_v16 = vadd.f32 %v1053_v32, %v997_v49  ;;  %vm13660_vm11 = vnez %v13604_v52 }
 0x282   : >> { %vm10216_vm3 = vmand %vm13657_vm10, %vm13656_vm13  ;;  %v1116_v29 = vsel %vm13660_vm11, 1.0, %v13457_v13  ;;  %v1121_v34 = vadd.f32 %v1113_v0, %v1057_v59  ;;  %vm1139_vm5 = vcmp.lt.f32.partialorder %v9817_v60, %v8521_v50  ;;  %vm13661_vm7 = vcmp.gt.s32.totalorder %v8341_v9, %v9883_v35 }
 0x283   : >> { %vm13662_vm14 = vcmp.eq.f32.partialorder %v9817_v60, %v8528_v56  ;;  %v1062_v18 = vadd.f32 %v1054_v42, %v998_v36  ;;  %vm13665_vm2 = vnez %v13611_v55  ;;  %v1122_v22 = vadd.f32 %v1114_v62, %v1058_v47 }
 0x284   : >> { %vm10231_vm4 = vmand %vm13662_vm14, %vm13661_vm7  ;;  %v1117_v52 = vsel %vm13665_vm2, 1.0, %v13457_v13  ;;  %vm1140_vm13 = vcmp.lt.f32.partialorder %v9817_v60, %v8518_v48  ;;  %vm13666_vm10 = vcmp.lt.f32.partialorder %v9817_v60, %v8501_v31  ;;  %v1063_v35 = vadd.f32 %v1055_v41, %v999_v51 }
 0x285   : >> { %vm1168_vm11 = vmor %vm13666_vm10, %vm10119_vm9  ;;  %v1118_v45 = vsel %vm10082_vm15, 1.0, %v13457_v13  ;;  %v1123_v33 = vadd.f32 %v1115_v37, %v1059_v63  ;;  %vm13667_vm7 = vcmp.lt.f32.partialorder %v9817_v60, %v8498_v28  ;;  %vm13668_vm2 = vnez %v13625_v53 }
 0x286   : >> { %vm1169_vm14 = vmor %vm13667_vm7, %vm10136_vm8  ;;  %v1176_v55 = vsel %vm1168_vm11, 1.0, %v13457_v13  ;;  %v1119_v11 = vsel %vm13668_vm2, 1.0, %v13457_v13  ;;  %v1124_v19 = vadd.f32 %v1116_v29, %v1060_v20  ;;  %vm13669_vm9 = vcmp.lt.f32.partialorder %v9817_v60, %v8511_v40 }
 0x287   : >> { %vm1170_vm15 = vmor %vm13669_vm9, %vm10152_vm0  ;;  %v1177_v58 = vsel %vm1169_vm14, 1.0, %v13457_v13  ;;  %v10263_v0 = vadd.f32 %v1176_v55, %v1120_v12   ;;  %v1125_v24 = vadd.f32 %v1117_v52, %v1061_v16  ;;  %vm1141_vm8 = vcmp.lt.f32.partialorder %v9817_v60, %v8530_v57  ;;  %v13717_v16 = vld [vmem:[#allocation14_spill] sm:$0xff] (%p668_p3) }
 0x288   : >> { %vm13671_vm10 = vcmp.lt.f32.partialorder %v9817_v60, %v8508_v38  ;;  %v1178_v53 = vsel %vm1170_vm15, 1.0, %v13457_v13  ;;  %v10273_v63 = vadd.f32 %v1177_v58, %v1121_v34   ;;  %v1126_v21 = vadd.f32 %v1118_v45, %v1062_v18  ;;  %vm1172_vm7 = vmor %vm1139_vm5, %vm10184_vm12  ;;  %v13718_v18 = vld [vmem:[#allocation17_spill] sm:$0xff] (%p668_p3)  ;;  %v13720_v45 = vld [vmem:[#allocation18_spill] sm:$0xff] (%p668_p3) }
 0x289   : >> { %v13670_v23 = vmov %v10263_v0  ;;  %vm1171_vm11 = vmor %vm13671_vm10, %vm10168_vm1  ;;  %vm1142_vm0 = vcmp.lt.f32.partialorder %v9817_v60, %v8528_v56  ;;  %v10283_v62 = vadd.f32 %v1178_v53, %v1122_v22   ;;  %v1127_v15 = vadd.f32 %v1119_v11, %v1063_v35  ;;  %v13719_v22 = vld [vmem:[#allocation16_spill] sm:$0xff] (%p668_p3) }
 0x28a   : >> { %v13672_v14 = vmov %v10273_v63  ;;  %v1179_v27 = vsel %vm1171_vm11, 1.0, %v13457_v13  ;;  %vm1173_vm1 = vmor %vm1140_vm13, %vm10200_vm6  ;;  %v1180_v39 = vsel %vm1172_vm7, 1.0, %v13457_v13  ;;  %v13686_v0 = vmov %v13670_v23 }
 0x28b   : >> { %v13673_v17 = vmov %v10283_v62  ;;  %v10291_v61 = vadd.f32 %v1179_v27, %v1123_v33   ;;  %vm1174_vm14 = vmor %vm1141_vm8, %vm10216_vm3  ;;  %v1181_v46 = vsel %vm1173_vm1, 1.0, %v13457_v13  ;;  %v10296_v60 = vadd.f32 %v1180_v39, %v1124_v19   ;;  %670 = sbr.rel (!%p668_p3) target bundleno = 506 (0x1fa), region = 154  ;;  %v13724_v27 = vld [vmem:[#allocation19_spill] sm:$0xff] (%p668_p3)  ;;  %v13725_v39 = vld [vmem:[#allocation20_spill] sm:$0xff] (%p668_p3) }
 0x28c   : >> { %vm1175_vm12 = vmor %vm1142_vm0, %vm10231_vm4  ;;  %v1182_v49 = vsel %vm1174_vm14, 1.0, %v13457_v13  ;;  %v10301_v59 = vadd.f32 %v1181_v46, %v1125_v24   ;;  %v13684_v62 = vmov %v13673_v17  ;;  %v13685_v63 = vmov %v13672_v14 }
 0x28d   : >> { %v13674_v44 = vmov %v10291_v61  ;;  %v13675_v10 = vmov %v10296_v60  ;;  %v1183_v30 = vsel %vm1175_vm12, 1.0, %v13457_v13  ;;  %v10304_v58 = vadd.f32 %v1182_v49, %v1126_v21   ;;  %v13696_v63 = vld [vmem:[#allocation10_spill] sm:$0xff] (%p668_p3) }
 0x28e   : >> { %v13676_v26 = vmov %v10301_v59  ;;  %v10306_v33 = vadd.f32 %v1183_v30, %v1127_v15   ;;  %v13682_v60 = vmov %v13675_v10  ;;  %v13683_v61 = vmov %v13674_v44 }
 0x28f   : >> { %v13677_v54 = vmov %v10304_v58  ;;  %v13681_v59 = vmov %v13676_v26  ;;  %vm1192_vm6 = vcmp.lt.f32.partialorder (%p668_p3), %v13670_v23, 2.0  ;;  %vm1194_vm3 = vcmp.lt.f32.partialorder (%p668_p3), %v13673_v17, 2.0 }
 0x290   : >> { %v13678_v36 = vmov %v10306_v33  ;;  %v13680_v58 = vmov %v13677_v54  ;;  %vm1193_vm5 = vcmp.lt.f32.partialorder (%p668_p3), %v13672_v14, 2.0  ;;  %vm1195_vm4 = vcmp.lt.f32.partialorder (%p668_p3), %v13674_v44, 2.0 }
 0x291   : >> { %v13679_v33 = vmov %v13678_v36  ;;  %v13687_v13 = vmov (%p668_p3), 0.0   ;;  %vm13688_vm13 = vcmask (%p668_p3), 523264   ;;  %vm1196_vm9 = vcmp.lt.f32.partialorder (%p668_p3), %v13675_v10, 2.0 }
 0x292   : > { %v1200_v32 = vsel %vm1192_vm6, 1.0, %v13687_v13  ;;  %v1202_v47 = vsel %vm1194_vm3, 1.0, %v13687_v13  ;;  %v1201_v0 = vsel %vm1193_vm5, 1.0, %v13687_v13  ;;  %v1203_v25 = vsel %vm1195_vm4, 1.0, %v13687_v13  ;;  %vm13689_vm2 = vmmov %vm13688_vm13 }
 0x293   : > { %v1208_v51 = vsel %vm13688_vm13, %v1200_v32, 0.0  ;;  %v1214_v42 = vsel %vm13689_vm2, %v1202_v47, 0.0  ;;  %vm1197_vm15 = vcmp.lt.f32.partialorder %v13676_v26, 2.0  ;;  %vm13690_vm8 = vmmov %vm13689_vm2  ;;  %v1204_v38 = vsel %vm1196_vm9, 1.0, %v13687_v13 }
 0x294   : > { %1209 = vadd.xlane.f32.xlu0 %v1208_v51  ;;  %1215 = vadd.xlane.f32.xlu1 %v1214_v42  ;;  %v1211_v28 = vsel %vm13690_vm8, %v1201_v0, 0.0  ;;  %vm13691_vm10 = vmmov %vm13689_vm2  ;;  %v1205_v40 = vsel %vm1197_vm15, 1.0, %v13687_v13  ;;  %vm1198_vm11 = vcmp.lt.f32.partialorder %v13677_v54, 2.0  ;;  %vm1199_vm0 = vcmp.lt.f32.partialorder %v13678_v36, 2.0  ;;  %v13728_v51 = vld [vmem:[#allocation21_spill] sm:$0xff] }
 0x295   : > { %v1217_v31 = vsel %vm13691_vm10, %v1203_v25, 0.0  ;;  %vm13692_vm7 = vmmov %vm13689_vm2  ;;  %v1206_v56 = vsel %vm1198_vm11, 1.0, %v13687_v13  ;;  %v1207_v57 = vsel %vm1199_vm0, 1.0, %v13687_v13  ;;  %vm13697_vm6 = vcmp.eq.s32.totalorder %v8318_v1, %v13696_v63 }
 0x296   : > { %v1220_v48 = vsel %vm13692_vm7, %v1204_v38, 0.0  ;;  %vm13693_vm1 = vmmov %vm13689_vm2  ;;  %vm13698_vm3 = vcmp.eq.s32.totalorder %v8323_v3, %v13696_v63  ;;  %v13699_v62 = vmov 0  ;;  %v13162_v61 = vmov 1.0|1.0  }
 0x297   : > { %v1223_v50 = vsel %vm13693_vm1, %v1205_v40, 0.0  ;;  %vm13694_vm14 = vmmov %vm13693_vm1  ;;  %vm13702_vm4 = vcmp.eq.s32.totalorder %v8326_v4, %v13696_v63  ;;  %vm13703_vm13 = vcmp.eq.s32.totalorder %v8329_v5, %v13696_v63  ;;  %v13704_v41 = vmov 0 }
 0x298   : > { %1212 = vadd.xlane.f32.xlu0 %v1211_v28  ;;  %1218 = vadd.xlane.f32.xlu1 %v1217_v31  ;;  %v1226_v60 = vsel %vm13694_vm14, %v1206_v56, 0.0  ;;  %vm13695_vm12 = vmmov %vm13693_vm1  ;;  %vm13707_vm9 = vcmp.eq.s32.totalorder %v8332_v6, %v13696_v63  ;;  %vm13708_vm15 = vcmp.eq.s32.totalorder %v8335_v7, %v13696_v63  ;;  %v13709_v20 = vmov 0  ;;  %v13729_v28 = vld [vmem:[#allocation22_spill] sm:$0xff] }
 0x299   : > { %v1229_v59 = vsel %vm13695_vm12, %v1207_v57, 0.0  ;;  %vm10365_vm5 = vmpackc.low %vm13698_vm3, %vm13697_vm6  ;;  %vm13712_vm10 = vcmp.eq.s32.totalorder %v8338_v8, %v13696_v63  ;;  %vm13713_vm11 = vcmp.eq.s32.totalorder %v8341_v9, %v13696_v63  ;;  %v13714_v37 = vmov 0 }
 0x29a   : > { %v13700_v62 = vsel %vm10365_vm5, 4294967295, %v13699_v62  ;;  %7512 = vmatprep.subr.msk.bf16.mxu1 %vm10365_vm5, %v13162_v61  ;;  %vm10381_vm2 = vmpackc.low %vm13703_vm13, %vm13702_vm4 }
 0x29b   : > { %13701 = vst [vmem:[#allocation31_spill] sm:$0xff] %v13700_v62  ;;  %7514 = vmatpush3.bf16.msk.msra.mxu1 %vm10365_vm5, %v13162_v61  ;;  %v13705_v41 = vsel %vm10381_vm2, 4294967295, %v13704_v41  ;;  %vm10397_vm8 = vmpackc.low %vm13708_vm15, %vm13707_vm9 }
 0x29c   : > { %1221 = vadd.xlane.f32.xlu0 %v1220_v48  ;;  %1224 = vadd.xlane.f32.xlu1 %v1223_v50  ;;  %13706 = vst [vmem:[#allocation32_spill] sm:$0xff] %v13705_v41  ;;  %v13710_v20 = vsel %vm10397_vm8, 4294967295, %v13709_v20  ;;  %vm10413_vm0 = vmpackc.low %vm13713_vm11, %vm13712_vm10  ;;  %vm13732_vm11 = vcmp.eq.s32.totalorder %v8318_v1, %v13696_v63 }
 0x29d   : > { %7516 = vmatprep.subr.msk.bf16.mxu1 %vm10381_vm2, %v13162_v61  ;;  %13711 = vst [vmem:[#allocation33_spill] sm:$0xff] %v13710_v20  ;;  %v13715_v37 = vsel %vm10413_vm0, 4294967295, %v13714_v37  ;;  %vm13721_vm7 = vmmov %vm13693_vm1 }
 0x29e   : > { %13716 = vst [vmem:[#allocation34_spill] sm:$0xff] %v13715_v37  ;;  %vm13722_vm14 = vmmov %vm13693_vm1 }
 0x29f   : > { %7518 = vmatpush3.bf16.msk.msra.mxu1 %vm10381_vm2, %v13162_v61  ;;  %vm13723_vm12 = vmmov %vm13693_vm1 }
 0x2a0   : > { %1227 = vadd.xlane.f32.xlu0 %v1226_v60  ;;  %1230 = vadd.xlane.f32.xlu1 %v1229_v59  ;;  %vm13726_vm6 = vmmov %vm13693_vm1 }
 0x2a1   : > { %7520 = vmatprep.subr.msk.bf16.mxu1 %vm10397_vm8, %v13162_v61  ;;  %vm13727_vm3 = vmmov %vm13693_vm1 }
 0x2a2   : > { %vm13730_vm4 = vmmov %vm13693_vm1 }
 0x2a3   : > { %7522 = vmatpush3.bf16.msk.msra.mxu1 %vm10397_vm8, %v13162_v61  ;;  %vm13731_vm13 = vmmov %vm13693_vm1 }
 0x2a4   : > { %7524 = vmatprep.subr.msk.bf16.mxu1 %vm10413_vm0, %v13162_v61 }
 0x2a7   : > { %7526 = vmatpush3.bf16.msk.msra.mxu1 %vm10413_vm0, %v13162_v61  ;;  %vm13735_vm0 = vmmov %vm13727_vm3 }
 0x321   : > { %v1210_v12 = vpop.xlane.xlu0 %1209  ;;  %v1216_v43 = vpop.xlane.xlu1 %1215 }
 0x322   : > { %v1232_v29 = vmul.f32 %v1210_v12, %v13717_v16  ;;  %v1234_v52 = vmul.f32 %v1216_v43, %v13718_v18 }
 0x324   : > { %v1240_v55 = vsel %vm13721_vm7, %v1232_v29, 0.0  ;;  %v1243_v53 = vsel %vm13722_vm14, %v1234_v52, 0.0  ;;  %vm13733_vm14 = vcmp.eq.s32.totalorder %v8323_v3, %v13696_v63  ;;  %v13159_v52 = vmov 0.0|0.0  }
 0x325   : > { %v1213_v34 = vpop.xlane.xlu0 %1212  ;;  %v1219_v2 = vpop.xlane.xlu1 %1218  ;;  %7527 = vmatprep.subr.bf16.mxu0 %v13159_v52 }
 0x326   : > { %v1233_v35 = vmul.f32 %v1213_v34, %v13719_v22  ;;  %v1235_v33 = vmul.f32 %v1219_v2, %v13720_v45 }
 0x328   : > { %v1241_v11 = vsel %vm13693_vm1, %v1233_v35, 0.0  ;;  %v1245_v21 = vsel %vm13723_vm12, %v1235_v33, 0.0  ;;  %v13749_v33 = vld [vmem:[#allocation11_spill] sm:$0xff] }
 0x329   : > { %v1242_v19 = vadd.f32 %v1241_v11, %v1240_v55  ;;  %v1222_v58 = vpop.xlane.xlu0 %1221  ;;  %v1225_v24 = vpop.xlane.xlu1 %1224 }
 0x32a   : > { %v1236_v15 = vmul.f32 %v1222_v58, %v13724_v27  ;;  %v1237_v46 = vmul.f32 %v1225_v24, %v13725_v39 }
 0x32b   : > { %v1244_v49 = vadd.f32 %v1243_v53, %v1242_v19 }
 0x32c   : > { %v1247_v30 = vsel %vm13726_vm6, %v1236_v15, 0.0  ;;  %v1249_v25 = vsel %vm13727_vm3, %v1237_v46, 0.0 }
 0x32d   : > { %v1246_v32 = vadd.f32 %v1245_v21, %v1244_v49  ;;  %v1228_v47 = vpop.xlane.xlu0 %1227  ;;  %v1231_v0 = vpop.xlane.xlu1 %1230  ;;  %v13751_v21 = vld [vmem:[#allocation12_spill] sm:$0xff] }
 0x32e   : > { %v1238_v42 = vmul.f32 %v1228_v47, %v13728_v51  ;;  %v1239_v31 = vmul.f32 %v1231_v0, %v13729_v28 }
 0x32f   : > { %v1248_v38 = vadd.f32 %v1247_v30, %v1246_v32  ;;  %v10511_v30 = vld [vmem:[%s13088_s1 + $0x20] sm:$0xff] }
 0x330   : > { %v1251_v40 = vsel %vm13730_vm4, %v1238_v42, 0.0  ;;  %v1253_v50 = vsel %vm13731_vm13, %v1239_v31, 0.0  ;;  %vm13734_vm4 = vcmp.eq.s32.totalorder %v8326_v4, %v13696_v63  ;;  %13752 = vst [vmem:[#allocation38_spill] sm:$0xff] %v10511_v30 }
 0x331   : > { %v1250_v48 = vadd.f32 %v1249_v25, %v1248_v38  ;;  %v13753_v25 = vld [vmem:[#allocation13_spill] sm:$0xff] }
 0x333   : > { %v1252_v56 = vadd.f32 %v1251_v40, %v1250_v48  ;;  %v10519_v48 = vld [vmem:[%s13088_s1 + $0x30] sm:$0xff] }
 0x334   : > { %13754 = vst [vmem:[#allocation39_spill] sm:$0xff] %v10519_v48 }
 0x335   : > { %v1254_v57 = vadd.f32 %v1253_v50, %v1252_v56 }
 0x337   : > { %v1255_v60 = vrot.slane %v1254_v57, 4 }
 0x339   : > { %v1256_v59 = vadd.f32 %v1255_v60, %v1254_v57  ;;  %v13755_v60 = vld [vmem:[#allocation15_spill] sm:$0xff] }
 0x33b   : > { %v1257_v12 = vrot.slane %v1256_v59, 2 }
 0x33d   : > { %v1258_v43 = vadd.f32 %v1257_v12, %v1256_v59 }
 0x33f   : > { %v1259_v29 = vrot.slane %v1258_v43, 1 }
 0x341   : > { %v1260_v34 = vadd.f32 %v1259_v29, %v1258_v43 }
 0x343   : > { %vm1261_vm9 = vcmp.lt.f32.partialorder %v13670_v23, %v1260_v34  ;;  %vm1262_vm15 = vcmp.lt.f32.partialorder %v13672_v14, %v1260_v34  ;;  %vm1263_vm10 = vcmp.lt.f32.partialorder %v13673_v17, %v1260_v34  ;;  %vm1264_vm1 = vcmp.lt.f32.partialorder %v13674_v44, %v1260_v34 }
 0x344   : > { %vm1269_vm7 = vmor %vm1261_vm9, %vm13732_vm11  ;;  %vm1265_vm6 = vcmp.lt.f32.partialorder %v13675_v10, %v1260_v34  ;;  %vm13736_vm9 = vcmp.eq.s32.totalorder %v8329_v5, %v13696_v63 }
 0x345   : > { %v1277_v2 = vsel %vm1269_vm7, 1.0, %v13687_v13  ;;  %vm1270_vm12 = vmor %vm1262_vm15, %vm13733_vm14  ;;  %vm13738_vm15 = vcmp.eq.s32.totalorder %v8332_v6, %v13696_v63 }
 0x346   : > { %6915 = vmatprep.mubr.msk.f32.mxu1 %vm13727_vm3, %v1277_v2  ;;  %v1278_v23 = vsel %vm1270_vm12, 1.0, %v13687_v13  ;;  %vm1271_vm13 = vmor %vm1263_vm10, %vm13734_vm4  ;;  %vm1266_vm12 = vcmp.lt.f32.partialorder %v13676_v26, %v1260_v34  ;;  %vm1267_vm3 = vcmp.lt.f32.partialorder %v13677_v54, %v1260_v34 }
 0x347   : > { %6916 = vmatmul.mubr.msk.f32.vlgmr.msra.gmra.mrb[8].mxu1 %vm13735_vm0, %v1278_v23  ;;  %v1279_v14 = vsel %vm1271_vm13, 1.0, %v13687_v13  ;;  %vm1272_vm11 = vmor %vm1264_vm1, %vm13736_vm9  ;;  %vm13742_vm13 = vcmp.eq.s32.totalorder %v8338_v8, %v13696_v63  ;;  %vm1268_vm9 = vcmp.lt.f32.partialorder %v13678_v36, %v1260_v34  ;;  %v10490_v36 = vld [vmem:[#allocation2 + $0x8] sm:$0xff] }
 0x348   : > { %vm13737_vm7 = vmmov %vm13735_vm0  ;;  %v1280_v17 = vsel %vm1272_vm11, 1.0, %v13687_v13  ;;  %vm13744_vm11 = vcmp.eq.s32.totalorder %v8341_v9, %v13696_v63  ;;  %13747 = vst [vmem:[#allocation35_spill] sm:$0xff] %v10490_v36  ;;  %6960 = vmatprep.subr.mxu1 %v10490_v36 }
 0x349   : > { %6918 = vmatprep.mubr.msk.f32.mxu1 %vm13737_vm7, %v1279_v14  ;;  %vm1273_vm14 = vmor %vm1265_vm6, %vm13738_vm15  ;;  %6961 = vmatpush3.msra.mxu1 %v10490_v36  ;;  %v13757_v14 = vld [vmem:[#allocation23_spill] sm:$0xff] }
 0x34a   : > { %vm13739_vm10 = vmmov %vm13735_vm0  ;;  %v1281_v44 = vsel %vm1273_vm14, 1.0, %v13687_v13  ;;  %vm13740_vm0 = vcmp.eq.s32.totalorder %v8335_v7, %v13696_v63  ;;  %v10497_v63 = vld [vmem:[%s13088_s1] sm:$0xff] }
 0x34b   : > { %6919 = vmatmul.mubr.msk.f32.gmra.mrb[10].mxu1 %vm13739_vm10, %v1280_v17  ;;  %vm1274_vm1 = vmor %vm1266_vm12, %vm13740_vm0  ;;  %13748 = vst [vmem:[#allocation36_spill] sm:$0xff] %v10497_v63  ;;  %v1748_v17 = vmul.f32 %v10490_v36, %v10490_v36 }
 0x34c   : > { %vm13741_vm4 = vmmov %vm13737_vm7  ;;  %v1282_v10 = vsel %vm1274_vm1, 1.0, %v13687_v13 }
 0x34d   : > { %6921 = vmatprep.mubr.msk.f32.mxu1 %vm13741_vm4, %v1281_v44  ;;  %vm1275_vm6 = vmor %vm1267_vm3, %vm13742_vm13  ;;  %vm13151_vm3 = vmmov 0  }
 0x34e   : > { %vm13743_vm7 = vmmov %vm13741_vm4  ;;  %v1283_v26 = vsel %vm1275_vm6, 1.0, %v13687_v13  ;;  %6943 = vmatprep.mubr.msk.f32.mxu0 %vm13151_vm3, %v13687_v13 }
 0x34f   : > { %6922 = vmatmul.mubr.msk.f32.gmra.mrb[12].mxu1 %vm13743_vm7, %v1282_v10  ;;  %vm1276_vm15 = vmor %vm1268_vm9, %vm13744_vm11 }
 0x350   : > { %vm13745_vm14 = vmmov %vm13741_vm4  ;;  %v1284_v54 = vsel %vm1276_vm15, 1.0, %v13687_v13  ;;  %v10504_v13 = vld [vmem:[%s13088_s1 + $0x10] sm:$0xff] }
 0x351   : > { %6924 = vmatprep.mubr.msk.f32.mxu1 %vm13745_vm14, %v1283_v26  ;;  %vm13746_vm12 = vmmov %vm13741_vm4  ;;  %13750 = vst [vmem:[#allocation37_spill] sm:$0xff] %v10504_v13 }
 0x352   : > { %vm13756_vm10 = vmmov %vm13741_vm4 }
 0x353   : > { %6925 = vmatmul.mubr.msk.f32.gmra.mrb[14].mxu1 %vm13746_vm12, %v1284_v54  ;;  %vm13758_vm0 = vmmov %vm13741_vm4 }
 0x354   : > { %vm13759_vm1 = vmmov %vm13758_vm0 }
 0x355   : > { %vm13760_vm4 = vmmov %vm13758_vm0 }
 0x356   : > { %vm13761_vm13 = vmmov %vm13758_vm0 }
 0x357   : > { %vm13762_vm6 = vmmov %vm13758_vm0 }
 0x358   : > { %vm13763_vm9 = vmmov %vm13758_vm0 }
 0x359   : > { %vm13764_vm7 = vmmov %vm13758_vm0 }
 0x35a   : > { %vm13765_vm11 = vmmov %vm13758_vm0 }
 0x35b   : > { %vm13766_vm15 = vmmov %vm13758_vm0 }
 0x35c   : > { %vm13767_vm14 = vmmov %vm13758_vm0 }
 0x35d   : > { %vm13768_vm12 = vmmov %vm13758_vm0 }
 0x35e   : > { %v1749_v44 = vsel %vm13768_vm12, %v1748_v17, 0.0 }
 0x35f   : > { %v1750_v10 = vrot.slane %v1749_v44, 4 }
 0x361   : > { %v1751_v26 = vadd.f32 %v1750_v10, %v1749_v44 }
 0x363   : > { %v1752_v54 = vrot.slane %v1751_v26, 2 }
 0x41a   : > { %v6917_v35 = vpop.f32.mrb[8].mxu1 }
 0x41b   : > { %v1381_v55 = vadd.f32 %v6917_v35, %v13749_v33  ;;  %v1375_v11 = vpop.f32.mrb[9].mxu1  ;;  %v1753_v35 = vadd.f32 %v1752_v54, %v1751_v26 }
 0x41c   : > { %v1376_v19 = vadd.f32 %v1375_v11, %v10497_v63 }
 0x41d   : > { %1501 = vst [vmem:[#allocation4 + $0x8] sm:$0xff] %v1381_v55  ;;  %v1754_v33 = vrot.slane %v1753_v35, 1 }
 0x41e   : > { %v1414_v58 = vadd.f32 %v1381_v55, %v1376_v19  ;;  %1500 = vst [vmem:[#allocation4] sm:$0xff] %v1376_v19  ;;  %v6920_v24 = vpop.f32.mrb[10].mxu1  ;;  %v7528_v53 = vpack.c.bf16 %v1381_v55, %v1376_v19 }
 0x41f   : > { %v1391_v15 = vadd.f32 %v6920_v24, %v13751_v21  ;;  %v1385_v46 = vpop.f32.mrb[11].mxu1  ;;  %v10550_v55 = vadd.f32 %v1754_v33, %v1753_v35 }
 0x420   : > { %v1386_v49 = vadd.f32 %v1385_v46, %v10504_v13  ;;  %7529 = vmatpush3.bf16.msra.mxu0 %v7528_v53 }
 0x421   : > { %1503 = vst [vmem:[#allocation4 + $0x18] sm:$0xff] %v1391_v15  ;;  %7530 = vmatprep.subr.bf16.mxu0 %v13159_v52  ;;  %v1757_v11 = vmul.f32 %v10550_v55, %v13719_v22  ;;  %v1756_v19 = vmul.f32 %v10550_v55, %v13717_v16  ;;  %v1758_v24 = vmul.f32 %v10550_v55, %v13718_v18 }
 0x422   : > { %v1415_v32 = vadd.f32 %v1414_v58, %v1386_v49  ;;  %1502 = vst [vmem:[#allocation4 + $0x10] sm:$0xff] %v1386_v49  ;;  %v6923_v47 = vpop.f32.mrb[12].mxu1  ;;  %v7531_v0 = vpack.c.bf16 %v1391_v15, %v1386_v49  ;;  %v1759_v58 = vmul.f32 %v10550_v55, %v13720_v45  ;;  %v1763_v49 = vmul.f32 %v10550_v55, %v13729_v28 }
 0x423   : > { %v1401_v42 = vadd.f32 %v6923_v47, %v13753_v25  ;;  %v1395_v31 = vpop.f32.mrb[13].mxu1  ;;  %v1764_v21 = vsel %vm13758_vm0, %v1756_v19, 0.0 }
 0x424   : > { %v1396_v38 = vadd.f32 %v1395_v31, %v10511_v30  ;;  %v1416_v40 = vadd.f32 %v1415_v32, %v1391_v15  ;;  %7532 = vmatpush3.bf16.msra.mxu0 %v7531_v0  ;;  %1765 = vadd.xlane.f32.xlu0 %v1764_v21  ;;  %v1762_v32 = vmul.f32 %v10550_v55, %v13728_v51 }
 0x425   : > { %1505 = vst [vmem:[#allocation4 + $0x28] sm:$0xff] %v1401_v42  ;;  %7533 = vmatprep.subr.bf16.mxu0 %v13159_v52 }
 0x426   : > { %v1417_v50 = vadd.f32 %v1416_v40, %v1396_v38  ;;  %1504 = vst [vmem:[#allocation4 + $0x20] sm:$0xff] %v1396_v38  ;;  %v6926_v56 = vpop.f32.mrb[14].mxu1  ;;  %v7534_v57 = vpack.c.bf16 %v1401_v42, %v1396_v38 }
 0x427   : > { %v1411_v59 = vadd.f32 %v6926_v56, %v13755_v60  ;;  %v1405_v12 = vpop.f32.mrb[15].mxu1 }
 0x428   : > { %v1406_v43 = vadd.f32 %v1405_v12, %v10519_v48  ;;  %v1418_v29 = vadd.f32 %v1417_v50, %v1401_v42  ;;  %7535 = vmatpush3.bf16.msra.mxu0 %v7534_v57 }
 0x429   : > { %1507 = vst [vmem:[#allocation4 + $0x38] sm:$0xff] %v1411_v59  ;;  %7536 = vmatprep.subr.bf16.mxu0 %v13159_v52 }
 0x42a   : > { %v1419_v34 = vadd.f32 %v1418_v29, %v1406_v43  ;;  %1506 = vst [vmem:[#allocation4 + $0x30] sm:$0xff] %v1406_v43  ;;  %v7537_v2 = vpack.c.bf16 %v1411_v59, %v1406_v43 }
 0x42c   : > { %v1420_v23 = vadd.f32 %v1419_v34, %v1411_v59  ;;  %7538 = vmatpush3.bf16.msra.mxu0 %v7537_v2 }
 0x42d   : > { %6946 = vmatprep.subr.msk.mxu0 %vm13756_vm10, %v10490_v36  ;;  %vm13769_vm10 = vmmov %vm13758_vm0 }
 0x42e   : > { %v1767_v53 = vsel %vm13769_vm10, %v1757_v11, 0.0 }
 0x42f   : > { %6944 = vmatmul.mubr.msk.f32.vlgmr.msra.gmra.mrb[8].mxu0 %vm13758_vm0, %v13757_v14  ;;  %1768 = vadd.xlane.f32.xlu1 %v1767_v53 }
 0x430   : > { %6948 = vmatprep.mubr.msk.f32.mxu0 %vm13759_vm1, %v13717_v16  ;;  %vm13770_vm1 = vmmov %vm13758_vm0  ;;  %v1760_v16 = vmul.f32 %v10550_v55, %v13724_v27 }
 0x431   : > { %v1773_v15 = vsel %vm13770_vm1, %v1759_v58, 0.0 }
 0x433   : > { %1774 = vadd.xlane.f32.xlu1 %v1773_v15 }
 0x435   : > { %6947 = vmatpush3.xpose.msk.msra.mxu0 %vm13760_vm4, %v10490_v36  ;;  %vm13771_vm4 = vmmov %vm13758_vm0 }
 0x436   : > { %v1770_v46 = vsel %vm13771_vm4, %v1758_v24, 0.0 }
 0x437   : > { %1771 = vadd.xlane.f32.xlu0 %v1770_v46 }
 0x438   : > { %6949 = vmatmul.mubr.msk.f32.vlgmr.msra.gmra.mrb[10].mxu0 %vm13761_vm13, %v13719_v22  ;;  %v1761_v22 = vmul.f32 %v10550_v55, %v13725_v39  ;;  %vm13772_vm13 = vmmov %vm13758_vm0 }
 0x439   : > { %6951 = vmatprep.mubr.msk.f32.mxu0 %vm13762_vm6, %v13718_v18  ;;  %vm13773_vm6 = vmmov %vm13758_vm0 }
 0x43a   : > { %v1779_v18 = vsel %vm13772_vm13, %v1761_v22, 0.0  ;;  %vm13784_vm13 = vmmov %vm13773_vm6 }
 0x43b   : > { %1780 = vadd.xlane.f32.xlu1 %v1779_v18 }
 0x43c   : > { %6952 = vmatmul.mubr.msk.f32.gmra.mrb[12].mxu0 %vm13763_vm9, %v13720_v45  ;;  %v1776_v45 = vsel %vm13773_vm6, %v1760_v16, 0.0  ;;  %vm13774_vm9 = vmmov %vm13758_vm0 }
 0x43d   : > { %6954 = vmatprep.mubr.msk.f32.mxu0 %vm13764_vm7, %v13724_v27  ;;  %1777 = vadd.xlane.f32.xlu0 %v1776_v45  ;;  %v1785_v47 = vsel %vm13774_vm9, %v1763_v49, 0.0  ;;  %vm13775_vm7 = vmmov %vm13758_vm0  ;;  %v1421_v27 = vrot.slane %v1420_v23, 4 }
 0x43e   : > { %vm13785_vm9 = vmmov %vm13773_vm6 }
 0x43f   : > { %1786 = vadd.xlane.f32.xlu1 %v1785_v47  ;;  %v1422_v0 = vadd.f32 %v1421_v27, %v1420_v23 }
 0x440   : > { %6955 = vmatmul.mubr.msk.f32.gmra.mrb[14].mxu0 %vm13765_vm11, %v13725_v39  ;;  %v1782_v39 = vsel %vm13775_vm7, %v1762_v32, 0.0  ;;  %vm13776_vm11 = vcmask 64512   ;;  %vm13786_vm7 = vmmov %vm13773_vm6 }
 0x441   : > { %6957 = vmatprep.mubr.msk.f32.mxu0 %vm13766_vm15, %v13728_v51  ;;  %1783 = vadd.xlane.f32.xlu0 %v1782_v39  ;;  %v1423_v25 = vrot.slane %v1422_v0, 2  ;;  %vm13777_vm15 = vmmov %vm13776_vm11 }
 0x442   : > { %vm13779_vm12 = vmmov %vm13776_vm11 }
 0x443   : > { %v1424_v42 = vadd.f32 %v1423_v25, %v1422_v0  ;;  %vm13780_vm10 = vmmov %vm13776_vm11 }
 0x444   : > { %6958 = vmatmul.mubr.msk.f32.gmra.mrb[16].mxu0 %vm13767_vm14, %v13729_v28  ;;  %vm13778_vm14 = vmmov %vm13776_vm11 }
 0x445   : > { %v1425_v31 = vrot.slane %v1424_v42, 1  ;;  %vm13781_vm0 = vmmov %vm13780_vm10 }
 0x446   : > { %vm13782_vm1 = vmmov %vm13781_vm0 }
 0x447   : > { %v1426_v38 = vadd.f32 %v1425_v31, %v1424_v42  ;;  %vm13783_vm4 = vmmov %vm13781_vm0 }
 0x449   : > { %v1427_v40 = vmax.f32 %v1426_v38, 1.0 }
 0x44b   : > { %8015 = vrcp.f32 %v1427_v40 }
 0x455   : > { %v8016_v28 = vpop.eup %8015 }
 0x4b1   : > { %v1766_v14 = vpop.xlane.xlu0 %1765 }
 0x4b2   : > { %v1788_v54 = vadd.f32 %v1766_v14, %v10550_v55  ;;  %v10636_v14 = vmov 0.0  }
 0x4bc   : > { %v1769_v23 = vpop.xlane.xlu1 %1768 }
 0x4bd   : > { %v1789_v10 = vadd.f32 %v1769_v23, %v10550_v55  ;;  %v10634_v23 = vmov 0.0  }
 0x4c0   : > { %v1775_v17 = vpop.xlane.xlu1 %1774 }
 0x4c1   : > { %v1791_v24 = vadd.f32 %v1775_v17, %v10550_v55  ;;  %v10638_v17 = vmov 0.0  }
 0x4c4   : > { %v1772_v44 = vpop.xlane.xlu0 %1771 }
 0x4c5   : > { %v1790_v46 = vadd.f32 %v1772_v44, %v10550_v55 }
 0x4c8   : > { %v1781_v19 = vpop.xlane.xlu1 %1780 }
 0x4c9   : > { %v1793_v49 = vadd.f32 %v1781_v19, %v10550_v55 }
 0x4ca   : > { %v1778_v53 = vpop.xlane.xlu0 %1777 }
 0x4cb   : > { %v1792_v39 = vadd.f32 %v1778_v53, %v10550_v55 }
 0x4cc   : > { %v1787_v27 = vpop.xlane.xlu1 %1786 }
 0x4cd   : > { %v1795_v40 = vadd.f32 %v1787_v27, %v10550_v55 }
 0x4ce   : > { %v1784_v42 = vpop.xlane.xlu0 %1783 }
 0x502   : > { %v1494_v50 = vpop.f32.mrb[8].mxu0 }
 0x503   : > { %v1499_v56 = vmul.f32 %v8016_v28, %v1494_v50  ;;  %v6945_v51 = vpop.f32.mrb[9].mxu0 }
 0x505   : > { %1508 = vst [vmem:[#allocation3] sm:$0xff] %v1499_v56  ;;  %v1794_v56 = vadd.f32 %v1784_v42, %v10550_v55  ;;  %v10624_v55 = vmov 0.0  }
 0x50b   : > { %v6950_v57 = vpop.f32.mrb[10].mxu0 }
 0x50c   : > { %v1580_v60 = vpop.f32.mrb[11].mxu0 }
 0x50d   : > { %6962 = vmatprep.mubr.msk.f32.mxu1 %vm13776_vm11, %v1580_v60  ;;  %vm13787_vm11 = vmmov %vm13773_vm6 }
 0x50e   : > { %6963 = vmatmul.mubr.msk.f32.vlgmr.msra.gmra.mrb[16].mxu1 %vm13777_vm15, %v6950_v57  ;;  %vm13788_vm15 = vmmov %vm13773_vm6 }
 0x50f   : > { %v6953_v59 = vpop.f32.mrb[12].mxu0 }
 0x510   : > { %v1590_v12 = vpop.f32.mrb[13].mxu0 }
 0x511   : > { %6965 = vmatprep.mubr.msk.f32.mxu1 %vm13778_vm14, %v1590_v12  ;;  %vm13789_vm14 = vmmov %vm13773_vm6 }
 0x512   : > { %6966 = vmatmul.mubr.msk.f32.gmra.mrb[18].mxu1 %vm13779_vm12, %v6953_v59  ;;  %vm13790_vm12 = vmmov %vm13773_vm6 }
 0x513   : > { %v6956_v43 = vpop.f32.mrb[14].mxu0 }
 0x514   : > { %v1600_v29 = vpop.f32.mrb[15].mxu0 }
 0x515   : > { %6968 = vmatprep.mubr.msk.f32.mxu1 %vm13780_vm10, %v1600_v29  ;;  %v10628_v29 = vmov 0.0  }
 0x516   : > { %6969 = vmatmul.mubr.msk.f32.gmra.mrb[20].mxu1 %vm13781_vm0, %v6956_v43  ;;  %v10626_v43 = vmov 0.0  }
 0x517   : > { %v6959_v34 = vpop.f32.mrb[16].mxu0 }
 0x518   : > { %v1610_v2 = vpop.f32.mrb[17].mxu0 }
 0x519   : > { %6971 = vmatprep.mubr.msk.f32.mxu1 %vm13782_vm1, %v1610_v2  ;;  %v10632_v2 = vmov 0.0  }
 0x51a   : > { %6972 = vmatmul.mubr.msk.f32.gmra.mrb[22].mxu1 %vm13783_vm4, %v6959_v34  ;;  %v10630_v34 = vmov 0.0  }
 0x5e1   : > { %v6964_v26 = vpop.f32.mrb[16].mxu1 }
 0x5e2   : > { %v1797_v35 = vmul.f32 2.0, %v6964_v26  ;;  %v1709_v33 = vpop.f32.mrb[17].mxu1 }
 0x5e3   : > { %v1796_v11 = vmul.f32 2.0, %v1709_v33 }
 0x5e4   : > { %v10586_v58 = vsub.f32 %v1789_v10, %v1797_v35 }
 0x5e5   : > { %v10589_v21 = vsub.f32 %v1788_v54, %v1796_v11  ;;  %v6967_v15 = vpop.f32.mrb[18].mxu1 }
 0x5e6   : > { %1813 = vst.msk [vmem:[#allocation5 + $0x48] sm:$0xff] %vm13784_vm13, %v10586_v58  ;;  %v1799_v22 = vmul.f32 2.0, %v6967_v15  ;;  %v1719_v16 = vpop.f32.mrb[19].mxu1 }
 0x5e7   : > { %1812 = vst.msk [vmem:[#allocation5 + $0x40] sm:$0xff] %vm13773_vm6, %v10589_v21  ;;  %v1798_v18 = vmul.f32 2.0, %v1719_v16 }
 0x5e8   : > { %v10596_v45 = vsub.f32 %v1791_v24, %v1799_v22 }
 0x5e9   : > { %v10599_v32 = vsub.f32 %v1790_v46, %v1798_v18  ;;  %v6970_v47 = vpop.f32.mrb[20].mxu1 }
 0x5ea   : > { %1815 = vst.msk [vmem:[#allocation5 + $0x58] sm:$0xff] %vm13785_vm9, %v10596_v45  ;;  %v1801_v0 = vmul.f32 2.0, %v6970_v47  ;;  %v1729_v25 = vpop.f32.mrb[21].mxu1 }
 0x5eb   : > { %1814 = vst.msk [vmem:[#allocation5 + $0x50] sm:$0xff] %vm13786_vm7, %v10599_v32  ;;  %v1800_v31 = vmul.f32 2.0, %v1729_v25 }
 0x5ec   : > { %v10606_v38 = vsub.f32 %v1793_v49, %v1801_v0 }
 0x5ed   : > { %v10609_v28 = vsub.f32 %v1792_v39, %v1800_v31  ;;  %v6973_v50 = vpop.f32.mrb[22].mxu1 }
 0x5ee   : > { %1817 = vst.msk [vmem:[#allocation5 + $0x68] sm:$0xff] %vm13787_vm11, %v10606_v38  ;;  %v1803_v51 = vmul.f32 2.0, %v6973_v50  ;;  %v1739_v57 = vpop.f32.mrb[23].mxu1 }
 0x5ef   : > { %1816 = vst.msk [vmem:[#allocation5 + $0x60] sm:$0xff] %vm13788_vm15, %v10609_v28  ;;  %v1802_v60 = vmul.f32 2.0, %v1739_v57 }
 0x5f0   : > { %v10616_v59 = vsub.f32 %v1795_v40, %v1803_v51 }
 0x5f1   : > { %v10618_v12 = vsub.f32 %v1794_v56, %v1802_v60 }
 0x5f2   : > { %1819 = vst.msk [vmem:[#allocation5 + $0x78] sm:$0xff] %vm13789_vm14, %v10616_v59 }
 0x5f3   : > { %1818 = vst.msk [vmem:[#allocation5 + $0x70] sm:$0xff] %vm13790_vm12, %v10618_v12 }
 0x5f4 LB: >> { %s10670_s14 = sshll.u32 %s8210_s13, 3  ;;  %v13793_v54 = vmov 0  ;;  %v13795_v35 = vmov 0  ;;  %v13797_v33 = vmov 0  ;;  %v13805_v53 = vmov 0  ;;  %s1825_s13 = sadd.s32 1, %s8210_s13   ;;  %s8210_s13 = sphi %s10640_s13, %s1825_s13   ;;  %v8206_v17 = vphi %v10638_v17, %v14270_v17   ;;  %v8202_v14 = vphi %v10636_v14, %v14269_v14   ;;  %v8198_v23 = vphi %v10634_v23, %v14268_v23   ;;  %v8194_v2 = vphi %v10632_v2, %v14267_v2   ;;  %v8190_v34 = vphi %v10630_v34, %v14266_v34   ;;  %v8186_v29 = vphi %v10628_v29, %v14265_v29   ;;  %v8182_v43 = vphi %v10626_v43, %v14264_v43   ;;  %v8178_v55 = vphi %v10624_v55, %v14263_v55  }
 0x5f5   : >> { %s10673_s15 = scalar_lea.vmem [#allocation5], %s10670_s14  ;;  %v1858_v10 = vstv %s10670_s14  ;;  %s1899_s16 = sadd.s32 1, %s10670_s14  ;;  %v13807_v15 = vmov 0  ;;  %v13810_v16 = vmov 0  ;;  %v13816_v49 = vmov 0 }
 0x5f6   : >> { %vm1859_vm0 = vcmp.gt.s32.totalorder %v8318_v1, %v1858_v10  ;;  %vm1860_vm4 = vcmp.gt.s32.totalorder %v8323_v3, %v1858_v10  ;;  %vm1861_vm6 = vcmp.gt.s32.totalorder %v8326_v4, %v1858_v10  ;;  %vm1862_vm7 = vcmp.gt.s32.totalorder %v8329_v5, %v1858_v10  ;;  %s1964_s17 = sadd.s32 2, %s10670_s14  ;;  %s2029_s18 = sadd.s32 3, %s10670_s14 }
 0x5f7   : >> { %vm1863_vm14 = vcmp.gt.s32.totalorder %v8332_v6, %v1858_v10  ;;  %vm1864_vm8 = vcmp.gt.s32.totalorder %v8335_v7, %v1858_v10  ;;  %v1923_v22 = vstv %s1899_s16  ;;  %v13818_v47 = vmov 0  ;;  %s2094_s19 = sadd.s32 4, %s10670_s14  ;;  %s2159_s20 = sadd.s32 5, %s10670_s14 }
 0x5f8   : >> { %v13820_v39 = vmov 0  ;;  %v13822_v27 = vmov 0  ;;  %v13825_v0 = vmov 0  ;;  %v13164_v51 = vmov 0.0   ;;  %s2224_s21 = sadd.s32 6, %s10670_s14  ;;  %s2289_s22 = sadd.s32 7, %s10670_s14 }
 0x5f9   : >> { %v13880_v31 = vmov 0  ;;  %v13884_v40 = vmov 0  ;;  %v13939_v42 = vmov 0  ;;  %v13951_v52 = vmov 0  ;;  %p1822_p4 = scmp.ge.s32.totalorder %s1825_s13, 8  }
 0x5fa   : >> { %v6451_v44 = vld [vmem:[%s10673_s15 + $0x40] ss:$0 sm:$0xff]  ;;  %v10737_v46 = vld [vmem:[%s10673_s15 + $0x41] ss:$0 sm:$0xff]  ;;  %v10825_v50 = vld [vmem:[%s10673_s15 + $0x42] ss:$0 sm:$0xff] }
 0x5fb   : >> { %vm1850_vm10 = vcmp.eq.f32.partialorder %v6451_v44, %v10589_v21  ;;  %vm1851_vm1 = vcmp.eq.f32.partialorder %v6451_v44, %v10586_v58  ;;  %vm1852_vm13 = vcmp.eq.f32.partialorder %v6451_v44, %v10599_v32  ;;  %vm1853_vm9 = vcmp.eq.f32.partialorder %v6451_v44, %v10596_v45  ;;  %s2674_s23 = ssub.s32 (%p1822_p4), 0, %s8278_s28  ;;  %p2673_p6 = scmp.lt.s32.totalorder (%p1822_p4), %s8278_s28, 0 }
 0x5fc   : >> { %vm10685_vm11 = vmand %vm1850_vm10, %vm1859_vm0  ;;  %vm1854_vm15 = vcmp.eq.f32.partialorder %v6451_v44, %v10609_v28  ;;  %vm1855_vm3 = vcmp.eq.f32.partialorder %v6451_v44, %v10606_v38  ;;  %vm1856_vm10 = vcmp.eq.f32.partialorder %v6451_v44, %v10618_v12  ;;  %vm1865_vm0 = vcmp.gt.s32.totalorder %v8338_v8, %v1858_v10  ;;  %s6490_s24 = smin.u32 (%p1822_p4), %s8278_s28, %s2674_s23 }
 0x5fd   : >> { %vm10691_vm12 = vmand %vm1851_vm1, %vm1860_vm4  ;;  %vm1857_vm1 = vcmp.eq.f32.partialorder %v6451_v44, %v10616_v59  ;;  %vm1866_vm4 = vcmp.gt.s32.totalorder %v8341_v9, %v1858_v10  ;;  %v13962_v61 = vmov 0  ;;  %v13991_v19 = vmov 0  ;;  %s2676_s25 = sand.u32 (%p1822_p4), 3, %s6490_s24  }
 0x5fe   : >> { %v13794_v54 = vsel %vm10691_vm12, 4294967295, %v13793_v54  ;;  %vm10697_vm2 = vmand %vm1852_vm13, %vm1861_vm6  ;;  %vm1842_vm13 = vcmp.lt.f32.partialorder %v6451_v44, %v10589_v21  ;;  %v13999_v36 = vmov 0  ;;  %v14003_v48 = vmov 0  ;;  %s2677_s26 = ssub.s32 (%p1822_p4), 0, %s2676_s25 }
 0x5ff   : >> { %v13796_v35 = vsel %vm10697_vm2, 4294967295, %v13795_v35  ;;  %vm10703_vm5 = vmand %vm1853_vm9, %vm1862_vm7  ;;  %vm1843_vm9 = vcmp.lt.f32.partialorder %v6451_v44, %v10586_v58  ;;  %v14007_v30 = vmov 0  ;;  %v14011_v13 = vmov 0 }
 0x600   : >> { %v13798_v33 = vsel %vm10703_vm5, 4294967295, %v13797_v33  ;;  %vm10709_vm12 = vmand %vm1854_vm15, %vm1863_vm14  ;;  %vm1844_vm5 = vcmp.lt.f32.partialorder %v6451_v44, %v10599_v32  ;;  %vm1845_vm15 = vcmp.lt.f32.partialorder %v6451_v44, %v10596_v45  ;;  %vm1847_vm14 = vcmp.lt.f32.partialorder %v6451_v44, %v10606_v38 }
 0x601   : >> { %vm10714_vm6 = vmand %vm1855_vm3, %vm1864_vm8  ;;  %vm1846_vm3 = vcmp.lt.f32.partialorder %v6451_v44, %v10609_v28  ;;  %v14027_v63 = vmov 0  ;;  %v14039_v20 = vmov 0  ;;  %v14045_v62 = vmov 0 }
 0x602   : >> { %vm10720_vm7 = vmand %vm1856_vm10, %vm1865_vm0  ;;  %vm13809_vm10 = vnez %v13794_v54  ;;  %v11163_v54 = vstv %s2094_s19 }
 0x603   : >> { %vm10725_vm2 = vmand %vm1857_vm1, %vm1866_vm4  ;;  %vm1848_vm1 = vcmp.lt.f32.partialorder %v6451_v44, %v10618_v12 }
 0x604   : >> { %v13806_v53 = vsel %vm10725_vm2, 4294967295, %v13805_v53  ;;  %vm10732_vm8 = vmor %vm1842_vm13, %vm10685_vm11  ;;  %vm13812_vm11 = vnez %v13796_v35  ;;  %vm1849_vm13 = vcmp.lt.f32.partialorder %v6451_v44, %v10616_v59  ;;  %v10894_v35 = vstv %s1964_s17 }
 0x605   : >> { %v13808_v15 = vsel %vm10732_vm8, 4294967295, %v13807_v15  ;;  %vm10743_vm0 = vmor %vm1843_vm9, %vm13809_vm10  ;;  %vm13815_vm8 = vnez %v13798_v33  ;;  %vm1915_vm9 = vcmp.eq.f32.partialorder %v10737_v46, %v10589_v21  ;;  %vm1924_vm10 = vcmp.gt.s32.totalorder %v8318_v1, %v1923_v22 }
 0x606   : >> { %v13811_v16 = vsel %vm10743_vm0, 4294967295, %v13810_v16  ;;  %vm10750_vm4 = vmor %vm1844_vm5, %vm13812_vm11 }
 0x607   : >> { %vm10757_vm2 = vmor %vm1845_vm15, %vm13815_vm8  ;;  %vm1916_vm15 = vcmp.eq.f32.partialorder %v10737_v46, %v10586_v58  ;;  %vm1925_vm8 = vcmp.gt.s32.totalorder %v8323_v3, %v1923_v22  ;;  %v1885_v26 = vsel %vm10750_vm4, 1.0, %v13164_v51 }
 0x608   : >> { %v13817_v49 = vsel %vm10757_vm2, 4294967295, %v13816_v49  ;;  %vm10766_vm0 = vmor %vm1846_vm3, %vm10709_vm12  ;;  %vm1917_vm12 = vcmp.eq.f32.partialorder %v10737_v46, %v10599_v32  ;;  %vm13824_vm3 = vnez %v13806_v53 }
 0x609   : >> { %v13819_v47 = vsel %vm10766_vm0, 4294967295, %v13818_v47  ;;  %vm10772_vm5 = vmor %vm1847_vm14, %vm10714_vm6  ;;  %vm1926_vm6 = vcmp.gt.s32.totalorder %v8326_v4, %v1923_v22  ;;  %vm1928_vm0 = vcmp.gt.s32.totalorder %v8332_v6, %v1923_v22  ;;  %vm13847_vm4 = vnez %v13817_v49 }
 0x60a   : >> { %v13821_v39 = vsel %vm10772_vm5, 4294967295, %v13820_v39  ;;  %vm10781_vm11 = vmor %vm1848_vm1, %vm10720_vm7  ;;  %vm1918_vm5 = vcmp.eq.f32.partialorder %v10737_v46, %v10596_v45  ;;  %vm1927_vm7 = vcmp.gt.s32.totalorder %v8329_v5, %v1923_v22  ;;  %v1886_v33 = vsel %vm13847_vm4, 1.0, %v13164_v51 }
 0x60b   : >> { %v13823_v27 = vsel %vm10781_vm11, 4294967295, %v13822_v27  ;;  %vm10790_vm14 = vmor %vm1849_vm13, %vm13824_vm3  ;;  %vm1919_vm11 = vcmp.eq.f32.partialorder %v10737_v46, %v10609_v28  ;;  %vm1929_vm3 = vcmp.gt.s32.totalorder %v8335_v7, %v1923_v22  ;;  %vm1931_vm13 = vcmp.gt.s32.totalorder %v8341_v9, %v1923_v22 }
 0x60c   : >> { %v13826_v0 = vsel %vm10790_vm14, 4294967295, %v13825_v0  ;;  %vm10797_vm1 = vmand %vm1915_vm9, %vm1924_vm10  ;;  %vm1921_vm10 = vcmp.eq.f32.partialorder %v10737_v46, %v10618_v12  ;;  %vm13851_vm4 = vnez %v13819_v47  ;;  %v10959_v18 = vadd.f32 %v8194_v2, %v1886_v33  ;;  %v10975_v47 = vld [vmem:[%s10673_s15 + $0x43] ss:$0 sm:$0xff] }
 0x60d   : >> { %vm10804_vm2 = vmand %vm1916_vm15, %vm1925_vm8  ;;  %vm1930_vm15 = vcmp.gt.s32.totalorder %v8338_v8, %v1923_v22 }
 0x60e   : >> { %vm10811_vm14 = vmand %vm1917_vm12, %vm1926_vm6  ;;  %vm13856_vm12 = vnez %v13823_v27  ;;  %v13920_v27 = vmov 0 }
 0x60f   : >> { %vm10820_vm8 = vmand %vm1918_vm5, %vm1927_vm7  ;;  %vm13837_vm7 = vnez %v13808_v15  ;;  %v1889_v22 = vsel %vm13856_vm12, 1.0, %v13164_v51  ;;  %vm13860_vm12 = vnez %v13826_v0  ;;  %v11024_v0 = vstv %s2029_s18 }
 0x610   : >> { %vm10837_vm5 = vmand %vm1919_vm11, %vm1928_vm0  ;;  %v1883_v57 = vsel %vm13837_vm7, 1.0, %v13164_v51  ;;  %vm13838_vm0 = vcmp.eq.f32.partialorder %v10737_v46, %v10606_v38  ;;  %vm13841_vm7 = vnez %v13811_v16  ;;  %v10939_v16 = vadd.f32 %v8198_v23, %v1885_v26 }
 0x611   : >> { %vm10856_vm11 = vmand %vm13838_vm0, %vm1929_vm3  ;;  %v1884_v44 = vsel %vm13841_vm7, 1.0, %v13164_v51  ;;  %vm1980_vm3 = vcmp.eq.f32.partialorder %v10825_v50, %v10589_v21  ;;  %vm13844_vm0 = vcmp.eq.f32.partialorder %v10737_v46, %v10616_v59  ;;  %v10900_v11 = vadd.f32 %v8206_v17, %v1883_v57  ;;  %v11121_v57 = vld [vmem:[%s10673_s15 + $0x44] ss:$0 sm:$0xff] }
 0x612   : >> { %vm10872_vm9 = vmand %vm1921_vm10, %vm1930_vm15  ;;  %v1887_v17 = vsel %vm13851_vm4, 1.0, %v13164_v51  ;;  %vm13852_vm10 = vnez %v13821_v39  ;;  %v10922_v53 = vadd.f32 %v8202_v14, %v1884_v44  ;;  %v1890_v23 = vsel %vm13860_vm12, 1.0, %v13164_v51 }
 0x613   : >> { %vm10886_vm7 = vmand %vm13844_vm0, %vm1931_vm13  ;;  %vm13848_vm13 = vcmp.lt.f32.partialorder %v10737_v46, %v10589_v21  ;;  %v1888_v24 = vsel %vm13852_vm10, 1.0, %v13164_v51  ;;  %vm13857_vm10 = vcmp.lt.f32.partialorder %v10737_v46, %v10599_v32  ;;  %v10978_v2 = vadd.f32 %v8190_v34, %v1887_v17 }
 0x614   : >> { %vm10907_vm0 = vmor %vm13848_vm13, %vm10797_vm1  ;;  %vm13853_vm1 = vcmp.lt.f32.partialorder %v10737_v46, %v10586_v58  ;;  %v10981_v39 = vadd.f32 %v8186_v29, %v1888_v24  ;;  %v10997_v34 = vadd.f32 %v8182_v43, %v1889_v22  ;;  %vm13867_vm4 = vcmp.lt.f32.partialorder %v10737_v46, %v10606_v38 }
 0x615   : >> { %vm10929_vm13 = vmor %vm13853_vm1, %vm10804_vm2  ;;  %vm1989_vm1 = vcmp.gt.s32.totalorder %v8318_v1, %v10894_v35  ;;  %v13870_v43 = vmov 0  ;;  %v11027_v25 = vadd.f32 %v8178_v55, %v1890_v23  ;;  %vm13875_vm2 = vcmp.gt.s32.totalorder %v8323_v3, %v10894_v35 }
 0x616   : >> { %vm10946_vm15 = vmor %vm13857_vm10, %vm10811_vm14  ;;  %vm13861_vm14 = vcmp.lt.f32.partialorder %v10737_v46, %v10596_v45  ;;  %v1948_v60 = vsel %vm10907_vm0, 1.0, %v13164_v51  ;;  %v1949_v10 = vsel %vm10929_vm13, 1.0, %v13164_v51  ;;  %vm13902_vm13 = vcmp.gt.s32.totalorder %v8341_v9, %v10894_v35 }
 0x617   : >> { %vm10966_vm10 = vmor %vm13861_vm14, %vm10820_vm8  ;;  %vm13864_vm8 = vcmp.lt.f32.partialorder %v10737_v46, %v10609_v28  ;;  %v1950_v33 = vsel %vm10946_vm15, 1.0, %v13164_v51  ;;  %v11189_v17 = vadd.f32 %v1948_v60, %v10900_v11  ;;  %v13908_v24 = vmov 0 }
 0x618   : >> { %vm10988_vm12 = vmor %vm13864_vm8, %vm10837_vm5  ;;  %vm13876_vm8 = vcmp.eq.f32.partialorder %v10825_v50, %v10586_v58  ;;  %v11211_v15 = vadd.f32 %v1949_v10, %v10922_v53  ;;  %v13912_v22 = vmov 0  ;;  %v11230_v53 = vadd.f32 %v1950_v33, %v10939_v16  ;;  %v11249_v16 = vld [vmem:[%s10673_s15 + $0x45] ss:$0 sm:$0xff] }
 0x619   : >> { %vm11004_vm6 = vmor %vm13867_vm4, %vm10856_vm11  ;;  %vm13872_vm11 = vcmp.lt.f32.partialorder %v10737_v46, %v10618_v12  ;;  %v1952_v11 = vsel %vm10988_vm12, 1.0, %v13164_v51  ;;  %vm13914_vm0 = vcmp.gt.s32.totalorder %v8326_v4, %v11024_v0  ;;  %v13916_v14 = vmov 0 }
 0x61a   : >> { %vm11020_vm14 = vmand %vm1980_vm3, %vm1989_vm1  ;;  %v11251_v23 = vstv %s2159_s20  ;;  %v11278_v60 = vadd.f32 %v1952_v11, %v10978_v2  ;;  %v13924_v10 = vmov 0  ;;  %vm13926_vm12 = vcmp.gt.s32.totalorder %v8332_v6, %v11024_v0 }
 0x61b   : >> { %v13871_v43 = vsel %vm11020_vm14, 4294967295, %v13870_v43  ;;  %vm11034_vm4 = vmor %vm13872_vm11, %vm10872_vm9  ;;  %vm13879_vm11 = vcmp.lt.f32.partialorder %v10737_v46, %v10616_v59  ;;  %vm13883_vm9 = vcmp.eq.f32.partialorder %v10825_v50, %v10599_v32  ;;  %v13935_v33 = vmov 0 }
 0x61c   : >> { %vm11050_vm14 = vmand %vm13876_vm8, %vm13875_vm2  ;;  %vm13882_vm8 = vcmp.gt.s32.totalorder %v8326_v4, %v10894_v35  ;;  %vm13891_vm2 = vcmp.eq.f32.partialorder %v10825_v50, %v10609_v28  ;;  %v13976_v44 = vmov 0  ;;  %v14062_v29 = vmov 0 }
 0x61d   : >> { %vm11061_vm3 = vmor %vm13879_vm11, %vm10886_vm7  ;;  %vm13886_vm7 = vcmp.gt.s32.totalorder %v8329_v5, %v10894_v35  ;;  %vm13887_vm11 = vcmp.eq.f32.partialorder %v10825_v50, %v10596_v45  ;;  %v14077_v11 = vmov 0 }
 0x61e   : >> { %v13881_v31 = vsel %vm11061_vm3, 4294967295, %v13880_v31  ;;  %vm11075_vm1 = vmand %vm13883_vm9, %vm13882_vm8  ;;  %vm13894_vm9 = vcmp.gt.s32.totalorder %v8335_v7, %v10894_v35 }
 0x61f   : >> { %v13885_v40 = vsel %vm11075_vm1, 4294967295, %v13884_v40  ;;  %vm11085_vm5 = vmand %vm13887_vm11, %vm13886_vm7  ;;  %vm13890_vm11 = vcmp.gt.s32.totalorder %v8332_v6, %v10894_v35  ;;  %vm13895_vm1 = vcmp.eq.f32.partialorder %v10825_v50, %v10606_v38 }
 0x620   : >> { %vm11108_vm3 = vmand %vm13891_vm2, %vm13890_vm11  ;;  %vm13898_vm11 = vcmp.gt.s32.totalorder %v8338_v8, %v10894_v35  ;;  %v1951_v35 = vsel %vm10966_vm10, 1.0, %v13164_v51 }
 0x621   : >> { %vm11136_vm8 = vmand %vm13895_vm1, %vm13894_vm9  ;;  %vm13899_vm1 = vcmp.eq.f32.partialorder %v10825_v50, %v10618_v12  ;;  %v11254_v49 = vadd.f32 %v1951_v35, %v10959_v18  ;;  %v1953_v18 = vsel %vm11004_vm6, 1.0, %v13164_v51  ;;  %vm13927_vm6 = vcmp.eq.f32.partialorder %v10975_v47, %v10609_v28 }
 0x622   : >> { %vm11155_vm9 = vmand %vm13899_vm1, %vm13898_vm11  ;;  %vm13903_vm11 = vcmp.eq.f32.partialorder %v10825_v50, %v10616_v59  ;;  %v11412_v46 = vadd.f32 %v1953_v18, %v10981_v39  ;;  %v13979_v18 = vmov 0 }
 0x623   : >> { %vm11174_vm1 = vmand %vm13903_vm11, %vm13902_vm13  ;;  %vm13906_vm13 = vcmp.gt.s32.totalorder %v8318_v1, %v11024_v0  ;;  %vm13907_vm11 = vcmp.eq.f32.partialorder %v10975_v47, %v10589_v21 }
 0x624   : >> { %vm11199_vm7 = vmand %vm13907_vm11, %vm13906_vm13  ;;  %vm13910_vm13 = vcmp.gt.s32.totalorder %v8323_v3, %v11024_v0  ;;  %vm13911_vm11 = vcmp.eq.f32.partialorder %v10975_v47, %v10586_v58 }
 0x625   : >> { %v13909_v24 = vsel %vm11199_vm7, 4294967295, %v13908_v24  ;;  %vm11221_vm10 = vmand %vm13911_vm11, %vm13910_vm13  ;;  %vm13915_vm13 = vcmp.eq.f32.partialorder %v10975_v47, %v10599_v32 }
 0x626   : >> { %v13913_v22 = vsel %vm11221_vm10, 4294967295, %v13912_v22  ;;  %vm11240_vm11 = vmand %vm13915_vm13, %vm13914_vm0  ;;  %vm13918_vm0 = vcmp.gt.s32.totalorder %v8329_v5, %v11024_v0  ;;  %vm13919_vm13 = vcmp.eq.f32.partialorder %v10975_v47, %v10596_v45 }
 0x627   : >> { %v13917_v14 = vsel %vm11240_vm11, 4294967295, %v13916_v14  ;;  %vm11264_vm2 = vmand %vm13919_vm13, %vm13918_vm0  ;;  %vm13922_vm0 = vnez %v13871_v43  ;;  %vm13923_vm13 = vcmp.lt.f32.partialorder %v10825_v50, %v10589_v21  ;;  %vm13930_vm11 = vcmp.gt.s32.totalorder %v8318_v1, %v11163_v54 }
 0x628   : >> { %v13921_v27 = vsel %vm11264_vm2, 4294967295, %v13920_v27  ;;  %vm11285_vm15 = vmor %vm13923_vm13, %vm13922_vm0  ;;  %v1954_v43 = vsel %vm11034_vm4, 1.0, %v13164_v51  ;;  %vm13942_vm2 = vcmp.eq.f32.partialorder %v11121_v57, %v10586_v58  ;;  %vm13946_vm4 = vnez %v13885_v40 }
 0x629   : >> { %v13925_v10 = vsel %vm11285_vm15, 4294967295, %v13924_v10  ;;  %vm11297_vm10 = vmand %vm13927_vm6, %vm13926_vm12  ;;  %vm13931_vm15 = vcmp.eq.f32.partialorder %v11121_v57, %v10589_v21  ;;  %vm13934_vm12 = vcmp.lt.f32.partialorder %v10825_v50, %v10586_v58  ;;  %v11463_v56 = vadd.f32 %v1954_v43, %v10997_v34  ;;  %v11541_v43 = vld [vmem:[%s10673_s15 + $0x46] ss:$0 sm:$0xff] }
 0x62a   : >> { %vm11313_vm7 = vmand %vm13931_vm15, %vm13930_vm11  ;;  %vm13937_vm15 = vcmp.gt.s32.totalorder %v8335_v7, %v11024_v0  ;;  %vm13938_vm11 = vcmp.eq.f32.partialorder %v10975_v47, %v10606_v38  ;;  %v13983_v34 = vmov 0 }
 0x62b   : >> { %vm11325_vm6 = vmor %vm13934_vm12, %vm11050_vm14  ;;  %vm13941_vm12 = vcmp.gt.s32.totalorder %v8323_v3, %v11163_v54  ;;  %vm13945_vm14 = vnez %v13881_v31 }
 0x62c   : >> { %v13936_v33 = vsel %vm11325_vm6, 4294967295, %v13935_v33  ;;  %vm11337_vm0 = vmand %vm13938_vm11, %vm13937_vm15  ;;  %v1955_v35 = vsel %vm13945_vm14, 1.0, %v13164_v51  ;;  %vm13953_vm15 = vcmp.gt.s32.totalorder %v8338_v8, %v11024_v0  ;;  %vm13958_vm14 = vcmp.eq.f32.partialorder %v11121_v57, %v10599_v32 }
 0x62d   : >> { %v13940_v42 = vsel %vm11337_vm0, 4294967295, %v13939_v42  ;;  %vm11351_vm13 = vmand %vm13942_vm2, %vm13941_vm12  ;;  %vm13947_vm0 = vcmp.lt.f32.partialorder %v10825_v50, %v10599_v32  ;;  %vm13950_vm2 = vcmp.lt.f32.partialorder %v10825_v50, %v10596_v45  ;;  %vm13961_vm11 = vcmp.lt.f32.partialorder %v10825_v50, %v10609_v28 }
 0x62e   : >> { %vm11367_vm6 = vmor %vm13947_vm0, %vm13946_vm4  ;;  %vm13954_vm0 = vcmp.eq.f32.partialorder %v10975_v47, %v10618_v12  ;;  %v13965_v51 = vmov 0  ;;  %v11512_v26 = vadd.f32 %v1955_v35, %v11027_v25  ;;  %v13995_v25 = vmov 0 }
 0x62f   : >> { %vm11376_vm12 = vmor %vm13950_vm2, %vm11085_vm5  ;;  %vm13957_vm2 = vcmp.gt.s32.totalorder %v8326_v4, %v11163_v54  ;;  %v11543_v35 = vstv %s2224_s21 }
 0x630   : >> { %v13952_v52 = vsel %vm11376_vm12, 4294967295, %v13951_v52  ;;  %vm11388_vm4 = vmand %vm13954_vm0, %vm13953_vm15  ;;  %vm13967_vm0 = vcmp.gt.s32.totalorder %v8341_v9, %v11024_v0  ;;  %vm13972_vm15 = vcmp.eq.f32.partialorder %v11121_v57, %v10596_v45  ;;  %v13973_v0 = vmov 0 }
 0x631   : >> { %vm11402_vm12 = vmand %vm13958_vm14, %vm13957_vm2  ;;  %vm13964_vm14 = vcmp.lt.f32.partialorder %v10825_v50, %v10606_v38 }
 0x632   : >> { %vm11419_vm5 = vmor %vm13961_vm11, %vm11108_vm3  ;;  %vm13968_vm3 = vcmp.eq.f32.partialorder %v10975_v47, %v10616_v59 }
 0x633   : >> { %v13963_v61 = vsel %vm11419_vm5, 4294967295, %v13962_v61  ;;  %vm11428_vm2 = vmor %vm13964_vm14, %vm11136_vm8  ;;  %vm13971_vm14 = vcmp.gt.s32.totalorder %v8329_v5, %v11163_v54  ;;  %vm13975_vm5 = vcmp.lt.f32.partialorder %v10825_v50, %v10618_v12 }
 0x634   : >> { %v13966_v51 = vsel %vm11428_vm2, 4294967295, %v13965_v51  ;;  %vm11440_vm11 = vmand %vm13968_vm3, %vm13967_vm0  ;;  %vm13985_vm0 = vcmp.gt.s32.totalorder %v8318_v1, %v11251_v23  ;;  %vm13986_vm3 = vcmp.eq.f32.partialorder %v11249_v16, %v10589_v21 }
 0x635   : >> { %vm11454_vm2 = vmand %vm13972_vm15, %vm13971_vm14  ;;  %vm13978_vm15 = vcmp.lt.f32.partialorder %v10825_v50, %v10616_v59  ;;  %v13987_v50 = vmov 0 }
 0x636   : >> { %v13974_v0 = vsel %vm11454_vm2, 4294967295, %v13973_v0  ;;  %vm11470_vm8 = vmor %vm13975_vm5, %vm11155_vm9  ;;  %vm13981_vm9 = vcmp.gt.s32.totalorder %v8332_v6, %v11163_v54  ;;  %vm13982_vm5 = vcmp.eq.f32.partialorder %v11121_v57, %v10609_v28 }
 0x637   : >> { %v13977_v44 = vsel %vm11470_vm8, 4294967295, %v13976_v44  ;;  %vm11479_vm14 = vmor %vm13978_vm15, %vm11174_vm1  ;;  %vm13990_vm1 = vcmp.eq.f32.partialorder %v11121_v57, %v10606_v38 }
 0x638   : >> { %v13980_v18 = vsel %vm11479_vm14, 4294967295, %v13979_v18  ;;  %vm11493_vm8 = vmand %vm13982_vm5, %vm13981_vm9  ;;  %vm13989_vm5 = vcmp.gt.s32.totalorder %v8335_v7, %v11163_v54  ;;  %vm13994_vm9 = vcmp.eq.f32.partialorder %v11249_v16, %v10586_v58 }
 0x639   : >> { %v13984_v34 = vsel %vm11493_vm8, 4294967295, %v13983_v34  ;;  %vm11507_vm14 = vmand %vm13986_vm3, %vm13985_vm0  ;;  %vm13998_vm0 = vcmp.eq.f32.partialorder %v11121_v57, %v10618_v12 }
 0x63a   : >> { %v13988_v50 = vsel %vm11507_vm14, 4294967295, %v13987_v50  ;;  %vm11522_vm15 = vmand %vm13990_vm1, %vm13989_vm5  ;;  %vm13993_vm14 = vcmp.gt.s32.totalorder %v8323_v3, %v11251_v23  ;;  %vm13997_vm5 = vcmp.gt.s32.totalorder %v8338_v8, %v11163_v54  ;;  %vm14009_vm1 = vcmp.gt.s32.totalorder %v8341_v9, %v11163_v54 }
 0x63b   : >> { %v13992_v19 = vsel %vm11522_vm15, 4294967295, %v13991_v19  ;;  %vm11536_vm8 = vmand %vm13994_vm9, %vm13993_vm14  ;;  %vm14001_vm15 = vcmp.gt.s32.totalorder %v8326_v4, %v11251_v23  ;;  %vm14005_vm14 = vnez %v13909_v24  ;;  %vm14006_vm9 = vcmp.lt.f32.partialorder %v10975_v47, %v10589_v21 }
 0x63c   : >> { %v13996_v25 = vsel %vm11536_vm8, 4294967295, %v13995_v25  ;;  %vm11553_vm3 = vmand %vm13998_vm0, %vm13997_vm5  ;;  %vm14002_vm0 = vcmp.eq.f32.partialorder %v11249_v16, %v10599_v32  ;;  %v14015_v54 = vmov 0  ;;  %v14019_v24 = vmov 0 }
 0x63d   : >> { %v14000_v36 = vsel %vm11553_vm3, 4294967295, %v13999_v36  ;;  %vm11571_vm5 = vmand %vm14002_vm0, %vm14001_vm15  ;;  %vm14010_vm15 = vcmp.eq.f32.partialorder %v11121_v57, %v10616_v59  ;;  %vm14026_vm8 = vcmp.lt.f32.partialorder %v10975_v47, %v10599_v32 }
 0x63e   : >> { %v14004_v48 = vsel %vm11571_vm5, 4294967295, %v14003_v48  ;;  %vm11580_vm3 = vmor %vm14006_vm9, %vm14005_vm14  ;;  %vm14017_vm5 = vnez %v13913_v22  ;;  %vm14018_vm14 = vcmp.lt.f32.partialorder %v10975_v47, %v10586_v58  ;;  %v14023_v22 = vmov 0 }
 0x63f   : >> { %v14008_v30 = vsel %vm11580_vm3, 4294967295, %v14007_v30  ;;  %vm11592_vm0 = vmand %vm14010_vm15, %vm14009_vm1  ;;  %vm14013_vm3 = vcmp.gt.s32.totalorder %v8329_v5, %v11251_v23  ;;  %vm14014_vm1 = vcmp.eq.f32.partialorder %v11249_v16, %v10596_v45  ;;  %vm14025_vm9 = vnez %v13917_v14 }
 0x640   : >> { %v14012_v13 = vsel %vm11592_vm0, 4294967295, %v14011_v13  ;;  %vm11610_vm15 = vmand %vm14014_vm1, %vm14013_vm3  ;;  %vm14021_vm1 = vcmp.gt.s32.totalorder %v8332_v6, %v11251_v23  ;;  %v14035_v14 = vmov 0 }
 0x641   : >> { %v14016_v54 = vsel %vm11610_vm15, 4294967295, %v14015_v54  ;;  %vm11619_vm0 = vmor %vm14018_vm14, %vm14017_vm5  ;;  %vm14022_vm15 = vcmp.eq.f32.partialorder %v11249_v16, %v10609_v28  ;;  %vm14030_vm5 = vcmp.eq.f32.partialorder %v11249_v16, %v10606_v38  ;;  %vm14038_vm14 = vcmp.eq.f32.partialorder %v11249_v16, %v10618_v12 }
 0x642   : >> { %v14020_v24 = vsel %vm11619_vm0, 4294967295, %v14019_v24  ;;  %vm11635_vm2 = vmand %vm14022_vm15, %vm14021_vm1  ;;  %vm14029_vm1 = vcmp.gt.s32.totalorder %v8335_v7, %v11251_v23  ;;  %vm14033_vm15 = vnez %v13921_v27  ;;  %v14042_v27 = vmov 0.0  }
 0x643   : >> { %v14024_v22 = vsel %vm11635_vm2, 4294967295, %v14023_v22  ;;  %vm11648_vm3 = vmor %vm14026_vm8, %vm14025_vm9 }
 0x644   : >> { %v14028_v63 = vsel %vm11648_vm3, 4294967295, %v14027_v63  ;;  %vm11660_vm2 = vmand %vm14030_vm5, %vm14029_vm1  ;;  %vm14034_vm3 = vcmp.lt.f32.partialorder %v10975_v47, %v10596_v45  ;;  %vm14037_vm1 = vcmp.gt.s32.totalorder %v8338_v8, %v11251_v23  ;;  %vm14061_vm5 = vcmp.lt.f32.partialorder %v10975_v47, %v10606_v38 }
 0x645   : >> { %vm11675_vm0 = vmor %vm14034_vm3, %vm14033_vm15  ;;  %vm14047_vm3 = vcmp.lt.f32.partialorder %v11121_v57, %v10589_v21  ;;  %vm14050_vm15 = vcmp.gt.s32.totalorder %v8341_v9, %v11251_v23 }
 0x646   : >> { %v14036_v14 = vsel %vm11675_vm0, 4294967295, %v14035_v14  ;;  %vm11687_vm8 = vmand %vm14038_vm14, %vm14037_vm1  ;;  %vm14043_vm0 = vnez %v13925_v10  ;;  %vm14044_vm14 = vcmp.lt.f32.partialorder %v10975_v47, %v10609_v28  ;;  %v14052_v10 = vmov 0 }
 0x647   : >> { %v14040_v20 = vsel %vm11687_vm8, 4294967295, %v14039_v20  ;;  %v2013_v41 = vsel %vm14043_vm0, 1.0, %v14042_v27  ;;  %vm11707_vm1 = vmor %vm14044_vm14, %vm11297_vm10  ;;  %vm14051_vm10 = vcmp.eq.f32.partialorder %v11249_v16, %v10616_v59  ;;  %vm14055_vm0 = vcmp.gt.s32.totalorder %v8318_v1, %v11543_v35 }
 0x648   : >> { %14041 = vst [vmem:[#allocation40_spill] sm:$0xff] %v14040_v20  ;;  %v14046_v62 = vsel %vm11707_vm1, 4294967295, %v14045_v62  ;;  %vm11716_vm9 = vmor %vm14047_vm3, %vm11313_vm7  ;;  %v14048_v20 = vmov 0  ;;  %vm14081_vm3 = vcmp.eq.f32.partialorder %v11541_v43, %v10599_v32 }
 0x649   : >> { %v14049_v20 = vsel %vm11716_vm9, 4294967295, %v14048_v20  ;;  %vm11728_vm14 = vmand %vm14051_vm10, %vm14050_vm15  ;;  %vm14056_vm9 = vcmp.eq.f32.partialorder %v11541_v43, %v10589_v21  ;;  %vm14059_vm15 = vnez %v13936_v33  ;;  %vm14060_vm10 = vnez %v13940_v42 }
 0x64a   : >> { %v14053_v10 = vsel %vm11728_vm14, 4294967295, %v14052_v10  ;;  %vm11744_vm1 = vmand %vm14056_vm9, %vm14055_vm0  ;;  %v2014_v2 = vsel %vm14059_vm15, 1.0, %v14042_v27  ;;  %vm14064_vm9 = vcmp.lt.f32.partialorder %v11121_v57, %v10586_v58  ;;  %v2015_v42 = vsel %vm11367_vm6, 1.0, %v14042_v27 }
 0x64b   : >> { %14054 = vst [vmem:[#allocation41_spill] sm:$0xff] %v14053_v10  ;;  %vm11756_vm7 = vmor %vm14061_vm5, %vm14060_vm10  ;;  %v14065_v10 = vmov 0  ;;  %vm14068_vm10 = vcmp.gt.s32.totalorder %v8323_v3, %v11543_v35 }
 0x64c   : >> { %v14063_v29 = vsel %vm11756_vm7, 4294967295, %v14062_v29  ;;  %vm11765_vm0 = vmor %vm14064_vm9, %vm11351_vm13  ;;  %vm14069_vm7 = vcmp.eq.f32.partialorder %v11541_v43, %v10586_v58  ;;  %vm14072_vm13 = vnez %v13952_v52  ;;  %vm14073_vm9 = vcmp.lt.f32.partialorder %v10975_v47, %v10618_v12 }
 0x64d   : >> { %v14066_v10 = vsel %vm11765_vm0, 4294967295, %v14065_v10  ;;  %vm11781_vm14 = vmand %vm14069_vm7, %vm14068_vm10  ;;  %v2016_v55 = vsel %vm14072_vm13, 1.0, %v14042_v27  ;;  %vm14076_vm7 = vcmp.lt.f32.partialorder %v11121_v57, %v10599_v32  ;;  %vm14086_vm10 = vcmp.lt.f32.partialorder %v10975_v47, %v10616_v59 }
 0x64e   : >> { %14067 = vst [vmem:[#allocation42_spill] sm:$0xff] %v14066_v10  ;;  %vm11796_vm15 = vmor %vm14073_vm9, %vm11388_vm4  ;;  %v14074_v10 = vmov 0  ;;  %vm14080_vm9 = vcmp.gt.s32.totalorder %v8326_v4, %v11543_v35  ;;  %vm14101_vm4 = vcmp.lt.f32.partialorder %v11121_v57, %v10609_v28 }
 0x64f   : >> { %v14075_v10 = vsel %vm11796_vm15, 4294967295, %v14074_v10  ;;  %vm11805_vm6 = vmor %vm14076_vm7, %vm11402_vm12  ;;  %vm14084_vm12 = vnez %v13963_v61  ;;  %vm14085_vm7 = vnez %v13966_v51  ;;  %v14091_v61 = vmov 0 }
 0x650   : >> { %v14078_v11 = vsel %vm11805_vm6, 4294967295, %v14077_v11  ;;  %vm11821_vm5 = vmand %vm14081_vm3, %vm14080_vm9  ;;  %v2017_v31 = vsel %vm14084_vm12, 1.0, %v14042_v27  ;;  %v2018_v40 = vsel %vm14085_vm7, 1.0, %v14042_v27  ;;  %vm14089_vm3 = vnez %v13974_v0 }
 0x651   : >> { %14079 = vst [vmem:[#allocation43_spill] sm:$0xff] %v14078_v11  ;;  %vm11836_vm13 = vmor %vm14086_vm10, %vm11440_vm11  ;;  %v14087_v11 = vmov 0  ;;  %vm14090_vm9 = vcmp.lt.f32.partialorder %v11121_v57, %v10596_v45  ;;  %vm14094_vm10 = vcmp.gt.s32.totalorder %v8329_v5, %v11543_v35  ;;  %vm14100_vm7 = vnez %v13984_v34  ;;  %v11905_v34 = vld [vmem:[%s10673_s15 + $0x47] ss:$0 sm:$0xff] }
 0x652   : >> { %v14088_v11 = vsel %vm11836_vm13, 4294967295, %v14087_v11  ;;  %vm11845_vm12 = vmor %vm14090_vm9, %vm14089_vm3  ;;  %vm14095_vm13 = vcmp.eq.f32.partialorder %v11541_v43, %v10596_v45  ;;  %vm14098_vm3 = vnez %v13977_v44  ;;  %vm14099_vm9 = vnez %v13980_v18 }
 0x653   : >> { %v14092_v61 = vsel %vm11845_vm12, 4294967295, %v14091_v61  ;;  %vm11861_vm6 = vmand %vm14095_vm13, %vm14094_vm10  ;;  %v2019_v47 = vsel %vm14098_vm3, 1.0, %v14042_v27  ;;  %v2020_v39 = vsel %vm14099_vm9, 1.0, %v14042_v27  ;;  %v14102_v0 = vmov 0 }
 0x654   : >> { %14093 = vst [vmem:[#allocation44_spill] sm:$0xff] %v14092_v61  ;;  %vm11877_vm11 = vmor %vm14101_vm4, %vm14100_vm7  ;;  %vm14105_vm13 = vnez %v13988_v50  ;;  %vm14106_vm10 = vcmp.lt.f32.partialorder %v11249_v16, %v10589_v21  ;;  %v14107_v44 = vmov 0  ;;  %vm14110_vm4 = vcmp.gt.s32.totalorder %v8332_v6, %v11543_v35 }
 0x655   : >> { %v14103_v0 = vsel %vm11877_vm11, 4294967295, %v14102_v0  ;;  %vm11886_vm12 = vmor %vm14106_vm10, %vm14105_vm13  ;;  %vm14111_vm7 = vcmp.eq.f32.partialorder %v11541_v43, %v10609_v28  ;;  %v14112_v18 = vmov 0  ;;  %v2021_v50 = vadd.f32 %v2013_v41, %v11189_v17 }
 0x656   : >> { %14104 = vst [vmem:[#allocation45_spill] sm:$0xff] %v14103_v0  ;;  %v14108_v44 = vsel %vm11886_vm12, 4294967295, %v14107_v44  ;;  %vm11900_vm11 = vmand %vm14111_vm7, %vm14110_vm4  ;;  %v2023_v0 = vadd.f32 %v2015_v42, %v11230_v53  ;;  %vm14114_vm13 = vnez %v13992_v19  ;;  %vm14115_vm10 = vcmp.lt.f32.partialorder %v11121_v57, %v10606_v38 }
 0x657   : >> { %14109 = vst [vmem:[#allocation46_spill] sm:$0xff] %v14108_v44  ;;  %v14113_v18 = vsel %vm11900_vm11, 4294967295, %v14112_v18  ;;  %v2022_v44 = vadd.f32 %v2014_v2, %v11211_v15  ;;  %vm11915_vm3 = vmor %vm14115_vm10, %vm14114_vm13  ;;  %v14116_v61 = vmov 0  ;;  %vm14118_vm4 = vnez %v13996_v25 }
 0x658   : >> { %v14117_v61 = vsel %vm11915_vm3, 4294967295, %v14116_v61  ;;  %vm14119_vm7 = vcmp.lt.f32.partialorder %v11249_v16, %v10586_v58  ;;  %v14120_v41 = vmov 0  ;;  %vm14122_vm15 = vcmp.gt.s32.totalorder %v8335_v7, %v11543_v35 }
 0x659   : >> { %vm11924_vm9 = vmor %vm14119_vm7, %vm14118_vm4  ;;  %vm14123_vm13 = vcmp.eq.f32.partialorder %v11541_v43, %v10606_v38  ;;  %v14124_v17 = vmov 0  ;;  %v2024_v15 = vadd.f32 %v2016_v55, %v11254_v49  ;;  %v2025_v53 = vadd.f32 %v2017_v31, %v11278_v60  ;;  %v14176_v31 = vld [vmem:[#allocation41_spill] sm:$0xff] }
 0x65a   : >> { %v14121_v41 = vsel %vm11924_vm9, 4294967295, %v14120_v41  ;;  %vm11936_vm10 = vmand %vm14123_vm13, %vm14122_vm15  ;;  %v2026_v19 = vadd.f32 %v2018_v40, %v11412_v46  ;;  %vm14126_vm4 = vnez %v14000_v36  ;;  %vm14127_vm7 = vcmp.lt.f32.partialorder %v11121_v57, %v10618_v12 }
 0x65b   : >> { %v14125_v17 = vsel %vm11936_vm10, 4294967295, %v14124_v17  ;;  %vm11948_vm12 = vmor %vm14127_vm7, %vm14126_vm4  ;;  %v14128_v25 = vmov 0  ;;  %vm14130_vm15 = vnez %v14004_v48  ;;  %vm14131_vm13 = vcmp.lt.f32.partialorder %v11249_v16, %v10599_v32 }
 0x65c   : >> { %v14129_v25 = vsel %vm11948_vm12, 4294967295, %v14128_v25  ;;  %vm11957_vm9 = vmor %vm14131_vm13, %vm14130_vm15  ;;  %v14132_v49 = vmov 0  ;;  %vm14134_vm3 = vcmp.gt.s32.totalorder %v8338_v8, %v11543_v35  ;;  %vm14135_vm10 = vcmp.eq.f32.partialorder %v11541_v43, %v10618_v12 }
 0x65d   : >> { %v14133_v49 = vsel %vm11957_vm9, 4294967295, %v14132_v49  ;;  %vm11967_vm11 = vmand %vm14135_vm10, %vm14134_vm3  ;;  %v14136_v36 = vmov 0  ;;  %v11971_v60 = vstv %s2289_s22  ;;  %v2027_v48 = vadd.f32 %v2019_v47, %v11463_v56 }
 0x65e   : >> { %v14137_v36 = vsel %vm11967_vm11, 4294967295, %v14136_v36  ;;  %v11975_v46 = vadd.f32 %v2020_v39, %v11512_v26  ;;  %vm14138_vm4 = vnez %v14008_v30  ;;  %vm14139_vm7 = vnez %v14012_v13 }
 0x65f   : >> { %v2078_v2 = vsel %vm14138_vm4, 1.0, %v14042_v27  ;;  %vm14140_vm15 = vcmp.lt.f32.partialorder %v11121_v57, %v10616_v59  ;;  %vm14143_vm10 = vnez %v14016_v54  ;;  %vm14144_vm13 = vcmp.lt.f32.partialorder %v11249_v16, %v10596_v45 }
 0x660   : >> { %vm11985_vm3 = vmor %vm14140_vm15, %vm14139_vm7  ;;  %v14145_v56 = vmov 0  ;;  %vm14147_vm4 = vcmp.gt.s32.totalorder %v8341_v9, %v11543_v35  ;;  %vm14148_vm12 = vcmp.eq.f32.partialorder %v11541_v43, %v10616_v59  ;;  %vm14151_vm15 = vnez %v14020_v24 }
 0x661   : >> { %vm11994_vm9 = vmor %vm14144_vm13, %vm14143_vm10  ;;  %v2079_v30 = vsel %vm14151_vm15, 1.0, %v14042_v27  ;;  %vm14152_vm10 = vnez %v14024_v22  ;;  %vm14153_vm13 = vcmp.lt.f32.partialorder %v11249_v16, %v10609_v28  ;;  %v14161_v54 = vmov 0 }
 0x662   : >> { %v14146_v56 = vsel %vm11994_vm9, 4294967295, %v14145_v56  ;;  %vm12004_vm11 = vmand %vm14148_vm12, %vm14147_vm4  ;;  %vm14156_vm12 = vcmp.lt.f32.partialorder %v11541_v43, %v10589_v21  ;;  %vm14163_vm7 = vcmp.lt.f32.partialorder %v11541_v43, %v10586_v58  ;;  %v2087_v55 = vadd.f32 %v2079_v30, %v2022_v44  ;;  %v14191_v44 = vld [vmem:[#allocation43_spill] sm:$0xff] }
 0x663   : >> { %vm12018_vm9 = vmor %vm14153_vm13, %vm14152_vm10  ;;  %vm14159_vm13 = vnez %v14028_v63  ;;  %v2086_v63 = vadd.f32 %v2078_v2, %v2021_v50  ;;  %v2144_v47 = vsel %vm11765_vm0, 1.0, %v14042_v27  ;;  %v14188_v39 = vmov 0 }
 0x664   : >> { %vm12027_vm4 = vmor %vm14156_vm12, %vm11744_vm1  ;;  %v2080_v35 = vsel %vm14159_vm13, 1.0, %v14042_v27  ;;  %vm14160_vm1 = vcmp.lt.f32.partialorder %v11249_v16, %v10606_v38  ;;  %vm14171_vm13 = vcmp.lt.f32.partialorder %v11541_v43, %v10599_v32  ;;  %vm14192_vm0 = vnez %v14191_v44 }
 0x665   : >> { %vm12045_vm12 = vmor %vm14160_vm1, %vm11660_vm2  ;;  %vm14190_vm2 = vnez %v14075_v10  ;;  %v14195_v50 = vmov 0  ;;  %v2152_v22 = vadd.f32 %v2144_v47, %v2087_v55  ;;  %v2212_v42 = vsel %vm12018_vm9, 1.0, %v14042_v27 }
 0x666   : >> { %v14162_v54 = vsel %vm12045_vm12, 4294967295, %v14161_v54  ;;  %vm12054_vm15 = vmor %vm14163_vm7, %vm11781_vm14  ;;  %vm14166_vm12 = vnez %v14036_v14  ;;  %vm14168_vm14 = vcmp.lt.f32.partialorder %v11249_v16, %v10618_v12  ;;  %vm14233_vm9 = vcmp.gt.s32.totalorder %v8332_v6, %v11971_v60 }
 0x667   : >> { %v2081_v37 = vsel %vm14166_vm12, 1.0, %v14042_v27  ;;  %vm12074_vm7 = vmor %vm14168_vm14, %vm11687_vm8  ;;  %vm14174_vm14 = vnez %v14046_v62  ;;  %vm14178_vm12 = vcmp.lt.f32.partialorder %v11249_v16, %v10616_v59  ;;  %vm14181_vm8 = vcmp.lt.f32.partialorder %v11541_v43, %v10596_v45 }
 0x668   : >> { %vm12083_vm1 = vmor %vm14171_vm13, %vm11821_vm5  ;;  %v2082_v14 = vsel %vm14174_vm14, 1.0, %v14042_v27  ;;  %vm14175_vm5 = vnez %v14049_v20  ;;  %vm14177_vm13 = vnez %v14176_v31  ;;  %v2088_v16 = vadd.f32 %v2080_v35, %v2023_v0 }
 0x669   : >> { %v2143_v52 = vsel %vm14175_vm5, 1.0, %v14042_v27  ;;  %vm12104_vm10 = vmor %vm14178_vm12, %vm14177_vm13  ;;  %vm14184_vm12 = vnez %v14063_v29  ;;  %v2084_v29 = vsel %vm14190_vm2, 1.0, %v14042_v27  ;;  %v2089_v0 = vadd.f32 %v2081_v37, %v2024_v15 }
 0x66a   : >> { %vm12113_vm14 = vmor %vm14181_vm8, %vm11861_vm6  ;;  %v2083_v20 = vsel %vm14184_vm12, 1.0, %v14042_v27  ;;  %vm14186_vm6 = vnez %v14113_v18  ;;  %vm14187_vm8 = vcmp.lt.f32.partialorder %v11541_v43, %v10609_v28  ;;  %v2145_v18 = vsel %vm14192_vm0, 1.0, %v14042_v27 }
 0x66b   : >> { %vm12132_vm13 = vmor %vm14187_vm8, %vm14186_vm6  ;;  %vm14193_vm6 = vnez %v14125_v17  ;;  %vm14194_vm8 = vcmp.lt.f32.partialorder %v11541_v43, %v10606_v38  ;;  %vm14197_vm12 = vnez %v14088_v11  ;;  %v2090_v15 = vadd.f32 %v2082_v14, %v2025_v53  ;;  %v14198_v17 = vld [vmem:[#allocation44_spill] sm:$0xff]  ;;  %v14204_v53 = vld [vmem:[#allocation45_spill] sm:$0xff] }
 0x66c   : >> { %v14189_v39 = vsel %vm12132_vm13, 4294967295, %v14188_v39  ;;  %vm12151_vm13 = vmor %vm14194_vm8, %vm14193_vm6  ;;  %v2085_v10 = vsel %vm14197_vm12, 1.0, %v14042_v27  ;;  %vm14199_vm0 = vnez %v14198_v17  ;;  %v2151_v30 = vadd.f32 %v2143_v52, %v2086_v63  ;;  %v14206_v63 = vld [vmem:[#allocation46_spill] sm:$0xff] }
 0x66d   : >> { %v14196_v50 = vsel %vm12151_vm13, 4294967295, %v14195_v50  ;;  %v2146_v2 = vsel %vm14199_vm0, 1.0, %v14042_v27  ;;  %vm14200_vm6 = vnez %v14137_v36  ;;  %vm14201_vm8 = vcmp.lt.f32.partialorder %v11541_v43, %v10618_v12 }
 0x66e   : >> { %vm12170_vm13 = vmor %vm14201_vm8, %vm14200_vm6  ;;  %v2091_v11 = vadd.f32 %v2083_v20, %v2026_v19  ;;  %vm14205_vm12 = vnez %v14204_v53  ;;  %vm14207_vm0 = vnez %v14206_v63  ;;  %vm14208_vm6 = vcmp.lt.f32.partialorder %v11541_v43, %v10616_v59 }
 0x66f   : >> { %v2147_v37 = vsel %vm14205_vm12, 1.0, %v14042_v27  ;;  %v2208_v36 = vsel %vm14207_vm0, 1.0, %v14042_v27  ;;  %vm12187_vm8 = vmor %vm14208_vm6, %vm12004_vm11  ;;  %v14209_v14 = vmov 0  ;;  %v2092_v19 = vadd.f32 %v2084_v29, %v2027_v48 }
 0x670   : >> { %v14210_v14 = vsel %vm12187_vm8, 4294967295, %v14209_v14  ;;  %vm14211_vm12 = vnez %v14117_v61  ;;  %v2153_v52 = vadd.f32 %v2145_v18, %v2088_v16  ;;  %vm14212_vm0 = vnez %v14121_v41 }
 0x671   : >> { %v2148_v55 = vsel %vm14211_vm12, 1.0, %v14042_v27  ;;  %v2209_v13 = vsel %vm14212_vm0, 1.0, %v14042_v27  ;;  %vm14213_vm11 = vcmp.gt.s32.totalorder %v8318_v1, %v11971_v60  ;;  %vm14214_vm6 = vcmp.eq.f32.partialorder %v11905_v34, %v10589_v21 }
 0x672   : >> { %vm12207_vm5 = vmand %vm14214_vm6, %vm14213_vm11  ;;  %v2093_v61 = vadd.f32 %v2085_v10, %v11975_v46  ;;  %vm14217_vm12 = vnez %v14129_v25  ;;  %v2154_v48 = vadd.f32 %v2146_v2, %v2089_v0  ;;  %vm14218_vm0 = vnez %v14133_v49 }
 0x673   : >> { %v2149_v41 = vsel %vm14217_vm12, 1.0, %v14042_v27  ;;  %v2210_v31 = vsel %vm14218_vm0, 1.0, %v14042_v27  ;;  %vm14219_vm2 = vcmp.gt.s32.totalorder %v8323_v3, %v11971_v60  ;;  %vm14220_vm11 = vcmp.eq.f32.partialorder %v11905_v34, %v10586_v58 }
 0x674   : >> { %vm12224_vm6 = vmand %vm14220_vm11, %vm14219_vm2  ;;  %v2150_v25 = vsel %vm11985_vm3, 1.0, %v14042_v27  ;;  %v2155_v46 = vadd.f32 %v2147_v37, %v2090_v15  ;;  %vm14223_vm12 = vnez %v14146_v56  ;;  %v2216_v16 = vadd.f32 %v2208_v36, %v2151_v30 }
 0x675   : >> { %v2211_v49 = vsel %vm14223_vm12, 1.0, %v14042_v27  ;;  %vm14224_vm0 = vcmp.gt.s32.totalorder %v8326_v4, %v11971_v60  ;;  %vm14225_vm8 = vcmp.eq.f32.partialorder %v11905_v34, %v10599_v32  ;;  %v2156_v47 = vadd.f32 %v2148_v55, %v2091_v11 }
 0x676   : >> { %vm12240_vm2 = vmand %vm14225_vm8, %vm14224_vm0  ;;  %v2217_v29 = vadd.f32 %v2209_v13, %v2152_v22  ;;  %v2273_v56 = vsel %vm12027_vm4, 1.0, %v14042_v27  ;;  %vm14228_vm3 = vcmp.gt.s32.totalorder %v8329_v5, %v11971_v60  ;;  %vm14229_vm11 = vcmp.eq.f32.partialorder %v11905_v34, %v10596_v45 }
 0x677   : >> { %vm12256_vm8 = vmand %vm14229_vm11, %vm14228_vm3  ;;  %v2157_v44 = vadd.f32 %v2149_v41, %v2092_v19  ;;  %vm14232_vm12 = vnez %v14162_v54  ;;  %v2218_v18 = vadd.f32 %v2210_v31, %v2153_v52  ;;  %v2274_v26 = vsel %vm12054_vm15, 1.0, %v14042_v27 }
 0x678   : >> { %v2213_v57 = vsel %vm14232_vm12, 1.0, %v14042_v27  ;;  %vm14234_vm4 = vcmp.eq.f32.partialorder %v11905_v34, %v10609_v28  ;;  %v2158_v15 = vadd.f32 %v2150_v25, %v2093_v61  ;;  %v2214_v54 = vsel %vm12074_vm7, 1.0, %v14042_v27 }
 0x679   : >> { %vm12272_vm0 = vmand %vm14234_vm4, %vm14233_vm9  ;;  %v2219_v17 = vadd.f32 %v2211_v49, %v2154_v48  ;;  %v2275_v24 = vsel %vm12083_vm1, 1.0, %v14042_v27  ;;  %vm14237_vm15 = vcmp.gt.s32.totalorder %v8335_v7, %v11971_v60  ;;  %vm14238_vm3 = vcmp.eq.f32.partialorder %v11905_v34, %v10606_v38 }
 0x67a   : >> { %vm12288_vm11 = vmand %vm14238_vm3, %vm14237_vm15  ;;  %v2215_v23 = vsel %vm12104_vm10, 1.0, %v14042_v27  ;;  %v2220_v30 = vadd.f32 %v2212_v42, %v2155_v46  ;;  %v2276_v33 = vsel %vm12113_vm14, 1.0, %v14042_v27  ;;  %v2281_v11 = vadd.f32 %v2273_v56, %v2216_v16 }
 0x67b   : >> { %vm14241_vm1 = vcmp.gt.s32.totalorder %v8338_v8, %v11971_v60  ;;  %vm14242_vm7 = vcmp.eq.f32.partialorder %v11905_v34, %v10618_v12  ;;  %v2221_v37 = vadd.f32 %v2213_v57, %v2156_v47  ;;  %vm14245_vm10 = vnez %v14189_v39  ;;  %v14272_v57 = vld [vmem:[#allocation31_spill] sm:$0xff] (%p1822_p4) }
 0x67c   : >> { %vm12304_vm12 = vmand %vm14242_vm7, %vm14241_vm1  ;;  %v2277_v40 = vsel %vm14245_vm10, 1.0, %v14042_v27  ;;  %v2282_v22 = vadd.f32 %v2274_v26, %v2217_v29  ;;  %vm2301_vm14 = vcmp.lt.f32.partialorder %v11905_v34, %v10609_v28  ;;  %vm14246_vm9 = vcmp.gt.s32.totalorder %v8341_v9, %v11971_v60 }
 0x67d   : >> { %vm14247_vm4 = vcmp.eq.f32.partialorder %v11905_v34, %v10616_v59  ;;  %v2222_v63 = vadd.f32 %v2214_v54, %v2157_v44  ;;  %vm14250_vm3 = vnez %v14196_v50  ;;  %v2283_v36 = vadd.f32 %v2275_v24, %v2218_v18 }
 0x67e   : >> { %vm12319_vm15 = vmand %vm14247_vm4, %vm14246_vm9  ;;  %v2278_v39 = vsel %vm14250_vm3, 1.0, %v14042_v27  ;;  %vm2302_vm1 = vcmp.lt.f32.partialorder %v11905_v34, %v10606_v38  ;;  %vm14251_vm7 = vcmp.lt.f32.partialorder %v11905_v34, %v10589_v21  ;;  %v2223_v60 = vadd.f32 %v2215_v23, %v2158_v15 }
 0x67f   : >> { %vm2330_vm10 = vmor %vm14251_vm7, %vm12207_vm5  ;;  %v2279_v19 = vsel %vm12170_vm13, 1.0, %v14042_v27  ;;  %v2284_v55 = vadd.f32 %v2276_v33, %v2219_v17  ;;  %vm14252_vm9 = vcmp.lt.f32.partialorder %v11905_v34, %v10586_v58  ;;  %vm14253_vm3 = vnez %v14210_v14 }
 0x680   : >> { %vm2331_vm4 = vmor %vm14252_vm9, %vm12224_vm6  ;;  %v2338_v50 = vsel %vm2330_vm10, 1.0, %v14042_v27  ;;  %v2280_v52 = vsel %vm14253_vm3, 1.0, %v14042_v27  ;;  %v2285_v13 = vadd.f32 %v2277_v40, %v2220_v30  ;;  %vm14254_vm5 = vcmp.lt.f32.partialorder %v11905_v34, %v10599_v32  ;;  %v14279_v32 = vld [vmem:[#allocation32_spill] sm:$0xff] (%p1822_p4) }
 0x681   : >> { %vm2332_vm13 = vmor %vm14254_vm5, %vm12240_vm2  ;;  %v2339_v35 = vsel %vm2331_vm4, 1.0, %v14042_v27  ;;  %v12351_v17 = vadd.f32 %v2338_v50, %v2281_v11   ;;  %v2286_v43 = vadd.f32 %v2278_v39, %v2221_v37  ;;  %vm2303_vm6 = vcmp.lt.f32.partialorder %v11905_v34, %v10618_v12  ;;  %v14291_v37 = vld [vmem:[#allocation14_spill] sm:$0xff] (%p1822_p4) }
 0x682   : >> { %vm14256_vm7 = vcmp.lt.f32.partialorder %v11905_v34, %v10596_v45  ;;  %v2340_v14 = vsel %vm2332_vm13, 1.0, %v14042_v27  ;;  %v12361_v41 = vadd.f32 %v2339_v35, %v2282_v22   ;;  %v2287_v48 = vadd.f32 %v2279_v19, %v2222_v63  ;;  %vm2334_vm9 = vmor %vm2301_vm14, %vm12272_vm0  ;;  %v14292_v63 = vld [vmem:[#allocation17_spill] sm:$0xff] (%p1822_p4)  ;;  %v14294_v19 = vld [vmem:[#allocation18_spill] sm:$0xff] (%p1822_p4) }
 0x683   : >> { %v14255_v61 = vmov %v12351_v17  ;;  %vm2333_vm10 = vmor %vm14256_vm7, %vm12256_vm8  ;;  %vm2304_vm2 = vcmp.lt.f32.partialorder %v11905_v34, %v10616_v59  ;;  %v12371_v23 = vadd.f32 %v2340_v14, %v2283_v36   ;;  %v2288_v25 = vadd.f32 %v2280_v52, %v2223_v60  ;;  %v14293_v36 = vld [vmem:[#allocation16_spill] sm:$0xff] (%p1822_p4) }
 0x684   : >> { %v2341_v31 = vsel %vm2333_vm10, 1.0, %v14042_v27  ;;  %vm2335_vm8 = vmor %vm2302_vm1, %vm12288_vm11  ;;  %v2342_v46 = vsel %vm2334_vm9, 1.0, %v14042_v27  ;;  %v14269_v14 = vmov %v12361_v41  ;;  %v14270_v17 = vmov %v14255_v61 }
 0x685   : >> { %v14257_v20 = vmov %v12371_v23  ;;  %v12379_v2 = vadd.f32 %v2341_v31, %v2284_v55   ;;  %vm2336_vm4 = vmor %vm2303_vm6, %vm12304_vm12  ;;  %v2343_v16 = vsel %vm2335_vm8, 1.0, %v14042_v27  ;;  %v12384_v34 = vadd.f32 %v2342_v46, %v2285_v13   ;;  %1824 = sbr.rel (!%p1822_p4) target bundleno = 1524 (0x5f4), region = 165  ;;  %v14299_v31 = vld [vmem:[#allocation19_spill] sm:$0xff] (%p1822_p4)  ;;  %v14300_v46 = vld [vmem:[#allocation20_spill] sm:$0xff] (%p1822_p4) }
 0x686   : >> { %vm2337_vm0 = vmor %vm2304_vm2, %vm12319_vm15  ;;  %v2344_v47 = vsel %vm2336_vm4, 1.0, %v14042_v27  ;;  %v12389_v29 = vadd.f32 %v2343_v16, %v2286_v43   ;;  %v14268_v23 = vmov %v14257_v20  ;;  %vm2354_vm11 = vcmp.lt.f32.partialorder (%p1822_p4), %v14255_v61, 2.0 }
 0x687   : >> { %v14258_v49 = vmov %v12379_v2  ;;  %v14259_v51 = vmov %v12384_v34  ;;  %v2345_v56 = vsel %vm2337_vm0, 1.0, %v14042_v27  ;;  %v12392_v43 = vadd.f32 %v2344_v47, %v2287_v48   ;;  %v14287_v23 = vld [vmem:[#allocation34_spill] sm:$0xff] (%p1822_p4) }
 0x688   : >> { %v14260_v42 = vmov %v12389_v29  ;;  %v12394_v55 = vadd.f32 %v2345_v56, %v2288_v25   ;;  %v14266_v34 = vmov %v14259_v51  ;;  %v14267_v2 = vmov %v14258_v49 }
 0x689   : >> { %v14261_v0 = vmov %v12392_v43  ;;  %v14265_v29 = vmov %v14260_v42  ;;  %vm2356_vm12 = vcmp.lt.f32.partialorder (%p1822_p4), %v14257_v20, 2.0  ;;  %vm2355_vm14 = vcmp.lt.f32.partialorder (%p1822_p4), %v12361_v41, 2.0  ;;  %v14283_v34 = vld [vmem:[#allocation33_spill] sm:$0xff] (%p1822_p4) }
 0x68a   : >> { %v14262_v44 = vmov %v12394_v55  ;;  %v14264_v43 = vmov %v14261_v0  ;;  %vm2357_vm15 = vcmp.lt.f32.partialorder (%p1822_p4), %v14258_v49, 2.0  ;;  %v14271_v27 = vmov (%p1822_p4), 1.0|1.0  }
 0x68b   : >> { %v14263_v55 = vmov %v14262_v44  ;;  %vm14273_vm1 = vnez (%p1822_p4), %v14272_v57  ;;  %v14274_v18 = vmov (%p1822_p4), 0.0|0.0   ;;  %v14275_v26 = vmov (%p1822_p4), 0.0  }
 0x68c   : > { %7540 = vmatprep.subr.msk.bf16.mxu0 %vm14273_vm1, %v14271_v27  ;;  %7555 = vmatprep.subr.bf16.mxu1 %v14274_v18  ;;  %v2362_v10 = vsel %vm2354_vm11, 1.0, %v14275_v26  ;;  %v2364_v15 = vsel %vm2356_vm12, 1.0, %v14275_v26  ;;  %v2363_v54 = vsel %vm2355_vm14, 1.0, %v14275_v26  ;;  %v2365_v58 = vsel %vm2357_vm15, 1.0, %v14275_v26  ;;  %s14416_s26 = smov (!%p2673_p6, %s2677_s26), %s2676_s25 }
 0x68d   : > { %7542 = vmatpush3.bf16.msk.msra.mxu0 %vm14273_vm1, %v14271_v27  ;;  %vm14276_vm3 = vmmov 0   ;;  %vm14277_vm5 = vcmask 523264   ;;  %vm14280_vm6 = vnez %v14279_v32  ;;  %vm2358_vm7 = vcmp.lt.f32.partialorder %v14259_v51, 2.0  ;;  %p6492_p10 = scmp.lt.s32.totalorder %s14416_s26, 0  ;;  %s2683_s29 = sadd.s32 4, %s14416_s26 }
 0x68e   : > { %7018 = vmatprep.mubr.msk.f32.mxu1 %vm14276_vm3, %v14275_v26  ;;  %v2370_v21 = vsel %vm14277_vm5, %v2362_v10, 0.0  ;;  %vm14278_vm13 = vmmov %vm14277_vm5  ;;  %7544 = vmatprep.subr.msk.bf16.mxu0 %vm14280_vm6, %v14271_v27  ;;  %vm2359_vm10 = vcmp.lt.f32.partialorder %v14260_v42, 2.0  ;;  %v2366_v59 = vsel %vm2358_vm7, 1.0, %v14275_v26  ;;  %vm2360_vm8 = vcmp.lt.f32.partialorder %v14261_v0, 2.0 }
 0x68f   : > { %v2376_v45 = vsel %vm14278_vm13, %v2364_v15, 0.0  ;;  %2371 = vadd.xlane.f32.xlu0 %v2370_v21  ;;  %vm14281_vm2 = vmmov %vm14277_vm5  ;;  %v2367_v12 = vsel %vm2359_vm10, 1.0, %v14275_v26  ;;  %vm2361_vm4 = vcmp.lt.f32.partialorder %v14262_v44, 2.0  ;;  %vm14284_vm0 = vnez %v14283_v34  ;;  %v14304_v21 = vld [vmem:[#allocation22_spill] sm:$0xff]  ;;  %s14418_s29 = smov (!%p6492_p10, %s2683_s29), %s14416_s26 }
 0x690   : > { %2377 = vadd.xlane.f32.xlu1 %v2376_v45  ;;  %v2373_v38 = vsel %vm14281_vm2, %v2363_v54, 0.0  ;;  %vm14282_vm9 = vmmov %vm14281_vm2  ;;  %v2368_v24 = vsel %vm2360_vm8, 1.0, %v14275_v26  ;;  %v2369_v2 = vsel %vm2361_vm4, 1.0, %v14275_v26  ;;  %vm14288_vm14 = vnez %v14287_v23  ;;  %v14303_v54 = vld [vmem:[#allocation21_spill] sm:$0xff]  ;;  %p6493_p11 = scmp.ne.s32.totalorder %s14418_s29, 0 }
 0x691   : > { %v2379_v28 = vsel %vm14282_vm9, %v2365_v58, 0.0  ;;  %7546 = vmatpush3.bf16.msk.msra.mxu0 %vm14280_vm6, %v14271_v27  ;;  %vm14285_vm11 = vmmov %vm14281_vm2  ;;  %p2689_p12 = scmp.lt.s32.totalorder (!%p6493_p11), %s8278_s28, 8 }
 0x692   : > { %7548 = vmatprep.subr.msk.bf16.mxu0 %vm14284_vm0, %v14271_v27  ;;  %v2382_v29 = vsel %vm14285_vm11, %v2366_v59, 0.0  ;;  %vm14286_vm12 = vmmov %vm14281_vm2 }
 0x693   : > { %2374 = vadd.xlane.f32.xlu0 %v2373_v38  ;;  %v2385_v17 = vsel %vm14286_vm12, %v2367_v12, 0.0  ;;  %vm14289_vm15 = vmmov %vm14281_vm2 }
 0x694   : > { %2380 = vadd.xlane.f32.xlu1 %v2379_v28  ;;  %v2388_v30 = vsel %vm14289_vm15, %v2368_v24, 0.0  ;;  %vm14290_vm1 = vmmov %vm14281_vm2 }
 0x695   : > { %7550 = vmatpush3.bf16.msk.msra.mxu0 %vm14284_vm0, %v14271_v27  ;;  %v2391_v33 = vsel %vm14290_vm1, %v2369_v2, 0.0  ;;  %vm14295_vm3 = vmmov %vm14290_vm1 }
 0x696   : > { %7552 = vmatprep.subr.msk.bf16.mxu0 %vm14288_vm14, %v14271_v27  ;;  %vm14296_vm5 = vmmov %vm14290_vm1 }
 0x697   : > { %2383 = vadd.xlane.f32.xlu0 %v2382_v29  ;;  %vm14297_vm13 = vmmov %vm14290_vm1 }
 0x698   : > { %2386 = vadd.xlane.f32.xlu1 %v2385_v17  ;;  %vm14298_vm6 = vmmov %vm14290_vm1 }
 0x699   : > { %7554 = vmatpush3.bf16.msk.msra.mxu0 %vm14288_vm14, %v14271_v27  ;;  %vm14301_vm7 = vmmov %vm14290_vm1 }
 0x69a   : > { %vm14302_vm10 = vmmov %vm14290_vm1 }
 0x69b   : > { %2389 = vadd.xlane.f32.xlu0 %v2388_v30  ;;  %vm14305_vm2 = vmmov %vm14290_vm1 }
 0x69c   : > { %2392 = vadd.xlane.f32.xlu1 %v2391_v33  ;;  %vm14306_vm9 = vmmov %vm14290_vm1  ;;  %v14307_v33 = vld [vmem:[#allocation10_spill] sm:$0xff] }
 0x69d   : > { %vm14308_vm11 = vcmp.eq.s32.totalorder %v8318_v1, %v14307_v33  ;;  %vm14309_vm15 = vcmp.eq.s32.totalorder %v8323_v3, %v14307_v33 }
 0x71c   : > { %v2372_v11 = vpop.xlane.xlu0 %2371 }
 0x71d   : > { %v2378_v53 = vpop.xlane.xlu1 %2377  ;;  %v2394_v40 = vmul.f32 %v2372_v11, %v14291_v37  ;;  %v14326_v37 = vld [vmem:[#allocation12_spill] sm:$0xff] }
 0x71e   : > { %v2396_v39 = vmul.f32 %v2378_v53, %v14292_v63 }
 0x71f   : > { %v2402_v50 = vsel %vm14295_vm3, %v2394_v40, 0.0 }
 0x720   : > { %v2375_v22 = vpop.xlane.xlu0 %2374  ;;  %v2405_v14 = vsel %vm14297_vm13, %v2396_v39, 0.0  ;;  %vm14311_vm13 = vcmp.eq.s32.totalorder %v8326_v4, %v14307_v33 }
 0x721   : > { %v2381_v62 = vpop.xlane.xlu1 %2380  ;;  %v2395_v60 = vmul.f32 %v2375_v22, %v14293_v36  ;;  %v14327_v22 = vld [vmem:[#allocation37_spill] sm:$0xff]  ;;  %v14328_v36 = vld [vmem:[#allocation13_spill] sm:$0xff] }
 0x722   : > { %v2397_v55 = vmul.f32 %v2381_v62, %v14294_v19 }
 0x723   : > { %v2403_v52 = vsel %vm14296_vm5, %v2395_v60, 0.0  ;;  %vm14310_vm5 = vmmov %vm14305_vm2 }
 0x724   : > { %v2404_v13 = vadd.f32 %v2403_v52, %v2402_v50  ;;  %v2384_v35 = vpop.xlane.xlu0 %2383  ;;  %v2407_v48 = vsel %vm14298_vm6, %v2397_v55, 0.0  ;;  %v14329_v55 = vld [vmem:[#allocation38_spill] sm:$0xff] }
 0x725   : > { %v2387_v43 = vpop.xlane.xlu1 %2386  ;;  %v2398_v25 = vmul.f32 %v2384_v35, %v14299_v31 }
 0x726   : > { %v2399_v16 = vmul.f32 %v2387_v43, %v14300_v46  ;;  %v2406_v47 = vadd.f32 %v2405_v14, %v2404_v13  ;;  %v14330_v14 = vld [vmem:[#allocation15_spill] sm:$0xff] }
 0x727   : > { %v2409_v56 = vsel %vm14301_vm7, %v2398_v25, 0.0  ;;  %vm14312_vm7 = vmmov %vm14305_vm2  ;;  %v14331_v25 = vld [vmem:[#allocation39_spill] sm:$0xff] }
 0x728   : > { %v2408_v27 = vadd.f32 %v2407_v48, %v2406_v47  ;;  %v2390_v57 = vpop.xlane.xlu0 %2389  ;;  %v2411_v15 = vsel %vm14302_vm10, %v2399_v16, 0.0  ;;  %vm14313_vm10 = vcmp.eq.s32.totalorder %v8329_v5, %v14307_v33 }
 0x729   : > { %v2393_v10 = vpop.xlane.xlu1 %2392  ;;  %v2400_v58 = vmul.f32 %v2390_v57, %v14303_v54  ;;  %v14332_v57 = vld [vmem:[#allocation35_spill] sm:$0xff] }
 0x72a   : > { %v2401_v45 = vmul.f32 %v2393_v10, %v14304_v21  ;;  %v2410_v32 = vadd.f32 %v2409_v56, %v2408_v27 }
 0x72b   : > { %v2413_v38 = vsel %vm14305_vm2, %v2400_v58, 0.0 }
 0x72c   : > { %v2412_v28 = vadd.f32 %v2411_v15, %v2410_v32  ;;  %v2415_v59 = vsel %vm14306_vm9, %v2401_v45, 0.0  ;;  %vm14314_vm9 = vmmov %vm14310_vm5 }
 0x72e   : > { %v2414_v12 = vadd.f32 %v2413_v38, %v2412_v28 }
 0x730   : > { %v2416_v34 = vadd.f32 %v2415_v59, %v2414_v12  ;;  %v2709_v12 = vld [vmem:[#allocation2] sm:$0xff] (!%p6493_p11) }
 0x732   : > { %v2417_v29 = vrot.slane %v2416_v34, 4 }
 0x734   : > { %v2418_v17 = vadd.f32 %v2417_v29, %v2416_v34  ;;  %v2710_v34 = vld [vmem:[#allocation2 + $0x8] sm:$0xff] (!%p6493_p11)  ;;  %v8221_v29 = vmov (!%p6493_p11), 0.0  }
 0x735   : > { %7021 = vmatprep.subr.mxu0 (!%p6493_p11), %v8221_v29 }
 0x736   : > { %v2419_v24 = vrot.slane %v2418_v17, 2 }
 0x738   : > { %v2420_v2 = vadd.f32 %v2419_v24, %v2418_v17  ;;  %v2690_v17 = vld [vmem:[%s13089_s2] sm:$0xff] (!%p6493_p11)  ;;  %v6494_v24 = vld [vmem:[%s13089_s2 + $0x8] sm:$0xff] (!%p6493_p11) }
 0x73a   : > { %v2421_v23 = vrot.slane %v2420_v2, 1 }
 0x73c   : > { %v2422_v30 = vadd.f32 %v2421_v23, %v2420_v2  ;;  %v2908_v23 = vld [vmem:[#allocation3] sm:$0xff] (!%p6493_p11) }
 0x73e   : > { %vm2423_vm8 = vcmp.lt.f32.partialorder %v14255_v61, %v2422_v30  ;;  %vm2424_vm4 = vcmp.lt.f32.partialorder %v12361_v41, %v2422_v30  ;;  %vm2425_vm0 = vcmp.lt.f32.partialorder %v14257_v20, %v2422_v30  ;;  %vm2426_vm14 = vcmp.lt.f32.partialorder %v14258_v49, %v2422_v30  ;;  %v14324_v41 = vld [vmem:[#allocation11_spill] sm:$0xff] }
 0x73f   : > { %vm2431_vm12 = vmor %vm2423_vm8, %vm14308_vm11  ;;  %vm2427_vm3 = vcmp.lt.f32.partialorder %v14259_v51, %v2422_v30  ;;  %vm14315_vm8 = vcmp.eq.s32.totalorder %v8332_v6, %v14307_v33  ;;  %vm2428_vm11 = vcmp.lt.f32.partialorder %v14260_v42, %v2422_v30  ;;  %v14325_v51 = vld [vmem:[#allocation36_spill] sm:$0xff] }
 0x740   : > { %v2439_v11 = vsel %vm2431_vm12, 1.0, %v14275_v26  ;;  %vm2432_vm1 = vmor %vm2424_vm4, %vm14309_vm15  ;;  %vm2429_vm12 = vcmp.lt.f32.partialorder %v14261_v0, %v2422_v30  ;;  %vm14317_vm15 = vcmp.eq.s32.totalorder %v8335_v7, %v14307_v33 }
 0x741   : > { %6990 = vmatprep.mubr.msk.f32.mxu0 %vm14310_vm5, %v2439_v11  ;;  %v2440_v61 = vsel %vm2432_vm1, 1.0, %v14275_v26  ;;  %vm2433_vm6 = vmor %vm2425_vm0, %vm14311_vm13  ;;  %vm2430_vm13 = vcmp.lt.f32.partialorder %v14262_v44, %v2422_v30  ;;  %v2697_v30 = vld [vmem:[%s13090_s3] sm:$0xff] (!%p6493_p11) }
 0x742   : > { %6991 = vmatmul.mubr.msk.f32.vlgmr.msra.gmra.mrb[18].mxu0 %vm14312_vm7, %v2440_v61  ;;  %v2441_v1 = vsel %vm2433_vm6, 1.0, %v14275_v26  ;;  %vm2434_vm2 = vmor %vm2426_vm14, %vm14313_vm10  ;;  %vm14321_vm7 = vcmp.eq.s32.totalorder %v8341_v9, %v14307_v33 }
 0x743   : > { %6993 = vmatprep.mubr.msk.f32.mxu0 %vm14314_vm9, %v2441_v1  ;;  %vm2435_vm4 = vmor %vm2427_vm3, %vm14315_vm8  ;;  %v2442_v3 = vsel %vm2434_vm2, 1.0, %v14275_v26  ;;  %7022 = vmatpush3.msra.mxu0 (!%p6493_p11), %v2709_v12  ;;  %v2701_v1 = vld [vmem:[%s13091_s4] sm:$0xff] (!%p6493_p11) }
 0x744   : > { %vm14316_vm0 = vmmov %vm14310_vm5  ;;  %v2443_v4 = vsel %vm2435_vm4, 1.0, %v14275_v26  ;;  %vm14319_vm5 = vcmp.eq.s32.totalorder %v8338_v8, %v14307_v33  ;;  %vm8222_vm4 = vmmov (!%p6493_p11), 0   ;;  %7031 = vmatprep.subr.mxu0 (!%p6493_p11), %v8221_v29  ;;  %v6495_v33 = vld [vmem:[%s13090_s3 + $0x8] sm:$0xff] (!%p6493_p11) }
 0x745   : > { %vm2436_vm14 = vmor %vm2428_vm11, %vm14317_vm15 }
 0x746   : > { %6994 = vmatmul.mubr.msk.f32.gmra.mrb[20].mxu0 %vm14316_vm0, %v2442_v3  ;;  %vm14318_vm1 = vmmov %vm14316_vm0  ;;  %v2444_v5 = vsel %vm2436_vm14, 1.0, %v14275_v26  ;;  %v6496_v3 = vld [vmem:[%s13091_s4 + $0x8] sm:$0xff] (!%p6493_p11) }
 0x747   : > { %6996 = vmatprep.mubr.msk.f32.mxu0 %vm14318_vm1, %v2443_v4  ;;  %vm2437_vm3 = vmor %vm2429_vm12, %vm14319_vm5  ;;  %v8223_v4 = vmov (!%p6493_p11), 0   ;;  %vm14336_vm12 = vcmask (!%p6493_p11), 64512   ;;  %vm14340_vm1 = vcmask (!%p6493_p11), 523264  }
 0x748   : > { %vm14320_vm6 = vmmov %vm14316_vm0  ;;  %v2445_v6 = vsel %vm2437_vm3, 1.0, %v14275_v26  ;;  %8019 = vset.pattern.permute.xlu0 (!%p6493_p11), %v8223_v4 }
 0x749   : > { %vm2438_vm10 = vmor %vm2430_vm13, %vm14321_vm7 }
 0x74a   : > { %6997 = vmatmul.mubr.msk.f32.gmra.mrb[22].mxu0 %vm14320_vm6, %v2444_v5  ;;  %vm14322_vm2 = vmmov %vm14316_vm0  ;;  %v2446_v7 = vsel %vm2438_vm10, 1.0, %v14275_v26 }
 0x74b   : > { %6999 = vmatprep.mubr.msk.f32.mxu0 %vm14322_vm2, %v2445_v6  ;;  %vm14323_vm9 = vmmov %vm14316_vm0 }
 0x74c   : > { %vm14333_vm8 = vmmov %vm14316_vm0 }
 0x74d   : > { %vm14337_vm0 = vmmov (!%p6493_p11), %vm14336_vm12 }
 0x74e   : > { %7000 = vmatmul.mubr.msk.f32.gmra.mrb[24].mxu0 %vm14323_vm9, %v2446_v7  ;;  %vm14338_vm15 = vmmov (!%p6493_p11), %vm14337_vm0 }
 0x74f   : > { %7023 = vmatprep.mubr.msk.f32.mxu0 (!%p6493_p11), %vm8222_vm4, %v8221_v29  ;;  %vm14339_vm14 = vmmov (!%p6493_p11), %vm14337_vm0 }
 0x750   : > { %vm14341_vm5 = vmmov (!%p6493_p11), %vm14340_vm1 }
 0x751   : > { %vm14342_vm3 = vmmov (!%p6493_p11), %vm14340_vm1 }
 0x752   : > { %vm14343_vm13 = vmmov (!%p6493_p11), %vm14340_vm1 }
 0x753   : > { %vm14344_vm6 = vmmov (!%p6493_p11), %vm14340_vm1 }
 0x754   : > { %vm14345_vm7 = vmmov (!%p6493_p11), %vm14340_vm1 }
 0x815   : > { %v6992_v8 = vpop.f32.mrb[18].mxu0 }
 0x816   : > { %v2543_v20 = vadd.f32 %v6992_v8, %v14324_v41  ;;  %v2537_v49 = vpop.f32.mrb[19].mxu0  ;;  %v2705_v8 = vld [vmem:[%s13092_s5] sm:$0xff] (!%p6493_p11)  ;;  %v6497_v41 = vld [vmem:[%s13092_s5 + $0x8] sm:$0xff] (!%p6493_p11) }
 0x817   : > { %v2538_v42 = vadd.f32 %v2537_v49, %v14325_v51 }
 0x818   : > { %2664 = vst [vmem:[#allocation4 + $0x48] sm:$0xff] %v2543_v20 }
 0x819   : > { %v2576_v0 = vadd.f32 %v2543_v20, %v2538_v42  ;;  %2663 = vst [vmem:[#allocation4 + $0x40] sm:$0xff] %v2538_v42  ;;  %v6995_v44 = vpop.f32.mrb[20].mxu0  ;;  %v7556_v53 = vpack.c.bf16 %v2543_v20, %v2538_v42 }
 0x81a   : > { %v2553_v9 = vadd.f32 %v6995_v44, %v14326_v37  ;;  %v2547_v40 = vpop.f32.mrb[21].mxu0 }
 0x81b   : > { %v2548_v62 = vadd.f32 %v2547_v40, %v14327_v22  ;;  %7557 = vmatpush3.bf16.msra.mxu1 %v7556_v53 }
 0x81c   : > { %2666 = vst [vmem:[#allocation4 + $0x58] sm:$0xff] %v2553_v9  ;;  %7558 = vmatprep.subr.bf16.mxu1 %v14274_v18 }
 0x81d   : > { %v2577_v26 = vadd.f32 %v2576_v0, %v2548_v62  ;;  %2665 = vst [vmem:[#allocation4 + $0x50] sm:$0xff] %v2548_v62  ;;  %v6998_v63 = vpop.f32.mrb[22].mxu0  ;;  %v7559_v39 = vpack.c.bf16 %v2553_v9, %v2548_v62 }
 0x81e   : > { %v2563_v60 = vadd.f32 %v6998_v63, %v14328_v36  ;;  %v2557_v19 = vpop.f32.mrb[23].mxu0 }
 0x81f   : > { %v2558_v50 = vadd.f32 %v2557_v19, %v14329_v55  ;;  %v2578_v52 = vadd.f32 %v2577_v26, %v2553_v9  ;;  %7560 = vmatpush3.bf16.msra.mxu1 %v7559_v39 }
 0x820   : > { %2668 = vst [vmem:[#allocation4 + $0x68] sm:$0xff] %v2563_v60  ;;  %7561 = vmatprep.subr.bf16.mxu1 %v14274_v18 }
 0x821   : > { %v2579_v13 = vadd.f32 %v2578_v52, %v2558_v50  ;;  %2667 = vst [vmem:[#allocation4 + $0x60] sm:$0xff] %v2558_v50  ;;  %v7001_v35 = vpop.f32.mrb[24].mxu0  ;;  %v7562_v43 = vpack.c.bf16 %v2563_v60, %v2558_v50 }
 0x822   : > { %v2573_v48 = vadd.f32 %v7001_v35, %v14330_v14  ;;  %v2567_v31 = vpop.f32.mrb[25].mxu0 }
 0x823   : > { %v2568_v46 = vadd.f32 %v2567_v31, %v14331_v25  ;;  %v2580_v16 = vadd.f32 %v2579_v13, %v2563_v60  ;;  %7563 = vmatpush3.bf16.msra.mxu1 %v7562_v43 }
 0x824   : > { %2670 = vst [vmem:[#allocation4 + $0x78] sm:$0xff] %v2573_v48  ;;  %7564 = vmatprep.subr.bf16.mxu1 %v14274_v18 }
 0x825   : > { %v2581_v47 = vadd.f32 %v2580_v16, %v2568_v46  ;;  %2669 = vst [vmem:[#allocation4 + $0x70] sm:$0xff] %v2568_v46  ;;  %v7565_v56 = vpack.c.bf16 %v2573_v48, %v2568_v46 }
 0x827   : > { %v2582_v27 = vadd.f32 %v2581_v47, %v2573_v48  ;;  %7566 = vmatpush3.bf16.msra.mxu1 %v7565_v56 }
 0x828   : > { %7026 = vmatprep.subr.mxu1 (!%p6493_p11), %v8221_v29 }
 0x829   : > { %v2583_v10 = vrot.slane %v2582_v27, 4 }
 0x82a   : > { %7019 = vmatmul.mubr.msk.f32.vlgmr.msra.gmra.mrb[24].mxu1 %vm14333_vm8, %v14332_v57 }
 0x82b   : > { %v2584_v15 = vadd.f32 %v2583_v10, %v2582_v27  ;;  %7027 = vmatpush3.msra.mxu1 (!%p6493_p11), %v2710_v34  ;;  %7028 = vmatprep.mubr.msk.f32.mxu1 (!%p6493_p11), %vm8222_vm4, %v8221_v29 }
 0x82c   : > { %7036 = vmatprep.subr.mxu1 (!%p6493_p11), %v8221_v29 }
 0x82d   : > { %v2585_v18 = vrot.slane %v2584_v15, 2 }
 0x82f   : > { %v2586_v54 = vadd.f32 %v2585_v18, %v2584_v15 }
 0x831   : > { %v2587_v58 = vrot.slane %v2586_v54, 1 }
 0x833   : > { %v2588_v21 = vadd.f32 %v2587_v58, %v2586_v54 }
 0x835   : > { %v2589_v45 = vmax.f32 %v2588_v21, 1.0 }
 0x837   : > { %8017 = vrcp.f32 %v2589_v45 }
 0x841   : > { %v8018_v32 = vpop.eup %8017 }
 0x8fa   : > { %2688 = sbr.rel (%p6493_p11) target bundleno = 2584 (0xa18), region = 78 }
 0x8fd   : > { %v2656_v38 = vpop.f32.mrb[24].mxu1 }
 0x8fe   : > { %v2661_v28 = vmul.f32 %v8018_v32, %v2656_v38  ;;  %v7020_v59 = vpop.f32.mrb[25].mxu1 }
 0x900   : > { %2672 = vst [vmem:[#allocation3 + $0x8] sm:$0xff] %v2661_v28 }
 0x901   : > { %s2693_s30 = scalar_select %p2689_p12, 1, 0 }
 0x903   : > { %v2694_v2 = vstv %s2693_s30 }
 0x904   : > { %vm12569_vm11 = vcmp.eq.s32.totalorder %v2694_v2, 1 }
 0x905   : > { %v2696_v5 = vsel %vm12569_vm11, %v2690_v17, %v6494_v24  ;;  %v2700_v6 = vsel %vm12569_vm11, %v2697_v30, %v6495_v33  ;;  %v2704_v7 = vsel %vm12569_vm11, %v2701_v1, %v6496_v3  ;;  %v2708_v20 = vsel %vm12569_vm11, %v2705_v8, %v6497_v41 }
 0x906   : > { %7024 = vmatmul.mubr.msk.f32.vlgmr.msra.gmra.mrb[0].mxu0 %vm14336_vm12, %v2696_v5  ;;  %7029 = vmatmul.mubr.msk.f32.vlgmr.msra.gmra.mrb[0].mxu1 %vm14337_vm0, %v2696_v5 }
 0x907   : > { %v2909_v61 = vld [vmem:[#allocation3 + $0x8] sm:$0xff]  ;;  %7032 = vmatpush3.msra.mxu0 %v2908_v23  ;;  %7033 = vmatprep.mubr.msk.f32.mxu0 %vm8222_vm4, %v8221_v29 }
 0x908   : > { %7037 = vmatpush3.msra.mxu1 %v2909_v61  ;;  %7038 = vmatprep.mubr.msk.f32.mxu1 %vm8222_vm4, %v8221_v29 }
 0x909   : > { %2713 = vperm.xlu0 %8019, %v2700_v6  }
 0x90a   : > { %7034 = vmatmul.mubr.msk.f32.vlgmr.msra.gmra.mrb[2].mxu0 %vm14338_vm15, %v2704_v7  ;;  %7039 = vmatmul.mubr.msk.f32.vlgmr.msra.gmra.mrb[2].mxu1 %vm14339_vm14, %v2704_v7 }
 0x90d   : > { %2912 = vperm.xlu0 %8019, %v2708_v20  }
 0x988   : > { %v2714_v49 = vpop.permute.xlu0 %2713 }
 0x98c   : > { %v2913_v9 = vpop.permute.xlu0 %2912 }
 0x9d9   : > { %v2785_v51 = vpop.f32.mrb[0].mxu0  ;;  %v2857_v42 = vpop.f32.mrb[0].mxu1 }
 0x9da   : > { %v2786_v0 = vadd.f32 %v2785_v51, %v2714_v49  ;;  %v2858_v44 = vadd.f32 %v2857_v42, %v2714_v49  ;;  %v7025_v53 = vpop.f32.mrb[1].mxu0  ;;  %v7030_v37 = vpop.f32.mrb[1].mxu1 }
 0x9dc   : > { %v2789_v40 = vmax.f32 %v2786_v0, 0.0  ;;  %v2861_v22 = vmax.f32 %v2858_v44, 0.0 }
 0x9dd   : > { %v2984_v62 = vpop.f32.mrb[2].mxu0  ;;  %v3056_v26 = vpop.f32.mrb[2].mxu1 }
 0x9de   : > { %v2790_v63 = vadd.f32 %v2789_v40, %v2709_v12  ;;  %v2862_v39 = vadd.f32 %v2861_v22, %v2710_v34  ;;  %v2985_v36 = vadd.f32 %v2984_v62, %v2913_v9  ;;  %v3057_v60 = vadd.f32 %v3056_v26, %v2913_v9  ;;  %v7035_v19 = vpop.f32.mrb[3].mxu0  ;;  %v7040_v55 = vpop.f32.mrb[3].mxu1 }
 0x9e0   : > { %v2863_v50 = vsel %vm14340_vm1, %v2790_v63, 0.0  ;;  %v2871_v52 = vsel %vm14341_vm5, %v2862_v39, 0.0  ;;  %v2988_v13 = vmax.f32 %v2985_v36, 0.0  ;;  %v3060_v35 = vmax.f32 %v3057_v60, 0.0 }
 0x9e1   : > { %v2864_v43 = vrot.slane %v2863_v50, 4  ;;  %v2872_v14 = vrot.slane %v2871_v52, 4 }
 0x9e2   : > { %v2989_v48 = vadd.f32 %v2988_v13, %v2908_v23  ;;  %v3061_v31 = vadd.f32 %v3060_v35, %v2909_v61 }
 0x9e3   : > { %v2865_v25 = vadd.f32 %v2864_v43, %v2863_v50  ;;  %v2873_v46 = vadd.f32 %v2872_v14, %v2871_v52 }
 0x9e4   : > { %v3062_v16 = vrot.slane %v2989_v48, 4  ;;  %v3069_v47 = vrot.slane %v3061_v31, 4 }
 0x9e5   : > { %v2866_v56 = vrot.slane %v2865_v25, 2  ;;  %v2874_v27 = vrot.slane %v2873_v46, 2 }
 0x9e6   : > { %v3063_v57 = vadd.f32 %v3062_v16, %v2989_v48  ;;  %v3070_v10 = vadd.f32 %v3069_v47, %v3061_v31 }
 0x9e7   : > { %v2867_v15 = vadd.f32 %v2866_v56, %v2865_v25  ;;  %v2875_v18 = vadd.f32 %v2874_v27, %v2873_v46 }
 0x9e8   : > { %v3064_v54 = vrot.slane %v3063_v57, 2  ;;  %v3071_v58 = vrot.slane %v3070_v10, 2 }
 0x9e9   : > { %v2868_v21 = vrot.slane %v2867_v15, 1  ;;  %v2876_v45 = vrot.slane %v2875_v18, 1 }
 0x9ea   : > { %v3065_v32 = vadd.f32 %v3064_v54, %v3063_v57  ;;  %v3072_v38 = vadd.f32 %v3071_v58, %v3070_v10 }
 0x9eb   : > { %v2869_v28 = vadd.f32 %v2868_v21, %v2867_v15  ;;  %v2877_v59 = vadd.f32 %v2876_v45, %v2875_v18 }
 0x9ec   : > { %v3066_v12 = vrot.slane %v3065_v32, 1  ;;  %v3073_v34 = vrot.slane %v3072_v38, 1 }
 0x9ed   : > { %v2878_v29 = vadd.f32 %v2877_v59, %v2869_v28 }
 0x9ee   : > { %v3067_v17 = vadd.f32 %v3066_v12, %v3065_v32  ;;  %v3074_v24 = vadd.f32 %v3073_v34, %v3072_v38 }
 0x9ef   : > { %v2880_v2 = vmul.f32 0.0625, %v2878_v29 }
 0x9f0   : > { %v3075_v23 = vadd.f32 %v3074_v24, %v3067_v17 }
 0x9f1   : > { %v2881_v30 = vsub.f32 %v2790_v63, %v2880_v2  ;;  %v2891_v33 = vsub.f32 %v2862_v39, %v2880_v2 }
 0x9f2   : > { %v3076_v11 = vmul.f32 0.0625, %v3075_v23 }
 0x9f3   : > { %v2882_v61 = vmul.f32 %v2881_v30, %v2881_v30  ;;  %v2892_v1 = vmul.f32 %v2891_v33, %v2891_v33 }
 0x9f4   : > { %v3077_v3 = vsub.f32 %v2989_v48, %v3076_v11  ;;  %v3086_v4 = vsub.f32 %v3061_v31, %v3076_v11 }
 0x9f5   : > { %v2883_v5 = vsel %vm14342_vm3, %v2882_v61, 0.0  ;;  %v2893_v6 = vsel %vm14343_vm13, %v2892_v1, 0.0 }
 0x9f6   : > { %v2884_v7 = vrot.slane %v2883_v5, 4  ;;  %v2894_v8 = vrot.slane %v2893_v6, 4  ;;  %v3078_v41 = vmul.f32 %v3077_v3, %v3077_v3  ;;  %v3087_v20 = vmul.f32 %v3086_v4, %v3086_v4 }
 0x9f8   : > { %v2885_v49 = vadd.f32 %v2884_v7, %v2883_v5  ;;  %v2895_v51 = vadd.f32 %v2894_v8, %v2893_v6  ;;  %v3079_v42 = vrot.slane %v3078_v41, 4  ;;  %v3088_v0 = vrot.slane %v3087_v20, 4 }
 0x9fa   : > { %v2886_v44 = vrot.slane %v2885_v49, 2  ;;  %v2896_v53 = vrot.slane %v2895_v51, 2  ;;  %v3080_v37 = vadd.f32 %v3079_v42, %v3078_v41  ;;  %v3089_v9 = vadd.f32 %v3088_v0, %v3087_v20 }
 0x9fc   : > { %v2887_v40 = vadd.f32 %v2886_v44, %v2885_v49  ;;  %v2897_v22 = vadd.f32 %v2896_v53, %v2895_v51  ;;  %v3081_v62 = vrot.slane %v3080_v37, 2  ;;  %v3090_v26 = vrot.slane %v3089_v9, 2 }
 0x9fe   : > { %v2888_v63 = vrot.slane %v2887_v40, 1  ;;  %v2898_v39 = vrot.slane %v2897_v22, 1  ;;  %v3082_v36 = vadd.f32 %v3081_v62, %v3080_v37  ;;  %v3091_v60 = vadd.f32 %v3090_v26, %v3089_v9 }
 0xa00   : > { %v2889_v19 = vadd.f32 %v2888_v63, %v2887_v40  ;;  %v2899_v55 = vadd.f32 %v2898_v39, %v2897_v22  ;;  %v3083_v50 = vrot.slane %v3082_v36, 1  ;;  %v3092_v52 = vrot.slane %v3091_v60, 1 }
 0xa02   : > { %v2900_v13 = vadd.f32 %v2899_v55, %v2889_v19  ;;  %v3084_v35 = vadd.f32 %v3083_v50, %v3082_v36  ;;  %v3093_v43 = vadd.f32 %v3092_v52, %v3091_v60 }
 0xa04   : > { %v2901_v14 = vmul.f32 0.0625, %v2900_v13  ;;  %v3094_v48 = vadd.f32 %v3093_v43, %v3084_v35 }
 0xa06   : > { %v2902_v31 = vadd.f32 1e-05, %v2901_v14  ;;  %v3095_v25 = vmul.f32 0.0625, %v3094_v48 }
 0xa08   : > { %8020 = vrsqrt.f32 %v2902_v31  ;;  %v3096_v46 = vadd.f32 1e-05, %v3095_v25 }
 0xa0a   : > { %8022 = vrsqrt.f32 %v3096_v46 }
 0xa12   : > { %v8021_v16 = vpop.eup %8020 }
 0xa13   : > { %v2904_v47 = vmul.f32 %v8021_v16, %v2881_v30  ;;  %v2906_v56 = vmul.f32 %v8021_v16, %v2891_v33 }
 0xa14   : > { %v8023_v27 = vpop.eup %8022 }
 0xa15   : > { %2905 = vst.msk [vmem:[#allocation2] sm:$0xff] %vm14344_vm6, %v2904_v47  ;;  %v3098_v57 = vmul.f32 %v8023_v27, %v3077_v3  ;;  %v3100_v10 = vmul.f32 %v8023_v27, %v3086_v4 }
 0xa16   : > { %2907 = vst.msk [vmem:[#allocation2 + $0x8] sm:$0xff] %vm14345_vm7, %v2906_v56 }
 0xa17   : > { %3099 = vst [vmem:[#allocation3] sm:$0xff] %v3098_v57  ;;  %3101 = vst [vmem:[#allocation3 + $0x8] sm:$0xff] %v3100_v10 }
 0xa18 PF: > { %v14346_v15 = vmov 0.0|0.0   ;;  %v3102_v18 = vld [vmem:[#allocation4] sm:$0xff]  ;;  %v3103_v54 = vld [vmem:[#allocation4 + $0x8] sm:$0xff]  ;;  %v14347_v38 = vmov 0.0   ;;  %vm14348_vm10 = vmmov 0   ;;  %v3104_v28 = vld [vmem:[#allocation4 + $0x10] sm:$0xff] }
 0xa19   : > { %7567 = vmatprep.subr.bf16.mxu0 %v14346_v15  ;;  %7579 = vmatprep.subr.bf16.mxu1 %v14346_v15  ;;  %v3233_v58 = vld [vmem:[#allocation4 + $0x40] sm:$0xff]  ;;  %v7568_v21 = vpack.c.bf16 %v3103_v54, %v3102_v18  ;;  %v3234_v45 = vld [vmem:[#allocation4 + $0x48] sm:$0xff]  ;;  %v3105_v59 = vld [vmem:[#allocation4 + $0x18] sm:$0xff]  ;;  %vm14351_vm2 = vcmask 523264   ;;  %p6502_p13 = scmp.ne.s32.totalorder %s8278_s28, 7 }
 0xa1a   : > { %3243 = vadd.xlane.f32.xlu1 %v3233_v58  ;;  %3112 = vadd.xlane.f32.xlu0 %v3102_v18  ;;  %v7580_v32 = vpack.c.bf16 %v3234_v45, %v3233_v58  ;;  %v3235_v12 = vld [vmem:[#allocation4 + $0x50] sm:$0xff]  ;;  %v3236_v34 = vld [vmem:[#allocation4 + $0x58] sm:$0xff]  ;;  %v7571_v29 = vpack.c.bf16 %v3105_v59, %v3104_v28  ;;  %v3106_v24 = vld [vmem:[#allocation4 + $0x20] sm:$0xff] }
 0xa1b   : > { %7057 = vmatprep.mubr.msk.f32.mxu0 %vm14348_vm10, %v14347_v38  ;;  %7076 = vmatprep.mubr.msk.f32.mxu1 %vm14348_vm10, %v14347_v38  ;;  %v7583_v17 = vpack.c.bf16 %v3236_v34, %v3235_v12  ;;  %v3107_v2 = vld [vmem:[#allocation4 + $0x28] sm:$0xff]  ;;  %v3237_v23 = vld [vmem:[#allocation4 + $0x60] sm:$0xff]  ;;  %v3108_v61 = vld [vmem:[#allocation4 + $0x30] sm:$0xff] }
 0xa1c   : > { %7569 = vmatpush3.bf16.xpose.msra.mxu0 %v7568_v21  ;;  %7581 = vmatpush3.bf16.xpose.msra.mxu1 %v7580_v32  ;;  %v3238_v30 = vld [vmem:[#allocation4 + $0x68] sm:$0xff]  ;;  %v7574_v33 = vpack.c.bf16 %v3107_v2, %v3106_v24  ;;  %v3109_v1 = vld [vmem:[#allocation4 + $0x38] sm:$0xff]  ;;  %v3239_v3 = vld [vmem:[#allocation4 + $0x70] sm:$0xff] }
 0xa1d   : > { %7570 = vmatprep.subr.bf16.mxu0 %v14346_v15  ;;  %7582 = vmatprep.subr.bf16.mxu1 %v14346_v15  ;;  %v7586_v11 = vpack.c.bf16 %v3238_v30, %v3237_v23  ;;  %v3240_v4 = vld [vmem:[#allocation4 + $0x78] sm:$0xff]  ;;  %v7577_v5 = vpack.c.bf16 %v3109_v1, %v3108_v61  ;;  %v14349_v37 = vld [vmem:[#allocation14_spill] sm:$0xff]  ;;  %v14350_v40 = vld [vmem:[#allocation16_spill] sm:$0xff] }
 0xa1e   : > { %3245 = vadd.xlane.f32.xlu1 %v3234_v45  ;;  %3114 = vadd.xlane.f32.xlu0 %v3103_v54  ;;  %v7589_v6 = vpack.c.bf16 %v3240_v4, %v3239_v3  ;;  %v3110_v7 = vld [vmem:[#allocation3] sm:$0xff]  ;;  %v3241_v8 = vld [vmem:[#allocation3 + $0x8] sm:$0xff]  ;;  %vm14352_vm9 = vmmov %vm14351_vm2 }
 0xa1f   : > { %v14353_v60 = vld [vmem:[#allocation17_spill] sm:$0xff]  ;;  %vm14354_vm8 = vmmov %vm14351_vm2  ;;  %v14357_v48 = vld [vmem:[#allocation18_spill] sm:$0xff] }
 0xa20   : > { %vm14355_vm4 = vmmov %vm14351_vm2  ;;  %v14360_v10 = vld [vmem:[#allocation19_spill] sm:$0xff]  ;;  %v14363_v38 = vld [vmem:[#allocation20_spill] sm:$0xff] }
 0xa21   : > { %vm14356_vm11 = vmmov %vm14351_vm2 }
 0xa22   : > { %3247 = vadd.xlane.f32.xlu1 %v3235_v12  ;;  %3116 = vadd.xlane.f32.xlu0 %v3104_v28  ;;  %vm14358_vm12 = vmmov %vm14351_vm2 }
 0xa23   : > { %vm14359_vm0 = vmmov %vm14351_vm2 }
 0xa24   : > { %7572 = vmatpush3.bf16.xpose.msra.mxu0 %v7571_v29  ;;  %7584 = vmatpush3.bf16.xpose.msra.mxu1 %v7583_v17  ;;  %vm14361_vm15 = vmmov %vm14359_vm0 }
 0xa25   : > { %7573 = vmatprep.subr.bf16.mxu0 %v14346_v15  ;;  %7585 = vmatprep.subr.bf16.mxu1 %v14346_v15  ;;  %vm14362_vm14 = vmmov %vm14359_vm0 }
 0xa26   : > { %3249 = vadd.xlane.f32.xlu1 %v3236_v34  ;;  %3118 = vadd.xlane.f32.xlu0 %v3105_v59  ;;  %vm14364_vm1 = vmmov %vm14359_vm0 }
 0xa27   : > { %vm14365_vm5 = vmmov %vm14359_vm0 }
 0xa28   : > { %vm14367_vm3 = vmmov %vm14359_vm0 }
 0xa29   : > { %vm14368_vm13 = vmmov %vm14359_vm0 }
 0xa2a   : > { %3251 = vadd.xlane.f32.xlu1 %v3237_v23  ;;  %3120 = vadd.xlane.f32.xlu0 %v3106_v24  ;;  %vm14370_vm6 = vmmov %vm14359_vm0 }
 0xa2b   : > { %vm14371_vm7 = vmmov %vm14359_vm0 }
 0xa2c   : > { %7575 = vmatpush3.bf16.xpose.msra.mxu0 %v7574_v33  ;;  %7587 = vmatpush3.bf16.xpose.msra.mxu1 %v7586_v11  ;;  %vm14372_vm10 = vmmov %vm14359_vm0 }
 0xa2d   : > { %7576 = vmatprep.subr.bf16.mxu0 %v14346_v15  ;;  %7588 = vmatprep.subr.bf16.mxu1 %v14346_v15 }
 0xa2e   : > { %3253 = vadd.xlane.f32.xlu1 %v3238_v30  ;;  %3122 = vadd.xlane.f32.xlu0 %v3107_v2  ;;  %v14366_v2 = vld [vmem:[#allocation21_spill] sm:$0xff] }
 0xa32   : > { %3255 = vadd.xlane.f32.xlu1 %v3239_v3  ;;  %3124 = vadd.xlane.f32.xlu0 %v3108_v61 }
 0xa34   : > { %7578 = vmatpush3.bf16.xpose.msra.mxu0 %v7577_v5  ;;  %7590 = vmatpush3.bf16.xpose.msra.mxu1 %v7589_v6  ;;  %v14369_v5 = vld [vmem:[#allocation22_spill] sm:$0xff] }
 0xa36   : > { %3257 = vadd.xlane.f32.xlu1 %v3240_v4  ;;  %3126 = vadd.xlane.f32.xlu0 %v3109_v1 }
 0xa3b   : > { %7058 = vmatmul.mubr.f32.vlgmr.msra.gmra.mrb[0].mxu0 %v3110_v7  ;;  %7077 = vmatmul.mubr.f32.vlgmr.msra.gmra.mrb[0].mxu1 %v3241_v8 }
 0xaa7   : > { %v3113_v41 = vpop.xlane.xlu0 %3112  ;;  %v3244_v20 = vpop.xlane.xlu1 %3243 }
 0xaa8   : > { %v3128_v9 = vmul.f32 %v3113_v41, %v14349_v37  ;;  %v3259_v62 = vmul.f32 %v3244_v20, %v14349_v37 }
 0xaaa   : > { %v3136_v39 = vsel %vm14351_vm2, %v3128_v9, 0.0  ;;  %v3267_v50 = vsel %vm14354_vm8, %v3259_v62, 0.0  ;;  %vm14373_vm2 = vmmov %vm14359_vm0  ;;  %vm8225_vm8 = vmmov (!%p6502_p13), 0  }
 0xaab   : > { %v3115_v49 = vpop.xlane.xlu0 %3114  ;;  %v3246_v51 = vpop.xlane.xlu1 %3245 }
 0xaac   : > { %v3129_v22 = vmul.f32 %v3115_v49, %v14350_v40  ;;  %v3260_v26 = vmul.f32 %v3246_v51, %v14350_v40 }
 0xaae   : > { %v3137_v36 = vsel %vm14352_vm9, %v3129_v22, 0.0  ;;  %v3268_v52 = vsel %vm14355_vm4, %v3260_v26, 0.0  ;;  %vm14374_vm9 = vmmov %vm14359_vm0  ;;  %vm14375_vm4 = vcmask (!%p6502_p13), 64512  }
 0xaaf   : > { %v3117_v42 = vpop.xlane.xlu0 %3116  ;;  %v3248_v0 = vpop.xlane.xlu1 %3247  ;;  %v3138_v35 = vadd.f32 %v3137_v36, %v3136_v39  ;;  %v3269_v43 = vadd.f32 %v3268_v52, %v3267_v50 }
 0xab0   : > { %v3130_v19 = vmul.f32 %v3117_v42, %v14353_v60  ;;  %v3261_v13 = vmul.f32 %v3248_v0, %v14353_v60 }
 0xab2   : > { %v3139_v14 = vsel %vm14356_vm11, %v3130_v19, 0.0  ;;  %v3270_v25 = vsel %vm14358_vm12, %v3261_v13, 0.0  ;;  %vm14376_vm11 = vmmov (!%p6502_p13), %vm14375_vm4 }
 0xab3   : > { %v3119_v44 = vpop.xlane.xlu0 %3118  ;;  %v3250_v53 = vpop.xlane.xlu1 %3249  ;;  %v3140_v56 = vadd.f32 %v3139_v14, %v3138_v35  ;;  %v3271_v27 = vadd.f32 %v3270_v25, %v3269_v43  ;;  %v3242_v35 = vld [vmem:[#allocation2 + $0x8] sm:$0xff]  ;;  %vm14377_vm12 = vmmov (!%p6502_p13), %vm14375_vm4 }
 0xab4   : > { %v3131_v31 = vmul.f32 %v3119_v44, %v14357_v48  ;;  %v3262_v46 = vmul.f32 %v3250_v53, %v14357_v48 }
 0xab6   : > { %v3141_v57 = vsel %vm14359_vm0, %v3131_v31, 0.0  ;;  %v3272_v18 = vsel %vm14361_vm15, %v3262_v46, 0.0  ;;  %vm14378_vm0 = vmmov (!%p6502_p13), %vm14375_vm4 }
 0xab7   : > { %v3121_v63 = vpop.xlane.xlu0 %3120  ;;  %v3252_v55 = vpop.xlane.xlu1 %3251  ;;  %v3142_v58 = vadd.f32 %v3141_v57, %v3140_v56  ;;  %v3273_v45 = vadd.f32 %v3272_v18, %v3271_v27  ;;  %v3371_v18 = vld [vmem:[%s13087_s0] sm:$0xff] (!%p6502_p13)  ;;  %vm14379_vm15 = vmmov (!%p6502_p13), %vm14378_vm0 }
 0xab8   : > { %v3132_v15 = vmul.f32 %v3121_v63, %v14360_v10  ;;  %v3263_v54 = vmul.f32 %v3252_v55, %v14360_v10  ;;  %v3111_v55 = vld [vmem:[#allocation2] sm:$0xff]  ;;  %v8224_v10 = vmov (!%p6502_p13), 0.0  }
 0xab9   : > { %7079 = vmatprep.subr.mxu0 (!%p6502_p13), %v8224_v10  ;;  %7127 = vmatprep.subr.mxu1 (!%p6502_p13), %v8224_v10 }
 0xaba   : > { %v3143_v32 = vsel %vm14362_vm14, %v3132_v15, 0.0  ;;  %v3274_v12 = vsel %vm14364_vm1, %v3263_v54, 0.0  ;;  %7081 = vmatprep.mubr.msk.f32.mxu0 (!%p6502_p13), %vm8225_vm8, %v8224_v10  ;;  %7129 = vmatprep.mubr.msk.f32.mxu1 (!%p6502_p13), %vm8225_vm8, %v8224_v10  ;;  %vm14380_vm14 = vmmov (!%p6502_p13), %vm14378_vm0 }
 0xabb   : > { %v3123_v16 = vpop.xlane.xlu0 %3122  ;;  %v3254_v47 = vpop.xlane.xlu1 %3253  ;;  %v3144_v29 = vadd.f32 %v3143_v32, %v3142_v58  ;;  %v3275_v17 = vadd.f32 %v3274_v12, %v3273_v45  ;;  %v12669_v45 = vld [vmem:[%s13093_s6 + $0x10] sm:$0xff] (!%p6502_p13)  ;;  %vm14381_vm1 = vmmov (!%p6502_p13), %vm14378_vm0 }
 0xabc   : > { %v3133_v28 = vmul.f32 %v3123_v16, %v14363_v38  ;;  %v3264_v34 = vmul.f32 %v3254_v47, %v14363_v38  ;;  %v3531_v32 = vld [vmem:[#allocation7 + $0x40] sm:$0xff] (!%p6502_p13)  ;;  %v3532_v38 = vld [vmem:[#allocation7 + $0x48] sm:$0xff] (!%p6502_p13) }
 0xabd   : > { %v12689_v12 = vpack.c.bf16 (!%p6502_p13), %v3532_v38, %v3531_v32 }
 0xabe   : > { %v3145_v24 = vsel %vm14365_vm5, %v3133_v28, 0.0  ;;  %v3276_v30 = vsel %vm14367_vm3, %v3264_v34, 0.0  ;;  %v6504_v28 = vld [vmem:[%s13093_s6 + $0x8] sm:$0xff] (!%p6502_p13)  ;;  %v3533_v34 = vld [vmem:[#allocation7 + $0x50] sm:$0xff] (!%p6502_p13)  ;;  %vm14382_vm5 = vmmov (!%p6502_p13), %vm14378_vm0 }
 0xabf   : > { %v3125_v21 = vpop.xlane.xlu0 %3124  ;;  %v3256_v59 = vpop.xlane.xlu1 %3255  ;;  %v3146_v1 = vadd.f32 %v3145_v24, %v3144_v29  ;;  %v3277_v3 = vadd.f32 %v3276_v30, %v3275_v17  ;;  %v3534_v29 = vld [vmem:[#allocation7 + $0x58] sm:$0xff] (!%p6502_p13)  ;;  %v12700_v17 = vld [vmem:[%s13093_s6 + $0x20] sm:$0xff] (!%p6502_p13)  ;;  %v8226_v24 = vmov (!%p6502_p13), 0.0|0.0   ;;  %v3536_v30 = vld [vmem:[#allocation7 + $0x68] sm:$0xff] (!%p6502_p13) }
 0xac0   : > { %v3134_v23 = vmul.f32 %v3125_v21, %v14366_v2  ;;  %v3265_v33 = vmul.f32 %v3256_v59, %v14366_v2  ;;  %v12664_v21 = vld [vmem:[%s13093_s6] sm:$0xff] (!%p6502_p13)  ;;  %v12683_v59 = vld [vmem:[%s13093_s6 + $0x18] sm:$0xff] (!%p6502_p13)  ;;  %v12705_v2 = vpack.c.bf16 (!%p6502_p13), %v3534_v29, %v3533_v34  ;;  %vm14383_vm3 = vmmov (!%p6502_p13), %vm14378_vm0 }
 0xac1   : > { %v3768_v34 = vld [vmem:[#allocation7 + $0xb8] sm:$0xff] (!%p6502_p13) }
 0xac2   : > { %v3147_v4 = vsel %vm14368_vm13, %v3134_v23, 0.0  ;;  %v3278_v7 = vsel %vm14370_vm6, %v3265_v33, 0.0  ;;  %v3535_v23 = vld [vmem:[#allocation7 + $0x60] sm:$0xff] (!%p6502_p13)  ;;  %v12715_v33 = vld [vmem:[%s13093_s6 + $0x28] sm:$0xff] (!%p6502_p13)  ;;  %vm14384_vm13 = vmmov (!%p6502_p13), %vm14378_vm0 }
 0xac3   : > { %v3127_v11 = vpop.xlane.xlu0 %3126  ;;  %v3258_v61 = vpop.xlane.xlu1 %3257  ;;  %v3148_v41 = vadd.f32 %v3147_v4, %v3146_v1  ;;  %v3279_v20 = vadd.f32 %v3278_v7, %v3277_v3  ;;  %v12731_v1 = vld [vmem:[%s13093_s6 + $0x30] sm:$0xff] (!%p6502_p13)  ;;  %v12743_v4 = vld [vmem:[%s13093_s6 + $0x38] sm:$0xff] (!%p6502_p13)  ;;  %v12756_v7 = vld [vmem:[%s13093_s6 + $0x40] sm:$0xff] (!%p6502_p13) }
 0xac4   : > { %v3135_v6 = vmul.f32 %v3127_v11, %v14369_v5  ;;  %v3266_v8 = vmul.f32 %v3258_v61, %v14369_v5  ;;  %v12721_v61 = vpack.c.bf16 (!%p6502_p13), %v3536_v30, %v3535_v23  ;;  %vm14385_vm6 = vmmov (!%p6502_p13), %vm14378_vm0 }
 0xac6   : > { %v3149_v49 = vsel %vm14371_vm7, %v3135_v6, 0.0  ;;  %v3280_v51 = vsel %vm14372_vm10, %v3266_v8, 0.0  ;;  %v6529_v6 = vld [vmem:[%s13087_s0 + $0x8] sm:$0xff] (!%p6502_p13)  ;;  %vm14386_vm7 = vcmask (!%p6502_p13), 523264  }
 0xac7   : > { %v3150_v42 = vadd.f32 %v3149_v49, %v3148_v41  ;;  %v3281_v0 = vadd.f32 %v3280_v51, %v3279_v20  ;;  %v3537_v41 = vld [vmem:[#allocation7 + $0x70] sm:$0xff] (!%p6502_p13)  ;;  %v3538_v20 = vld [vmem:[#allocation7 + $0x78] sm:$0xff] (!%p6502_p13)  ;;  %v3447_v51 = vld [vmem:[#allocation7] sm:$0xff] (!%p6502_p13) }
 0xac8   : > { %v12776_v49 = vpack.c.bf16 (!%p6502_p13), %v3538_v20, %v3537_v41  ;;  %vm14387_vm10 = vmmov (!%p6502_p13), %vm14386_vm7  ;;  %v3921_v20 = vld [vmem:[#allocation7 + $0xd0] sm:$0xff] (!%p6502_p13) }
 0xac9   : > { %v3151_v44 = vrot.slane %v3150_v42, 4  ;;  %v3282_v53 = vrot.slane %v3281_v0, 4 }
 0xacb   : > { %v3152_v37 = vadd.f32 %v3151_v44, %v3150_v42  ;;  %v3283_v9 = vadd.f32 %v3282_v53, %v3281_v0  ;;  %v3448_v42 = vld [vmem:[#allocation7 + $0x8] sm:$0xff] (!%p6502_p13)  ;;  %v3449_v44 = vld [vmem:[#allocation7 + $0x10] sm:$0xff] (!%p6502_p13)  ;;  %v3450_v53 = vld [vmem:[#allocation7 + $0x18] sm:$0xff] (!%p6502_p13) }
 0xacc   : > { %v7604_v0 = vpack.c.bf16 (!%p6502_p13), %v3448_v42, %v3447_v51  ;;  %v3922_v51 = vld [vmem:[#allocation7 + $0xd8] sm:$0xff] (!%p6502_p13)  ;;  %v3923_v42 = vld [vmem:[#allocation7 + $0xe0] sm:$0xff] (!%p6502_p13) }
 0xacd   : > { %v3153_v40 = vrot.slane %v3152_v37, 2  ;;  %v3284_v22 = vrot.slane %v3283_v9, 2 }
 0xacf   : > { %v3154_v62 = vadd.f32 %v3153_v40, %v3152_v37  ;;  %v3285_v26 = vadd.f32 %v3284_v22, %v3283_v9  ;;  %v7607_v37 = vpack.c.bf16 (!%p6502_p13), %v3450_v53, %v3449_v44  ;;  %v3451_v9 = vld [vmem:[#allocation7 + $0x20] sm:$0xff] (!%p6502_p13)  ;;  %v3452_v40 = vld [vmem:[#allocation7 + $0x28] sm:$0xff] (!%p6502_p13)  ;;  %v3925_v53 = vld [vmem:[#allocation7 + $0xf0] sm:$0xff] (!%p6502_p13) }
 0xad0   : > { %v7610_v22 = vpack.c.bf16 (!%p6502_p13), %v3452_v40, %v3451_v9  ;;  %v4077_v40 = vld [vmem:[#allocation7 + $0x100] sm:$0xff] (!%p6502_p13) }
 0xad1   : > { %v3155_v63 = vrot.slane %v3154_v62, 1  ;;  %v3286_v39 = vrot.slane %v3285_v26, 1 }
 0xad3   : > { %v3156_v36 = vadd.f32 %v3155_v63, %v3154_v62  ;;  %v3287_v60 = vadd.f32 %v3286_v39, %v3285_v26  ;;  %v3453_v62 = vld [vmem:[#allocation7 + $0x30] sm:$0xff] (!%p6502_p13)  ;;  %v3454_v26 = vld [vmem:[#allocation7 + $0x38] sm:$0xff] (!%p6502_p13) }
 0xad4   : > { %v7613_v63 = vpack.c.bf16 (!%p6502_p13), %v3454_v26, %v3453_v62  ;;  %v4079_v26 = vld [vmem:[#allocation7 + $0x110] sm:$0xff] (!%p6502_p13) }
 0xad5   : > { %8024 = vrcp.f32 %v3156_v36 }
 0xad6   : > { %8026 = vrcp.f32 %v3287_v60 }
 0xadf   : > { %v8025_v19 = vpop.eup %8024 }
 0xae0   : > { %v8027_v52 = vpop.eup %8026 }
 0xb0e   : > { %v3223_v50 = vpop.f32.mrb[0].mxu0  ;;  %v3354_v43 = vpop.f32.mrb[0].mxu1 }
 0xb0f   : > { %v3228_v13 = vmul.f32 %v8025_v19, %v3223_v50  ;;  %v7059_v14 = vpop.f32.mrb[1].mxu0  ;;  %v3359_v48 = vmul.f32 %v8027_v52, %v3354_v43  ;;  %v7078_v31 = vpop.f32.mrb[1].mxu1 }
 0xb10   : > { %v3761_v31 = vld [vmem:[#allocation7 + $0x80] sm:$0xff] (!%p6502_p13) }
 0xb11   : > { %v3229_v25 = vsub.f32 %v3111_v55, %v3228_v13  ;;  %v3360_v46 = vsub.f32 %v3242_v35, %v3359_v48 }
 0xb12   : > { %3367 = sbr.rel (%p6502_p13) target bundleno = 4226 (0x1082), region = 82 }
 0xb13   : > { %v3230_v16 = vmul.f32 0.05, %v3229_v25  ;;  %v3361_v47 = vmul.f32 0.05, %v3360_v46  ;;  %v3762_v25 = vld [vmem:[#allocation7 + $0x88] sm:$0xff] (!%p6502_p13) }
 0xb15   : > { %v3231_v56 = vsub.f32 %v3111_v55, %v3230_v16  ;;  %v3362_v27 = vsub.f32 %v3242_v35, %v3361_v47  ;;  %v7616_v47 = vpack.c.bf16 (!%p6502_p13), %v3762_v25, %v3761_v31  ;;  %v4237_v31 = vld [vmem:[#allocation7 + $0x150] sm:$0xff] (!%p6502_p13)  ;;  %v4238_v25 = vld [vmem:[#allocation7 + $0x158] sm:$0xff] (!%p6502_p13) }
 0xb17   : > { %3232 = vst.msk [vmem:[#allocation2] sm:$0xff] %vm14373_vm2, %v3231_v56  ;;  %v3763_v56 = vld [vmem:[#allocation7 + $0x90] sm:$0xff] (!%p6502_p13)  ;;  %vm14388_vm2 = vmmov (!%p6502_p13), %vm14386_vm7 }
 0xb18   : > { %3363 = vst.msk [vmem:[#allocation2 + $0x8] sm:$0xff] %vm14374_vm9, %v3362_v27  ;;  %v3764_v27 = vld [vmem:[#allocation7 + $0x98] sm:$0xff] (!%p6502_p13)  ;;  %vm14389_vm9 = vmmov (!%p6502_p13), %vm14378_vm0 }
 0xb1e   : > { %v3368_v57 = vld [vmem:[#allocation2] sm:$0xff] }
 0xb1f   : > { %v3369_v15 = vmul.f32 0.999995, %v3368_v57  ;;  %v4795_v11 = vld [vmem:[#allocation2 + $0x8] sm:$0xff] }
 0xb20   : > { %v4796_v3 = vmul.f32 0.999995, %v4795_v11  ;;  %v3919_v11 = vld [vmem:[#allocation7 + $0xc0] sm:$0xff] }
 0xb21   : > { %v3370_v54 = vmax.f32 %v3369_v15, 0.0 }
 0xb22   : > { %v4797_v5 = vmax.f32 %v4796_v3, 0.0  ;;  %v3920_v3 = vld [vmem:[#allocation7 + $0xc8] sm:$0xff] }
 0xb23   : > { %v3372_v58 = vadd.f32 %v3371_v18, %v3370_v54  ;;  %v7619_v18 = vpack.c.bf16 %v3764_v27, %v3763_v56  ;;  %v3765_v54 = vld [vmem:[#allocation7 + $0xa0] sm:$0xff]  ;;  %v12820_v41 = vpack.c.bf16 %v3920_v3, %v3919_v11  ;;  %v4240_v56 = vld [vmem:[#allocation7 + $0x168] sm:$0xff]  ;;  %v4399_v11 = vld [vmem:[#allocation7 + $0x1b0] sm:$0xff] }
 0xb24   : > { %v12758_v8 = vadd.f32 %v6529_v6, %v4797_v5  ;;  %v4400_v3 = vld [vmem:[#allocation7 + $0x1b8] sm:$0xff] }
 0xb25   : > { %7080 = vmatpush3.msra.mxu0 %v3372_v58  ;;  %7128 = vmatpush3.msra.mxu1 %v3372_v58 }
 0xb26   : > { %7082 = vmatmul.mubr.msk.f32.vlgmr.msra.gmra.mrb[0].mxu0 %vm14375_vm4, %v12664_v21  ;;  %7130 = vmatmul.mubr.msk.f32.vlgmr.msra.gmra.mrb[0].mxu1 %vm14376_vm11, %v12669_v45  ;;  %vm14390_vm4 = vmmov %vm14388_vm2 }
 0xb27   : > { %7151 = vmatprep.subr.mxu1 %v8224_v10  ;;  %7084 = vmatprep.subr.mxu0 %v8224_v10  ;;  %vm14391_vm11 = vmmov %vm14388_vm2 }
 0xb28   : > { %7152 = vmatpush3.msra.mxu1 %v3372_v58  ;;  %7085 = vmatpush3.msra.mxu0 %v3372_v58 }
 0xb29   : > { %7086 = vmatprep.mubr.msk.f32.mxu0 %vm8225_vm8, %v8224_v10  ;;  %7153 = vmatprep.mubr.msk.f32.mxu1 %vm8225_vm8, %v8224_v10 }
 0xb2a   : > { %7087 = vmatmul.mubr.msk.f32.vlgmr.msra.gmra.mrb[2].mxu0 %vm14377_vm12, %v6504_v28  ;;  %7154 = vmatmul.mubr.msk.f32.vlgmr.msra.gmra.mrb[2].mxu1 %vm14378_vm0, %v12683_v59  ;;  %vm14392_vm12 = vmmov %vm14388_vm2 }
 0xb2b   : > { %7175 = vmatprep.subr.mxu1 %v8224_v10  ;;  %7177 = vmatprep.mubr.msk.f32.mxu1 %vm8225_vm8, %v8224_v10  ;;  %vm14393_vm0 = vmmov %vm14388_vm2 }
 0xb2c   : > { %7176 = vmatpush3.msra.mxu1 %v3372_v58  ;;  %7591 = vmatprep.subr.bf16.mxu0 %v8226_v24 }
 0xb2d   : > { %7199 = vmatprep.subr.mxu1 %v8224_v10  ;;  %7593 = vmatpush3.bf16.msra.mxu0 %v12689_v12 }
 0xb2e   : > { %7178 = vmatmul.mubr.msk.f32.vlgmr.msra.gmra.mrb[4].mxu1 %vm14379_vm15, %v12700_v17  ;;  %7594 = vmatprep.subr.bf16.mxu0 %v8226_v24  ;;  %vm14394_vm15 = vmmov %vm14393_vm0 }
 0xb2f   : > { %7200 = vmatpush3.msra.mxu1 %v3372_v58  ;;  %7201 = vmatprep.mubr.msk.f32.mxu1 %vm8225_vm8, %v8224_v10 }
 0xb30   : > { %7223 = vmatprep.subr.mxu1 %v8224_v10  ;;  %7105 = vmatprep.mubr.msk.f32.mxu0 %vm8225_vm8, %v8224_v10 }
 0xb31   : > { %7596 = vmatpush3.bf16.msra.mxu0 %v12705_v2 }
 0xb32   : > { %7202 = vmatmul.mubr.msk.f32.vlgmr.msra.gmra.mrb[6].mxu1 %vm14380_vm14, %v12715_v33  ;;  %7597 = vmatprep.subr.bf16.mxu0 %v8226_v24  ;;  %vm14395_vm14 = vmmov %vm14393_vm0 }
 0xb33   : > { %7224 = vmatpush3.msra.mxu1 %v3372_v58  ;;  %7225 = vmatprep.mubr.msk.f32.mxu1 %vm8225_vm8, %v8224_v10 }
 0xb34   : > { %7247 = vmatprep.subr.mxu1 %v8224_v10 }
 0xb35   : > { %7599 = vmatpush3.bf16.msra.mxu0 %v12721_v61 }
 0xb36   : > { %7226 = vmatmul.mubr.msk.f32.vlgmr.msra.gmra.mrb[8].mxu1 %vm14381_vm1, %v12731_v1  ;;  %7600 = vmatprep.subr.bf16.mxu0 %v8226_v24  ;;  %vm14396_vm1 = vmmov %vm14393_vm0 }
 0xb37   : > { %7248 = vmatpush3.msra.mxu1 %v3372_v58  ;;  %7249 = vmatprep.mubr.msk.f32.mxu1 %vm8225_vm8, %v8224_v10 }
 0xb38   : > { %7271 = vmatprep.subr.mxu1 %v8224_v10 }
 0xb39   : > { %7602 = vmatpush3.bf16.msra.mxu0 %v12776_v49 }
 0xb3a   : > { %7250 = vmatmul.mubr.msk.f32.vlgmr.msra.gmra.mrb[10].mxu1 %vm14382_vm5, %v12743_v4  ;;  %7603 = vmatprep.subr.bf16.mxu0 %v8226_v24  ;;  %vm14397_vm5 = vmmov %vm14393_vm0 }
 0xb3b   : > { %7272 = vmatpush3.msra.mxu1 %v3372_v58  ;;  %7273 = vmatprep.mubr.msk.f32.mxu1 %vm8225_vm8, %v8224_v10  ;;  %v3766_v58 = vld [vmem:[#allocation7 + $0xa8] sm:$0xff] }
 0xb3c   : > { %7295 = vmatprep.subr.mxu1 %v8224_v10  ;;  %v7622_v38 = vpack.c.bf16 %v3766_v58, %v3765_v54  ;;  %v4393_v54 = vld [vmem:[#allocation7 + $0x180] sm:$0xff]  ;;  %v4394_v58 = vld [vmem:[#allocation7 + $0x188] sm:$0xff] }
 0xb3e   : > { %7274 = vmatmul.mubr.msk.f32.vlgmr.msra.gmra.mrb[12].mxu1 %vm14383_vm3, %v12756_v7 }
 0xb3f   : > { %7296 = vmatpush3.msra.mxu1 %v12758_v8  ;;  %7297 = vmatprep.mubr.msk.f32.mxu1 %vm8225_vm8, %v8224_v10 }
 0xb40   : > { %7300 = vmatprep.subr.mxu1 %v8224_v10 }
 0xb42   : > { %7298 = vmatmul.mubr.msk.f32.vlgmr.msra.gmra.mrb[14].mxu1 %vm14384_vm13, %v12664_v21  ;;  %vm14398_vm13 = vmmov %vm14383_vm3 }
 0xb43   : > { %7301 = vmatpush3.msra.mxu1 %v12758_v8  ;;  %7302 = vmatprep.mubr.msk.f32.mxu1 %vm8225_vm8, %v8224_v10 }
 0xb44   : > { %7711 = vmatprep.subr.bf16.mxu1 %v8226_v24 }
 0xb46   : > { %7303 = vmatmul.mubr.msk.f32.vlgmr.msra.gmra.mrb[16].mxu1 %vm14385_vm6, %v6504_v28  ;;  %v3767_v28 = vld [vmem:[#allocation7 + $0xb0] sm:$0xff]  ;;  %vm14399_vm6 = vmmov %vm14383_vm3 }
 0xb47   : > { %7340 = vmatprep.mubr.msk.f32.mxu1 %vm8225_vm8, %v8224_v10  ;;  %7713 = vmatpush3.bf16.msra.mxu1 %v7604_v0  ;;  %v7625_v30 = vpack.c.bf16 %v3768_v34, %v3767_v28  ;;  %v4396_v28 = vld [vmem:[#allocation7 + $0x198] sm:$0xff] }
 0xb48   : > { %7714 = vmatprep.subr.bf16.mxu1 %v8226_v24 }
 0xb4b   : > { %7716 = vmatpush3.bf16.msra.mxu1 %v7607_v37 }
 0xb4c   : > { %7717 = vmatprep.subr.bf16.mxu1 %v8226_v24 }
 0xb4f   : > { %7719 = vmatpush3.bf16.msra.mxu1 %v7610_v22 }
 0xb50   : > { %7720 = vmatprep.subr.bf16.mxu1 %v8226_v24 }
 0xb53   : > { %7722 = vmatpush3.bf16.msra.mxu1 %v7613_v63 }
 0xb54   : > { %7343 = vmatprep.subr.mxu1 %v8224_v10 }
 0xbf9   : > { %v12784_v39 = vpop.f32.mrb[0].mxu1  ;;  %v3443_v36 = vpop.f32.mrb[0].mxu0 }
 0xbfa   : > { %v7131_v60 = vpop.f32.mrb[1].mxu1  ;;  %v7083_v19 = vpop.f32.mrb[1].mxu0 }
 0xbfb   : > { %v4082_v60 = vld [vmem:[#allocation7 + $0x128] sm:$0xff] }
 0xbfd   : > { %v3526_v55 = vpop.f32.mrb[2].mxu0  ;;  %v12786_v50 = vpop.f32.mrb[2].mxu1 }
 0xbfe   : > { %7106 = vmatmul.mubr.msk.f32.vlgmr.msra.gmra.mrb[4].mxu0 %vm14386_vm7, %v3526_v55  ;;  %v7155_v52 = vpop.f32.mrb[3].mxu1  ;;  %v7088_v13 = vpop.f32.mrb[3].mxu0  ;;  %v4083_v55 = vld [vmem:[#allocation7 + $0x130] sm:$0xff]  ;;  %vm14400_vm7 = vmmov %vm14393_vm0 }
 0xbff   : > { %7605 = vmatpush3.bf16.msra.mxu0 %v7604_v0  ;;  %7124 = vmatprep.mubr.msk.f32.mxu0 %vm8225_vm8, %v8224_v10  ;;  %v3924_v0 = vld [vmem:[#allocation7 + $0xe8] sm:$0xff]  ;;  %v4084_v52 = vld [vmem:[#allocation7 + $0x138] sm:$0xff]  ;;  %v4235_v13 = vld [vmem:[#allocation7 + $0x140] sm:$0xff] }
 0xc00   : > { %7606 = vmatprep.subr.bf16.mxu0 %v8226_v24  ;;  %v12836_v44 = vpack.c.bf16 %v3924_v0, %v3923_v42  ;;  %v4553_v42 = vld [vmem:[#allocation7 + $0x1d0] sm:$0xff]  ;;  %v4554_v0 = vld [vmem:[#allocation7 + $0x1d8] sm:$0xff] }
 0xc01   : > { %v12792_v35 = vpop.f32.mrb[4].mxu1 }
 0xc02   : > { %v7179_v43 = vpop.f32.mrb[5].mxu1 }
 0xc03   : > { %7608 = vmatpush3.bf16.msra.mxu0 %v7607_v37  ;;  %v3926_v37 = vld [vmem:[#allocation7 + $0xf8] sm:$0xff]  ;;  %v4236_v43 = vld [vmem:[#allocation7 + $0x148] sm:$0xff] }
 0xc04   : > { %7609 = vmatprep.subr.bf16.mxu0 %v8226_v24  ;;  %v12841_v9 = vpack.c.bf16 %v3926_v37, %v3925_v53  ;;  %v12912_v53 = vpack.c.bf16 %v4554_v0, %v4553_v42  ;;  %v4555_v37 = vld [vmem:[#allocation7 + $0x1e0] sm:$0xff] }
 0xc05   : > { %v12795_v14 = vpop.f32.mrb[6].mxu1 }
 0xc06   : > { %v7203_v48 = vpop.f32.mrb[7].mxu1 }
 0xc07   : > { %7611 = vmatpush3.bf16.msra.mxu0 %v7610_v22  ;;  %v4078_v22 = vld [vmem:[#allocation7 + $0x108] sm:$0xff]  ;;  %v12866_v48 = vpack.c.bf16 %v4236_v43, %v4235_v13  ;;  %v4712_v13 = vld [vmem:[#allocation7 + $0x218] sm:$0xff] }
 0xc08   : > { %7612 = vmatprep.subr.bf16.mxu0 %v8226_v24  ;;  %v12846_v62 = vpack.c.bf16 %v4078_v22, %v4077_v40  ;;  %v4556_v40 = vld [vmem:[#allocation7 + $0x1e8] sm:$0xff] }
 0xc09   : > { %v12798_v46 = vpop.f32.mrb[8].mxu1  ;;  %v12918_v22 = vpack.c.bf16 %v4556_v40, %v4555_v37 }
 0xc0a   : > { %v7227_v16 = vpop.f32.mrb[9].mxu1 }
 0xc0b   : > { %7614 = vmatpush3.bf16.msra.mxu0 %v7613_v63  ;;  %v4080_v63 = vld [vmem:[#allocation7 + $0x118] sm:$0xff]  ;;  %v12872_v16 = vpack.c.bf16 %v4238_v25, %v4237_v31  ;;  %v4713_v31 = vld [vmem:[#allocation7 + $0x220] sm:$0xff]  ;;  %v4714_v25 = vld [vmem:[#allocation7 + $0x228] sm:$0xff] }
 0xc0c   : > { %7615 = vmatprep.subr.bf16.mxu0 %v8226_v24 }
 0xc0d   : > { %v12801_v57 = vpop.f32.mrb[10].mxu1 }
 0xc0e   : > { %7125 = vmatmul.mubr.msk.f32.vlgmr.msra.gmra.mrb[4].mxu0 %vm14387_vm10, %v3443_v36  ;;  %v7251_v15 = vpop.f32.mrb[11].mxu1  ;;  %v4081_v36 = vld [vmem:[#allocation7 + $0x120] sm:$0xff]  ;;  %vm14401_vm10 = vmmov %vm14383_vm3 }
 0xc0f   : > { %7617 = vmatpush3.bf16.msra.mxu0 %v7616_v47  ;;  %7148 = vmatprep.mubr.msk.f32.mxu0 %vm8225_vm8, %v8224_v10  ;;  %v12858_v19 = vpack.c.bf16 %v4082_v60, %v4081_v36  ;;  %v4241_v15 = vld [vmem:[#allocation7 + $0x170] sm:$0xff]  ;;  %v4709_v36 = vld [vmem:[#allocation7 + $0x200] sm:$0xff]  ;;  %v4710_v60 = vld [vmem:[#allocation7 + $0x208] sm:$0xff] }
 0xc10   : > { %7618 = vmatprep.subr.bf16.mxu0 %v8226_v24 }
 0xc11   : > { %v12807_v21 = vpop.f32.mrb[12].mxu1 }
 0xc12   : > { %v7275_v32 = vpop.f32.mrb[13].mxu1 }
 0xc13   : > { %7620 = vmatpush3.bf16.msra.mxu0 %v7619_v18  ;;  %v12886_v32 = vpack.c.bf16 %v4394_v58, %v4393_v54 }
 0xc14   : > { %7621 = vmatprep.subr.bf16.mxu0 %v8226_v24 }
 0xc15   : > { %v4871_v29 = vpop.f32.mrb[14].mxu1 }
 0xc16   : > { %v7299_v23 = vpop.f32.mrb[15].mxu1  ;;  %7341 = vmatmul.mubr.msk.f32.vlgmr.msra.gmra.mrb[18].mxu1 %vm14388_vm2, %v4871_v29  ;;  %v4397_v29 = vld [vmem:[#allocation7 + $0x1a0] sm:$0xff]  ;;  %vm14402_vm2 = vmmov %vm14393_vm0 }
 0xc17   : > { %7623 = vmatpush3.bf16.msra.mxu0 %v7622_v38  ;;  %7344 = vmatpush3.msra.mxu1 %v12758_v8  ;;  %v4398_v23 = vld [vmem:[#allocation7 + $0x1a8] sm:$0xff] }
 0xc18   : > { %7624 = vmatprep.subr.bf16.mxu0 %v8226_v24  ;;  %7345 = vmatprep.mubr.msk.f32.mxu1 %vm8225_vm8, %v8224_v10 }
 0xc19   : > { %v12815_v5 = vpop.f32.mrb[16].mxu1  ;;  %7723 = vmatprep.subr.bf16.mxu1 %v8226_v24 }
 0xc1a   : > { %7346 = vmatmul.mubr.msk.f32.vlgmr.msra.gmra.mrb[20].mxu1 %vm14389_vm9, %v12669_v45  ;;  %v7304_v6 = vpop.f32.mrb[17].mxu1  ;;  %v12829_v45 = vpack.c.bf16 %v3922_v51, %v3921_v20  ;;  %v4552_v20 = vld [vmem:[#allocation7 + $0x1c8] sm:$0xff]  ;;  %vm14403_vm9 = vmmov %vm14393_vm0 }
 0xc1b   : > { %7626 = vmatpush3.bf16.msra.mxu0 %v7625_v30  ;;  %7725 = vmatpush3.bf16.msra.mxu1 %v7616_v47  ;;  %v4239_v47 = vld [vmem:[#allocation7 + $0x160] sm:$0xff] }
 0xc1c   : > { %7627 = vmatprep.subr.bf16.mxu0 %v8226_v24  ;;  %7726 = vmatprep.subr.bf16.mxu1 %v8226_v24  ;;  %v12878_v27 = vpack.c.bf16 %v4240_v56, %v4239_v47  ;;  %v4551_v6 = vld [vmem:[#allocation7 + $0x1c0] sm:$0xff]  ;;  %v12938_v47 = vpack.c.bf16 %v4714_v25, %v4713_v31  ;;  %v4715_v56 = vld [vmem:[#allocation7 + $0x230] sm:$0xff] }
 0xc1d   : > { %7364 = vmatprep.mubr.msk.f32.mxu1 %vm8225_vm8, %v8224_v10  ;;  %v12906_v51 = vpack.c.bf16 %v4552_v20, %v4551_v6 }
 0xc1e   : > { %7149 = vmatmul.mubr.msk.f32.vlgmr.msra.gmra.mrb[4].mxu0 %vm14390_vm4, %v12784_v39  ;;  %v12852_v39 = vpack.c.bf16 %v4080_v63, %v4079_v26  ;;  %v4557_v26 = vld [vmem:[#allocation7 + $0x1f0] sm:$0xff]  ;;  %v4558_v63 = vld [vmem:[#allocation7 + $0x1f8] sm:$0xff]  ;;  %vm14404_vm4 = vmmov %vm14393_vm0 }
 0xc1f   : > { %7629 = vmatpush3.bf16.msra.mxu0 %v12820_v41  ;;  %7172 = vmatprep.mubr.msk.f32.mxu0 %vm8225_vm8, %v8224_v10 }
 0xc20   : > { %7630 = vmatprep.subr.bf16.mxu0 %v8226_v24  ;;  %7728 = vmatpush3.bf16.msra.mxu1 %v7619_v18  ;;  %v4242_v18 = vld [vmem:[#allocation7 + $0x178] sm:$0xff] }
 0xc21   : > { %7729 = vmatprep.subr.bf16.mxu1 %v8226_v24 }
 0xc23   : > { %7632 = vmatpush3.bf16.msra.mxu0 %v12829_v45 }
 0xc24   : > { %7633 = vmatprep.subr.bf16.mxu0 %v8226_v24  ;;  %7731 = vmatpush3.bf16.msra.mxu1 %v7622_v38  ;;  %v4395_v38 = vld [vmem:[#allocation7 + $0x190] sm:$0xff] }
 0xc25   : > { %7732 = vmatprep.subr.bf16.mxu1 %v8226_v24  ;;  %v12892_v34 = vpack.c.bf16 %v4396_v28, %v4395_v38 }
 0xc27   : > { %7635 = vmatpush3.bf16.msra.mxu0 %v12836_v44 }
 0xc28   : > { %7636 = vmatprep.subr.bf16.mxu0 %v8226_v24  ;;  %7734 = vmatpush3.bf16.msra.mxu1 %v7625_v30  ;;  %v12898_v30 = vpack.c.bf16 %v4398_v23, %v4397_v29 }
 0xc29   : > { %7367 = vmatprep.subr.mxu1 %v8224_v10 }
 0xc2b   : > { %7638 = vmatpush3.bf16.msra.mxu0 %v12841_v9 }
 0xc2c   : > { %7639 = vmatprep.subr.bf16.mxu0 %v8226_v24 }
 0xc2e   : > { %7173 = vmatmul.mubr.msk.f32.vlgmr.msra.gmra.mrb[4].mxu0 %vm14391_vm11, %v12786_v50  ;;  %v12862_v50 = vpack.c.bf16 %v4084_v52, %v4083_v55  ;;  %v12926_v55 = vpack.c.bf16 %v4710_v60, %v4709_v36  ;;  %v4711_v52 = vld [vmem:[#allocation7 + $0x210] sm:$0xff]  ;;  %vm14405_vm11 = vmmov %vm14383_vm3 }
 0xc2f   : > { %7641 = vmatpush3.bf16.msra.mxu0 %v12846_v62  ;;  %7196 = vmatprep.mubr.msk.f32.mxu0 %vm8225_vm8, %v8224_v10  ;;  %v12932_v43 = vpack.c.bf16 %v4712_v13, %v4711_v52 }
 0xc30   : > { %7642 = vmatprep.subr.bf16.mxu0 %v8226_v24 }
 0xc33   : > { %7644 = vmatpush3.bf16.msra.mxu0 %v12852_v39 }
 0xc34   : > { %7645 = vmatprep.subr.bf16.mxu0 %v8226_v24 }
 0xc37   : > { %7647 = vmatpush3.bf16.msra.mxu0 %v12858_v19 }
 0xc38   : > { %7648 = vmatprep.subr.bf16.mxu0 %v8226_v24 }
 0xc3b   : > { %7650 = vmatpush3.bf16.msra.mxu0 %v12862_v50 }
 0xc3c   : > { %7651 = vmatprep.subr.bf16.mxu0 %v8226_v24 }
 0xc3e   : > { %7197 = vmatmul.mubr.msk.f32.vlgmr.msra.gmra.mrb[4].mxu0 %vm14392_vm12, %v12792_v35  ;;  %v12882_v35 = vpack.c.bf16 %v4242_v18, %v4241_v15  ;;  %v4716_v15 = vld [vmem:[#allocation7 + $0x238] sm:$0xff]  ;;  %vm14406_vm12 = vmmov %vm14393_vm0 }
 0xc3f   : > { %7653 = vmatpush3.bf16.msra.mxu0 %v12866_v48  ;;  %7220 = vmatprep.mubr.msk.f32.mxu0 %vm8225_vm8, %v8224_v10 }
 0xc40   : > { %7654 = vmatprep.subr.bf16.mxu0 %v8226_v24 }
 0xc43   : > { %7656 = vmatpush3.bf16.msra.mxu0 %v12872_v16 }
 0xc44   : > { %7657 = vmatprep.subr.bf16.mxu0 %v8226_v24 }
 0xc47   : > { %7659 = vmatpush3.bf16.msra.mxu0 %v12878_v27 }
 0xc48   : > { %7660 = vmatprep.subr.bf16.mxu0 %v8226_v24 }
 0xc4b   : > { %7662 = vmatpush3.bf16.msra.mxu0 %v12882_v35 }
 0xc4c   : > { %7663 = vmatprep.subr.bf16.mxu0 %v8226_v24 }
 0xc4e   : > { %7221 = vmatmul.mubr.msk.f32.vlgmr.msra.gmra.mrb[4].mxu0 %vm14393_vm0, %v12795_v14  ;;  %v12902_v14 = vpack.c.bf16 %v4400_v3, %v4399_v11  ;;  %vm14407_vm0 = vmmov %vm14383_vm3 }
 0xc4f   : > { %7665 = vmatpush3.bf16.msra.mxu0 %v12886_v32  ;;  %7244 = vmatprep.mubr.msk.f32.mxu0 %vm8225_vm8, %v8224_v10 }
 0xc50   : > { %7666 = vmatprep.subr.bf16.mxu0 %v8226_v24 }
 0xc53   : > { %7668 = vmatpush3.bf16.msra.mxu0 %v12892_v34 }
 0xc54   : > { %7669 = vmatprep.subr.bf16.mxu0 %v8226_v24 }
 0xc57   : > { %7671 = vmatpush3.bf16.msra.mxu0 %v12898_v30 }
 0xc58   : > { %7672 = vmatprep.subr.bf16.mxu0 %v8226_v24 }
 0xc5b   : > { %7674 = vmatpush3.bf16.msra.mxu0 %v12902_v14 }
 0xc5c   : > { %7675 = vmatprep.subr.bf16.mxu0 %v8226_v24 }
 0xc5e   : > { %7245 = vmatmul.mubr.msk.f32.vlgmr.msra.gmra.mrb[4].mxu0 %vm14394_vm15, %v12798_v46  ;;  %v12922_v46 = vpack.c.bf16 %v4558_v63, %v4557_v26  ;;  %vm14408_vm15 = vmmov %vm14396_vm1 }
 0xc5f   : > { %7677 = vmatpush3.bf16.msra.mxu0 %v12906_v51  ;;  %7268 = vmatprep.mubr.msk.f32.mxu0 %vm8225_vm8, %v8224_v10 }
 0xc60   : > { %7678 = vmatprep.subr.bf16.mxu0 %v8226_v24 }
 0xc63   : > { %7680 = vmatpush3.bf16.msra.mxu0 %v12912_v53 }
 0xc64   : > { %7681 = vmatprep.subr.bf16.mxu0 %v8226_v24 }
 0xc67   : > { %7683 = vmatpush3.bf16.msra.mxu0 %v12918_v22 }
 0xc68   : > { %7684 = vmatprep.subr.bf16.mxu0 %v8226_v24 }
 0xc6b   : > { %7686 = vmatpush3.bf16.msra.mxu0 %v12922_v46 }
 0xc6c   : > { %7687 = vmatprep.subr.bf16.mxu0 %v8226_v24 }
 0xc6e   : > { %7269 = vmatmul.mubr.msk.f32.vlgmr.msra.gmra.mrb[4].mxu0 %vm14395_vm14, %v12801_v57  ;;  %v12942_v57 = vpack.c.bf16 %v4716_v15, %v4715_v56  ;;  %vm14409_vm14 = vmmov %vm14396_vm1 }
 0xc6f   : > { %7689 = vmatpush3.bf16.msra.mxu0 %v12926_v55  ;;  %7292 = vmatprep.mubr.msk.f32.mxu0 %vm8225_vm8, %v8224_v10 }
 0xc70   : > { %7690 = vmatprep.subr.bf16.mxu0 %v8226_v24 }
 0xc73   : > { %7692 = vmatpush3.bf16.msra.mxu0 %v12932_v43 }
 0xc74   : > { %7693 = vmatprep.subr.bf16.mxu0 %v8226_v24 }
 0xc77   : > { %7695 = vmatpush3.bf16.msra.mxu0 %v12938_v47 }
 0xc78   : > { %7696 = vmatprep.subr.bf16.mxu0 %v8226_v24 }
 0xc7b   : > { %7698 = vmatpush3.bf16.msra.mxu0 %v12942_v57 }
 0xc7c   : > { %7699 = vmatprep.subr.bf16.mxu0 %v8226_v24 }
 0xc7e   : > { %7293 = vmatmul.mubr.msk.f32.vlgmr.msra.gmra.mrb[4].mxu0 %vm14396_vm1, %v12807_v21 }
 0xc7f   : > { %7701 = vmatpush3.bf16.msra.mxu0 %v12689_v12  ;;  %7321 = vmatprep.mubr.msk.f32.mxu0 %vm8225_vm8, %v8224_v10 }
 0xc80   : > { %7702 = vmatprep.subr.bf16.mxu0 %v8226_v24 }
 0xc83   : > { %7704 = vmatpush3.bf16.msra.mxu0 %v12705_v2 }
 0xc84   : > { %7705 = vmatprep.subr.bf16.mxu0 %v8226_v24 }
 0xc87   : > { %7707 = vmatpush3.bf16.msra.mxu0 %v12721_v61 }
 0xc88   : > { %7708 = vmatprep.subr.bf16.mxu0 %v8226_v24 }
 0xc8b   : > { %7710 = vmatpush3.bf16.msra.mxu0 %v12776_v49 }
 0xc8c   : > { %7439 = vmatprep.subr.mxu0 %v8224_v10 }
 0xc8e   : > { %7322 = vmatmul.mubr.msk.f32.vlgmr.msra.gmra.mrb[6].mxu0 %vm14397_vm5, %v12815_v5  ;;  %vm14410_vm5 = vmmov %vm14396_vm1 }
 0xc8f   : > { %7440 = vmatpush3.msra.mxu0 %v12758_v8  ;;  %7441 = vmatprep.mubr.msk.f32.mxu0 %vm8225_vm8, %v8224_v10 }
 0xc90   : > { %7463 = vmatprep.subr.mxu0 %v8224_v10 }
 0xc92   : > { %7442 = vmatmul.mubr.msk.f32.vlgmr.msra.gmra.mrb[8].mxu0 %vm14383_vm3, %v12731_v1  ;;  %vm14412_vm3 = vmmov %vm14396_vm1 }
 0xc93   : > { %7464 = vmatpush3.msra.mxu0 %v12758_v8  ;;  %7465 = vmatprep.mubr.msk.f32.mxu0 %vm8225_vm8, %v8224_v10 }
 0xc94   : > { %7487 = vmatprep.subr.mxu0 %v8224_v10 }
 0xc96   : > { %7466 = vmatmul.mubr.msk.f32.vlgmr.msra.gmra.mrb[10].mxu0 %vm14398_vm13, %v12743_v4 }
 0xc97   : > { %7488 = vmatpush3.msra.mxu0 %v12758_v8  ;;  %7489 = vmatprep.mubr.msk.f32.mxu0 %vm8225_vm8, %v8224_v10 }
 0xc9a   : > { %7490 = vmatmul.mubr.msk.f32.vlgmr.msra.gmra.mrb[12].mxu0 %vm14399_vm6, %v12756_v7 }
 0xced   : > { %v5181_v12 = vpop.f32.mrb[20].mxu1 }
 0xcee   : > { %v7347_v2 = vpop.f32.mrb[21].mxu1  ;;  %7365 = vmatmul.mubr.msk.f32.vlgmr.msra.gmra.mrb[18].mxu1 %vm14400_vm7, %v5181_v12 }
 0xcef   : > { %7368 = vmatpush3.msra.mxu1 %v12758_v8  ;;  %7369 = vmatprep.mubr.msk.f32.mxu1 %vm8225_vm8, %v8224_v10 }
 0xcf0   : > { %7735 = vmatprep.subr.bf16.mxu1 %v8226_v24 }
 0xcf2   : > { %7370 = vmatmul.mubr.msk.f32.vlgmr.msra.gmra.mrb[22].mxu1 %vm14401_vm10, %v12683_v59 }
 0xcf3   : > { %7737 = vmatpush3.bf16.msra.mxu1 %v12820_v41  ;;  %7388 = vmatprep.mubr.msk.f32.mxu1 %vm8225_vm8, %v8224_v10 }
 0xcf4   : > { %7738 = vmatprep.subr.bf16.mxu1 %v8226_v24 }
 0xcf7   : > { %7740 = vmatpush3.bf16.msra.mxu1 %v12829_v45 }
 0xcf8   : > { %7741 = vmatprep.subr.bf16.mxu1 %v8226_v24 }
 0xcfb   : > { %7743 = vmatpush3.bf16.msra.mxu1 %v12836_v44 }
 0xcfc   : > { %7744 = vmatprep.subr.bf16.mxu1 %v8226_v24 }
 0xcff   : > { %7746 = vmatpush3.bf16.msra.mxu1 %v12841_v9 }
 0xd00   : > { %7391 = vmatprep.subr.mxu1 %v8224_v10 }
 0xd51   : > { %v4786_v59 = vpop.f32.mrb[4].mxu0 }
 0xd52   : > { %v4791_v61 = vmul.f32 0.999995, %v4786_v59  ;;  %v7294_v1 = vpop.f32.mrb[5].mxu0 }
 0xd54   : > { %v4792_v4 = vmax.f32 %v4791_v61, 0.0 }
 0xd56   : > { %4793 = vst.msk [vmem:[#allocation2] sm:$0xff] %vm14402_vm2, %v4792_v4 }
 0xd57   : > { %4794 = vst.msk [vmem:[#allocation6] sm:$0xff] %vm14403_vm9, %v4792_v4 }
 0xd61   : > { %v12997_v7 = vpop.f32.mrb[6].mxu0 }
 0xd62   : > { %v7323_v49 = vpop.f32.mrb[7].mxu0 }
 0xdc5   : > { %v5337_v21 = vpop.f32.mrb[22].mxu1 }
 0xdc6   : > { %v7371_v5 = vpop.f32.mrb[23].mxu1  ;;  %7389 = vmatmul.mubr.msk.f32.vlgmr.msra.gmra.mrb[18].mxu1 %vm14404_vm4, %v5337_v21 }
 0xdc7   : > { %7392 = vmatpush3.msra.mxu1 %v12758_v8  ;;  %7393 = vmatprep.mubr.msk.f32.mxu1 %vm8225_vm8, %v8224_v10 }
 0xdc8   : > { %7747 = vmatprep.subr.bf16.mxu1 %v8226_v24 }
 0xdca   : > { %7394 = vmatmul.mubr.msk.f32.vlgmr.msra.gmra.mrb[24].mxu1 %vm14405_vm11, %v12700_v17 }
 0xdcb   : > { %7749 = vmatpush3.bf16.msra.mxu1 %v12846_v62  ;;  %7412 = vmatprep.mubr.msk.f32.mxu1 %vm8225_vm8, %v8224_v10 }
 0xdcc   : > { %7750 = vmatprep.subr.bf16.mxu1 %v8226_v24 }
 0xdcf   : > { %7752 = vmatpush3.bf16.msra.mxu1 %v12852_v39 }
 0xdd0   : > { %7753 = vmatprep.subr.bf16.mxu1 %v8226_v24 }
 0xdd3   : > { %7755 = vmatpush3.bf16.msra.mxu1 %v12858_v19 }
 0xdd4   : > { %7756 = vmatprep.subr.bf16.mxu1 %v8226_v24 }
 0xdd7   : > { %7758 = vmatpush3.bf16.msra.mxu1 %v12862_v50 }
 0xdd8   : > { %7415 = vmatprep.subr.mxu1 %v8224_v10 }
 0xe9d   : > { %v5493_v17 = vpop.f32.mrb[24].mxu1 }
 0xe9e   : > { %v7395_v41 = vpop.f32.mrb[25].mxu1  ;;  %7413 = vmatmul.mubr.msk.f32.vlgmr.msra.gmra.mrb[18].mxu1 %vm14406_vm12, %v5493_v17 }
 0xe9f   : > { %7416 = vmatpush3.msra.mxu1 %v12758_v8  ;;  %7417 = vmatprep.mubr.msk.f32.mxu1 %vm8225_vm8, %v8224_v10 }
 0xea0   : > { %7759 = vmatprep.subr.bf16.mxu1 %v8226_v24 }
 0xea2   : > { %7418 = vmatmul.mubr.msk.f32.vlgmr.msra.gmra.mrb[26].mxu1 %vm14407_vm0, %v12715_v33  ;;  %v5805_v33 = vpop.f32.mrb[8].mxu0 }
 0xea3   : > { %7761 = vmatpush3.bf16.msra.mxu1 %v12866_v48  ;;  %7436 = vmatprep.mubr.msk.f32.mxu1 %vm8225_vm8, %v8224_v10  ;;  %v7443_v8 = vpop.f32.mrb[9].mxu0 }
 0xea4   : > { %7762 = vmatprep.subr.bf16.mxu1 %v8226_v24  ;;  %v5961_v45 = vpop.f32.mrb[10].mxu0 }
 0xea5   : > { %v7467_v44 = vpop.f32.mrb[11].mxu0 }
 0xea6   : > { %v6117_v9 = vpop.f32.mrb[12].mxu0 }
 0xea7   : > { %7764 = vmatpush3.bf16.msra.mxu1 %v12872_v16  ;;  %v7491_v62 = vpop.f32.mrb[13].mxu0 }
 0xea8   : > { %7765 = vmatprep.subr.bf16.mxu1 %v8226_v24 }
 0xeab   : > { %7767 = vmatpush3.bf16.msra.mxu1 %v12878_v27 }
 0xeac   : > { %7768 = vmatprep.subr.bf16.mxu1 %v8226_v24 }
 0xeaf   : > { %7770 = vmatpush3.bf16.msra.mxu1 %v12882_v35 }
 0xeb0   : > { %7771 = vmatprep.subr.bf16.mxu1 %v8226_v24 }
 0xf75   : > { %v5649_v39 = vpop.f32.mrb[26].mxu1 }
 0xf76   : > { %v7419_v19 = vpop.f32.mrb[27].mxu1  ;;  %7437 = vmatmul.mubr.msk.f32.vlgmr.msra.gmra.mrb[18].mxu1 %vm14408_vm15, %v5649_v39 }
 0xf77   : > { %7773 = vmatpush3.bf16.msra.mxu1 %v12886_v32  ;;  %7460 = vmatprep.mubr.msk.f32.mxu1 %vm8225_vm8, %v8224_v10 }
 0xf78   : > { %7774 = vmatprep.subr.bf16.mxu1 %v8226_v24 }
 0xf7b   : > { %7776 = vmatpush3.bf16.msra.mxu1 %v12892_v34 }
 0xf7c   : > { %7777 = vmatprep.subr.bf16.mxu1 %v8226_v24 }
 0xf7f   : > { %7779 = vmatpush3.bf16.msra.mxu1 %v12898_v30 }
 0xf80   : > { %7780 = vmatprep.subr.bf16.mxu1 %v8226_v24 }
 0xf83   : > { %7782 = vmatpush3.bf16.msra.mxu1 %v12902_v14 }
 0xf84   : > { %7783 = vmatprep.subr.bf16.mxu1 %v8226_v24 }
 0xf86   : > { %7461 = vmatmul.mubr.msk.f32.vlgmr.msra.gmra.mrb[18].mxu1 %vm14409_vm14, %v5805_v33 }
 0xf87   : > { %7785 = vmatpush3.bf16.msra.mxu1 %v12906_v51  ;;  %7484 = vmatprep.mubr.msk.f32.mxu1 %vm8225_vm8, %v8224_v10 }
 0xf88   : > { %7786 = vmatprep.subr.bf16.mxu1 %v8226_v24 }
 0xf8b   : > { %7788 = vmatpush3.bf16.msra.mxu1 %v12912_v53 }
 0xf8c   : > { %7789 = vmatprep.subr.bf16.mxu1 %v8226_v24 }
 0xf8f   : > { %7791 = vmatpush3.bf16.msra.mxu1 %v12918_v22 }
 0xf90   : > { %7792 = vmatprep.subr.bf16.mxu1 %v8226_v24 }
 0xf93   : > { %7794 = vmatpush3.bf16.msra.mxu1 %v12922_v46 }
 0xf94   : > { %7795 = vmatprep.subr.bf16.mxu1 %v8226_v24 }
 0xf96   : > { %7485 = vmatmul.mubr.msk.f32.vlgmr.msra.gmra.mrb[18].mxu1 %vm14396_vm1, %v5961_v45 }
 0xf97   : > { %7797 = vmatpush3.bf16.msra.mxu1 %v12926_v55  ;;  %7508 = vmatprep.mubr.msk.f32.mxu1 %vm8225_vm8, %v8224_v10  ;;  %vm14411_vm8 = vmmov %vm14396_vm1 }
 0xf98   : > { %7798 = vmatprep.subr.bf16.mxu1 %v8226_v24 }
 0xf9b   : > { %7800 = vmatpush3.bf16.msra.mxu1 %v12932_v43 }
 0xf9c   : > { %7801 = vmatprep.subr.bf16.mxu1 %v8226_v24 }
 0xf9f   : > { %7803 = vmatpush3.bf16.msra.mxu1 %v12938_v47 }
 0xfa0   : > { %7804 = vmatprep.subr.bf16.mxu1 %v8226_v24 }
 0xfa3   : > { %7806 = vmatpush3.bf16.msra.mxu1 %v12942_v57 }
 0xfa6   : > { %7509 = vmatmul.mubr.msk.f32.vlgmr.msra.gmra.mrb[18].mxu1 %vm14410_vm5, %v6117_v9 }
0x1079   : > { %v6198_v50 = vpop.f32.mrb[18].mxu1 }
0x107a   : > { %v7807_v48 = vadd.f32 %v6198_v50, %v12997_v7  ;;  %v7510_v16 = vpop.f32.mrb[19].mxu1 }
0x107c   : > { %v6203_v27 = vmul.f32 0.999995, %v7807_v48 }
0x107e   : > { %v6204_v10 = vmax.f32 %v6203_v27, 0.0 }
0x1080   : > { %6205 = vst.msk [vmem:[#allocation2 + $0x8] sm:$0xff] %vm14411_vm8, %v6204_v10 }
0x1081   : > { %6207 = vst.msk [vmem:[#allocation6 + $0x8] sm:$0xff] %vm14412_vm3, %v6204_v10 }
0x1082 PF: > { %p6556_p0 = scmp.ne.s32.totalorder %s8278_s28, 15 }
0x1083   : > { %v6215_v54 = vld [vmem:[#allocation6] sm:$0xff] (!%p6556_p0)  ;;  %v6557_v11 = vld [vmem:[%s13087_s0 + $0x8] sm:$0xff] (!%p6556_p0)  ;;  %vm14413_vm13 = vcmask (!%p6556_p0), 523264  }
0x1084   : > { %6211 = sbr.rel (%p6556_p0) target bundleno = 4246 (0x1096), region = 86  ;;  %v6218_v29 = vld [vmem:[%s13087_s0] sm:$0xff] (!%p6556_p0)  ;;  %vm14414_vm6 = vmmov (!%p6556_p0), %vm14413_vm13 }
0x1087   : > { %v6212_v18 = vld [vmem:[#allocation2] sm:$0xff] (!%p6556_p0) }
0x1088   : > { %v6213_v24 = vmul.f32 (!%p6556_p0), 0.999995, %v6212_v18  ;;  %v6222_v35 = vld [vmem:[#allocation2 + $0x8] sm:$0xff] (!%p6556_p0) }
0x1089   : > { %v6223_v58 = vmul.f32 (!%p6556_p0), 0.999995, %v6222_v35  ;;  %v6226_v38 = vld [vmem:[#allocation6 + $0x8] sm:$0xff] (!%p6556_p0) }
0x108a   : > { %v6214_v32 = vmax.f32 (!%p6556_p0), %v6213_v24, 0.0 }
0x108b   : > { %v6224_v28 = vmax.f32 %v6223_v58, 0.0 }
0x108c   : > { %v6216_v34 = vadd.f32 %v6215_v54, %v6214_v32 }
0x108d   : > { %v6227_v23 = vadd.f32 %v6226_v38, %v6224_v28 }
0x108e   : > { %v6217_v30 = vmul.f32 0.999995, %v6216_v34 }
0x108f   : > { %v6228_v3 = vmul.f32 0.999995, %v6227_v23 }
0x1090   : > { %v6219_v14 = vadd.f32 %v6218_v29, %v6217_v30 }
0x1091   : > { %v6231_v6 = vadd.f32 %v6557_v11, %v6228_v3 }
0x1092   : > { %v6220_v20 = vmax.f32 %v6219_v14, 0.0 }
0x1093   : > { %v6232_v51 = vmax.f32 %v6231_v6, 0.0 }
0x1094   : > { %6221 = vst.msk [vmem:[%s13095_s8] sm:$0xff] %vm14413_vm13, %v6220_v20 }
0x1095   : > { %6558 = vst.msk [vmem:[%s13095_s8 + $0x8] sm:$0xff] %vm14414_vm6, %v6232_v51 }
0x1096 PF: > { %s19_s27 = sadd.s32 1, %s8138_s27  }
0x1097   : > { %p16_p1 = scmp.ge.s32.totalorder %s19_s27, 18  }
0x1099   :  { %18 = sbr.rel (!%p16_p1) target bundleno = 1 (0x1), region = 176 }
0x10a0   :  { %6246 = vsyncpa [#allocation8], 1 }
0x10a1   :  { %6248 = vsyncpa [#allocation8 + $0x1], 1 }

</bundles_post_ra>
